<compile_context>
chip_gen: v7x
topology: tpu7x:2x2x1
jax: 0.10.0
libtpu: 0.0.40
codegen_flags: <defaults>
</compile_context>

<pallas_src>
import jax
import jax.numpy as jnp
from jax import lax
from jax.experimental import pallas as pl
from jax.experimental.pallas import tpu as pltpu

HIDDEN_SIZE = 128
INPUT_SIZE = 28
NUM_CLASSES = 10
NUM_LAYERS = 2

LANE = 128
D_PAD = 128                      # input features zero-padded to one lane tile
H = HIDDEN_SIZE


# -----------------------------------------------------------------------------
# Fused Pallas kernel: both layers, both directions, FC head.
# -----------------------------------------------------------------------------
def _cell_elementwise(gates, c):
    """PyTorch-order LSTM gate math (i, f, g, o) on a (B, 4H) pre-activation."""
    i_g = jax.nn.sigmoid(gates[:, 0 * H:1 * H])
    f_g = jax.nn.sigmoid(gates[:, 1 * H:2 * H])
    g_g = jnp.tanh(gates[:, 2 * H:3 * H])
    o_g = jax.nn.sigmoid(gates[:, 3 * H:4 * H])
    c_new = f_g * c + i_g * g_g
    h_new = o_g * jnp.tanh(c_new)
    return h_new, c_new


def birnn_kernel(x_ref,                    # (seq, B, D_PAD)   VMEM
                 w1x_ref,                  # (D_PAD, 8H)       VMEM  layer-1 input proj [fwd|bwd]
                 b1_ref,                   # (1, 8H)           VMEM  folded biases, both dirs
                 w1hf_ref, w1hb_ref,       # (H, 4H) each      VMEM  layer-1 recurrent weights
                 b2_ref,                   # (1, 8H)           VMEM  layer-2 folded biases
                 bfc_ref,                  # (1, LANE)         VMEM
                 w2x_hbm,                  # (2H, 8H)          ANY (HBM) layer-2 input proj
                 w2hf_hbm,                 # (H, 4H)           ANY (HBM) layer-2 fwd recurrent
                 wfc_hbm,                  # (2H, LANE)        ANY (HBM) FC weight
                 out_ref,                  # (B, LANE)         VMEM  padded logits
                 xp_ref,                   # (seq, B, 8H)      VMEM scratch: gate pre-activations
                 l1_ref,                   # (seq, B, 2H)      VMEM scratch: layer-1 outputs [fwd|bwd]
                 w2x_vmem, w2hf_vmem, wfc_vmem,   # VMEM scratch for DMA'd weights
                 dma_sem):                 # DMA semaphores (3,)
    seq, B, _ = x_ref.shape

    # --- start layer-2 / FC weight DMA now; hide it behind layer-1 compute ---
    copies = (pltpu.make_async_copy(w2x_hbm, w2x_vmem, dma_sem.at[0]),
              pltpu.make_async_copy(w2hf_hbm, w2hf_vmem, dma_sem.at[1]),
              pltpu.make_async_copy(wfc_hbm, wfc_vmem, dma_sem.at[2]))
    for cp in copies:
        cp.start()

    zero = jnp.zeros((B, H), jnp.float32)

    # --- layer 1: input->gate projection for ALL timesteps in ONE matmul -----
    x2d = x_ref[...].reshape(seq * B, D_PAD)
    xp1 = jnp.dot(x2d, w1x_ref[...], preferred_element_type=jnp.float32) + b1_ref[...]
    xp_ref[...] = xp1.reshape(seq, B, 8 * H)

    # --- layer 1: fwd + bwd recurrences interleaved in a single loop ---------
    def l1_body(t, carry):
        h_f, c_f, h_b, c_b = carry
        tb = seq - 1 - t
        gf = xp_ref[t, :, 0:4 * H] + jnp.dot(
            h_f, w1hf_ref[...], preferred_element_type=jnp.float32)
        gb = xp_ref[tb, :, 4 * H:8 * H] + jnp.dot(
            h_b, w1hb_ref[...], preferred_element_type=jnp.float32)
        h_f, c_f = _cell_elementwise(gf, c_f)
        h_b, c_b = _cell_elementwise(gb, c_b)
        l1_ref[t, :, 0:H] = h_f             # fwd hidden at output index t
        l1_ref[tb, :, H:2 * H] = h_b        # bwd hidden at output index tb
        return (h_f, c_f, h_b, c_b)

    lax.fori_loop(0, seq, l1_body, (zero, zero, zero, zero), unroll=True)

    # --- layer-2 / FC weights must be resident from here on ------------------
    for cp in copies:
        cp.wait()

    # --- layer 2: input->gate projection in ONE matmul (reuses xp scratch) ---
    l1_2d = l1_ref[...].reshape(seq * B, 2 * H)
    xp2 = jnp.dot(l1_2d, w2x_vmem[...], preferred_element_type=jnp.float32) + b2_ref[...]
    xp_ref[...] = xp2.reshape(seq, B, 8 * H)

    # --- layer 2, forward: full recurrence (only the final h feeds the FC) ---
    def l2f_body(t, carry):
        h, c = carry
        g = xp_ref[t, :, 0:4 * H] + jnp.dot(
            h, w2hf_vmem[...], preferred_element_type=jnp.float32)
        return _cell_elementwise(g, c)

    h2f, _ = lax.fori_loop(0, seq, l2f_body, (zero, zero), unroll=True)

    # --- layer 2, backward: out[:, -1, :] only needs the backward hidden at
    # the last index, i.e. the backward recurrence's FIRST step from zero
    # state -> h @ W_hh == 0 and f_g * c == 0, so no recurrent dot is needed.
    gb = xp_ref[seq - 1, :, 4 * H:8 * H]
    i_g = jax.nn.sigmoid(gb[:, 0 * H:1 * H])
    g_g = jnp.tanh(gb[:, 2 * H:3 * H])
    o_g = jax.nn.sigmoid(gb[:, 3 * H:4 * H])
    h2b = o_g * jnp.tanh(i_g * g_g)

    # --- fused FC head: two dots (no concat), lane-padded logits -------------
    out_ref[...] = (
        jnp.dot(h2f, wfc_vmem[0:H, :], preferred_element_type=jnp.float32)
        + jnp.dot(h2b, wfc_vmem[H:2 * H, :], preferred_element_type=jnp.float32)
        + bfc_ref[...])


# -----------------------------------------------------------------------------
# Parameter packing for the kernel
# -----------------------------------------------------------------------------
def pack_params(p):
    l1f, l1b = p["lstm"][0]["fwd"], p["lstm"][0]["bwd"]
    l2f, l2b = p["lstm"][1]["fwd"], p["lstm"][1]["bwd"]

    # layer-1 input projection: (D_PAD, 8H) with columns [fwd 4H | bwd 4H].
    w1x = jnp.zeros((D_PAD, 8 * H), jnp.float32)
    w1x = w1x.at[:INPUT_SIZE, 0:4 * H].set(l1f["w_ih"].T)
    w1x = w1x.at[:INPUT_SIZE, 4 * H:8 * H].set(l1b["w_ih"].T)
    b1 = jnp.concatenate([l1f["b_ih"] + l1f["b_hh"],
                          l1b["b_ih"] + l1b["b_hh"]]).reshape(1, 8 * H)
    w1hf = l1f["w_hh"].T
    w1hb = l1b["w_hh"].T

    # layer-2 input projection: (2H, 8H) with columns [fwd 4H | bwd 4H].
    w2x = jnp.concatenate([l2f["w_ih"].T, l2b["w_ih"].T], axis=1)
    b2 = jnp.concatenate([l2f["b_ih"] + l2f["b_hh"],
                          l2b["b_ih"] + l2b["b_hh"]]).reshape(1, 8 * H)
    w2hf = l2f["w_hh"].T
    # NOTE: layer-2 backward W_hh is provably unused (its only consumed step
    # starts from a zero hidden state), so it is never packed or DMA'd.

    w_fc, b_fc = p["fc"]["w"], p["fc"]["b"]          # (C, 2H), (C,)
    C = w_fc.shape[0]
    wfc = jnp.zeros((2 * H, LANE), jnp.float32).at[:, :C].set(w_fc.T)
    bfc = jnp.zeros((1, LANE), jnp.float32).at[:, :C].set(b_fc)

    return dict(w1x=w1x, b1=b1, w1hf=w1hf, w1hb=w1hb,
                w2x=w2x, b2=b2, w2hf=w2hf, wfc=wfc, bfc=bfc)


# -----------------------------------------------------------------------------
# Wrapper: one fused pallas_call
# -----------------------------------------------------------------------------
def birnn_forward(x, kp):
    """x: (B, seq, INPUT_SIZE) -> logits (B, NUM_CLASSES)."""
    B, seq, D = x.shape
    B_pad = max(8, ((B + 7) // 8) * 8)                 # f32 sublane padding

    x_t = jnp.transpose(x, (1, 0, 2)).astype(jnp.float32)          # (seq, B, D)
    x_p = jnp.zeros((seq, B_pad, D_PAD), jnp.float32).at[:, :B, :D].set(x_t)

    vmem = pl.BlockSpec(memory_space=pltpu.MemorySpace.VMEM)
    hbm = pl.BlockSpec(memory_space=pl.ANY)

    out_pad = pl.pallas_call(
        birnn_kernel,
        out_shape=jax.ShapeDtypeStruct((B_pad, LANE), jnp.float32),
        in_specs=[vmem, vmem, vmem, vmem, vmem, vmem, vmem, hbm, hbm, hbm],
        out_specs=vmem,
        scratch_shapes=[
            pltpu.VMEM((seq, B_pad, 8 * H), jnp.float32),   # gate pre-activations
            pltpu.VMEM((seq, B_pad, 2 * H), jnp.float32),   # layer-1 outputs
            pltpu.VMEM((2 * H, 8 * H), jnp.float32),        # layer-2 input-proj W
            pltpu.VMEM((H, 4 * H), jnp.float32),            # layer-2 fwd recurrent W
            pltpu.VMEM((2 * H, LANE), jnp.float32),         # FC weight
            pltpu.SemaphoreType.DMA((3,)),
        ],
    )(x_p,
      kp["w1x"], kp["b1"], kp["w1hf"], kp["w1hb"], kp["b2"], kp["bfc"],
      kp["w2x"], kp["w2hf"], kp["wfc"])

    return out_pad[:B, :NUM_CLASSES]


# -----------------------------------------------------------------------------
# Pure-JAX reference (for correctness check)
# -----------------------------------------------------------------------------
def lstm_dir_ref(x_tbd, d):
    B = x_tbd.shape[1]
    Hh = d["w_hh"].shape[1]
    wih_t, whh_t = d["w_ih"].T, d["w_hh"].T
    bias = d["b_ih"] + d["b_hh"]

    def step(carry, x_t):
        h, c = carry
        gates = x_t @ wih_t + h @ whh_t + bias
        i_g = jax.nn.sigmoid(gates[:, 0 * Hh:1 * Hh])
        f_g = jax.nn.sigmoid(gates[:, 1 * Hh:2 * Hh])
        g_g = jnp.tanh(gates[:, 2 * Hh:3 * Hh])
        o_g = jax.nn.sigmoid(gates[:, 3 * Hh:4 * Hh])
        c = f_g * c + i_g * g_g
        h = o_g * jnp.tanh(c)
        return (h, c), h

    init = (jnp.zeros((B, Hh), jnp.float32), jnp.zeros((B, Hh), jnp.float32))
    _, hs = lax.scan(step, init, x_tbd)
    return hs


def birnn_ref(x, params):
    x_t = jnp.transpose(x, (1, 0, 2)).astype(jnp.float32)
    layer_in = x_t
    for layer in range(NUM_LAYERS):
        hs_f = lstm_dir_ref(layer_in, params["lstm"][layer]["fwd"])
        hs_b = lstm_dir_ref(layer_in[::-1], params["lstm"][layer]["bwd"])[::-1]
        layer_in = jnp.concatenate([hs_f, hs_b], axis=-1)
    last = layer_in[-1]
    return last @ params["fc"]["w"].T + params["fc"]["b"]


# -----------------------------------------------------------------------------
# Parameter init (deterministic, PyTorch-like uniform(-1/sqrt(H), 1/sqrt(H)))
# -----------------------------------------------------------------------------
def init_params(key, input_size, hidden, num_layers, num_classes):
    k = 1.0 / jnp.sqrt(hidden)
    params = {"lstm": []}
    for layer in range(num_layers):
        d_in = input_size if layer == 0 else 2 * hidden
        layer_p = {}
        for name in ("fwd", "bwd"):
            key, k1, k2, k3, k4 = jax.random.split(key, 5)
            layer_p[name] = {
                "w_ih": jax.random.uniform(k1, (4 * hidden, d_in), jnp.float32, -k, k),
                "w_hh": jax.random.uniform(k2, (4 * hidden, hidden), jnp.float32, -k, k),
                "b_ih": jax.random.uniform(k3, (4 * hidden,), jnp.float32, -k, k),
                "b_hh": jax.random.uniform(k4, (4 * hidden,), jnp.float32, -k, k),
            }
        params["lstm"].append(layer_p)

    key, k1, k2 = jax.random.split(key, 3)
    kf = 1.0 / jnp.sqrt(2 * hidden)
    params["fc"] = {
        "w": jax.random.uniform(k1, (num_classes, 2 * hidden), jnp.float32, -kf, kf),
        "b": jax.random.uniform(k2, (num_classes,), jnp.float32, -kf, kf),
    }
    return params


if __name__ == "__main__":
    key = jax.random.PRNGKey(0)
    key, pkey, xkey = jax.random.split(key, 3)

    batch, seq = 2, 8
    params = init_params(pkey, INPUT_SIZE, HIDDEN_SIZE, NUM_LAYERS, NUM_CLASSES)
    kparams = pack_params(params)
    x = jax.random.normal(xkey, (batch, seq, INPUT_SIZE), jnp.float32)

    fwd = jax.jit(birnn_forward)
    out = jax.block_until_ready(fwd(x, kparams))
    ref = jax.block_until_ready(birnn_ref(x, params))

    assert out.shape == (batch, NUM_CLASSES)
    max_diff = float(jnp.max(jnp.abs(out - ref)))
    assert jnp.allclose(out, ref, atol=5e-4, rtol=5e-4), (
        f"mismatch: max abs diff {max_diff}")
    print("KERNEL_OK")
</pallas_src>

<mosaic_0001>
module attributes {stable_mosaic.version = 11 : i64} {
  func.func @birnn_kernel(%arg0: memref<8x8x128xf32, #tpu.memory_space<vmem>>, %arg1: memref<128x1024xf32, #tpu.memory_space<vmem>>, %arg2: memref<1x1024xf32, #tpu.memory_space<vmem>>, %arg3: memref<128x512xf32, #tpu.memory_space<vmem>>, %arg4: memref<128x512xf32, #tpu.memory_space<vmem>>, %arg5: memref<1x1024xf32, #tpu.memory_space<vmem>>, %arg6: memref<1x128xf32, #tpu.memory_space<vmem>>, %arg7: memref<256x1024xf32, #tpu.memory_space<any>>, %arg8: memref<128x512xf32, #tpu.memory_space<any>>, %arg9: memref<256x128xf32, #tpu.memory_space<any>>, %arg10: memref<8x128xf32, #tpu.memory_space<vmem>>, %arg11: memref<8x8x1024xf32, #tpu.memory_space<vmem>>, %arg12: memref<8x8x256xf32, #tpu.memory_space<vmem>>, %arg13: memref<256x1024xf32, #tpu.memory_space<vmem>>, %arg14: memref<128x512xf32, #tpu.memory_space<vmem>>, %arg15: memref<256x128xf32, #tpu.memory_space<vmem>>, %arg16: memref<3x!tpu.dma_semaphore, #tpu.memory_space<semaphore_mem>>) attributes {dimension_semantics = [], scalar_prefetch = 0 : i64, scratch_operands = 6 : i64, tpu.core_type = #tpu.core_type<tc>} {
    %c0_i32 = arith.constant 0 : i32
    %0 = tpu.memref_slice %arg16[%c0_i32] : memref<3x!tpu.dma_semaphore, #tpu.memory_space<semaphore_mem>> -> memref<1x!tpu.dma_semaphore, #tpu.memory_space<semaphore_mem>>
    %1 = tpu.memref_squeeze %0 : memref<1x!tpu.dma_semaphore, #tpu.memory_space<semaphore_mem>> -> memref<!tpu.dma_semaphore, #tpu.memory_space<semaphore_mem>>
    tpu.enqueue_dma source(%arg7 : memref<256x1024xf32, #tpu.memory_space<any>>) target(%arg13 : memref<256x1024xf32, #tpu.memory_space<vmem>>) target_semaphore(%1 : memref<!tpu.dma_semaphore, #tpu.memory_space<semaphore_mem>>)
    %c1_i32 = arith.constant 1 : i32
    %2 = tpu.memref_slice %arg16[%c1_i32] : memref<3x!tpu.dma_semaphore, #tpu.memory_space<semaphore_mem>> -> memref<1x!tpu.dma_semaphore, #tpu.memory_space<semaphore_mem>>
    %3 = tpu.memref_squeeze %2 : memref<1x!tpu.dma_semaphore, #tpu.memory_space<semaphore_mem>> -> memref<!tpu.dma_semaphore, #tpu.memory_space<semaphore_mem>>
    tpu.enqueue_dma source(%arg8 : memref<128x512xf32, #tpu.memory_space<any>>) target(%arg14 : memref<128x512xf32, #tpu.memory_space<vmem>>) target_semaphore(%3 : memref<!tpu.dma_semaphore, #tpu.memory_space<semaphore_mem>>)
    %c2_i32 = arith.constant 2 : i32
    %4 = tpu.memref_slice %arg16[%c2_i32] : memref<3x!tpu.dma_semaphore, #tpu.memory_space<semaphore_mem>> -> memref<1x!tpu.dma_semaphore, #tpu.memory_space<semaphore_mem>>
    %5 = tpu.memref_squeeze %4 : memref<1x!tpu.dma_semaphore, #tpu.memory_space<semaphore_mem>> -> memref<!tpu.dma_semaphore, #tpu.memory_space<semaphore_mem>>
    tpu.enqueue_dma source(%arg9 : memref<256x128xf32, #tpu.memory_space<any>>) target(%arg15 : memref<256x128xf32, #tpu.memory_space<vmem>>) target_semaphore(%5 : memref<!tpu.dma_semaphore, #tpu.memory_space<semaphore_mem>>)
    %cst = arith.constant 0.000000e+00 : f32
    %6 = vector.broadcast %cst : f32 to vector<8x128xf32>
    %c0 = arith.constant 0 : index
    %c0_0 = arith.constant 0 : index
    %c0_1 = arith.constant 0 : index
    %7 = vector.load %arg0[%c0, %c0_0, %c0_1] : memref<8x8x128xf32, #tpu.memory_space<vmem>>, vector<8x8x128xf32>
    %8 = vector.shape_cast %7 : vector<8x8x128xf32> to vector<64x128xf32>
    %c0_2 = arith.constant 0 : index
    %c0_3 = arith.constant 0 : index
    %9 = vector.load %arg1[%c0_2, %c0_3] : memref<128x1024xf32, #tpu.memory_space<vmem>>, vector<128x1024xf32>
    %cst_4 = arith.constant dense<0.000000e+00> : vector<64x1024xf32>
    %10 = tpu.matmul %8, %9, %cst_4 {dimension_numbers = #tpu.dot_dimension_numbers<[1], [0], [0], [1], [0, 0, 1, 1], [], []>} : vector<64x128xf32>, vector<128x1024xf32>, vector<64x1024xf32> -> vector<64x1024xf32>
    %c0_5 = arith.constant 0 : index
    %c0_6 = arith.constant 0 : index
    %11 = vector.load %arg2[%c0_5, %c0_6] : memref<1x1024xf32, #tpu.memory_space<vmem>>, vector<1x1024xf32>
    %12 = vector.broadcast %11 : vector<1x1024xf32> to vector<64x1024xf32>
    %13 = arith.addf %10, %12 : vector<64x1024xf32>
    %14 = vector.shape_cast %13 : vector<64x1024xf32> to vector<8x8x1024xf32>
    %c0_7 = arith.constant 0 : index
    %c0_8 = arith.constant 0 : index
    %c0_9 = arith.constant 0 : index
    %15 = vector.load %arg11[%c0_7, %c0_8, %c0_9] : memref<8x8x1024xf32, #tpu.memory_space<vmem>>, vector<8x8x1024xf32>
    tpu.vector_store %arg11[%c0_7, %c0_8, %c0_9], %14 {strides = array<i32>} : memref<8x8x1024xf32, #tpu.memory_space<vmem>>, vector<8x8x1024xf32>,
    %c0_i32_10 = arith.constant 0 : i32
    %c7_i32 = arith.constant 7 : i32
    %16 = arith.subi %c7_i32, %c0_i32_10 : i32
    %17 = arith.index_cast %c0_i32_10 : i32 to index
    %c0_11 = arith.constant 0 : index
    %c0_12 = arith.constant 0 : index
    %18 = vector.load %arg11[%17, %c0_11, %c0_12] : memref<8x8x1024xf32, #tpu.memory_space<vmem>>, vector<1x8x512xf32>
    %19 = vector.shape_cast %18 : vector<1x8x512xf32> to vector<8x512xf32>
    %c0_13 = arith.constant 0 : index
    %c0_14 = arith.constant 0 : index
    %20 = vector.load %arg3[%c0_13, %c0_14] : memref<128x512xf32, #tpu.memory_space<vmem>>, vector<128x512xf32>
    %cst_15 = arith.constant dense<0.000000e+00> : vector<8x512xf32>
    %21 = tpu.matmul %6, %20, %cst_15 {dimension_numbers = #tpu.dot_dimension_numbers<[1], [0], [0], [1], [0, 0, 1, 1], [], []>} : vector<8x128xf32>, vector<128x512xf32>, vector<8x512xf32> -> vector<8x512xf32>
    %22 = arith.addf %19, %21 : vector<8x512xf32>
    %23 = arith.index_cast %16 : i32 to index
    %c0_16 = arith.constant 0 : index
    %c512 = arith.constant 512 : index
    %24 = vector.load %arg11[%23, %c0_16, %c512] : memref<8x8x1024xf32, #tpu.memory_space<vmem>>, vector<1x8x512xf32>
    %25 = vector.shape_cast %24 : vector<1x8x512xf32> to vector<8x512xf32>
    %c0_17 = arith.constant 0 : index
    %c0_18 = arith.constant 0 : index
    %26 = vector.load %arg4[%c0_17, %c0_18] : memref<128x512xf32, #tpu.memory_space<vmem>>, vector<128x512xf32>
    %cst_19 = arith.constant dense<0.000000e+00> : vector<8x512xf32>
    %27 = tpu.matmul %6, %26, %cst_19 {dimension_numbers = #tpu.dot_dimension_numbers<[1], [0], [0], [1], [0, 0, 1, 1], [], []>} : vector<8x128xf32>, vector<128x512xf32>, vector<8x512xf32> -> vector<8x512xf32>
    %28 = arith.addf %25, %27 : vector<8x512xf32>
    %29 = vector.extract_strided_slice %22 {offsets = [0, 0], sizes = [8, 128], strides = [1, 1]} : vector<8x512xf32> to vector<8x128xf32>
    %30 = arith.negf %29 : vector<8x128xf32>
    %31 = math.exp %30 : vector<8x128xf32>
    %cst_20 = arith.constant 1.000000e+00 : f32
    %32 = vector.broadcast %cst_20 : f32 to vector<8x128xf32>
    %33 = arith.addf %32, %31 : vector<8x128xf32>
    %34 = arith.divf %32, %33 : vector<8x128xf32>
    %35 = vector.extract_strided_slice %22 {offsets = [0, 128], sizes = [8, 128], strides = [1, 1]} : vector<8x512xf32> to vector<8x128xf32>
    %36 = arith.negf %35 : vector<8x128xf32>
    %37 = math.exp %36 : vector<8x128xf32>
    %cst_21 = arith.constant 1.000000e+00 : f32
    %38 = vector.broadcast %cst_21 : f32 to vector<8x128xf32>
    %39 = arith.addf %38, %37 : vector<8x128xf32>
    %40 = arith.divf %38, %39 : vector<8x128xf32>
    %41 = vector.extract_strided_slice %22 {offsets = [0, 256], sizes = [8, 128], strides = [1, 1]} : vector<8x512xf32> to vector<8x128xf32>
    %42 = math.tanh %41 : vector<8x128xf32>
    %43 = vector.extract_strided_slice %22 {offsets = [0, 384], sizes = [8, 128], strides = [1, 1]} : vector<8x512xf32> to vector<8x128xf32>
    %44 = arith.negf %43 : vector<8x128xf32>
    %45 = math.exp %44 : vector<8x128xf32>
    %cst_22 = arith.constant 1.000000e+00 : f32
    %46 = vector.broadcast %cst_22 : f32 to vector<8x128xf32>
    %47 = arith.addf %46, %45 : vector<8x128xf32>
    %48 = arith.divf %46, %47 : vector<8x128xf32>
    %49 = arith.mulf %40, %6 : vector<8x128xf32>
    %50 = arith.mulf %34, %42 : vector<8x128xf32>
    %51 = arith.addf %49, %50 : vector<8x128xf32>
    %52 = math.tanh %51 : vector<8x128xf32>
    %53 = arith.mulf %48, %52 : vector<8x128xf32>
    %54 = vector.extract_strided_slice %28 {offsets = [0, 0], sizes = [8, 128], strides = [1, 1]} : vector<8x512xf32> to vector<8x128xf32>
    %55 = arith.negf %54 : vector<8x128xf32>
    %56 = math.exp %55 : vector<8x128xf32>
    %cst_23 = arith.constant 1.000000e+00 : f32
    %57 = vector.broadcast %cst_23 : f32 to vector<8x128xf32>
    %58 = arith.addf %57, %56 : vector<8x128xf32>
    %59 = arith.divf %57, %58 : vector<8x128xf32>
    %60 = vector.extract_strided_slice %28 {offsets = [0, 128], sizes = [8, 128], strides = [1, 1]} : vector<8x512xf32> to vector<8x128xf32>
    %61 = arith.negf %60 : vector<8x128xf32>
    %62 = math.exp %61 : vector<8x128xf32>
    %cst_24 = arith.constant 1.000000e+00 : f32
    %63 = vector.broadcast %cst_24 : f32 to vector<8x128xf32>
    %64 = arith.addf %63, %62 : vector<8x128xf32>
    %65 = arith.divf %63, %64 : vector<8x128xf32>
    %66 = vector.extract_strided_slice %28 {offsets = [0, 256], sizes = [8, 128], strides = [1, 1]} : vector<8x512xf32> to vector<8x128xf32>
    %67 = math.tanh %66 : vector<8x128xf32>
    %68 = vector.extract_strided_slice %28 {offsets = [0, 384], sizes = [8, 128], strides = [1, 1]} : vector<8x512xf32> to vector<8x128xf32>
    %69 = arith.negf %68 : vector<8x128xf32>
    %70 = math.exp %69 : vector<8x128xf32>
    %cst_25 = arith.constant 1.000000e+00 : f32
    %71 = vector.broadcast %cst_25 : f32 to vector<8x128xf32>
    %72 = arith.addf %71, %70 : vector<8x128xf32>
    %73 = arith.divf %71, %72 : vector<8x128xf32>
    %74 = arith.mulf %65, %6 : vector<8x128xf32>
    %75 = arith.mulf %59, %67 : vector<8x128xf32>
    %76 = arith.addf %74, %75 : vector<8x128xf32>
    %77 = math.tanh %76 : vector<8x128xf32>
    %78 = arith.mulf %73, %77 : vector<8x128xf32>
    %79 = arith.index_cast %c0_i32_10 : i32 to index
    %c0_26 = arith.constant 0 : index
    %c0_27 = arith.constant 0 : index
    %80 = vector.load %arg12[%79, %c0_26, %c0_27] : memref<8x8x256xf32, #tpu.memory_space<vmem>>, vector<1x8x128xf32>
    %81 = vector.shape_cast %80 : vector<1x8x128xf32> to vector<8x128xf32>
    %82 = vector.shape_cast %53 : vector<8x128xf32> to vector<1x8x128xf32>
    tpu.vector_store %arg12[%79, %c0_26, %c0_27], %82 {strides = array<i32>} : memref<8x8x256xf32, #tpu.memory_space<vmem>>, vector<1x8x128xf32>,
    %83 = arith.index_cast %16 : i32 to index
    %c0_28 = arith.constant 0 : index
    %c128 = arith.constant 128 : index
    %84 = vector.load %arg12[%83, %c0_28, %c128] : memref<8x8x256xf32, #tpu.memory_space<vmem>>, vector<1x8x128xf32>
    %85 = vector.shape_cast %84 : vector<1x8x128xf32> to vector<8x128xf32>
    %86 = vector.shape_cast %78 : vector<8x128xf32> to vector<1x8x128xf32>
    tpu.vector_store %arg12[%83, %c0_28, %c128], %86 {strides = array<i32>} : memref<8x8x256xf32, #tpu.memory_space<vmem>>, vector<1x8x128xf32>,
    %c1_i32_29 = arith.constant 1 : i32
    %c7_i32_30 = arith.constant 7 : i32
    %87 = arith.subi %c7_i32_30, %c1_i32_29 : i32
    %88 = arith.index_cast %c1_i32_29 : i32 to index
    %c0_31 = arith.constant 0 : index
    %c0_32 = arith.constant 0 : index
    %89 = vector.load %arg11[%88, %c0_31, %c0_32] : memref<8x8x1024xf32, #tpu.memory_space<vmem>>, vector<1x8x512xf32>
    %90 = vector.shape_cast %89 : vector<1x8x512xf32> to vector<8x512xf32>
    %c0_33 = arith.constant 0 : index
    %c0_34 = arith.constant 0 : index
    %91 = vector.load %arg3[%c0_33, %c0_34] : memref<128x512xf32, #tpu.memory_space<vmem>>, vector<128x512xf32>
    %cst_35 = arith.constant dense<0.000000e+00> : vector<8x512xf32>
    %92 = tpu.matmul %53, %91, %cst_35 {dimension_numbers = #tpu.dot_dimension_numbers<[1], [0], [0], [1], [0, 0, 1, 1], [], []>} : vector<8x128xf32>, vector<128x512xf32>, vector<8x512xf32> -> vector<8x512xf32>
    %93 = arith.addf %90, %92 : vector<8x512xf32>
    %94 = arith.index_cast %87 : i32 to index
    %c0_36 = arith.constant 0 : index
    %c512_37 = arith.constant 512 : index
    %95 = vector.load %arg11[%94, %c0_36, %c512_37] : memref<8x8x1024xf32, #tpu.memory_space<vmem>>, vector<1x8x512xf32>
    %96 = vector.shape_cast %95 : vector<1x8x512xf32> to vector<8x512xf32>
    %c0_38 = arith.constant 0 : index
    %c0_39 = arith.constant 0 : index
    %97 = vector.load %arg4[%c0_38, %c0_39] : memref<128x512xf32, #tpu.memory_space<vmem>>, vector<128x512xf32>
    %cst_40 = arith.constant dense<0.000000e+00> : vector<8x512xf32>
    %98 = tpu.matmul %78, %97, %cst_40 {dimension_numbers = #tpu.dot_dimension_numbers<[1], [0], [0], [1], [0, 0, 1, 1], [], []>} : vector<8x128xf32>, vector<128x512xf32>, vector<8x512xf32> -> vector<8x512xf32>
    %99 = arith.addf %96, %98 : vector<8x512xf32>
    %100 = vector.extract_strided_slice %93 {offsets = [0, 0], sizes = [8, 128], strides = [1, 1]} : vector<8x512xf32> to vector<8x128xf32>
    %101 = arith.negf %100 : vector<8x128xf32>
    %102 = math.exp %101 : vector<8x128xf32>
    %cst_41 = arith.constant 1.000000e+00 : f32
    %103 = vector.broadcast %cst_41 : f32 to vector<8x128xf32>
    %104 = arith.addf %103, %102 : vector<8x128xf32>
    %105 = arith.divf %103, %104 : vector<8x128xf32>
    %106 = vector.extract_strided_slice %93 {offsets = [0, 128], sizes = [8, 128], strides = [1, 1]} : vector<8x512xf32> to vector<8x128xf32>
    %107 = arith.negf %106 : vector<8x128xf32>
    %108 = math.exp %107 : vector<8x128xf32>
    %cst_42 = arith.constant 1.000000e+00 : f32
    %109 = vector.broadcast %cst_42 : f32 to vector<8x128xf32>
    %110 = arith.addf %109, %108 : vector<8x128xf32>
    %111 = arith.divf %109, %110 : vector<8x128xf32>
    %112 = vector.extract_strided_slice %93 {offsets = [0, 256], sizes = [8, 128], strides = [1, 1]} : vector<8x512xf32> to vector<8x128xf32>
    %113 = math.tanh %112 : vector<8x128xf32>
    %114 = vector.extract_strided_slice %93 {offsets = [0, 384], sizes = [8, 128], strides = [1, 1]} : vector<8x512xf32> to vector<8x128xf32>
    %115 = arith.negf %114 : vector<8x128xf32>
    %116 = math.exp %115 : vector<8x128xf32>
    %cst_43 = arith.constant 1.000000e+00 : f32
    %117 = vector.broadcast %cst_43 : f32 to vector<8x128xf32>
    %118 = arith.addf %117, %116 : vector<8x128xf32>
    %119 = arith.divf %117, %118 : vector<8x128xf32>
    %120 = arith.mulf %111, %51 : vector<8x128xf32>
    %121 = arith.mulf %105, %113 : vector<8x128xf32>
    %122 = arith.addf %120, %121 : vector<8x128xf32>
    %123 = math.tanh %122 : vector<8x128xf32>
    %124 = arith.mulf %119, %123 : vector<8x128xf32>
    %125 = vector.extract_strided_slice %99 {offsets = [0, 0], sizes = [8, 128], strides = [1, 1]} : vector<8x512xf32> to vector<8x128xf32>
    %126 = arith.negf %125 : vector<8x128xf32>
    %127 = math.exp %126 : vector<8x128xf32>
    %cst_44 = arith.constant 1.000000e+00 : f32
    %128 = vector.broadcast %cst_44 : f32 to vector<8x128xf32>
    %129 = arith.addf %128, %127 : vector<8x128xf32>
    %130 = arith.divf %128, %129 : vector<8x128xf32>
    %131 = vector.extract_strided_slice %99 {offsets = [0, 128], sizes = [8, 128], strides = [1, 1]} : vector<8x512xf32> to vector<8x128xf32>
    %132 = arith.negf %131 : vector<8x128xf32>
    %133 = math.exp %132 : vector<8x128xf32>
    %cst_45 = arith.constant 1.000000e+00 : f32
    %134 = vector.broadcast %cst_45 : f32 to vector<8x128xf32>
    %135 = arith.addf %134, %133 : vector<8x128xf32>
    %136 = arith.divf %134, %135 : vector<8x128xf32>
    %137 = vector.extract_strided_slice %99 {offsets = [0, 256], sizes = [8, 128], strides = [1, 1]} : vector<8x512xf32> to vector<8x128xf32>
    %138 = math.tanh %137 : vector<8x128xf32>
    %139 = vector.extract_strided_slice %99 {offsets = [0, 384], sizes = [8, 128], strides = [1, 1]} : vector<8x512xf32> to vector<8x128xf32>
    %140 = arith.negf %139 : vector<8x128xf32>
    %141 = math.exp %140 : vector<8x128xf32>
    %cst_46 = arith.constant 1.000000e+00 : f32
    %142 = vector.broadcast %cst_46 : f32 to vector<8x128xf32>
    %143 = arith.addf %142, %141 : vector<8x128xf32>
    %144 = arith.divf %142, %143 : vector<8x128xf32>
    %145 = arith.mulf %136, %76 : vector<8x128xf32>
    %146 = arith.mulf %130, %138 : vector<8x128xf32>
    %147 = arith.addf %145, %146 : vector<8x128xf32>
    %148 = math.tanh %147 : vector<8x128xf32>
    %149 = arith.mulf %144, %148 : vector<8x128xf32>
    %150 = arith.index_cast %c1_i32_29 : i32 to index
    %c0_47 = arith.constant 0 : index
    %c0_48 = arith.constant 0 : index
    %151 = vector.load %arg12[%150, %c0_47, %c0_48] : memref<8x8x256xf32, #tpu.memory_space<vmem>>, vector<1x8x128xf32>
    %152 = vector.shape_cast %151 : vector<1x8x128xf32> to vector<8x128xf32>
    %153 = vector.shape_cast %124 : vector<8x128xf32> to vector<1x8x128xf32>
    tpu.vector_store %arg12[%150, %c0_47, %c0_48], %153 {strides = array<i32>} : memref<8x8x256xf32, #tpu.memory_space<vmem>>, vector<1x8x128xf32>,
    %154 = arith.index_cast %87 : i32 to index
    %c0_49 = arith.constant 0 : index
    %c128_50 = arith.constant 128 : index
    %155 = vector.load %arg12[%154, %c0_49, %c128_50] : memref<8x8x256xf32, #tpu.memory_space<vmem>>, vector<1x8x128xf32>
    %156 = vector.shape_cast %155 : vector<1x8x128xf32> to vector<8x128xf32>
    %157 = vector.shape_cast %149 : vector<8x128xf32> to vector<1x8x128xf32>
    tpu.vector_store %arg12[%154, %c0_49, %c128_50], %157 {strides = array<i32>} : memref<8x8x256xf32, #tpu.memory_space<vmem>>, vector<1x8x128xf32>,
    %c2_i32_51 = arith.constant 2 : i32
    %c7_i32_52 = arith.constant 7 : i32
    %158 = arith.subi %c7_i32_52, %c2_i32_51 : i32
    %159 = arith.index_cast %c2_i32_51 : i32 to index
    %c0_53 = arith.constant 0 : index
    %c0_54 = arith.constant 0 : index
    %160 = vector.load %arg11[%159, %c0_53, %c0_54] : memref<8x8x1024xf32, #tpu.memory_space<vmem>>, vector<1x8x512xf32>
    %161 = vector.shape_cast %160 : vector<1x8x512xf32> to vector<8x512xf32>
    %c0_55 = arith.constant 0 : index
    %c0_56 = arith.constant 0 : index
    %162 = vector.load %arg3[%c0_55, %c0_56] : memref<128x512xf32, #tpu.memory_space<vmem>>, vector<128x512xf32>
    %cst_57 = arith.constant dense<0.000000e+00> : vector<8x512xf32>
    %163 = tpu.matmul %124, %162, %cst_57 {dimension_numbers = #tpu.dot_dimension_numbers<[1], [0], [0], [1], [0, 0, 1, 1], [], []>} : vector<8x128xf32>, vector<128x512xf32>, vector<8x512xf32> -> vector<8x512xf32>
    %164 = arith.addf %161, %163 : vector<8x512xf32>
    %165 = arith.index_cast %158 : i32 to index
    %c0_58 = arith.constant 0 : index
    %c512_59 = arith.constant 512 : index
    %166 = vector.load %arg11[%165, %c0_58, %c512_59] : memref<8x8x1024xf32, #tpu.memory_space<vmem>>, vector<1x8x512xf32>
    %167 = vector.shape_cast %166 : vector<1x8x512xf32> to vector<8x512xf32>
    %c0_60 = arith.constant 0 : index
    %c0_61 = arith.constant 0 : index
    %168 = vector.load %arg4[%c0_60, %c0_61] : memref<128x512xf32, #tpu.memory_space<vmem>>, vector<128x512xf32>
    %cst_62 = arith.constant dense<0.000000e+00> : vector<8x512xf32>
    %169 = tpu.matmul %149, %168, %cst_62 {dimension_numbers = #tpu.dot_dimension_numbers<[1], [0], [0], [1], [0, 0, 1, 1], [], []>} : vector<8x128xf32>, vector<128x512xf32>, vector<8x512xf32> -> vector<8x512xf32>
    %170 = arith.addf %167, %169 : vector<8x512xf32>
    %171 = vector.extract_strided_slice %164 {offsets = [0, 0], sizes = [8, 128], strides = [1, 1]} : vector<8x512xf32> to vector<8x128xf32>
    %172 = arith.negf %171 : vector<8x128xf32>
    %173 = math.exp %172 : vector<8x128xf32>
    %cst_63 = arith.constant 1.000000e+00 : f32
    %174 = vector.broadcast %cst_63 : f32 to vector<8x128xf32>
    %175 = arith.addf %174, %173 : vector<8x128xf32>
    %176 = arith.divf %174, %175 : vector<8x128xf32>
    %177 = vector.extract_strided_slice %164 {offsets = [0, 128], sizes = [8, 128], strides = [1, 1]} : vector<8x512xf32> to vector<8x128xf32>
    %178 = arith.negf %177 : vector<8x128xf32>
    %179 = math.exp %178 : vector<8x128xf32>
    %cst_64 = arith.constant 1.000000e+00 : f32
    %180 = vector.broadcast %cst_64 : f32 to vector<8x128xf32>
    %181 = arith.addf %180, %179 : vector<8x128xf32>
    %182 = arith.divf %180, %181 : vector<8x128xf32>
    %183 = vector.extract_strided_slice %164 {offsets = [0, 256], sizes = [8, 128], strides = [1, 1]} : vector<8x512xf32> to vector<8x128xf32>
    %184 = math.tanh %183 : vector<8x128xf32>
    %185 = vector.extract_strided_slice %164 {offsets = [0, 384], sizes = [8, 128], strides = [1, 1]} : vector<8x512xf32> to vector<8x128xf32>
    %186 = arith.negf %185 : vector<8x128xf32>
    %187 = math.exp %186 : vector<8x128xf32>
    %cst_65 = arith.constant 1.000000e+00 : f32
    %188 = vector.broadcast %cst_65 : f32 to vector<8x128xf32>
    %189 = arith.addf %188, %187 : vector<8x128xf32>
    %190 = arith.divf %188, %189 : vector<8x128xf32>
    %191 = arith.mulf %182, %122 : vector<8x128xf32>
    %192 = arith.mulf %176, %184 : vector<8x128xf32>
    %193 = arith.addf %191, %192 : vector<8x128xf32>
    %194 = math.tanh %193 : vector<8x128xf32>
    %195 = arith.mulf %190, %194 : vector<8x128xf32>
    %196 = vector.extract_strided_slice %170 {offsets = [0, 0], sizes = [8, 128], strides = [1, 1]} : vector<8x512xf32> to vector<8x128xf32>
    %197 = arith.negf %196 : vector<8x128xf32>
    %198 = math.exp %197 : vector<8x128xf32>
    %cst_66 = arith.constant 1.000000e+00 : f32
    %199 = vector.broadcast %cst_66 : f32 to vector<8x128xf32>
    %200 = arith.addf %199, %198 : vector<8x128xf32>
    %201 = arith.divf %199, %200 : vector<8x128xf32>
    %202 = vector.extract_strided_slice %170 {offsets = [0, 128], sizes = [8, 128], strides = [1, 1]} : vector<8x512xf32> to vector<8x128xf32>
    %203 = arith.negf %202 : vector<8x128xf32>
    %204 = math.exp %203 : vector<8x128xf32>
    %cst_67 = arith.constant 1.000000e+00 : f32
    %205 = vector.broadcast %cst_67 : f32 to vector<8x128xf32>
    %206 = arith.addf %205, %204 : vector<8x128xf32>
    %207 = arith.divf %205, %206 : vector<8x128xf32>
    %208 = vector.extract_strided_slice %170 {offsets = [0, 256], sizes = [8, 128], strides = [1, 1]} : vector<8x512xf32> to vector<8x128xf32>
    %209 = math.tanh %208 : vector<8x128xf32>
    %210 = vector.extract_strided_slice %170 {offsets = [0, 384], sizes = [8, 128], strides = [1, 1]} : vector<8x512xf32> to vector<8x128xf32>
    %211 = arith.negf %210 : vector<8x128xf32>
    %212 = math.exp %211 : vector<8x128xf32>
    %cst_68 = arith.constant 1.000000e+00 : f32
    %213 = vector.broadcast %cst_68 : f32 to vector<8x128xf32>
    %214 = arith.addf %213, %212 : vector<8x128xf32>
    %215 = arith.divf %213, %214 : vector<8x128xf32>
    %216 = arith.mulf %207, %147 : vector<8x128xf32>
    %217 = arith.mulf %201, %209 : vector<8x128xf32>
    %218 = arith.addf %216, %217 : vector<8x128xf32>
    %219 = math.tanh %218 : vector<8x128xf32>
    %220 = arith.mulf %215, %219 : vector<8x128xf32>
    %221 = arith.index_cast %c2_i32_51 : i32 to index
    %c0_69 = arith.constant 0 : index
    %c0_70 = arith.constant 0 : index
    %222 = vector.load %arg12[%221, %c0_69, %c0_70] : memref<8x8x256xf32, #tpu.memory_space<vmem>>, vector<1x8x128xf32>
    %223 = vector.shape_cast %222 : vector<1x8x128xf32> to vector<8x128xf32>
    %224 = vector.shape_cast %195 : vector<8x128xf32> to vector<1x8x128xf32>
    tpu.vector_store %arg12[%221, %c0_69, %c0_70], %224 {strides = array<i32>} : memref<8x8x256xf32, #tpu.memory_space<vmem>>, vector<1x8x128xf32>,
    %225 = arith.index_cast %158 : i32 to index
    %c0_71 = arith.constant 0 : index
    %c128_72 = arith.constant 128 : index
    %226 = vector.load %arg12[%225, %c0_71, %c128_72] : memref<8x8x256xf32, #tpu.memory_space<vmem>>, vector<1x8x128xf32>
    %227 = vector.shape_cast %226 : vector<1x8x128xf32> to vector<8x128xf32>
    %228 = vector.shape_cast %220 : vector<8x128xf32> to vector<1x8x128xf32>
    tpu.vector_store %arg12[%225, %c0_71, %c128_72], %228 {strides = array<i32>} : memref<8x8x256xf32, #tpu.memory_space<vmem>>, vector<1x8x128xf32>,
    %c3_i32 = arith.constant 3 : i32
    %c7_i32_73 = arith.constant 7 : i32
    %229 = arith.subi %c7_i32_73, %c3_i32 : i32
    %230 = arith.index_cast %c3_i32 : i32 to index
    %c0_74 = arith.constant 0 : index
    %c0_75 = arith.constant 0 : index
    %231 = vector.load %arg11[%230, %c0_74, %c0_75] : memref<8x8x1024xf32, #tpu.memory_space<vmem>>, vector<1x8x512xf32>
    %232 = vector.shape_cast %231 : vector<1x8x512xf32> to vector<8x512xf32>
    %c0_76 = arith.constant 0 : index
    %c0_77 = arith.constant 0 : index
    %233 = vector.load %arg3[%c0_76, %c0_77] : memref<128x512xf32, #tpu.memory_space<vmem>>, vector<128x512xf32>
    %cst_78 = arith.constant dense<0.000000e+00> : vector<8x512xf32>
    %234 = tpu.matmul %195, %233, %cst_78 {dimension_numbers = #tpu.dot_dimension_numbers<[1], [0], [0], [1], [0, 0, 1, 1], [], []>} : vector<8x128xf32>, vector<128x512xf32>, vector<8x512xf32> -> vector<8x512xf32>
    %235 = arith.addf %232, %234 : vector<8x512xf32>
    %236 = arith.index_cast %229 : i32 to index
    %c0_79 = arith.constant 0 : index
    %c512_80 = arith.constant 512 : index
    %237 = vector.load %arg11[%236, %c0_79, %c512_80] : memref<8x8x1024xf32, #tpu.memory_space<vmem>>, vector<1x8x512xf32>
    %238 = vector.shape_cast %237 : vector<1x8x512xf32> to vector<8x512xf32>
    %c0_81 = arith.constant 0 : index
    %c0_82 = arith.constant 0 : index
    %239 = vector.load %arg4[%c0_81, %c0_82] : memref<128x512xf32, #tpu.memory_space<vmem>>, vector<128x512xf32>
    %cst_83 = arith.constant dense<0.000000e+00> : vector<8x512xf32>
    %240 = tpu.matmul %220, %239, %cst_83 {dimension_numbers = #tpu.dot_dimension_numbers<[1], [0], [0], [1], [0, 0, 1, 1], [], []>} : vector<8x128xf32>, vector<128x512xf32>, vector<8x512xf32> -> vector<8x512xf32>
    %241 = arith.addf %238, %240 : vector<8x512xf32>
    %242 = vector.extract_strided_slice %235 {offsets = [0, 0], sizes = [8, 128], strides = [1, 1]} : vector<8x512xf32> to vector<8x128xf32>
    %243 = arith.negf %242 : vector<8x128xf32>
    %244 = math.exp %243 : vector<8x128xf32>
    %cst_84 = arith.constant 1.000000e+00 : f32
    %245 = vector.broadcast %cst_84 : f32 to vector<8x128xf32>
    %246 = arith.addf %245, %244 : vector<8x128xf32>
    %247 = arith.divf %245, %246 : vector<8x128xf32>
    %248 = vector.extract_strided_slice %235 {offsets = [0, 128], sizes = [8, 128], strides = [1, 1]} : vector<8x512xf32> to vector<8x128xf32>
    %249 = arith.negf %248 : vector<8x128xf32>
    %250 = math.exp %249 : vector<8x128xf32>
    %cst_85 = arith.constant 1.000000e+00 : f32
    %251 = vector.broadcast %cst_85 : f32 to vector<8x128xf32>
    %252 = arith.addf %251, %250 : vector<8x128xf32>
    %253 = arith.divf %251, %252 : vector<8x128xf32>
    %254 = vector.extract_strided_slice %235 {offsets = [0, 256], sizes = [8, 128], strides = [1, 1]} : vector<8x512xf32> to vector<8x128xf32>
    %255 = math.tanh %254 : vector<8x128xf32>
    %256 = vector.extract_strided_slice %235 {offsets = [0, 384], sizes = [8, 128], strides = [1, 1]} : vector<8x512xf32> to vector<8x128xf32>
    %257 = arith.negf %256 : vector<8x128xf32>
    %258 = math.exp %257 : vector<8x128xf32>
    %cst_86 = arith.constant 1.000000e+00 : f32
    %259 = vector.broadcast %cst_86 : f32 to vector<8x128xf32>
    %260 = arith.addf %259, %258 : vector<8x128xf32>
    %261 = arith.divf %259, %260 : vector<8x128xf32>
    %262 = arith.mulf %253, %193 : vector<8x128xf32>
    %263 = arith.mulf %247, %255 : vector<8x128xf32>
    %264 = arith.addf %262, %263 : vector<8x128xf32>
    %265 = math.tanh %264 : vector<8x128xf32>
    %266 = arith.mulf %261, %265 : vector<8x128xf32>
    %267 = vector.extract_strided_slice %241 {offsets = [0, 0], sizes = [8, 128], strides = [1, 1]} : vector<8x512xf32> to vector<8x128xf32>
    %268 = arith.negf %267 : vector<8x128xf32>
    %269 = math.exp %268 : vector<8x128xf32>
    %cst_87 = arith.constant 1.000000e+00 : f32
    %270 = vector.broadcast %cst_87 : f32 to vector<8x128xf32>
    %271 = arith.addf %270, %269 : vector<8x128xf32>
    %272 = arith.divf %270, %271 : vector<8x128xf32>
    %273 = vector.extract_strided_slice %241 {offsets = [0, 128], sizes = [8, 128], strides = [1, 1]} : vector<8x512xf32> to vector<8x128xf32>
    %274 = arith.negf %273 : vector<8x128xf32>
    %275 = math.exp %274 : vector<8x128xf32>
    %cst_88 = arith.constant 1.000000e+00 : f32
    %276 = vector.broadcast %cst_88 : f32 to vector<8x128xf32>
    %277 = arith.addf %276, %275 : vector<8x128xf32>
    %278 = arith.divf %276, %277 : vector<8x128xf32>
    %279 = vector.extract_strided_slice %241 {offsets = [0, 256], sizes = [8, 128], strides = [1, 1]} : vector<8x512xf32> to vector<8x128xf32>
    %280 = math.tanh %279 : vector<8x128xf32>
    %281 = vector.extract_strided_slice %241 {offsets = [0, 384], sizes = [8, 128], strides = [1, 1]} : vector<8x512xf32> to vector<8x128xf32>
    %282 = arith.negf %281 : vector<8x128xf32>
    %283 = math.exp %282 : vector<8x128xf32>
    %cst_89 = arith.constant 1.000000e+00 : f32
    %284 = vector.broadcast %cst_89 : f32 to vector<8x128xf32>
    %285 = arith.addf %284, %283 : vector<8x128xf32>
    %286 = arith.divf %284, %285 : vector<8x128xf32>
    %287 = arith.mulf %278, %218 : vector<8x128xf32>
    %288 = arith.mulf %272, %280 : vector<8x128xf32>
    %289 = arith.addf %287, %288 : vector<8x128xf32>
    %290 = math.tanh %289 : vector<8x128xf32>
    %291 = arith.mulf %286, %290 : vector<8x128xf32>
    %292 = arith.index_cast %c3_i32 : i32 to index
    %c0_90 = arith.constant 0 : index
    %c0_91 = arith.constant 0 : index
    %293 = vector.load %arg12[%292, %c0_90, %c0_91] : memref<8x8x256xf32, #tpu.memory_space<vmem>>, vector<1x8x128xf32>
    %294 = vector.shape_cast %293 : vector<1x8x128xf32> to vector<8x128xf32>
    %295 = vector.shape_cast %266 : vector<8x128xf32> to vector<1x8x128xf32>
    tpu.vector_store %arg12[%292, %c0_90, %c0_91], %295 {strides = array<i32>} : memref<8x8x256xf32, #tpu.memory_space<vmem>>, vector<1x8x128xf32>,
    %296 = arith.index_cast %229 : i32 to index
    %c0_92 = arith.constant 0 : index
    %c128_93 = arith.constant 128 : index
    %297 = vector.load %arg12[%296, %c0_92, %c128_93] : memref<8x8x256xf32, #tpu.memory_space<vmem>>, vector<1x8x128xf32>
    %298 = vector.shape_cast %297 : vector<1x8x128xf32> to vector<8x128xf32>
    %299 = vector.shape_cast %291 : vector<8x128xf32> to vector<1x8x128xf32>
    tpu.vector_store %arg12[%296, %c0_92, %c128_93], %299 {strides = array<i32>} : memref<8x8x256xf32, #tpu.memory_space<vmem>>, vector<1x8x128xf32>,
    %c4_i32 = arith.constant 4 : i32
    %c7_i32_94 = arith.constant 7 : i32
    %300 = arith.subi %c7_i32_94, %c4_i32 : i32
    %301 = arith.index_cast %c4_i32 : i32 to index
    %c0_95 = arith.constant 0 : index
    %c0_96 = arith.constant 0 : index
    %302 = vector.load %arg11[%301, %c0_95, %c0_96] : memref<8x8x1024xf32, #tpu.memory_space<vmem>>, vector<1x8x512xf32>
    %303 = vector.shape_cast %302 : vector<1x8x512xf32> to vector<8x512xf32>
    %c0_97 = arith.constant 0 : index
    %c0_98 = arith.constant 0 : index
    %304 = vector.load %arg3[%c0_97, %c0_98] : memref<128x512xf32, #tpu.memory_space<vmem>>, vector<128x512xf32>
    %cst_99 = arith.constant dense<0.000000e+00> : vector<8x512xf32>
    %305 = tpu.matmul %266, %304, %cst_99 {dimension_numbers = #tpu.dot_dimension_numbers<[1], [0], [0], [1], [0, 0, 1, 1], [], []>} : vector<8x128xf32>, vector<128x512xf32>, vector<8x512xf32> -> vector<8x512xf32>
    %306 = arith.addf %303, %305 : vector<8x512xf32>
    %307 = arith.index_cast %300 : i32 to index
    %c0_100 = arith.constant 0 : index
    %c512_101 = arith.constant 512 : index
    %308 = vector.load %arg11[%307, %c0_100, %c512_101] : memref<8x8x1024xf32, #tpu.memory_space<vmem>>, vector<1x8x512xf32>
    %309 = vector.shape_cast %308 : vector<1x8x512xf32> to vector<8x512xf32>
    %c0_102 = arith.constant 0 : index
    %c0_103 = arith.constant 0 : index
    %310 = vector.load %arg4[%c0_102, %c0_103] : memref<128x512xf32, #tpu.memory_space<vmem>>, vector<128x512xf32>
    %cst_104 = arith.constant dense<0.000000e+00> : vector<8x512xf32>
    %311 = tpu.matmul %291, %310, %cst_104 {dimension_numbers = #tpu.dot_dimension_numbers<[1], [0], [0], [1], [0, 0, 1, 1], [], []>} : vector<8x128xf32>, vector<128x512xf32>, vector<8x512xf32> -> vector<8x512xf32>
    %312 = arith.addf %309, %311 : vector<8x512xf32>
    %313 = vector.extract_strided_slice %306 {offsets = [0, 0], sizes = [8, 128], strides = [1, 1]} : vector<8x512xf32> to vector<8x128xf32>
    %314 = arith.negf %313 : vector<8x128xf32>
    %315 = math.exp %314 : vector<8x128xf32>
    %cst_105 = arith.constant 1.000000e+00 : f32
    %316 = vector.broadcast %cst_105 : f32 to vector<8x128xf32>
    %317 = arith.addf %316, %315 : vector<8x128xf32>
    %318 = arith.divf %316, %317 : vector<8x128xf32>
    %319 = vector.extract_strided_slice %306 {offsets = [0, 128], sizes = [8, 128], strides = [1, 1]} : vector<8x512xf32> to vector<8x128xf32>
    %320 = arith.negf %319 : vector<8x128xf32>
    %321 = math.exp %320 : vector<8x128xf32>
    %cst_106 = arith.constant 1.000000e+00 : f32
    %322 = vector.broadcast %cst_106 : f32 to vector<8x128xf32>
    %323 = arith.addf %322, %321 : vector<8x128xf32>
    %324 = arith.divf %322, %323 : vector<8x128xf32>
    %325 = vector.extract_strided_slice %306 {offsets = [0, 256], sizes = [8, 128], strides = [1, 1]} : vector<8x512xf32> to vector<8x128xf32>
    %326 = math.tanh %325 : vector<8x128xf32>
    %327 = vector.extract_strided_slice %306 {offsets = [0, 384], sizes = [8, 128], strides = [1, 1]} : vector<8x512xf32> to vector<8x128xf32>
    %328 = arith.negf %327 : vector<8x128xf32>
    %329 = math.exp %328 : vector<8x128xf32>
    %cst_107 = arith.constant 1.000000e+00 : f32
    %330 = vector.broadcast %cst_107 : f32 to vector<8x128xf32>
    %331 = arith.addf %330, %329 : vector<8x128xf32>
    %332 = arith.divf %330, %331 : vector<8x128xf32>
    %333 = arith.mulf %324, %264 : vector<8x128xf32>
    %334 = arith.mulf %318, %326 : vector<8x128xf32>
    %335 = arith.addf %333, %334 : vector<8x128xf32>
    %336 = math.tanh %335 : vector<8x128xf32>
    %337 = arith.mulf %332, %336 : vector<8x128xf32>
    %338 = vector.extract_strided_slice %312 {offsets = [0, 0], sizes = [8, 128], strides = [1, 1]} : vector<8x512xf32> to vector<8x128xf32>
    %339 = arith.negf %338 : vector<8x128xf32>
    %340 = math.exp %339 : vector<8x128xf32>
    %cst_108 = arith.constant 1.000000e+00 : f32
    %341 = vector.broadcast %cst_108 : f32 to vector<8x128xf32>
    %342 = arith.addf %341, %340 : vector<8x128xf32>
    %343 = arith.divf %341, %342 : vector<8x128xf32>
    %344 = vector.extract_strided_slice %312 {offsets = [0, 128], sizes = [8, 128], strides = [1, 1]} : vector<8x512xf32> to vector<8x128xf32>
    %345 = arith.negf %344 : vector<8x128xf32>
    %346 = math.exp %345 : vector<8x128xf32>
    %cst_109 = arith.constant 1.000000e+00 : f32
    %347 = vector.broadcast %cst_109 : f32 to vector<8x128xf32>
    %348 = arith.addf %347, %346 : vector<8x128xf32>
    %349 = arith.divf %347, %348 : vector<8x128xf32>
    %350 = vector.extract_strided_slice %312 {offsets = [0, 256], sizes = [8, 128], strides = [1, 1]} : vector<8x512xf32> to vector<8x128xf32>
    %351 = math.tanh %350 : vector<8x128xf32>
    %352 = vector.extract_strided_slice %312 {offsets = [0, 384], sizes = [8, 128], strides = [1, 1]} : vector<8x512xf32> to vector<8x128xf32>
    %353 = arith.negf %352 : vector<8x128xf32>
    %354 = math.exp %353 : vector<8x128xf32>
    %cst_110 = arith.constant 1.000000e+00 : f32
    %355 = vector.broadcast %cst_110 : f32 to vector<8x128xf32>
    %356 = arith.addf %355, %354 : vector<8x128xf32>
    %357 = arith.divf %355, %356 : vector<8x128xf32>
    %358 = arith.mulf %349, %289 : vector<8x128xf32>
    %359 = arith.mulf %343, %351 : vector<8x128xf32>
    %360 = arith.addf %358, %359 : vector<8x128xf32>
    %361 = math.tanh %360 : vector<8x128xf32>
    %362 = arith.mulf %357, %361 : vector<8x128xf32>
    %363 = arith.index_cast %c4_i32 : i32 to index
    %c0_111 = arith.constant 0 : index
    %c0_112 = arith.constant 0 : index
    %364 = vector.load %arg12[%363, %c0_111, %c0_112] : memref<8x8x256xf32, #tpu.memory_space<vmem>>, vector<1x8x128xf32>
    %365 = vector.shape_cast %364 : vector<1x8x128xf32> to vector<8x128xf32>
    %366 = vector.shape_cast %337 : vector<8x128xf32> to vector<1x8x128xf32>
    tpu.vector_store %arg12[%363, %c0_111, %c0_112], %366 {strides = array<i32>} : memref<8x8x256xf32, #tpu.memory_space<vmem>>, vector<1x8x128xf32>,
    %367 = arith.index_cast %300 : i32 to index
    %c0_113 = arith.constant 0 : index
    %c128_114 = arith.constant 128 : index
    %368 = vector.load %arg12[%367, %c0_113, %c128_114] : memref<8x8x256xf32, #tpu.memory_space<vmem>>, vector<1x8x128xf32>
    %369 = vector.shape_cast %368 : vector<1x8x128xf32> to vector<8x128xf32>
    %370 = vector.shape_cast %362 : vector<8x128xf32> to vector<1x8x128xf32>
    tpu.vector_store %arg12[%367, %c0_113, %c128_114], %370 {strides = array<i32>} : memref<8x8x256xf32, #tpu.memory_space<vmem>>, vector<1x8x128xf32>,
    %c5_i32 = arith.constant 5 : i32
    %c7_i32_115 = arith.constant 7 : i32
    %371 = arith.subi %c7_i32_115, %c5_i32 : i32
    %372 = arith.index_cast %c5_i32 : i32 to index
    %c0_116 = arith.constant 0 : index
    %c0_117 = arith.constant 0 : index
    %373 = vector.load %arg11[%372, %c0_116, %c0_117] : memref<8x8x1024xf32, #tpu.memory_space<vmem>>, vector<1x8x512xf32>
    %374 = vector.shape_cast %373 : vector<1x8x512xf32> to vector<8x512xf32>
    %c0_118 = arith.constant 0 : index
    %c0_119 = arith.constant 0 : index
    %375 = vector.load %arg3[%c0_118, %c0_119] : memref<128x512xf32, #tpu.memory_space<vmem>>, vector<128x512xf32>
    %cst_120 = arith.constant dense<0.000000e+00> : vector<8x512xf32>
    %376 = tpu.matmul %337, %375, %cst_120 {dimension_numbers = #tpu.dot_dimension_numbers<[1], [0], [0], [1], [0, 0, 1, 1], [], []>} : vector<8x128xf32>, vector<128x512xf32>, vector<8x512xf32> -> vector<8x512xf32>
    %377 = arith.addf %374, %376 : vector<8x512xf32>
    %378 = arith.index_cast %371 : i32 to index
    %c0_121 = arith.constant 0 : index
    %c512_122 = arith.constant 512 : index
    %379 = vector.load %arg11[%378, %c0_121, %c512_122] : memref<8x8x1024xf32, #tpu.memory_space<vmem>>, vector<1x8x512xf32>
    %380 = vector.shape_cast %379 : vector<1x8x512xf32> to vector<8x512xf32>
    %c0_123 = arith.constant 0 : index
    %c0_124 = arith.constant 0 : index
    %381 = vector.load %arg4[%c0_123, %c0_124] : memref<128x512xf32, #tpu.memory_space<vmem>>, vector<128x512xf32>
    %cst_125 = arith.constant dense<0.000000e+00> : vector<8x512xf32>
    %382 = tpu.matmul %362, %381, %cst_125 {dimension_numbers = #tpu.dot_dimension_numbers<[1], [0], [0], [1], [0, 0, 1, 1], [], []>} : vector<8x128xf32>, vector<128x512xf32>, vector<8x512xf32> -> vector<8x512xf32>
    %383 = arith.addf %380, %382 : vector<8x512xf32>
    %384 = vector.extract_strided_slice %377 {offsets = [0, 0], sizes = [8, 128], strides = [1, 1]} : vector<8x512xf32> to vector<8x128xf32>
    %385 = arith.negf %384 : vector<8x128xf32>
    %386 = math.exp %385 : vector<8x128xf32>
    %cst_126 = arith.constant 1.000000e+00 : f32
    %387 = vector.broadcast %cst_126 : f32 to vector<8x128xf32>
    %388 = arith.addf %387, %386 : vector<8x128xf32>
    %389 = arith.divf %387, %388 : vector<8x128xf32>
    %390 = vector.extract_strided_slice %377 {offsets = [0, 128], sizes = [8, 128], strides = [1, 1]} : vector<8x512xf32> to vector<8x128xf32>
    %391 = arith.negf %390 : vector<8x128xf32>
    %392 = math.exp %391 : vector<8x128xf32>
    %cst_127 = arith.constant 1.000000e+00 : f32
    %393 = vector.broadcast %cst_127 : f32 to vector<8x128xf32>
    %394 = arith.addf %393, %392 : vector<8x128xf32>
    %395 = arith.divf %393, %394 : vector<8x128xf32>
    %396 = vector.extract_strided_slice %377 {offsets = [0, 256], sizes = [8, 128], strides = [1, 1]} : vector<8x512xf32> to vector<8x128xf32>
    %397 = math.tanh %396 : vector<8x128xf32>
    %398 = vector.extract_strided_slice %377 {offsets = [0, 384], sizes = [8, 128], strides = [1, 1]} : vector<8x512xf32> to vector<8x128xf32>
    %399 = arith.negf %398 : vector<8x128xf32>
    %400 = math.exp %399 : vector<8x128xf32>
    %cst_128 = arith.constant 1.000000e+00 : f32
    %401 = vector.broadcast %cst_128 : f32 to vector<8x128xf32>
    %402 = arith.addf %401, %400 : vector<8x128xf32>
    %403 = arith.divf %401, %402 : vector<8x128xf32>
    %404 = arith.mulf %395, %335 : vector<8x128xf32>
    %405 = arith.mulf %389, %397 : vector<8x128xf32>
    %406 = arith.addf %404, %405 : vector<8x128xf32>
    %407 = math.tanh %406 : vector<8x128xf32>
    %408 = arith.mulf %403, %407 : vector<8x128xf32>
    %409 = vector.extract_strided_slice %383 {offsets = [0, 0], sizes = [8, 128], strides = [1, 1]} : vector<8x512xf32> to vector<8x128xf32>
    %410 = arith.negf %409 : vector<8x128xf32>
    %411 = math.exp %410 : vector<8x128xf32>
    %cst_129 = arith.constant 1.000000e+00 : f32
    %412 = vector.broadcast %cst_129 : f32 to vector<8x128xf32>
    %413 = arith.addf %412, %411 : vector<8x128xf32>
    %414 = arith.divf %412, %413 : vector<8x128xf32>
    %415 = vector.extract_strided_slice %383 {offsets = [0, 128], sizes = [8, 128], strides = [1, 1]} : vector<8x512xf32> to vector<8x128xf32>
    %416 = arith.negf %415 : vector<8x128xf32>
    %417 = math.exp %416 : vector<8x128xf32>
    %cst_130 = arith.constant 1.000000e+00 : f32
    %418 = vector.broadcast %cst_130 : f32 to vector<8x128xf32>
    %419 = arith.addf %418, %417 : vector<8x128xf32>
    %420 = arith.divf %418, %419 : vector<8x128xf32>
    %421 = vector.extract_strided_slice %383 {offsets = [0, 256], sizes = [8, 128], strides = [1, 1]} : vector<8x512xf32> to vector<8x128xf32>
    %422 = math.tanh %421 : vector<8x128xf32>
    %423 = vector.extract_strided_slice %383 {offsets = [0, 384], sizes = [8, 128], strides = [1, 1]} : vector<8x512xf32> to vector<8x128xf32>
    %424 = arith.negf %423 : vector<8x128xf32>
    %425 = math.exp %424 : vector<8x128xf32>
    %cst_131 = arith.constant 1.000000e+00 : f32
    %426 = vector.broadcast %cst_131 : f32 to vector<8x128xf32>
    %427 = arith.addf %426, %425 : vector<8x128xf32>
    %428 = arith.divf %426, %427 : vector<8x128xf32>
    %429 = arith.mulf %420, %360 : vector<8x128xf32>
    %430 = arith.mulf %414, %422 : vector<8x128xf32>
    %431 = arith.addf %429, %430 : vector<8x128xf32>
    %432 = math.tanh %431 : vector<8x128xf32>
    %433 = arith.mulf %428, %432 : vector<8x128xf32>
    %434 = arith.index_cast %c5_i32 : i32 to index
    %c0_132 = arith.constant 0 : index
    %c0_133 = arith.constant 0 : index
    %435 = vector.load %arg12[%434, %c0_132, %c0_133] : memref<8x8x256xf32, #tpu.memory_space<vmem>>, vector<1x8x128xf32>
    %436 = vector.shape_cast %435 : vector<1x8x128xf32> to vector<8x128xf32>
    %437 = vector.shape_cast %408 : vector<8x128xf32> to vector<1x8x128xf32>
    tpu.vector_store %arg12[%434, %c0_132, %c0_133], %437 {strides = array<i32>} : memref<8x8x256xf32, #tpu.memory_space<vmem>>, vector<1x8x128xf32>,
    %438 = arith.index_cast %371 : i32 to index
    %c0_134 = arith.constant 0 : index
    %c128_135 = arith.constant 128 : index
    %439 = vector.load %arg12[%438, %c0_134, %c128_135] : memref<8x8x256xf32, #tpu.memory_space<vmem>>, vector<1x8x128xf32>
    %440 = vector.shape_cast %439 : vector<1x8x128xf32> to vector<8x128xf32>
    %441 = vector.shape_cast %433 : vector<8x128xf32> to vector<1x8x128xf32>
    tpu.vector_store %arg12[%438, %c0_134, %c128_135], %441 {strides = array<i32>} : memref<8x8x256xf32, #tpu.memory_space<vmem>>, vector<1x8x128xf32>,
    %c6_i32 = arith.constant 6 : i32
    %c7_i32_136 = arith.constant 7 : i32
    %442 = arith.subi %c7_i32_136, %c6_i32 : i32
    %443 = arith.index_cast %c6_i32 : i32 to index
    %c0_137 = arith.constant 0 : index
    %c0_138 = arith.constant 0 : index
    %444 = vector.load %arg11[%443, %c0_137, %c0_138] : memref<8x8x1024xf32, #tpu.memory_space<vmem>>, vector<1x8x512xf32>
    %445 = vector.shape_cast %444 : vector<1x8x512xf32> to vector<8x512xf32>
    %c0_139 = arith.constant 0 : index
    %c0_140 = arith.constant 0 : index
    %446 = vector.load %arg3[%c0_139, %c0_140] : memref<128x512xf32, #tpu.memory_space<vmem>>, vector<128x512xf32>
    %cst_141 = arith.constant dense<0.000000e+00> : vector<8x512xf32>
    %447 = tpu.matmul %408, %446, %cst_141 {dimension_numbers = #tpu.dot_dimension_numbers<[1], [0], [0], [1], [0, 0, 1, 1], [], []>} : vector<8x128xf32>, vector<128x512xf32>, vector<8x512xf32> -> vector<8x512xf32>
    %448 = arith.addf %445, %447 : vector<8x512xf32>
    %449 = arith.index_cast %442 : i32 to index
    %c0_142 = arith.constant 0 : index
    %c512_143 = arith.constant 512 : index
    %450 = vector.load %arg11[%449, %c0_142, %c512_143] : memref<8x8x1024xf32, #tpu.memory_space<vmem>>, vector<1x8x512xf32>
    %451 = vector.shape_cast %450 : vector<1x8x512xf32> to vector<8x512xf32>
    %c0_144 = arith.constant 0 : index
    %c0_145 = arith.constant 0 : index
    %452 = vector.load %arg4[%c0_144, %c0_145] : memref<128x512xf32, #tpu.memory_space<vmem>>, vector<128x512xf32>
    %cst_146 = arith.constant dense<0.000000e+00> : vector<8x512xf32>
    %453 = tpu.matmul %433, %452, %cst_146 {dimension_numbers = #tpu.dot_dimension_numbers<[1], [0], [0], [1], [0, 0, 1, 1], [], []>} : vector<8x128xf32>, vector<128x512xf32>, vector<8x512xf32> -> vector<8x512xf32>
    %454 = arith.addf %451, %453 : vector<8x512xf32>
    %455 = vector.extract_strided_slice %448 {offsets = [0, 0], sizes = [8, 128], strides = [1, 1]} : vector<8x512xf32> to vector<8x128xf32>
    %456 = arith.negf %455 : vector<8x128xf32>
    %457 = math.exp %456 : vector<8x128xf32>
    %cst_147 = arith.constant 1.000000e+00 : f32
    %458 = vector.broadcast %cst_147 : f32 to vector<8x128xf32>
    %459 = arith.addf %458, %457 : vector<8x128xf32>
    %460 = arith.divf %458, %459 : vector<8x128xf32>
    %461 = vector.extract_strided_slice %448 {offsets = [0, 128], sizes = [8, 128], strides = [1, 1]} : vector<8x512xf32> to vector<8x128xf32>
    %462 = arith.negf %461 : vector<8x128xf32>
    %463 = math.exp %462 : vector<8x128xf32>
    %cst_148 = arith.constant 1.000000e+00 : f32
    %464 = vector.broadcast %cst_148 : f32 to vector<8x128xf32>
    %465 = arith.addf %464, %463 : vector<8x128xf32>
    %466 = arith.divf %464, %465 : vector<8x128xf32>
    %467 = vector.extract_strided_slice %448 {offsets = [0, 256], sizes = [8, 128], strides = [1, 1]} : vector<8x512xf32> to vector<8x128xf32>
    %468 = math.tanh %467 : vector<8x128xf32>
    %469 = vector.extract_strided_slice %448 {offsets = [0, 384], sizes = [8, 128], strides = [1, 1]} : vector<8x512xf32> to vector<8x128xf32>
    %470 = arith.negf %469 : vector<8x128xf32>
    %471 = math.exp %470 : vector<8x128xf32>
    %cst_149 = arith.constant 1.000000e+00 : f32
    %472 = vector.broadcast %cst_149 : f32 to vector<8x128xf32>
    %473 = arith.addf %472, %471 : vector<8x128xf32>
    %474 = arith.divf %472, %473 : vector<8x128xf32>
    %475 = arith.mulf %466, %406 : vector<8x128xf32>
    %476 = arith.mulf %460, %468 : vector<8x128xf32>
    %477 = arith.addf %475, %476 : vector<8x128xf32>
    %478 = math.tanh %477 : vector<8x128xf32>
    %479 = arith.mulf %474, %478 : vector<8x128xf32>
    %480 = vector.extract_strided_slice %454 {offsets = [0, 0], sizes = [8, 128], strides = [1, 1]} : vector<8x512xf32> to vector<8x128xf32>
    %481 = arith.negf %480 : vector<8x128xf32>
    %482 = math.exp %481 : vector<8x128xf32>
    %cst_150 = arith.constant 1.000000e+00 : f32
    %483 = vector.broadcast %cst_150 : f32 to vector<8x128xf32>
    %484 = arith.addf %483, %482 : vector<8x128xf32>
    %485 = arith.divf %483, %484 : vector<8x128xf32>
    %486 = vector.extract_strided_slice %454 {offsets = [0, 128], sizes = [8, 128], strides = [1, 1]} : vector<8x512xf32> to vector<8x128xf32>
    %487 = arith.negf %486 : vector<8x128xf32>
    %488 = math.exp %487 : vector<8x128xf32>
    %cst_151 = arith.constant 1.000000e+00 : f32
    %489 = vector.broadcast %cst_151 : f32 to vector<8x128xf32>
    %490 = arith.addf %489, %488 : vector<8x128xf32>
    %491 = arith.divf %489, %490 : vector<8x128xf32>
    %492 = vector.extract_strided_slice %454 {offsets = [0, 256], sizes = [8, 128], strides = [1, 1]} : vector<8x512xf32> to vector<8x128xf32>
    %493 = math.tanh %492 : vector<8x128xf32>
    %494 = vector.extract_strided_slice %454 {offsets = [0, 384], sizes = [8, 128], strides = [1, 1]} : vector<8x512xf32> to vector<8x128xf32>
    %495 = arith.negf %494 : vector<8x128xf32>
    %496 = math.exp %495 : vector<8x128xf32>
    %cst_152 = arith.constant 1.000000e+00 : f32
    %497 = vector.broadcast %cst_152 : f32 to vector<8x128xf32>
    %498 = arith.addf %497, %496 : vector<8x128xf32>
    %499 = arith.divf %497, %498 : vector<8x128xf32>
    %500 = arith.mulf %491, %431 : vector<8x128xf32>
    %501 = arith.mulf %485, %493 : vector<8x128xf32>
    %502 = arith.addf %500, %501 : vector<8x128xf32>
    %503 = math.tanh %502 : vector<8x128xf32>
    %504 = arith.mulf %499, %503 : vector<8x128xf32>
    %505 = arith.index_cast %c6_i32 : i32 to index
    %c0_153 = arith.constant 0 : index
    %c0_154 = arith.constant 0 : index
    %506 = vector.load %arg12[%505, %c0_153, %c0_154] : memref<8x8x256xf32, #tpu.memory_space<vmem>>, vector<1x8x128xf32>
    %507 = vector.shape_cast %506 : vector<1x8x128xf32> to vector<8x128xf32>
    %508 = vector.shape_cast %479 : vector<8x128xf32> to vector<1x8x128xf32>
    tpu.vector_store %arg12[%505, %c0_153, %c0_154], %508 {strides = array<i32>} : memref<8x8x256xf32, #tpu.memory_space<vmem>>, vector<1x8x128xf32>,
    %509 = arith.index_cast %442 : i32 to index
    %c0_155 = arith.constant 0 : index
    %c128_156 = arith.constant 128 : index
    %510 = vector.load %arg12[%509, %c0_155, %c128_156] : memref<8x8x256xf32, #tpu.memory_space<vmem>>, vector<1x8x128xf32>
    %511 = vector.shape_cast %510 : vector<1x8x128xf32> to vector<8x128xf32>
    %512 = vector.shape_cast %504 : vector<8x128xf32> to vector<1x8x128xf32>
    tpu.vector_store %arg12[%509, %c0_155, %c128_156], %512 {strides = array<i32>} : memref<8x8x256xf32, #tpu.memory_space<vmem>>, vector<1x8x128xf32>,
    %c7_i32_157 = arith.constant 7 : i32
    %c7_i32_158 = arith.constant 7 : i32
    %513 = arith.subi %c7_i32_158, %c7_i32_157 : i32
    %514 = arith.index_cast %c7_i32_157 : i32 to index
    %c0_159 = arith.constant 0 : index
    %c0_160 = arith.constant 0 : index
    %515 = vector.load %arg11[%514, %c0_159, %c0_160] : memref<8x8x1024xf32, #tpu.memory_space<vmem>>, vector<1x8x512xf32>
    %516 = vector.shape_cast %515 : vector<1x8x512xf32> to vector<8x512xf32>
    %c0_161 = arith.constant 0 : index
    %c0_162 = arith.constant 0 : index
    %517 = vector.load %arg3[%c0_161, %c0_162] : memref<128x512xf32, #tpu.memory_space<vmem>>, vector<128x512xf32>
    %cst_163 = arith.constant dense<0.000000e+00> : vector<8x512xf32>
    %518 = tpu.matmul %479, %517, %cst_163 {dimension_numbers = #tpu.dot_dimension_numbers<[1], [0], [0], [1], [0, 0, 1, 1], [], []>} : vector<8x128xf32>, vector<128x512xf32>, vector<8x512xf32> -> vector<8x512xf32>
    %519 = arith.addf %516, %518 : vector<8x512xf32>
    %520 = arith.index_cast %513 : i32 to index
    %c0_164 = arith.constant 0 : index
    %c512_165 = arith.constant 512 : index
    %521 = vector.load %arg11[%520, %c0_164, %c512_165] : memref<8x8x1024xf32, #tpu.memory_space<vmem>>, vector<1x8x512xf32>
    %522 = vector.shape_cast %521 : vector<1x8x512xf32> to vector<8x512xf32>
    %c0_166 = arith.constant 0 : index
    %c0_167 = arith.constant 0 : index
    %523 = vector.load %arg4[%c0_166, %c0_167] : memref<128x512xf32, #tpu.memory_space<vmem>>, vector<128x512xf32>
    %cst_168 = arith.constant dense<0.000000e+00> : vector<8x512xf32>
    %524 = tpu.matmul %504, %523, %cst_168 {dimension_numbers = #tpu.dot_dimension_numbers<[1], [0], [0], [1], [0, 0, 1, 1], [], []>} : vector<8x128xf32>, vector<128x512xf32>, vector<8x512xf32> -> vector<8x512xf32>
    %525 = arith.addf %522, %524 : vector<8x512xf32>
    %526 = vector.extract_strided_slice %519 {offsets = [0, 0], sizes = [8, 128], strides = [1, 1]} : vector<8x512xf32> to vector<8x128xf32>
    %527 = arith.negf %526 : vector<8x128xf32>
    %528 = math.exp %527 : vector<8x128xf32>
    %cst_169 = arith.constant 1.000000e+00 : f32
    %529 = vector.broadcast %cst_169 : f32 to vector<8x128xf32>
    %530 = arith.addf %529, %528 : vector<8x128xf32>
    %531 = arith.divf %529, %530 : vector<8x128xf32>
    %532 = vector.extract_strided_slice %519 {offsets = [0, 128], sizes = [8, 128], strides = [1, 1]} : vector<8x512xf32> to vector<8x128xf32>
    %533 = arith.negf %532 : vector<8x128xf32>
    %534 = math.exp %533 : vector<8x128xf32>
    %cst_170 = arith.constant 1.000000e+00 : f32
    %535 = vector.broadcast %cst_170 : f32 to vector<8x128xf32>
    %536 = arith.addf %535, %534 : vector<8x128xf32>
    %537 = arith.divf %535, %536 : vector<8x128xf32>
    %538 = vector.extract_strided_slice %519 {offsets = [0, 256], sizes = [8, 128], strides = [1, 1]} : vector<8x512xf32> to vector<8x128xf32>
    %539 = math.tanh %538 : vector<8x128xf32>
    %540 = vector.extract_strided_slice %519 {offsets = [0, 384], sizes = [8, 128], strides = [1, 1]} : vector<8x512xf32> to vector<8x128xf32>
    %541 = arith.negf %540 : vector<8x128xf32>
    %542 = math.exp %541 : vector<8x128xf32>
    %cst_171 = arith.constant 1.000000e+00 : f32
    %543 = vector.broadcast %cst_171 : f32 to vector<8x128xf32>
    %544 = arith.addf %543, %542 : vector<8x128xf32>
    %545 = arith.divf %543, %544 : vector<8x128xf32>
    %546 = arith.mulf %537, %477 : vector<8x128xf32>
    %547 = arith.mulf %531, %539 : vector<8x128xf32>
    %548 = arith.addf %546, %547 : vector<8x128xf32>
    %549 = math.tanh %548 : vector<8x128xf32>
    %550 = arith.mulf %545, %549 : vector<8x128xf32>
    %551 = vector.extract_strided_slice %525 {offsets = [0, 0], sizes = [8, 128], strides = [1, 1]} : vector<8x512xf32> to vector<8x128xf32>
    %552 = arith.negf %551 : vector<8x128xf32>
    %553 = math.exp %552 : vector<8x128xf32>
    %cst_172 = arith.constant 1.000000e+00 : f32
    %554 = vector.broadcast %cst_172 : f32 to vector<8x128xf32>
    %555 = arith.addf %554, %553 : vector<8x128xf32>
    %556 = arith.divf %554, %555 : vector<8x128xf32>
    %557 = vector.extract_strided_slice %525 {offsets = [0, 128], sizes = [8, 128], strides = [1, 1]} : vector<8x512xf32> to vector<8x128xf32>
    %558 = arith.negf %557 : vector<8x128xf32>
    %559 = math.exp %558 : vector<8x128xf32>
    %cst_173 = arith.constant 1.000000e+00 : f32
    %560 = vector.broadcast %cst_173 : f32 to vector<8x128xf32>
    %561 = arith.addf %560, %559 : vector<8x128xf32>
    %562 = arith.divf %560, %561 : vector<8x128xf32>
    %563 = vector.extract_strided_slice %525 {offsets = [0, 256], sizes = [8, 128], strides = [1, 1]} : vector<8x512xf32> to vector<8x128xf32>
    %564 = math.tanh %563 : vector<8x128xf32>
    %565 = vector.extract_strided_slice %525 {offsets = [0, 384], sizes = [8, 128], strides = [1, 1]} : vector<8x512xf32> to vector<8x128xf32>
    %566 = arith.negf %565 : vector<8x128xf32>
    %567 = math.exp %566 : vector<8x128xf32>
    %cst_174 = arith.constant 1.000000e+00 : f32
    %568 = vector.broadcast %cst_174 : f32 to vector<8x128xf32>
    %569 = arith.addf %568, %567 : vector<8x128xf32>
    %570 = arith.divf %568, %569 : vector<8x128xf32>
    %571 = arith.mulf %562, %502 : vector<8x128xf32>
    %572 = arith.mulf %556, %564 : vector<8x128xf32>
    %573 = arith.addf %571, %572 : vector<8x128xf32>
    %574 = math.tanh %573 : vector<8x128xf32>
    %575 = arith.mulf %570, %574 : vector<8x128xf32>
    %576 = arith.index_cast %c7_i32_157 : i32 to index
    %c0_175 = arith.constant 0 : index
    %c0_176 = arith.constant 0 : index
    %577 = vector.load %arg12[%576, %c0_175, %c0_176] : memref<8x8x256xf32, #tpu.memory_space<vmem>>, vector<1x8x128xf32>
    %578 = vector.shape_cast %577 : vector<1x8x128xf32> to vector<8x128xf32>
    %579 = vector.shape_cast %550 : vector<8x128xf32> to vector<1x8x128xf32>
    tpu.vector_store %arg12[%576, %c0_175, %c0_176], %579 {strides = array<i32>} : memref<8x8x256xf32, #tpu.memory_space<vmem>>, vector<1x8x128xf32>,
    %580 = arith.index_cast %513 : i32 to index
    %c0_177 = arith.constant 0 : index
    %c128_178 = arith.constant 128 : index
    %581 = vector.load %arg12[%580, %c0_177, %c128_178] : memref<8x8x256xf32, #tpu.memory_space<vmem>>, vector<1x8x128xf32>
    %582 = vector.shape_cast %581 : vector<1x8x128xf32> to vector<8x128xf32>
    %583 = vector.shape_cast %575 : vector<8x128xf32> to vector<1x8x128xf32>
    tpu.vector_store %arg12[%580, %c0_177, %c128_178], %583 {strides = array<i32>} : memref<8x8x256xf32, #tpu.memory_space<vmem>>, vector<1x8x128xf32>,
    %c8_i32 = arith.constant 8 : i32
    %c0_i32_179 = arith.constant 0 : i32
    %584 = tpu.memref_slice %arg16[%c0_i32_179] : memref<3x!tpu.dma_semaphore, #tpu.memory_space<semaphore_mem>> -> memref<1x!tpu.dma_semaphore, #tpu.memory_space<semaphore_mem>>
    %585 = tpu.memref_squeeze %584 : memref<1x!tpu.dma_semaphore, #tpu.memory_space<semaphore_mem>> -> memref<!tpu.dma_semaphore, #tpu.memory_space<semaphore_mem>>
    tpu.wait_dma2 semaphore(%585 : memref<!tpu.dma_semaphore, #tpu.memory_space<semaphore_mem>>) src(%arg7 : memref<256x1024xf32, #tpu.memory_space<any>>) dst(%arg13 : memref<256x1024xf32, #tpu.memory_space<vmem>>)
    %c1_i32_180 = arith.constant 1 : i32
    %586 = tpu.memref_slice %arg16[%c1_i32_180] : memref<3x!tpu.dma_semaphore, #tpu.memory_space<semaphore_mem>> -> memref<1x!tpu.dma_semaphore, #tpu.memory_space<semaphore_mem>>
    %587 = tpu.memref_squeeze %586 : memref<1x!tpu.dma_semaphore, #tpu.memory_space<semaphore_mem>> -> memref<!tpu.dma_semaphore, #tpu.memory_space<semaphore_mem>>
    tpu.wait_dma2 semaphore(%587 : memref<!tpu.dma_semaphore, #tpu.memory_space<semaphore_mem>>) src(%arg8 : memref<128x512xf32, #tpu.memory_space<any>>) dst(%arg14 : memref<128x512xf32, #tpu.memory_space<vmem>>)
    %c2_i32_181 = arith.constant 2 : i32
    %588 = tpu.memref_slice %arg16[%c2_i32_181] : memref<3x!tpu.dma_semaphore, #tpu.memory_space<semaphore_mem>> -> memref<1x!tpu.dma_semaphore, #tpu.memory_space<semaphore_mem>>
    %589 = tpu.memref_squeeze %588 : memref<1x!tpu.dma_semaphore, #tpu.memory_space<semaphore_mem>> -> memref<!tpu.dma_semaphore, #tpu.memory_space<semaphore_mem>>
    tpu.wait_dma2 semaphore(%589 : memref<!tpu.dma_semaphore, #tpu.memory_space<semaphore_mem>>) src(%arg9 : memref<256x128xf32, #tpu.memory_space<any>>) dst(%arg15 : memref<256x128xf32, #tpu.memory_space<vmem>>)
    %c0_182 = arith.constant 0 : index
    %c0_183 = arith.constant 0 : index
    %c0_184 = arith.constant 0 : index
    %590 = vector.load %arg12[%c0_182, %c0_183, %c0_184] : memref<8x8x256xf32, #tpu.memory_space<vmem>>, vector<8x8x256xf32>
    %591 = vector.shape_cast %590 : vector<8x8x256xf32> to vector<64x256xf32>
    %c0_185 = arith.constant 0 : index
    %c0_186 = arith.constant 0 : index
    %592 = vector.load %arg13[%c0_185, %c0_186] : memref<256x1024xf32, #tpu.memory_space<vmem>>, vector<256x1024xf32>
    %cst_187 = arith.constant dense<0.000000e+00> : vector<64x1024xf32>
    %593 = tpu.matmul %591, %592, %cst_187 {dimension_numbers = #tpu.dot_dimension_numbers<[1], [0], [0], [1], [0, 0, 1, 1], [], []>} : vector<64x256xf32>, vector<256x1024xf32>, vector<64x1024xf32> -> vector<64x1024xf32>
    %c0_188 = arith.constant 0 : index
    %c0_189 = arith.constant 0 : index
    %594 = vector.load %arg5[%c0_188, %c0_189] : memref<1x1024xf32, #tpu.memory_space<vmem>>, vector<1x1024xf32>
    %595 = vector.broadcast %594 : vector<1x1024xf32> to vector<64x1024xf32>
    %596 = arith.addf %593, %595 : vector<64x1024xf32>
    %597 = vector.shape_cast %596 : vector<64x1024xf32> to vector<8x8x1024xf32>
    %c0_190 = arith.constant 0 : index
    %c0_191 = arith.constant 0 : index
    %c0_192 = arith.constant 0 : index
    %598 = vector.load %arg11[%c0_190, %c0_191, %c0_192] : memref<8x8x1024xf32, #tpu.memory_space<vmem>>, vector<8x8x1024xf32>
    tpu.vector_store %arg11[%c0_190, %c0_191, %c0_192], %597 {strides = array<i32>} : memref<8x8x1024xf32, #tpu.memory_space<vmem>>, vector<8x8x1024xf32>,
    %c0_i32_193 = arith.constant 0 : i32
    %599 = arith.index_cast %c0_i32_193 : i32 to index
    %c0_194 = arith.constant 0 : index
    %c0_195 = arith.constant 0 : index
    %600 = vector.load %arg11[%599, %c0_194, %c0_195] : memref<8x8x1024xf32, #tpu.memory_space<vmem>>, vector<1x8x512xf32>
    %601 = vector.shape_cast %600 : vector<1x8x512xf32> to vector<8x512xf32>
    %c0_196 = arith.constant 0 : index
    %c0_197 = arith.constant 0 : index
    %602 = vector.load %arg14[%c0_196, %c0_197] : memref<128x512xf32, #tpu.memory_space<vmem>>, vector<128x512xf32>
    %cst_198 = arith.constant dense<0.000000e+00> : vector<8x512xf32>
    %603 = tpu.matmul %6, %602, %cst_198 {dimension_numbers = #tpu.dot_dimension_numbers<[1], [0], [0], [1], [0, 0, 1, 1], [], []>} : vector<8x128xf32>, vector<128x512xf32>, vector<8x512xf32> -> vector<8x512xf32>
    %604 = arith.addf %601, %603 : vector<8x512xf32>
    %605 = vector.extract_strided_slice %604 {offsets = [0, 0], sizes = [8, 128], strides = [1, 1]} : vector<8x512xf32> to vector<8x128xf32>
    %606 = arith.negf %605 : vector<8x128xf32>
    %607 = math.exp %606 : vector<8x128xf32>
    %cst_199 = arith.constant 1.000000e+00 : f32
    %608 = vector.broadcast %cst_199 : f32 to vector<8x128xf32>
    %609 = arith.addf %608, %607 : vector<8x128xf32>
    %610 = arith.divf %608, %609 : vector<8x128xf32>
    %611 = vector.extract_strided_slice %604 {offsets = [0, 128], sizes = [8, 128], strides = [1, 1]} : vector<8x512xf32> to vector<8x128xf32>
    %612 = arith.negf %611 : vector<8x128xf32>
    %613 = math.exp %612 : vector<8x128xf32>
    %cst_200 = arith.constant 1.000000e+00 : f32
    %614 = vector.broadcast %cst_200 : f32 to vector<8x128xf32>
    %615 = arith.addf %614, %613 : vector<8x128xf32>
    %616 = arith.divf %614, %615 : vector<8x128xf32>
    %617 = vector.extract_strided_slice %604 {offsets = [0, 256], sizes = [8, 128], strides = [1, 1]} : vector<8x512xf32> to vector<8x128xf32>
    %618 = math.tanh %617 : vector<8x128xf32>
    %619 = vector.extract_strided_slice %604 {offsets = [0, 384], sizes = [8, 128], strides = [1, 1]} : vector<8x512xf32> to vector<8x128xf32>
    %620 = arith.negf %619 : vector<8x128xf32>
    %621 = math.exp %620 : vector<8x128xf32>
    %cst_201 = arith.constant 1.000000e+00 : f32
    %622 = vector.broadcast %cst_201 : f32 to vector<8x128xf32>
    %623 = arith.addf %622, %621 : vector<8x128xf32>
    %624 = arith.divf %622, %623 : vector<8x128xf32>
    %625 = arith.mulf %616, %6 : vector<8x128xf32>
    %626 = arith.mulf %610, %618 : vector<8x128xf32>
    %627 = arith.addf %625, %626 : vector<8x128xf32>
    %628 = math.tanh %627 : vector<8x128xf32>
    %629 = arith.mulf %624, %628 : vector<8x128xf32>
    %c1_i32_202 = arith.constant 1 : i32
    %630 = arith.index_cast %c1_i32_202 : i32 to index
    %c0_203 = arith.constant 0 : index
    %c0_204 = arith.constant 0 : index
    %631 = vector.load %arg11[%630, %c0_203, %c0_204] : memref<8x8x1024xf32, #tpu.memory_space<vmem>>, vector<1x8x512xf32>
    %632 = vector.shape_cast %631 : vector<1x8x512xf32> to vector<8x512xf32>
    %c0_205 = arith.constant 0 : index
    %c0_206 = arith.constant 0 : index
    %633 = vector.load %arg14[%c0_205, %c0_206] : memref<128x512xf32, #tpu.memory_space<vmem>>, vector<128x512xf32>
    %cst_207 = arith.constant dense<0.000000e+00> : vector<8x512xf32>
    %634 = tpu.matmul %629, %633, %cst_207 {dimension_numbers = #tpu.dot_dimension_numbers<[1], [0], [0], [1], [0, 0, 1, 1], [], []>} : vector<8x128xf32>, vector<128x512xf32>, vector<8x512xf32> -> vector<8x512xf32>
    %635 = arith.addf %632, %634 : vector<8x512xf32>
    %636 = vector.extract_strided_slice %635 {offsets = [0, 0], sizes = [8, 128], strides = [1, 1]} : vector<8x512xf32> to vector<8x128xf32>
    %637 = arith.negf %636 : vector<8x128xf32>
    %638 = math.exp %637 : vector<8x128xf32>
    %cst_208 = arith.constant 1.000000e+00 : f32
    %639 = vector.broadcast %cst_208 : f32 to vector<8x128xf32>
    %640 = arith.addf %639, %638 : vector<8x128xf32>
    %641 = arith.divf %639, %640 : vector<8x128xf32>
    %642 = vector.extract_strided_slice %635 {offsets = [0, 128], sizes = [8, 128], strides = [1, 1]} : vector<8x512xf32> to vector<8x128xf32>
    %643 = arith.negf %642 : vector<8x128xf32>
    %644 = math.exp %643 : vector<8x128xf32>
    %cst_209 = arith.constant 1.000000e+00 : f32
    %645 = vector.broadcast %cst_209 : f32 to vector<8x128xf32>
    %646 = arith.addf %645, %644 : vector<8x128xf32>
    %647 = arith.divf %645, %646 : vector<8x128xf32>
    %648 = vector.extract_strided_slice %635 {offsets = [0, 256], sizes = [8, 128], strides = [1, 1]} : vector<8x512xf32> to vector<8x128xf32>
    %649 = math.tanh %648 : vector<8x128xf32>
    %650 = vector.extract_strided_slice %635 {offsets = [0, 384], sizes = [8, 128], strides = [1, 1]} : vector<8x512xf32> to vector<8x128xf32>
    %651 = arith.negf %650 : vector<8x128xf32>
    %652 = math.exp %651 : vector<8x128xf32>
    %cst_210 = arith.constant 1.000000e+00 : f32
    %653 = vector.broadcast %cst_210 : f32 to vector<8x128xf32>
    %654 = arith.addf %653, %652 : vector<8x128xf32>
    %655 = arith.divf %653, %654 : vector<8x128xf32>
    %656 = arith.mulf %647, %627 : vector<8x128xf32>
    %657 = arith.mulf %641, %649 : vector<8x128xf32>
    %658 = arith.addf %656, %657 : vector<8x128xf32>
    %659 = math.tanh %658 : vector<8x128xf32>
    %660 = arith.mulf %655, %659 : vector<8x128xf32>
    %c2_i32_211 = arith.constant 2 : i32
    %661 = arith.index_cast %c2_i32_211 : i32 to index
    %c0_212 = arith.constant 0 : index
    %c0_213 = arith.constant 0 : index
    %662 = vector.load %arg11[%661, %c0_212, %c0_213] : memref<8x8x1024xf32, #tpu.memory_space<vmem>>, vector<1x8x512xf32>
    %663 = vector.shape_cast %662 : vector<1x8x512xf32> to vector<8x512xf32>
    %c0_214 = arith.constant 0 : index
    %c0_215 = arith.constant 0 : index
    %664 = vector.load %arg14[%c0_214, %c0_215] : memref<128x512xf32, #tpu.memory_space<vmem>>, vector<128x512xf32>
    %cst_216 = arith.constant dense<0.000000e+00> : vector<8x512xf32>
    %665 = tpu.matmul %660, %664, %cst_216 {dimension_numbers = #tpu.dot_dimension_numbers<[1], [0], [0], [1], [0, 0, 1, 1], [], []>} : vector<8x128xf32>, vector<128x512xf32>, vector<8x512xf32> -> vector<8x512xf32>
    %666 = arith.addf %663, %665 : vector<8x512xf32>
    %667 = vector.extract_strided_slice %666 {offsets = [0, 0], sizes = [8, 128], strides = [1, 1]} : vector<8x512xf32> to vector<8x128xf32>
    %668 = arith.negf %667 : vector<8x128xf32>
    %669 = math.exp %668 : vector<8x128xf32>
    %cst_217 = arith.constant 1.000000e+00 : f32
    %670 = vector.broadcast %cst_217 : f32 to vector<8x128xf32>
    %671 = arith.addf %670, %669 : vector<8x128xf32>
    %672 = arith.divf %670, %671 : vector<8x128xf32>
    %673 = vector.extract_strided_slice %666 {offsets = [0, 128], sizes = [8, 128], strides = [1, 1]} : vector<8x512xf32> to vector<8x128xf32>
    %674 = arith.negf %673 : vector<8x128xf32>
    %675 = math.exp %674 : vector<8x128xf32>
    %cst_218 = arith.constant 1.000000e+00 : f32
    %676 = vector.broadcast %cst_218 : f32 to vector<8x128xf32>
    %677 = arith.addf %676, %675 : vector<8x128xf32>
    %678 = arith.divf %676, %677 : vector<8x128xf32>
    %679 = vector.extract_strided_slice %666 {offsets = [0, 256], sizes = [8, 128], strides = [1, 1]} : vector<8x512xf32> to vector<8x128xf32>
    %680 = math.tanh %679 : vector<8x128xf32>
    %681 = vector.extract_strided_slice %666 {offsets = [0, 384], sizes = [8, 128], strides = [1, 1]} : vector<8x512xf32> to vector<8x128xf32>
    %682 = arith.negf %681 : vector<8x128xf32>
    %683 = math.exp %682 : vector<8x128xf32>
    %cst_219 = arith.constant 1.000000e+00 : f32
    %684 = vector.broadcast %cst_219 : f32 to vector<8x128xf32>
    %685 = arith.addf %684, %683 : vector<8x128xf32>
    %686 = arith.divf %684, %685 : vector<8x128xf32>
    %687 = arith.mulf %678, %658 : vector<8x128xf32>
    %688 = arith.mulf %672, %680 : vector<8x128xf32>
    %689 = arith.addf %687, %688 : vector<8x128xf32>
    %690 = math.tanh %689 : vector<8x128xf32>
    %691 = arith.mulf %686, %690 : vector<8x128xf32>
    %c3_i32_220 = arith.constant 3 : i32
    %692 = arith.index_cast %c3_i32_220 : i32 to index
    %c0_221 = arith.constant 0 : index
    %c0_222 = arith.constant 0 : index
    %693 = vector.load %arg11[%692, %c0_221, %c0_222] : memref<8x8x1024xf32, #tpu.memory_space<vmem>>, vector<1x8x512xf32>
    %694 = vector.shape_cast %693 : vector<1x8x512xf32> to vector<8x512xf32>
    %c0_223 = arith.constant 0 : index
    %c0_224 = arith.constant 0 : index
    %695 = vector.load %arg14[%c0_223, %c0_224] : memref<128x512xf32, #tpu.memory_space<vmem>>, vector<128x512xf32>
    %cst_225 = arith.constant dense<0.000000e+00> : vector<8x512xf32>
    %696 = tpu.matmul %691, %695, %cst_225 {dimension_numbers = #tpu.dot_dimension_numbers<[1], [0], [0], [1], [0, 0, 1, 1], [], []>} : vector<8x128xf32>, vector<128x512xf32>, vector<8x512xf32> -> vector<8x512xf32>
    %697 = arith.addf %694, %696 : vector<8x512xf32>
    %698 = vector.extract_strided_slice %697 {offsets = [0, 0], sizes = [8, 128], strides = [1, 1]} : vector<8x512xf32> to vector<8x128xf32>
    %699 = arith.negf %698 : vector<8x128xf32>
    %700 = math.exp %699 : vector<8x128xf32>
    %cst_226 = arith.constant 1.000000e+00 : f32
    %701 = vector.broadcast %cst_226 : f32 to vector<8x128xf32>
    %702 = arith.addf %701, %700 : vector<8x128xf32>
    %703 = arith.divf %701, %702 : vector<8x128xf32>
    %704 = vector.extract_strided_slice %697 {offsets = [0, 128], sizes = [8, 128], strides = [1, 1]} : vector<8x512xf32> to vector<8x128xf32>
    %705 = arith.negf %704 : vector<8x128xf32>
    %706 = math.exp %705 : vector<8x128xf32>
    %cst_227 = arith.constant 1.000000e+00 : f32
    %707 = vector.broadcast %cst_227 : f32 to vector<8x128xf32>
    %708 = arith.addf %707, %706 : vector<8x128xf32>
    %709 = arith.divf %707, %708 : vector<8x128xf32>
    %710 = vector.extract_strided_slice %697 {offsets = [0, 256], sizes = [8, 128], strides = [1, 1]} : vector<8x512xf32> to vector<8x128xf32>
    %711 = math.tanh %710 : vector<8x128xf32>
    %712 = vector.extract_strided_slice %697 {offsets = [0, 384], sizes = [8, 128], strides = [1, 1]} : vector<8x512xf32> to vector<8x128xf32>
    %713 = arith.negf %712 : vector<8x128xf32>
    %714 = math.exp %713 : vector<8x128xf32>
    %cst_228 = arith.constant 1.000000e+00 : f32
    %715 = vector.broadcast %cst_228 : f32 to vector<8x128xf32>
    %716 = arith.addf %715, %714 : vector<8x128xf32>
    %717 = arith.divf %715, %716 : vector<8x128xf32>
    %718 = arith.mulf %709, %689 : vector<8x128xf32>
    %719 = arith.mulf %703, %711 : vector<8x128xf32>
    %720 = arith.addf %718, %719 : vector<8x128xf32>
    %721 = math.tanh %720 : vector<8x128xf32>
    %722 = arith.mulf %717, %721 : vector<8x128xf32>
    %c4_i32_229 = arith.constant 4 : i32
    %723 = arith.index_cast %c4_i32_229 : i32 to index
    %c0_230 = arith.constant 0 : index
    %c0_231 = arith.constant 0 : index
    %724 = vector.load %arg11[%723, %c0_230, %c0_231] : memref<8x8x1024xf32, #tpu.memory_space<vmem>>, vector<1x8x512xf32>
    %725 = vector.shape_cast %724 : vector<1x8x512xf32> to vector<8x512xf32>
    %c0_232 = arith.constant 0 : index
    %c0_233 = arith.constant 0 : index
    %726 = vector.load %arg14[%c0_232, %c0_233] : memref<128x512xf32, #tpu.memory_space<vmem>>, vector<128x512xf32>
    %cst_234 = arith.constant dense<0.000000e+00> : vector<8x512xf32>
    %727 = tpu.matmul %722, %726, %cst_234 {dimension_numbers = #tpu.dot_dimension_numbers<[1], [0], [0], [1], [0, 0, 1, 1], [], []>} : vector<8x128xf32>, vector<128x512xf32>, vector<8x512xf32> -> vector<8x512xf32>
    %728 = arith.addf %725, %727 : vector<8x512xf32>
    %729 = vector.extract_strided_slice %728 {offsets = [0, 0], sizes = [8, 128], strides = [1, 1]} : vector<8x512xf32> to vector<8x128xf32>
    %730 = arith.negf %729 : vector<8x128xf32>
    %731 = math.exp %730 : vector<8x128xf32>
    %cst_235 = arith.constant 1.000000e+00 : f32
    %732 = vector.broadcast %cst_235 : f32 to vector<8x128xf32>
    %733 = arith.addf %732, %731 : vector<8x128xf32>
    %734 = arith.divf %732, %733 : vector<8x128xf32>
    %735 = vector.extract_strided_slice %728 {offsets = [0, 128], sizes = [8, 128], strides = [1, 1]} : vector<8x512xf32> to vector<8x128xf32>
    %736 = arith.negf %735 : vector<8x128xf32>
    %737 = math.exp %736 : vector<8x128xf32>
    %cst_236 = arith.constant 1.000000e+00 : f32
    %738 = vector.broadcast %cst_236 : f32 to vector<8x128xf32>
    %739 = arith.addf %738, %737 : vector<8x128xf32>
    %740 = arith.divf %738, %739 : vector<8x128xf32>
    %741 = vector.extract_strided_slice %728 {offsets = [0, 256], sizes = [8, 128], strides = [1, 1]} : vector<8x512xf32> to vector<8x128xf32>
    %742 = math.tanh %741 : vector<8x128xf32>
    %743 = vector.extract_strided_slice %728 {offsets = [0, 384], sizes = [8, 128], strides = [1, 1]} : vector<8x512xf32> to vector<8x128xf32>
    %744 = arith.negf %743 : vector<8x128xf32>
    %745 = math.exp %744 : vector<8x128xf32>
    %cst_237 = arith.constant 1.000000e+00 : f32
    %746 = vector.broadcast %cst_237 : f32 to vector<8x128xf32>
    %747 = arith.addf %746, %745 : vector<8x128xf32>
    %748 = arith.divf %746, %747 : vector<8x128xf32>
    %749 = arith.mulf %740, %720 : vector<8x128xf32>
    %750 = arith.mulf %734, %742 : vector<8x128xf32>
    %751 = arith.addf %749, %750 : vector<8x128xf32>
    %752 = math.tanh %751 : vector<8x128xf32>
    %753 = arith.mulf %748, %752 : vector<8x128xf32>
    %c5_i32_238 = arith.constant 5 : i32
    %754 = arith.index_cast %c5_i32_238 : i32 to index
    %c0_239 = arith.constant 0 : index
    %c0_240 = arith.constant 0 : index
    %755 = vector.load %arg11[%754, %c0_239, %c0_240] : memref<8x8x1024xf32, #tpu.memory_space<vmem>>, vector<1x8x512xf32>
    %756 = vector.shape_cast %755 : vector<1x8x512xf32> to vector<8x512xf32>
    %c0_241 = arith.constant 0 : index
    %c0_242 = arith.constant 0 : index
    %757 = vector.load %arg14[%c0_241, %c0_242] : memref<128x512xf32, #tpu.memory_space<vmem>>, vector<128x512xf32>
    %cst_243 = arith.constant dense<0.000000e+00> : vector<8x512xf32>
    %758 = tpu.matmul %753, %757, %cst_243 {dimension_numbers = #tpu.dot_dimension_numbers<[1], [0], [0], [1], [0, 0, 1, 1], [], []>} : vector<8x128xf32>, vector<128x512xf32>, vector<8x512xf32> -> vector<8x512xf32>
    %759 = arith.addf %756, %758 : vector<8x512xf32>
    %760 = vector.extract_strided_slice %759 {offsets = [0, 0], sizes = [8, 128], strides = [1, 1]} : vector<8x512xf32> to vector<8x128xf32>
    %761 = arith.negf %760 : vector<8x128xf32>
    %762 = math.exp %761 : vector<8x128xf32>
    %cst_244 = arith.constant 1.000000e+00 : f32
    %763 = vector.broadcast %cst_244 : f32 to vector<8x128xf32>
    %764 = arith.addf %763, %762 : vector<8x128xf32>
    %765 = arith.divf %763, %764 : vector<8x128xf32>
    %766 = vector.extract_strided_slice %759 {offsets = [0, 128], sizes = [8, 128], strides = [1, 1]} : vector<8x512xf32> to vector<8x128xf32>
    %767 = arith.negf %766 : vector<8x128xf32>
    %768 = math.exp %767 : vector<8x128xf32>
    %cst_245 = arith.constant 1.000000e+00 : f32
    %769 = vector.broadcast %cst_245 : f32 to vector<8x128xf32>
    %770 = arith.addf %769, %768 : vector<8x128xf32>
    %771 = arith.divf %769, %770 : vector<8x128xf32>
    %772 = vector.extract_strided_slice %759 {offsets = [0, 256], sizes = [8, 128], strides = [1, 1]} : vector<8x512xf32> to vector<8x128xf32>
    %773 = math.tanh %772 : vector<8x128xf32>
    %774 = vector.extract_strided_slice %759 {offsets = [0, 384], sizes = [8, 128], strides = [1, 1]} : vector<8x512xf32> to vector<8x128xf32>
    %775 = arith.negf %774 : vector<8x128xf32>
    %776 = math.exp %775 : vector<8x128xf32>
    %cst_246 = arith.constant 1.000000e+00 : f32
    %777 = vector.broadcast %cst_246 : f32 to vector<8x128xf32>
    %778 = arith.addf %777, %776 : vector<8x128xf32>
    %779 = arith.divf %777, %778 : vector<8x128xf32>
    %780 = arith.mulf %771, %751 : vector<8x128xf32>
    %781 = arith.mulf %765, %773 : vector<8x128xf32>
    %782 = arith.addf %780, %781 : vector<8x128xf32>
    %783 = math.tanh %782 : vector<8x128xf32>
    %784 = arith.mulf %779, %783 : vector<8x128xf32>
    %c6_i32_247 = arith.constant 6 : i32
    %785 = arith.index_cast %c6_i32_247 : i32 to index
    %c0_248 = arith.constant 0 : index
    %c0_249 = arith.constant 0 : index
    %786 = vector.load %arg11[%785, %c0_248, %c0_249] : memref<8x8x1024xf32, #tpu.memory_space<vmem>>, vector<1x8x512xf32>
    %787 = vector.shape_cast %786 : vector<1x8x512xf32> to vector<8x512xf32>
    %c0_250 = arith.constant 0 : index
    %c0_251 = arith.constant 0 : index
    %788 = vector.load %arg14[%c0_250, %c0_251] : memref<128x512xf32, #tpu.memory_space<vmem>>, vector<128x512xf32>
    %cst_252 = arith.constant dense<0.000000e+00> : vector<8x512xf32>
    %789 = tpu.matmul %784, %788, %cst_252 {dimension_numbers = #tpu.dot_dimension_numbers<[1], [0], [0], [1], [0, 0, 1, 1], [], []>} : vector<8x128xf32>, vector<128x512xf32>, vector<8x512xf32> -> vector<8x512xf32>
    %790 = arith.addf %787, %789 : vector<8x512xf32>
    %791 = vector.extract_strided_slice %790 {offsets = [0, 0], sizes = [8, 128], strides = [1, 1]} : vector<8x512xf32> to vector<8x128xf32>
    %792 = arith.negf %791 : vector<8x128xf32>
    %793 = math.exp %792 : vector<8x128xf32>
    %cst_253 = arith.constant 1.000000e+00 : f32
    %794 = vector.broadcast %cst_253 : f32 to vector<8x128xf32>
    %795 = arith.addf %794, %793 : vector<8x128xf32>
    %796 = arith.divf %794, %795 : vector<8x128xf32>
    %797 = vector.extract_strided_slice %790 {offsets = [0, 128], sizes = [8, 128], strides = [1, 1]} : vector<8x512xf32> to vector<8x128xf32>
    %798 = arith.negf %797 : vector<8x128xf32>
    %799 = math.exp %798 : vector<8x128xf32>
    %cst_254 = arith.constant 1.000000e+00 : f32
    %800 = vector.broadcast %cst_254 : f32 to vector<8x128xf32>
    %801 = arith.addf %800, %799 : vector<8x128xf32>
    %802 = arith.divf %800, %801 : vector<8x128xf32>
    %803 = vector.extract_strided_slice %790 {offsets = [0, 256], sizes = [8, 128], strides = [1, 1]} : vector<8x512xf32> to vector<8x128xf32>
    %804 = math.tanh %803 : vector<8x128xf32>
    %805 = vector.extract_strided_slice %790 {offsets = [0, 384], sizes = [8, 128], strides = [1, 1]} : vector<8x512xf32> to vector<8x128xf32>
    %806 = arith.negf %805 : vector<8x128xf32>
    %807 = math.exp %806 : vector<8x128xf32>
    %cst_255 = arith.constant 1.000000e+00 : f32
    %808 = vector.broadcast %cst_255 : f32 to vector<8x128xf32>
    %809 = arith.addf %808, %807 : vector<8x128xf32>
    %810 = arith.divf %808, %809 : vector<8x128xf32>
    %811 = arith.mulf %802, %782 : vector<8x128xf32>
    %812 = arith.mulf %796, %804 : vector<8x128xf32>
    %813 = arith.addf %811, %812 : vector<8x128xf32>
    %814 = math.tanh %813 : vector<8x128xf32>
    %815 = arith.mulf %810, %814 : vector<8x128xf32>
    %c7_i32_256 = arith.constant 7 : i32
    %816 = arith.index_cast %c7_i32_256 : i32 to index
    %c0_257 = arith.constant 0 : index
    %c0_258 = arith.constant 0 : index
    %817 = vector.load %arg11[%816, %c0_257, %c0_258] : memref<8x8x1024xf32, #tpu.memory_space<vmem>>, vector<1x8x512xf32>
    %818 = vector.shape_cast %817 : vector<1x8x512xf32> to vector<8x512xf32>
    %c0_259 = arith.constant 0 : index
    %c0_260 = arith.constant 0 : index
    %819 = vector.load %arg14[%c0_259, %c0_260] : memref<128x512xf32, #tpu.memory_space<vmem>>, vector<128x512xf32>
    %cst_261 = arith.constant dense<0.000000e+00> : vector<8x512xf32>
    %820 = tpu.matmul %815, %819, %cst_261 {dimension_numbers = #tpu.dot_dimension_numbers<[1], [0], [0], [1], [0, 0, 1, 1], [], []>} : vector<8x128xf32>, vector<128x512xf32>, vector<8x512xf32> -> vector<8x512xf32>
    %821 = arith.addf %818, %820 : vector<8x512xf32>
    %822 = vector.extract_strided_slice %821 {offsets = [0, 0], sizes = [8, 128], strides = [1, 1]} : vector<8x512xf32> to vector<8x128xf32>
    %823 = arith.negf %822 : vector<8x128xf32>
    %824 = math.exp %823 : vector<8x128xf32>
    %cst_262 = arith.constant 1.000000e+00 : f32
    %825 = vector.broadcast %cst_262 : f32 to vector<8x128xf32>
    %826 = arith.addf %825, %824 : vector<8x128xf32>
    %827 = arith.divf %825, %826 : vector<8x128xf32>
    %828 = vector.extract_strided_slice %821 {offsets = [0, 128], sizes = [8, 128], strides = [1, 1]} : vector<8x512xf32> to vector<8x128xf32>
    %829 = arith.negf %828 : vector<8x128xf32>
    %830 = math.exp %829 : vector<8x128xf32>
    %cst_263 = arith.constant 1.000000e+00 : f32
    %831 = vector.broadcast %cst_263 : f32 to vector<8x128xf32>
    %832 = arith.addf %831, %830 : vector<8x128xf32>
    %833 = arith.divf %831, %832 : vector<8x128xf32>
    %834 = vector.extract_strided_slice %821 {offsets = [0, 256], sizes = [8, 128], strides = [1, 1]} : vector<8x512xf32> to vector<8x128xf32>
    %835 = math.tanh %834 : vector<8x128xf32>
    %836 = vector.extract_strided_slice %821 {offsets = [0, 384], sizes = [8, 128], strides = [1, 1]} : vector<8x512xf32> to vector<8x128xf32>
    %837 = arith.negf %836 : vector<8x128xf32>
    %838 = math.exp %837 : vector<8x128xf32>
    %cst_264 = arith.constant 1.000000e+00 : f32
    %839 = vector.broadcast %cst_264 : f32 to vector<8x128xf32>
    %840 = arith.addf %839, %838 : vector<8x128xf32>
    %841 = arith.divf %839, %840 : vector<8x128xf32>
    %842 = arith.mulf %833, %813 : vector<8x128xf32>
    %843 = arith.mulf %827, %835 : vector<8x128xf32>
    %844 = arith.addf %842, %843 : vector<8x128xf32>
    %845 = math.tanh %844 : vector<8x128xf32>
    %846 = arith.mulf %841, %845 : vector<8x128xf32>
    %c8_i32_265 = arith.constant 8 : i32
    %c7 = arith.constant 7 : index
    %c0_266 = arith.constant 0 : index
    %c512_267 = arith.constant 512 : index
    %847 = vector.load %arg11[%c7, %c0_266, %c512_267] : memref<8x8x1024xf32, #tpu.memory_space<vmem>>, vector<1x8x512xf32>
    %848 = vector.shape_cast %847 : vector<1x8x512xf32> to vector<8x512xf32>
    %849 = vector.extract_strided_slice %848 {offsets = [0, 0], sizes = [8, 128], strides = [1, 1]} : vector<8x512xf32> to vector<8x128xf32>
    %850 = arith.negf %849 : vector<8x128xf32>
    %851 = math.exp %850 : vector<8x128xf32>
    %cst_268 = arith.constant 1.000000e+00 : f32
    %852 = vector.broadcast %cst_268 : f32 to vector<8x128xf32>
    %853 = arith.addf %852, %851 : vector<8x128xf32>
    %854 = arith.divf %852, %853 : vector<8x128xf32>
    %855 = vector.extract_strided_slice %848 {offsets = [0, 256], sizes = [8, 128], strides = [1, 1]} : vector<8x512xf32> to vector<8x128xf32>
    %856 = math.tanh %855 : vector<8x128xf32>
    %857 = vector.extract_strided_slice %848 {offsets = [0, 384], sizes = [8, 128], strides = [1, 1]} : vector<8x512xf32> to vector<8x128xf32>
    %858 = arith.negf %857 : vector<8x128xf32>
    %859 = math.exp %858 : vector<8x128xf32>
    %cst_269 = arith.constant 1.000000e+00 : f32
    %860 = vector.broadcast %cst_269 : f32 to vector<8x128xf32>
    %861 = arith.addf %860, %859 : vector<8x128xf32>
    %862 = arith.divf %860, %861 : vector<8x128xf32>
    %863 = arith.mulf %854, %856 : vector<8x128xf32>
    %864 = math.tanh %863 : vector<8x128xf32>
    %865 = arith.mulf %862, %864 : vector<8x128xf32>
    %c0_270 = arith.constant 0 : index
    %c0_271 = arith.constant 0 : index
    %866 = vector.load %arg15[%c0_270, %c0_271] : memref<256x128xf32, #tpu.memory_space<vmem>>, vector<128x128xf32>
    %cst_272 = arith.constant dense<0.000000e+00> : vector<8x128xf32>
    %867 = tpu.matmul %846, %866, %cst_272 {dimension_numbers = #tpu.dot_dimension_numbers<[1], [0], [0], [1], [0, 0, 1, 1], [], []>} : vector<8x128xf32>, vector<128x128xf32>, vector<8x128xf32> -> vector<8x128xf32>
    %c128_273 = arith.constant 128 : index
    %c0_274 = arith.constant 0 : index
    %868 = vector.load %arg15[%c128_273, %c0_274] : memref<256x128xf32, #tpu.memory_space<vmem>>, vector<128x128xf32>
    %cst_275 = arith.constant dense<0.000000e+00> : vector<8x128xf32>
    %869 = tpu.matmul %865, %868, %cst_275 {dimension_numbers = #tpu.dot_dimension_numbers<[1], [0], [0], [1], [0, 0, 1, 1], [], []>} : vector<8x128xf32>, vector<128x128xf32>, vector<8x128xf32> -> vector<8x128xf32>
    %870 = arith.addf %867, %869 : vector<8x128xf32>
    %c0_276 = arith.constant 0 : index
    %c0_277 = arith.constant 0 : index
    %871 = vector.load %arg6[%c0_276, %c0_277] : memref<1x128xf32, #tpu.memory_space<vmem>>, vector<1x128xf32>
    %872 = vector.broadcast %871 : vector<1x128xf32> to vector<8x128xf32>
    %873 = arith.addf %870, %872 : vector<8x128xf32>
    %c0_278 = arith.constant 0 : index
    %c0_279 = arith.constant 0 : index
    %874 = vector.load %arg10[%c0_278, %c0_279] : memref<8x128xf32, #tpu.memory_space<vmem>>, vector<8x128xf32>
    tpu.vector_store %arg10[%c0_278, %c0_279], %873 {strides = array<i32>} : memref<8x128xf32, #tpu.memory_space<vmem>>, vector<8x128xf32>,
    return
  }
}

</mosaic_0001>

<bundles_post_ra>
// kernel: birnn_forward.1
= control target key start
LH: loop header
LB: loop body
LE: loop exit
PB: predicated region body
PF: predicated region fallthrough
CT: control target
= control target key end

     0   :  { %15 = vsyncpa [#allocation9], 0  ;;  %s12100_s0 = inlined_call_operand.vmem [shape: f32[8,8,128], index: 0, kind: input, shape index: {}]   ;;  %s12101_s1 = inlined_call_operand.hbm [shape: f32[128,1024], index: 1, kind: input, shape index: {}]   ;;  %s12102_s2 = inlined_call_operand.vmem [shape: f32[1,1024], index: 2, kind: input, shape index: {}]   ;;  %s12103_s3 = inlined_call_operand.hbm [shape: f32[128,512], index: 3, kind: input, shape index: {}]   ;;  %s12104_s4 = inlined_call_operand.hbm [shape: f32[128,512], index: 4, kind: input, shape index: {}]   ;;  %s12105_s5 = inlined_call_operand.vmem [shape: f32[1,1024], index: 5, kind: input, shape index: {}]   ;;  %s12106_s6 = inlined_call_operand.vmem [shape: f32[1,128], index: 6, kind: input, shape index: {}]   ;;  %s12107_s7 = inlined_call_operand.hbm [shape: f32[256,1024], index: 7, kind: input, shape index: {}]   ;;  %s12108_s8 = inlined_call_operand.hbm [shape: f32[128,512], index: 8, kind: input, shape index: {}]   ;;  %s12109_s9 = inlined_call_operand.hbm [shape: f32[256,128], index: 9, kind: input, shape index: {}]   ;;  %s12110_s10 = inlined_call_operand.vmem [shape: f32[8,128], index: 10, kind: output, shape index: {}]  }
   0x1   :  { %16 = vsyncpa [#allocation11], 0  ;;  %s10053_s13 = smov [#allocation10]   ;;  %s9911_s17 = scalar_lea.hbm %s12103_s3, 8192 }
   0x2   :  { %s38_s14 = sshll.u32 %s10053_s13, 4  ;;  %p9912_p0 = scmp.ne.s32.totalorder %s12103_s3, %s9911_s17  ;;  %s39_s14 = int_to_ptr.vmem [resolvable:$true] %s38_s14 }
   0x3   :  { %p9915_p1 = scmp.lt.u32.totalorder %s9911_s17, %s12103_s3 }
   0x5   :  { %p9917_p2 = pnand %p9915_p1, %p9912_p0 }
   0x7   :  { %9920 = shalt.err (!%p9917_p2)
}
   0x8   :  { %s9921_s22 = scalar_lea.vmem %s39_s14, 8192  ;;  %p9926_p4 = scmp.lt.s32.totalorder %s39_s14, %s39_s14 }
   0x9   :  { %p9922_p3 = scmp.ne.s32.totalorder %s39_s14, %s9921_s22  ;;  %p9927_p5 = scmp.lt.s32.totalorder %s9921_s22, %s9921_s22 }
   0xb   :  { %p9928_p6 = por %p9927_p5, %p9926_p4 }
   0xd   :  { %p9929_p7 = pnand %p9928_p6, %p9922_p3 }
   0xf   :  { %9932 = shalt.err (!%p9929_p7)
}
  0x10   :  { %s10054_s23 = smov 512   ;;  %s10055_s24 = smov 32  }
  0x11   :  { %44 = dma.hbm_to_vmem [thread:$0]  %s12103_s3, 8192, %s39_s14, [#allocation11], %s10054_s23, %s10054_s23, %s10055_s24  }
  0x12   :  { %s10056_s27 = smov [#allocation8]   ;;  %s9933_s11 = scalar_lea.hbm %s12101_s1, 16384 }
  0x13   :  { %s24_s28 = sshll.u32 %s10056_s27, 4  ;;  %p9934_p8 = scmp.ne.s32.totalorder %s12101_s1, %s9933_s11  ;;  %s25_s28 = int_to_ptr.vmem [resolvable:$true] %s24_s28 }
  0x14   :  { %p9937_p9 = scmp.lt.u32.totalorder %s9933_s11, %s12101_s1 }
  0x16   :  { %p9939_p10 = pnand %p9937_p9, %p9934_p8 }
  0x18   :  { %9942 = shalt.err (!%p9939_p10)
}
  0x19   :  { %s9943_s17 = scalar_lea.vmem %s25_s28, 16384  ;;  %p9948_p12 = scmp.lt.s32.totalorder %s25_s28, %s25_s28 }
  0x1a   :  { %p9944_p11 = scmp.ne.s32.totalorder %s25_s28, %s9943_s17  ;;  %p9949_p13 = scmp.lt.s32.totalorder %s9943_s17, %s9943_s17 }
  0x1c   :  { %p9950_p0 = por %p9949_p13, %p9948_p12 }
  0x1e   :  { %p9951_p1 = pnand %p9950_p0, %p9944_p11 }
  0x20   :  { %9954 = shalt.err (!%p9951_p1)
}
  0x21   :  { %s10057_s3 = smov 1024   ;;  %s10058_s14 = smov 64  }
  0x22   :  { %30 = dma.hbm_to_vmem [thread:$0]  %s12101_s1, 16384, %s25_s28, [#allocation9], %s10057_s3, %s10057_s3, %s10058_s14  }
  0x23   :  { %s10059_s20 = smov [#allocation12]   ;;  %s9955_s26 = scalar_lea.hbm %s12104_s4, 8192 }
  0x24   :  { %s50_s21 = sshll.u32 %s10059_s20, 4  ;;  %p9956_p2 = scmp.ne.s32.totalorder %s12104_s4, %s9955_s26  ;;  %s51_s21 = int_to_ptr.vmem [resolvable:$true] %s50_s21 }
  0x25   :  { %p9959_p3 = scmp.lt.u32.totalorder %s9955_s26, %s12104_s4 }
  0x27   :  { %p9961_p4 = pnand %p9959_p3, %p9956_p2 }
  0x29   :  { %9964 = shalt.err (!%p9961_p4)
}
  0x2a   :  { %s9965_s12 = scalar_lea.vmem %s51_s21, 8192  ;;  %p9970_p6 = scmp.lt.s32.totalorder %s51_s21, %s51_s21 }
  0x2b   :  { %p9966_p5 = scmp.ne.s32.totalorder %s51_s21, %s9965_s12  ;;  %p9971_p7 = scmp.lt.s32.totalorder %s9965_s12, %s9965_s12 }
  0x2d   :  { %p9972_p8 = por %p9971_p7, %p9970_p6 }
  0x2f   :  { %p9973_p9 = pnand %p9972_p8, %p9966_p5 }
  0x31   :  { %9976 = shalt.err (!%p9973_p9)
}
  0x32   :  { %56 = dma.hbm_to_vmem [thread:$0]  %s12104_s4, 8192, %s51_s21, [#allocation11], %s10054_s23, %s10054_s23, %s10055_s24  }
  0x33   :  { %10043 = dma.done.wait [#allocation9], 16384  }
  0x34   :  { %10044 = vsyncadd [#allocation9], 4294950912 }
  0x35   :  { %10045 = dma.done.wait [#allocation11], 16384  }
  0x36   :  { %10046 = vsyncadd [#allocation11], 4294950912  ;;  %v12111_v0 = vmov 0.0   ;;  %v114_v1 = vld [vmem:[#allocation8 + $0x8] sm:$0xff]  ;;  %v116_v3 = vld [vmem:[#allocation8 + $0x18] sm:$0xff]  ;;  %s10062_s30 = smov [#allocation5]  }
  0x37   :  { %347 = vmatprep.mubr.f32.mxu0 %v12111_v0  ;;  %460 = vmatprep.mubr.f32.mxu1 %v12111_v0  ;;  %v122_v2 = vld [vmem:[#allocation8 + $0x48] sm:$0xff]  ;;  %v124_v5 = vld [vmem:[#allocation8 + $0x58] sm:$0xff]  ;;  %v113_v6 = vld [vmem:[#allocation8] sm:$0xff]  ;;  %s89_s11 = sshll.u32 %s10062_s30, 4  ;;  %s9977_s28 = scalar_lea.hbm %s12107_s7, 32768  ;;  %s90_s11 = int_to_ptr.vmem [resolvable:$true] %s89_s11 }
  0x38   :  { %v7342_v4 = vpack.c.bf16 %v122_v2, %v114_v1  ;;  %v121_v7 = vld [vmem:[#allocation8 + $0x40] sm:$0xff]  ;;  %v7374_v8 = vpack.c.bf16 %v124_v5, %v116_v3  ;;  %v115_v10 = vld [vmem:[#allocation8 + $0x10] sm:$0xff]  ;;  %v130_v12 = vld [vmem:[#allocation8 + $0x88] sm:$0xff]  ;;  %p9978_p10 = scmp.ne.s32.totalorder %s12107_s7, %s9977_s28  ;;  %p9981_p11 = scmp.lt.u32.totalorder %s9977_s28, %s12107_s7 }
  0x39   :  { %v7344_v9 = vpack.c.bf16 %v121_v7, %v113_v6  ;;  %v123_v11 = vld [vmem:[#allocation8 + $0x50] sm:$0xff]  ;;  %v138_v14 = vld [vmem:[#allocation8 + $0xc8] sm:$0xff]  ;;  %v132_v15 = vld [vmem:[#allocation8 + $0x98] sm:$0xff] }
  0x3a   :  { %7343 = vmatprep.subr.bf16.mxu0 %v7342_v4  ;;  %v7376_v13 = vpack.c.bf16 %v123_v11, %v115_v10  ;;  %v140_v16 = vld [vmem:[#allocation8 + $0xd8] sm:$0xff]  ;;  %7375 = vmatprep.subr.bf16.mxu1 %v7374_v8  ;;  %v7346_v17 = vpack.c.bf16 %v138_v14, %v130_v12  ;;  %v129_v19 = vld [vmem:[#allocation8 + $0x80] sm:$0xff]  ;;  %v131_v21 = vld [vmem:[#allocation8 + $0x90] sm:$0xff]  ;;  %p9983_p12 = pnand %p9981_p11, %p9978_p10 }
  0x3b   :  { %7345 = vmatpush1.bf16.msra.mxu0 %v7344_v9  ;;  %v7378_v18 = vpack.c.bf16 %v140_v16, %v132_v15  ;;  %v137_v20 = vld [vmem:[#allocation8 + $0xc0] sm:$0xff]  ;;  %v139_v23 = vld [vmem:[#allocation8 + $0xd0] sm:$0xff]  ;;  %v146_v24 = vld [vmem:[#allocation8 + $0x108] sm:$0xff] }
  0x3c   :  { %7377 = vmatpush1.bf16.msra.mxu1 %v7376_v13  ;;  %v7348_v22 = vpack.c.bf16 %v137_v20, %v129_v19  ;;  %v154_v25 = vld [vmem:[#allocation8 + $0x148] sm:$0xff]  ;;  %7347 = vmatprep.subr.bf16.mxu0 %v7346_v17  ;;  %v7380_v26 = vpack.c.bf16 %v139_v23, %v131_v21  ;;  %v148_v28 = vld [vmem:[#allocation8 + $0x118] sm:$0xff]  ;;  %v145_v30 = vld [vmem:[#allocation8 + $0x100] sm:$0xff] }
  0x3d   :  { %7379 = vmatprep.subr.bf16.mxu1 %v7378_v18  ;;  %v7350_v27 = vpack.c.bf16 %v154_v25, %v146_v24  ;;  %v156_v29 = vld [vmem:[#allocation8 + $0x158] sm:$0xff]  ;;  %v153_v32 = vld [vmem:[#allocation8 + $0x140] sm:$0xff]  ;;  %v147_v33 = vld [vmem:[#allocation8 + $0x110] sm:$0xff] }
  0x3e   :  { %v7382_v31 = vpack.c.bf16 %v156_v29, %v148_v28  ;;  %v155_v34 = vld [vmem:[#allocation8 + $0x150] sm:$0xff]  ;;  %v7352_v35 = vpack.c.bf16 %v153_v32, %v145_v30  ;;  %v162_v36 = vld [vmem:[#allocation8 + $0x188] sm:$0xff]  ;;  %v164_v38 = vld [vmem:[#allocation8 + $0x198] sm:$0xff] }
  0x3f   :  { %7349 = vmatpush1.bf16.msra.mxu0 %v7348_v22  ;;  %v170_v37 = vld [vmem:[#allocation8 + $0x1c8] sm:$0xff]  ;;  %v7384_v39 = vpack.c.bf16 %v155_v34, %v147_v33  ;;  %v172_v41 = vld [vmem:[#allocation8 + $0x1d8] sm:$0xff]  ;;  %v161_v42 = vld [vmem:[#allocation8 + $0x180] sm:$0xff] }
  0x40   :  { %7381 = vmatpush1.bf16.msra.mxu1 %v7380_v26  ;;  %7351 = vmatprep.subr.bf16.mxu0 %v7350_v27  ;;  %v7354_v40 = vpack.c.bf16 %v170_v37, %v162_v36  ;;  %v169_v43 = vld [vmem:[#allocation8 + $0x1c0] sm:$0xff]  ;;  %v7386_v44 = vpack.c.bf16 %v172_v41, %v164_v38  ;;  %v163_v45 = vld [vmem:[#allocation8 + $0x190] sm:$0xff]  ;;  %v178_v47 = vld [vmem:[#allocation8 + $0x208] sm:$0xff] }
  0x41   :  { %7383 = vmatprep.subr.bf16.mxu1 %v7382_v31  ;;  %v171_v46 = vld [vmem:[#allocation8 + $0x1d0] sm:$0xff]  ;;  %v186_v48 = vld [vmem:[#allocation8 + $0x248] sm:$0xff]  ;;  %v180_v49 = vld [vmem:[#allocation8 + $0x218] sm:$0xff]  ;;  %v7356_v51 = vpack.c.bf16 %v169_v43, %v161_v42 }
  0x42   :  { %v188_v50 = vld [vmem:[#allocation8 + $0x258] sm:$0xff]  ;;  %v7388_v52 = vpack.c.bf16 %v171_v46, %v163_v45  ;;  %v7358_v53 = vpack.c.bf16 %v186_v48, %v178_v47  ;;  %v177_v54 = vld [vmem:[#allocation8 + $0x200] sm:$0xff]  ;;  %v179_v56 = vld [vmem:[#allocation8 + $0x210] sm:$0xff] }
  0x43   :  { %7353 = vmatpush1.bf16.msra.mxu0 %v7352_v35  ;;  %v185_v55 = vld [vmem:[#allocation8 + $0x240] sm:$0xff]  ;;  %v7390_v57 = vpack.c.bf16 %v188_v50, %v180_v49  ;;  %v187_v58 = vld [vmem:[#allocation8 + $0x250] sm:$0xff]  ;;  %v194_v59 = vld [vmem:[#allocation8 + $0x288] sm:$0xff] }
  0x44   :  { %7385 = vmatpush1.bf16.msra.mxu1 %v7384_v39  ;;  %7355 = vmatprep.subr.bf16.mxu0 %v7354_v40  ;;  %v202_v60 = vld [vmem:[#allocation8 + $0x2c8] sm:$0xff]  ;;  %v196_v61 = vld [vmem:[#allocation8 + $0x298] sm:$0xff]  ;;  %v7360_v63 = vpack.c.bf16 %v185_v55, %v177_v54  ;;  %v7392_v1 = vpack.c.bf16 %v187_v58, %v179_v56  ;;  %v193_v3 = vld [vmem:[#allocation8 + $0x280] sm:$0xff] }
  0x45   :  { %7387 = vmatprep.subr.bf16.mxu1 %v7386_v44  ;;  %v204_v62 = vld [vmem:[#allocation8 + $0x2d8] sm:$0xff]  ;;  %v7362_v2 = vpack.c.bf16 %v202_v60, %v194_v59  ;;  %v201_v4 = vld [vmem:[#allocation8 + $0x2c0] sm:$0xff]  ;;  %v195_v5 = vld [vmem:[#allocation8 + $0x290] sm:$0xff] }
  0x46   :  { %v7394_v6 = vpack.c.bf16 %v204_v62, %v196_v61  ;;  %v203_v7 = vld [vmem:[#allocation8 + $0x2d0] sm:$0xff]  ;;  %v210_v8 = vld [vmem:[#allocation8 + $0x308] sm:$0xff]  ;;  %v212_v10 = vld [vmem:[#allocation8 + $0x318] sm:$0xff]  ;;  %v7364_v12 = vpack.c.bf16 %v201_v4, %v193_v3 }
  0x47   :  { %7357 = vmatpush1.bf16.msra.mxu0 %v7356_v51  ;;  %v218_v9 = vld [vmem:[#allocation8 + $0x348] sm:$0xff]  ;;  %v220_v11 = vld [vmem:[#allocation8 + $0x358] sm:$0xff]  ;;  %v7396_v13 = vpack.c.bf16 %v203_v7, %v195_v5  ;;  %v209_v15 = vld [vmem:[#allocation8 + $0x300] sm:$0xff] }
  0x48   :  { %7389 = vmatpush1.bf16.msra.mxu1 %v7388_v52  ;;  %7359 = vmatprep.subr.bf16.mxu0 %v7358_v53  ;;  %v7366_v14 = vpack.c.bf16 %v218_v9, %v210_v8  ;;  %v217_v16 = vld [vmem:[#allocation8 + $0x340] sm:$0xff]  ;;  %v211_v17 = vld [vmem:[#allocation8 + $0x310] sm:$0xff]  ;;  %v7398_v18 = vpack.c.bf16 %v220_v11, %v212_v10  ;;  %v226_v20 = vld [vmem:[#allocation8 + $0x388] sm:$0xff] }
  0x49   :  { %7391 = vmatprep.subr.bf16.mxu1 %v7390_v57  ;;  %v219_v19 = vld [vmem:[#allocation8 + $0x350] sm:$0xff]  ;;  %v234_v21 = vld [vmem:[#allocation8 + $0x3c8] sm:$0xff]  ;;  %v228_v22 = vld [vmem:[#allocation8 + $0x398] sm:$0xff]  ;;  %v7368_v24 = vpack.c.bf16 %v217_v16, %v209_v15 }
  0x4a   :  { %v236_v23 = vld [vmem:[#allocation8 + $0x3d8] sm:$0xff]  ;;  %v7400_v25 = vpack.c.bf16 %v219_v19, %v211_v17  ;;  %v7370_v26 = vpack.c.bf16 %v234_v21, %v226_v20  ;;  %v225_v27 = vld [vmem:[#allocation8 + $0x380] sm:$0xff]  ;;  %v227_v29 = vld [vmem:[#allocation8 + $0x390] sm:$0xff] }
  0x4b   :  { %7361 = vmatpush1.bf16.msra.mxu0 %v7360_v63  ;;  %v233_v28 = vld [vmem:[#allocation8 + $0x3c0] sm:$0xff]  ;;  %v7402_v30 = vpack.c.bf16 %v236_v23, %v228_v22  ;;  %v235_v31 = vld [vmem:[#allocation8 + $0x3d0] sm:$0xff]  ;;  %v118_v32 = vld [vmem:[#allocation8 + $0x28] sm:$0xff] }
  0x4c   :  { %7393 = vmatpush1.bf16.msra.mxu1 %v7392_v1  ;;  %7363 = vmatprep.subr.bf16.mxu0 %v7362_v2  ;;  %v126_v33 = vld [vmem:[#allocation8 + $0x68] sm:$0xff]  ;;  %v120_v34 = vld [vmem:[#allocation8 + $0x38] sm:$0xff]  ;;  %v7372_v36 = vpack.c.bf16 %v233_v28, %v225_v27  ;;  %v7404_v37 = vpack.c.bf16 %v235_v31, %v227_v29  ;;  %v117_v39 = vld [vmem:[#allocation8 + $0x20] sm:$0xff] }
  0x4d   :  { %7395 = vmatprep.subr.bf16.mxu1 %v7394_v6  ;;  %v128_v35 = vld [vmem:[#allocation8 + $0x78] sm:$0xff]  ;;  %v7406_v38 = vpack.c.bf16 %v126_v33, %v118_v32  ;;  %v125_v40 = vld [vmem:[#allocation8 + $0x60] sm:$0xff]  ;;  %v119_v42 = vld [vmem:[#allocation8 + $0x30] sm:$0xff] }
  0x4e   :  { %v7438_v41 = vpack.c.bf16 %v128_v35, %v120_v34  ;;  %v127_v43 = vld [vmem:[#allocation8 + $0x70] sm:$0xff]  ;;  %v134_v44 = vld [vmem:[#allocation8 + $0xa8] sm:$0xff]  ;;  %v10168_v46 = vld [vmem:[%s12100_s0] sm:$0xff]  ;;  %v7408_v47 = vpack.c.bf16 %v125_v40, %v117_v39 }
  0x4f   :  { %7365 = vmatpush1.bf16.msra.mxu0 %v7364_v12  ;;  %v142_v45 = vld [vmem:[#allocation8 + $0xe8] sm:$0xff]  ;;  %v136_v48 = vld [vmem:[#allocation8 + $0xb8] sm:$0xff]  ;;  %v7440_v50 = vpack.c.bf16 %v127_v43, %v119_v42  ;;  %v133_v51 = vld [vmem:[#allocation8 + $0xa0] sm:$0xff] }
  0x50   :  { %7397 = vmatpush1.bf16.msra.mxu1 %v7396_v13  ;;  %7367 = vmatprep.subr.bf16.mxu0 %v7366_v14  ;;  %v144_v49 = vld [vmem:[#allocation8 + $0xf8] sm:$0xff]  ;;  %v141_v52 = vld [vmem:[#allocation8 + $0xe0] sm:$0xff]  ;;  %v7410_v53 = vpack.c.bf16 %v142_v45, %v134_v44  ;;  %v135_v54 = vld [vmem:[#allocation8 + $0xb0] sm:$0xff] }
  0x51   :  { %7399 = vmatprep.subr.bf16.mxu1 %v7398_v18  ;;  %v143_v55 = vld [vmem:[#allocation8 + $0xf0] sm:$0xff]  ;;  %v7442_v56 = vpack.c.bf16 %v144_v49, %v136_v48  ;;  %v150_v57 = vld [vmem:[#allocation8 + $0x128] sm:$0xff]  ;;  %v7412_v60 = vpack.c.bf16 %v141_v52, %v133_v51  ;;  %v152_v61 = vld [vmem:[#allocation8 + $0x138] sm:$0xff] }
  0x52   :  { %v158_v58 = vld [vmem:[#allocation8 + $0x168] sm:$0xff]  ;;  %v160_v62 = vld [vmem:[#allocation8 + $0x178] sm:$0xff]  ;;  %v7444_v63 = vpack.c.bf16 %v143_v55, %v135_v54  ;;  %v149_v1 = vld [vmem:[#allocation8 + $0x120] sm:$0xff] }
  0x53   :  { %7369 = vmatpush1.bf16.msra.mxu0 %v7368_v24  ;;  %v10175_v59 = vld [vmem:[%s12100_s0 + $0x8] sm:$0xff]  ;;  %v157_v2 = vld [vmem:[#allocation8 + $0x160] sm:$0xff]  ;;  %v7414_v3 = vpack.c.bf16 %v158_v58, %v150_v57  ;;  %v151_v4 = vld [vmem:[#allocation8 + $0x130] sm:$0xff]  ;;  %v7446_v6 = vpack.c.bf16 %v160_v62, %v152_v61 }
  0x54   :  { %7401 = vmatpush1.bf16.msra.mxu1 %v7400_v25  ;;  %7371 = vmatprep.subr.bf16.mxu0 %v7370_v26  ;;  %v159_v5 = vld [vmem:[#allocation8 + $0x170] sm:$0xff]  ;;  %v166_v7 = vld [vmem:[#allocation8 + $0x1a8] sm:$0xff]  ;;  %v7416_v10 = vpack.c.bf16 %v157_v2, %v149_v1  ;;  %v168_v11 = vld [vmem:[#allocation8 + $0x1b8] sm:$0xff] }
  0x55   :  { %7403 = vmatprep.subr.bf16.mxu1 %v7402_v30  ;;  %v174_v8 = vld [vmem:[#allocation8 + $0x1e8] sm:$0xff]  ;;  %v10184_v9 = vld [vmem:[%s12100_s0 + $0x10] sm:$0xff]  ;;  %v176_v12 = vld [vmem:[#allocation8 + $0x1f8] sm:$0xff]  ;;  %v7448_v13 = vpack.c.bf16 %v159_v5, %v151_v4 }
  0x56   :  { %v165_v14 = vld [vmem:[#allocation8 + $0x1a0] sm:$0xff]  ;;  %v7418_v16 = vpack.c.bf16 %v174_v8, %v166_v7  ;;  %v167_v17 = vld [vmem:[#allocation8 + $0x1b0] sm:$0xff]  ;;  %v7450_v19 = vpack.c.bf16 %v176_v12, %v168_v11  ;;  %v182_v20 = vld [vmem:[#allocation8 + $0x228] sm:$0xff] }
  0x57   :  { %7373 = vmatpush1.bf16.msra.mxu0 %v7372_v36  ;;  %v173_v15 = vld [vmem:[#allocation8 + $0x1e0] sm:$0xff]  ;;  %v175_v18 = vld [vmem:[#allocation8 + $0x1f0] sm:$0xff]  ;;  %v190_v21 = vld [vmem:[#allocation8 + $0x268] sm:$0xff] }
  0x58   :  { %7405 = vmatpush1.bf16.msra.mxu1 %v7404_v37  ;;  %7407 = vmatprep.subr.bf16.mxu0 %v7406_v38  ;;  %v10193_v22 = vld [vmem:[%s12100_s0 + $0x18] sm:$0xff]  ;;  %v7420_v23 = vpack.c.bf16 %v173_v15, %v165_v14  ;;  %v7452_v26 = vpack.c.bf16 %v175_v18, %v167_v17  ;;  %v181_v27 = vld [vmem:[#allocation8 + $0x220] sm:$0xff]  ;;  %v7422_v29 = vpack.c.bf16 %v190_v21, %v182_v20  ;;  %v183_v30 = vld [vmem:[#allocation8 + $0x230] sm:$0xff] }
  0x59   :  { %7439 = vmatprep.subr.bf16.mxu1 %v7438_v41  ;;  %v184_v24 = vld [vmem:[#allocation8 + $0x238] sm:$0xff]  ;;  %v189_v28 = vld [vmem:[#allocation8 + $0x260] sm:$0xff]  ;;  %v191_v31 = vld [vmem:[#allocation8 + $0x270] sm:$0xff] }
  0x5a   :  { %348 = vmatmul.mubr.f32.vlgmr.msra.gmra.mrb[0].mxu0 %v10168_v46  ;;  %v192_v25 = vld [vmem:[#allocation8 + $0x278] sm:$0xff]  ;;  %v198_v33 = vld [vmem:[#allocation8 + $0x2a8] sm:$0xff]  ;;  %v10202_v35 = vld [vmem:[%s12100_s0 + $0x20] sm:$0xff]  ;;  %v7424_v36 = vpack.c.bf16 %v189_v28, %v181_v27  ;;  %v7456_v39 = vpack.c.bf16 %v191_v31, %v183_v30 }
  0x5b   :  { %461 = vmatmul.mubr.f32.vlgmr.msra.gmra.mrb[0].mxu1 %v10168_v46  ;;  %7409 = vmatpush1.bf16.msra.mxu0 %v7408_v47  ;;  %v7454_v32 = vpack.c.bf16 %v192_v25, %v184_v24  ;;  %v206_v34 = vld [vmem:[#allocation8 + $0x2e8] sm:$0xff]  ;;  %v200_v37 = vld [vmem:[#allocation8 + $0x2b8] sm:$0xff]  ;;  %v197_v40 = vld [vmem:[#allocation8 + $0x2a0] sm:$0xff] }
  0x5c   :  { %7441 = vmatpush1.bf16.msra.mxu1 %v7440_v50  ;;  %353 = vmatprep.mubr.f32.mxu0 %v12111_v0  ;;  %v208_v38 = vld [vmem:[#allocation8 + $0x2f8] sm:$0xff]  ;;  %v205_v41 = vld [vmem:[#allocation8 + $0x2e0] sm:$0xff]  ;;  %v7426_v42 = vpack.c.bf16 %v206_v34, %v198_v33  ;;  %v199_v43 = vld [vmem:[#allocation8 + $0x2b0] sm:$0xff] }
  0x5d   :  { %466 = vmatprep.mubr.f32.mxu1 %v12111_v0  ;;  %7411 = vmatprep.subr.bf16.mxu0 %v7410_v53  ;;  %v207_v44 = vld [vmem:[#allocation8 + $0x2f0] sm:$0xff]  ;;  %v7458_v45 = vpack.c.bf16 %v208_v38, %v200_v37  ;;  %v214_v47 = vld [vmem:[#allocation8 + $0x328] sm:$0xff]  ;;  %v7428_v50 = vpack.c.bf16 %v205_v41, %v197_v40  ;;  %v216_v51 = vld [vmem:[#allocation8 + $0x338] sm:$0xff] }
  0x5e   :  { %354 = vmatmul.mubr.f32.gmra.mrb[2].mxu0 %v10175_v59  ;;  %7443 = vmatprep.subr.bf16.mxu1 %v7442_v56  ;;  %v222_v48 = vld [vmem:[#allocation8 + $0x368] sm:$0xff]  ;;  %v224_v52 = vld [vmem:[#allocation8 + $0x378] sm:$0xff]  ;;  %v7460_v53 = vpack.c.bf16 %v207_v44, %v199_v43  ;;  %v213_v54 = vld [vmem:[#allocation8 + $0x320] sm:$0xff] }
  0x5f   :  { %467 = vmatmul.mubr.f32.gmra.mrb[2].mxu1 %v10175_v59  ;;  %7413 = vmatpush1.bf16.msra.mxu0 %v7412_v60  ;;  %v10211_v49 = vld [vmem:[%s12100_s0 + $0x28] sm:$0xff]  ;;  %v221_v55 = vld [vmem:[#allocation8 + $0x360] sm:$0xff]  ;;  %v7430_v56 = vpack.c.bf16 %v222_v48, %v214_v47  ;;  %v215_v57 = vld [vmem:[#allocation8 + $0x330] sm:$0xff]  ;;  %v7462_v60 = vpack.c.bf16 %v224_v52, %v216_v51 }
  0x60   :  { %7445 = vmatpush1.bf16.msra.mxu1 %v7444_v63  ;;  %359 = vmatprep.mubr.f32.mxu0 %v12111_v0  ;;  %v223_v58 = vld [vmem:[#allocation8 + $0x370] sm:$0xff]  ;;  %v230_v61 = vld [vmem:[#allocation8 + $0x3a8] sm:$0xff]  ;;  %v7432_v1 = vpack.c.bf16 %v221_v55, %v213_v54  ;;  %v232_v2 = vld [vmem:[#allocation8 + $0x3b8] sm:$0xff] }
  0x61   :  { %472 = vmatprep.mubr.f32.mxu1 %v12111_v0  ;;  %7415 = vmatprep.subr.bf16.mxu0 %v7414_v3  ;;  %v238_v62 = vld [vmem:[#allocation8 + $0x3e8] sm:$0xff]  ;;  %v10220_v63 = vld [vmem:[%s12100_s0 + $0x30] sm:$0xff]  ;;  %v240_v3 = vld [vmem:[#allocation8 + $0x3f8] sm:$0xff]  ;;  %v7464_v4 = vpack.c.bf16 %v223_v58, %v215_v57 }
  0x62   :  { %360 = vmatmul.mubr.f32.gmra.mrb[4].mxu0 %v10184_v9  ;;  %7447 = vmatprep.subr.bf16.mxu1 %v7446_v6  ;;  %v229_v5 = vld [vmem:[#allocation8 + $0x3a0] sm:$0xff]  ;;  %v7434_v7 = vpack.c.bf16 %v238_v62, %v230_v61  ;;  %v231_v8 = vld [vmem:[#allocation8 + $0x3b0] sm:$0xff]  ;;  %v7466_v11 = vpack.c.bf16 %v240_v3, %v232_v2  ;;  %v804_v12 = vld [vmem:[#allocation10 + $0x8] sm:$0xff] }
  0x63   :  { %473 = vmatmul.mubr.f32.gmra.mrb[4].mxu1 %v10184_v9  ;;  %7417 = vmatpush1.bf16.msra.mxu0 %v7416_v10  ;;  %v237_v6 = vld [vmem:[#allocation8 + $0x3e0] sm:$0xff]  ;;  %v239_v10 = vld [vmem:[#allocation8 + $0x3f0] sm:$0xff]  ;;  %v10229_v14 = vld [vmem:[%s12100_s0 + $0x38] sm:$0xff] }
  0x64   :  { %7449 = vmatpush1.bf16.msra.mxu1 %v7448_v13  ;;  %365 = vmatprep.mubr.f32.mxu0 %v12111_v0  ;;  %v808_v13 = vld [vmem:[#allocation10 + $0x28] sm:$0xff]  ;;  %v7436_v15 = vpack.c.bf16 %v237_v6, %v229_v5  ;;  %v810_v17 = vld [vmem:[#allocation10 + $0x38] sm:$0xff]  ;;  %v7468_v18 = vpack.c.bf16 %v239_v10, %v231_v8  ;;  %v807_v20 = vld [vmem:[#allocation10 + $0x20] sm:$0xff] }
  0x65   :  { %478 = vmatprep.mubr.f32.mxu1 %v12111_v0  ;;  %7419 = vmatprep.subr.bf16.mxu0 %v7418_v16  ;;  %v806_v16 = vld [vmem:[#allocation10 + $0x18] sm:$0xff]  ;;  %v10233_v21 = vpack.c.bf16 %v808_v13, %v804_v12  ;;  %v809_v24 = vld [vmem:[#allocation10 + $0x30] sm:$0xff]  ;;  %v816_v27 = vld [vmem:[#allocation10 + $0x68] sm:$0xff] }
  0x66   :  { %366 = vmatmul.mubr.f32.gmra.mrb[6].mxu0 %v10193_v22  ;;  %7451 = vmatprep.subr.bf16.mxu1 %v7450_v19  ;;  %v803_v19 = vld [vmem:[#allocation10] sm:$0xff]  ;;  %v10236_v25 = vpack.c.bf16 %v810_v17, %v806_v16  ;;  %v818_v30 = vld [vmem:[#allocation10 + $0x78] sm:$0xff]  ;;  %v817_v37 = vld [vmem:[#allocation10 + $0x70] sm:$0xff] }
  0x67   :  { %479 = vmatmul.mubr.f32.gmra.mrb[6].mxu1 %v10193_v22  ;;  %7421 = vmatpush1.bf16.msra.mxu0 %v7420_v23  ;;  %v805_v23 = vld [vmem:[#allocation10 + $0x10] sm:$0xff]  ;;  %v10239_v28 = vpack.c.bf16 %v807_v20, %v803_v19  ;;  %v815_v33 = vld [vmem:[#allocation10 + $0x60] sm:$0xff]  ;;  %v824_v40 = vld [vmem:[#allocation10 + $0xa8] sm:$0xff] }
  0x68   :  { %7453 = vmatpush1.bf16.msra.mxu1 %v7452_v26  ;;  %371 = vmatprep.mubr.f32.mxu0 %v12111_v0  ;;  %v812_v26 = vld [vmem:[#allocation10 + $0x48] sm:$0xff]  ;;  %v10242_v31 = vpack.c.bf16 %v809_v24, %v805_v23  ;;  %v826_v43 = vld [vmem:[#allocation10 + $0xb8] sm:$0xff]  ;;  %v823_v47 = vld [vmem:[#allocation10 + $0xa0] sm:$0xff] }
  0x69   :  { %484 = vmatprep.mubr.f32.mxu1 %v12111_v0  ;;  %7423 = vmatprep.subr.bf16.mxu0 %v7422_v29  ;;  %v814_v29 = vld [vmem:[#allocation10 + $0x58] sm:$0xff]  ;;  %v10246_v34 = vpack.c.bf16 %v816_v27, %v812_v26  ;;  %v828_v52 = vld [vmem:[#allocation10 + $0xc8] sm:$0xff]  ;;  %v827_v58 = vld [vmem:[#allocation10 + $0xc0] sm:$0xff] }
  0x6a   :  { %372 = vmatmul.mubr.f32.gmra.mrb[8].mxu0 %v10202_v35  ;;  %7455 = vmatprep.subr.bf16.mxu1 %v7454_v32  ;;  %v811_v32 = vld [vmem:[#allocation10 + $0x40] sm:$0xff]  ;;  %v10250_v38 = vpack.c.bf16 %v818_v30, %v814_v29  ;;  %v830_v55 = vld [vmem:[#allocation10 + $0xd8] sm:$0xff]  ;;  %v833_v62 = vld [vmem:[#allocation10 + $0xf0] sm:$0xff] }
  0x6b   :  { %485 = vmatmul.mubr.f32.gmra.mrb[8].mxu1 %v10202_v35  ;;  %7425 = vmatpush1.bf16.msra.mxu0 %v7424_v36  ;;  %v813_v36 = vld [vmem:[#allocation10 + $0x50] sm:$0xff]  ;;  %v10254_v41 = vpack.c.bf16 %v815_v33, %v811_v32  ;;  %v836_v2 = vld [vmem:[#allocation10 + $0x108] sm:$0xff]  ;;  %v838_v5 = vld [vmem:[#allocation10 + $0x118] sm:$0xff] }
  0x6c   :  { %7457 = vmatpush1.bf16.msra.mxu1 %v7456_v39  ;;  %377 = vmatprep.mubr.f32.mxu0 %v12111_v0  ;;  %v820_v39 = vld [vmem:[#allocation10 + $0x88] sm:$0xff]  ;;  %v10258_v44 = vpack.c.bf16 %v817_v37, %v813_v36  ;;  %v842_v6 = vld [vmem:[#allocation10 + $0x138] sm:$0xff]  ;;  %v835_v8 = vld [vmem:[#allocation10 + $0x100] sm:$0xff] }
  0x6d   :  { %490 = vmatprep.mubr.f32.mxu1 %v12111_v0  ;;  %7427 = vmatprep.subr.bf16.mxu0 %v7426_v42  ;;  %v822_v42 = vld [vmem:[#allocation10 + $0x98] sm:$0xff]  ;;  %v10262_v48 = vpack.c.bf16 %v824_v40, %v820_v39  ;;  %v840_v3 = vld [vmem:[#allocation10 + $0x128] sm:$0xff]  ;;  %v839_v10 = vld [vmem:[#allocation10 + $0x120] sm:$0xff]  ;;  %v10298_v13 = vpack.c.bf16 %v842_v6, %v838_v5 }
  0x6e   :  { %378 = vmatmul.mubr.f32.gmra.mrb[10].mxu0 %v10211_v49  ;;  %7459 = vmatprep.subr.bf16.mxu1 %v7458_v45  ;;  %v819_v45 = vld [vmem:[#allocation10 + $0x80] sm:$0xff]  ;;  %v10266_v51 = vpack.c.bf16 %v826_v43, %v822_v42  ;;  %v841_v12 = vld [vmem:[#allocation10 + $0x130] sm:$0xff]  ;;  %v848_v16 = vld [vmem:[#allocation10 + $0x168] sm:$0xff]  ;;  %v10302_v17 = vpack.c.bf16 %v839_v10, %v835_v8 }
  0x6f   :  { %491 = vmatmul.mubr.f32.gmra.mrb[10].mxu1 %v10211_v49  ;;  %7429 = vmatpush1.bf16.msra.mxu0 %v7428_v50  ;;  %v825_v50 = vld [vmem:[#allocation10 + $0xb0] sm:$0xff]  ;;  %v10270_v54 = vpack.c.bf16 %v823_v47, %v819_v45  ;;  %v850_v19 = vld [vmem:[#allocation10 + $0x178] sm:$0xff]  ;;  %v843_v23 = vld [vmem:[#allocation10 + $0x140] sm:$0xff] }
  0x70   :  { %7461 = vmatpush1.bf16.msra.mxu1 %v7460_v53  ;;  %383 = vmatprep.mubr.f32.mxu0 %v12111_v0  ;;  %v832_v53 = vld [vmem:[#allocation10 + $0xe8] sm:$0xff]  ;;  %v847_v24 = vld [vmem:[#allocation10 + $0x160] sm:$0xff]  ;;  %v849_v27 = vld [vmem:[#allocation10 + $0x170] sm:$0xff] }
  0x71   :  { %496 = vmatprep.mubr.f32.mxu1 %v12111_v0  ;;  %7431 = vmatprep.subr.bf16.mxu0 %v7430_v56  ;;  %v834_v56 = vld [vmem:[#allocation10 + $0xf8] sm:$0xff]  ;;  %v10278_v61 = vpack.c.bf16 %v832_v53, %v828_v52  ;;  %v852_v30 = vld [vmem:[#allocation10 + $0x188] sm:$0xff]  ;;  %v10318_v33 = vpack.c.bf16 %v847_v24, %v843_v23  ;;  %v851_v40 = vld [vmem:[#allocation10 + $0x180] sm:$0xff] }
  0x72   :  { %384 = vmatmul.mubr.f32.gmra.mrb[12].mxu0 %v10220_v63  ;;  %7463 = vmatprep.subr.bf16.mxu1 %v7462_v60  ;;  %v831_v60 = vld [vmem:[#allocation10 + $0xe0] sm:$0xff]  ;;  %v856_v32 = vld [vmem:[#allocation10 + $0x1a8] sm:$0xff]  ;;  %v854_v36 = vld [vmem:[#allocation10 + $0x198] sm:$0xff] }
  0x73   :  { %497 = vmatmul.mubr.f32.gmra.mrb[12].mxu1 %v10220_v63  ;;  %7433 = vmatpush1.bf16.msra.mxu0 %v7432_v1  ;;  %v10282_v1 = vpack.c.bf16 %v834_v56, %v830_v55  ;;  %v858_v37 = vld [vmem:[#allocation10 + $0x1b8] sm:$0xff]  ;;  %v855_v42 = vld [vmem:[#allocation10 + $0x1a0] sm:$0xff]  ;;  %v10326_v43 = vpack.c.bf16 %v856_v32, %v852_v30  ;;  %v857_v45 = vld [vmem:[#allocation10 + $0x1b0] sm:$0xff] }
  0x74   :  { %7465 = vmatpush1.bf16.msra.mxu1 %v7464_v4  ;;  %389 = vmatprep.mubr.f32.mxu0 %v12111_v0  ;;  %v10286_v4 = vpack.c.bf16 %v831_v60, %v827_v58  ;;  %v10330_v47 = vpack.c.bf16 %v858_v37, %v854_v36  ;;  %v10334_v52 = vpack.c.bf16 %v855_v42, %v851_v40  ;;  %v862_v53 = vld [vmem:[#allocation10 + $0x1d8] sm:$0xff]  ;;  %v859_v58 = vld [vmem:[#allocation10 + $0x1c0] sm:$0xff]  ;;  %v1023_v5 = vld [vmem:[#allocation12 + $0x28] sm:$0xff] }
  0x75   :  { %502 = vmatprep.mubr.f32.mxu1 %v12111_v0  ;;  %7435 = vmatprep.subr.bf16.mxu0 %v7434_v7  ;;  %v866_v55 = vld [vmem:[#allocation10 + $0x1f8] sm:$0xff]  ;;  %v863_v60 = vld [vmem:[#allocation10 + $0x1e0] sm:$0xff]  ;;  %v1031_v23 = vld [vmem:[#allocation12 + $0x68] sm:$0xff] }
  0x76   :  { %390 = vmatmul.mubr.f32.gmra.mrb[14].mxu0 %v10229_v14  ;;  %7467 = vmatprep.subr.bf16.mxu1 %v7466_v11  ;;  %v10294_v11 = vpack.c.bf16 %v840_v3, %v836_v2  ;;  %v10346_v2 = vpack.c.bf16 %v866_v55, %v862_v53  ;;  %v1019_v3 = vld [vmem:[#allocation12 + $0x8] sm:$0xff]  ;;  %v10350_v6 = vpack.c.bf16 %v863_v60, %v859_v58  ;;  %v1021_v8 = vld [vmem:[#allocation12 + $0x18] sm:$0xff]  ;;  %v1026_v37 = vld [vmem:[#allocation12 + $0x40] sm:$0xff] }
  0x77   :  { %503 = vmatmul.mubr.f32.gmra.mrb[14].mxu1 %v10229_v14  ;;  %7437 = vmatpush1.bf16.msra.mxu0 %v7436_v15  ;;  %v844_v15 = vld [vmem:[#allocation10 + $0x148] sm:$0xff]  ;;  %v1025_v10 = vld [vmem:[#allocation12 + $0x38] sm:$0xff]  ;;  %v1030_v40 = vld [vmem:[#allocation12 + $0x60] sm:$0xff] }
  0x78   :  { %7469 = vmatpush1.bf16.msra.mxu1 %v7468_v18  ;;  %573 = vmatprep.mubr.f32.mxu0 %v12111_v0  ;;  %v846_v18 = vld [vmem:[#allocation10 + $0x158] sm:$0xff]  ;;  %v10310_v26 = vpack.c.bf16 %v848_v16, %v844_v15  ;;  %v1022_v15 = vld [vmem:[#allocation12 + $0x20] sm:$0xff]  ;;  %v1020_v16 = vld [vmem:[#allocation12 + $0x10] sm:$0xff]  ;;  %v10362_v24 = vpack.c.bf16 %v1025_v10, %v1021_v8  ;;  %v10382_v55 = vpack.c.bf16 %v1030_v40, %v1026_v37 }
  0x79   :  { %686 = vmatprep.mubr.f32.mxu1 %v12111_v0  ;;  %7471 = vmatprep.subr.bf16.mxu0 %v10233_v21  ;;  %v10314_v29 = vpack.c.bf16 %v850_v19, %v846_v18  ;;  %v1024_v18 = vld [vmem:[#allocation12 + $0x30] sm:$0xff]  ;;  %v1027_v19 = vld [vmem:[#allocation12 + $0x48] sm:$0xff]  ;;  %v1041_v53 = vld [vmem:[#allocation12 + $0xb8] sm:$0xff] }
  0x7a   :  { %574 = vmatmul.mubr.f32.vlgmr.msra.gmra.mrb[16].mxu0 %v10168_v46  ;;  %7503 = vmatprep.subr.bf16.mxu1 %v10236_v25  ;;  %v10370_v32 = vpack.c.bf16 %v1024_v18, %v1020_v16  ;;  %v10372_v36 = vpack.c.bf16 %v1031_v23, %v1027_v19  ;;  %v1028_v42 = vld [vmem:[#allocation12 + $0x50] sm:$0xff]  ;;  %v1043_v10 = vld [vmem:[#allocation12 + $0xc8] sm:$0xff]  ;;  %v1049_v16 = vld [vmem:[#allocation12 + $0xf8] sm:$0xff] }
  0x7b   :  { %687 = vmatmul.mubr.f32.vlgmr.msra.gmra.mrb[16].mxu1 %v10168_v46  ;;  %7473 = vmatpush1.bf16.msra.mxu0 %v10239_v28  ;;  %v821_v46 = vld [vmem:[#allocation10 + $0x90] sm:$0xff] }
  0x7c   :  { %7505 = vmatpush1.bf16.msra.mxu1 %v10242_v31  ;;  %579 = vmatprep.mubr.f32.mxu0 %v12111_v0  ;;  %v10274_v57 = vpack.c.bf16 %v825_v50, %v821_v46  ;;  %v860_v46 = vld [vmem:[#allocation10 + $0x1c8] sm:$0xff]  ;;  %v1040_v8 = vld [vmem:[#allocation12 + $0xb0] sm:$0xff] }
  0x7d   :  { %692 = vmatprep.mubr.f32.mxu1 %v12111_v0  ;;  %7475 = vmatprep.subr.bf16.mxu0 %v10246_v34  ;;  %v864_v50 = vld [vmem:[#allocation10 + $0x1e8] sm:$0xff]  ;;  %v1044_v37 = vld [vmem:[#allocation12 + $0xd0] sm:$0xff] }
  0x7e   :  { %580 = vmatmul.mubr.f32.gmra.mrb[18].mxu0 %v10175_v59  ;;  %7507 = vmatprep.subr.bf16.mxu1 %v10250_v38 }
  0x7f   :  { %693 = vmatmul.mubr.f32.gmra.mrb[18].mxu1 %v10175_v59  ;;  %7477 = vmatpush1.bf16.msra.mxu0 %v10254_v41  ;;  %v829_v59 = vld [vmem:[#allocation10 + $0xd0] sm:$0xff] }
  0x80   :  { %7509 = vmatpush1.bf16.msra.mxu1 %v10258_v44  ;;  %585 = vmatprep.mubr.f32.mxu0 %v12111_v0  ;;  %v10290_v7 = vpack.c.bf16 %v833_v62, %v829_v59  ;;  %v10342_v59 = vpack.c.bf16 %v864_v50, %v860_v46  ;;  %v865_v62 = vld [vmem:[#allocation10 + $0x1f0] sm:$0xff]  ;;  %v1039_v46 = vld [vmem:[#allocation12 + $0xa8] sm:$0xff]  ;;  %v1037_v50 = vld [vmem:[#allocation12 + $0x98] sm:$0xff] }
  0x81   :  { %698 = vmatprep.mubr.f32.mxu1 %v12111_v0  ;;  %7479 = vmatprep.subr.bf16.mxu0 %v10262_v48 }
  0x82   :  { %586 = vmatmul.mubr.f32.gmra.mrb[20].mxu0 %v10184_v9  ;;  %7511 = vmatprep.subr.bf16.mxu1 %v10266_v51 }
  0x83   :  { %699 = vmatmul.mubr.f32.gmra.mrb[20].mxu1 %v10184_v9  ;;  %7481 = vmatpush1.bf16.msra.mxu0 %v10270_v54  ;;  %v837_v9 = vld [vmem:[#allocation10 + $0x110] sm:$0xff] }
  0x84   :  { %7513 = vmatpush1.bf16.msra.mxu1 %v10274_v57  ;;  %591 = vmatprep.mubr.f32.mxu0 %v12111_v0  ;;  %v10306_v20 = vpack.c.bf16 %v841_v12, %v837_v9  ;;  %v1018_v12 = vld [vmem:[#allocation12] sm:$0xff] }
  0x85   :  { %704 = vmatprep.mubr.f32.mxu1 %v12111_v0  ;;  %7483 = vmatprep.subr.bf16.mxu0 %v10278_v61  ;;  %v10366_v30 = vpack.c.bf16 %v1022_v15, %v1018_v12  ;;  %v1047_v12 = vld [vmem:[#allocation12 + $0xe8] sm:$0xff]  ;;  %v1045_v15 = vld [vmem:[#allocation12 + $0xd8] sm:$0xff] }
  0x86   :  { %592 = vmatmul.mubr.f32.gmra.mrb[22].mxu0 %v10193_v22  ;;  %7515 = vmatprep.subr.bf16.mxu1 %v10282_v1  ;;  %v10402_v23 = vpack.c.bf16 %v1047_v12, %v1043_v10  ;;  %v10405_v40 = vpack.c.bf16 %v1049_v16, %v1045_v15  ;;  %v1052_v10 = vld [vmem:[#allocation12 + $0x110] sm:$0xff]  ;;  %v1059_v16 = vld [vmem:[#allocation12 + $0x148] sm:$0xff] }
  0x87   :  { %705 = vmatmul.mubr.f32.gmra.mrb[22].mxu1 %v10193_v22  ;;  %7485 = vmatpush1.bf16.msra.mxu0 %v10286_v4  ;;  %v845_v22 = vld [vmem:[#allocation10 + $0x150] sm:$0xff] }
  0x88   :  { %7517 = vmatpush1.bf16.msra.mxu1 %v10290_v7  ;;  %597 = vmatprep.mubr.f32.mxu0 %v12111_v0  ;;  %v10322_v39 = vpack.c.bf16 %v849_v27, %v845_v22  ;;  %v1029_v22 = vld [vmem:[#allocation12 + $0x58] sm:$0xff]  ;;  %12224 = vst [vmem:[#allocation27_spill] sm:$0xff] %v10402_v23  ;;  %12225 = vst [vmem:[#allocation28_spill] sm:$0xff] %v10405_v40  ;;  %v1056_v15 = vld [vmem:[#allocation12 + $0x130] sm:$0xff] }
  0x89   :  { %710 = vmatprep.mubr.f32.mxu1 %v12111_v0  ;;  %7487 = vmatprep.subr.bf16.mxu0 %v10294_v11  ;;  %v1033_v27 = vld [vmem:[#allocation12 + $0x78] sm:$0xff] }
  0x8a   :  { %598 = vmatmul.mubr.f32.gmra.mrb[24].mxu0 %v10202_v35  ;;  %7519 = vmatprep.subr.bf16.mxu1 %v10298_v13 }
  0x8b   :  { %711 = vmatmul.mubr.f32.gmra.mrb[24].mxu1 %v10202_v35  ;;  %7489 = vmatpush1.bf16.msra.mxu0 %v10302_v17  ;;  %v853_v35 = vld [vmem:[#allocation10 + $0x190] sm:$0xff] }
  0x8c   :  { %7521 = vmatpush1.bf16.msra.mxu1 %v10306_v20  ;;  %603 = vmatprep.mubr.f32.mxu0 %v12111_v0  ;;  %v10338_v56 = vpack.c.bf16 %v857_v45, %v853_v35  ;;  %v1032_v35 = vld [vmem:[#allocation12 + $0x70] sm:$0xff]  ;;  %v1035_v45 = vld [vmem:[#allocation12 + $0x88] sm:$0xff] }
  0x8d   :  { %716 = vmatprep.mubr.f32.mxu1 %v12111_v0  ;;  %7491 = vmatprep.subr.bf16.mxu0 %v10310_v26  ;;  %v10386_v58 = vpack.c.bf16 %v1032_v35, %v1028_v42  ;;  %v10388_v60 = vpack.c.bf16 %v1039_v46, %v1035_v45  ;;  %v1048_v42 = vld [vmem:[#allocation12 + $0xf0] sm:$0xff]  ;;  %v1051_v35 = vld [vmem:[#allocation12 + $0x108] sm:$0xff]  ;;  %v1053_v46 = vld [vmem:[#allocation12 + $0x118] sm:$0xff] }
  0x8e   :  { %604 = vmatmul.mubr.f32.gmra.mrb[26].mxu0 %v10211_v49  ;;  %7523 = vmatprep.subr.bf16.mxu1 %v10314_v29  ;;  %v1055_v45 = vld [vmem:[#allocation12 + $0x128] sm:$0xff] }
  0x8f   :  { %717 = vmatmul.mubr.f32.gmra.mrb[26].mxu1 %v10211_v49  ;;  %7493 = vmatpush1.bf16.msra.mxu0 %v10318_v33  ;;  %v861_v49 = vld [vmem:[#allocation10 + $0x1d0] sm:$0xff] }
  0x90   :  { %7525 = vmatpush1.bf16.msra.mxu1 %v10322_v39  ;;  %609 = vmatprep.mubr.f32.mxu0 %v12111_v0  ;;  %v10354_v9 = vpack.c.bf16 %v865_v62, %v861_v49  ;;  %v1034_v49 = vld [vmem:[#allocation12 + $0x80] sm:$0xff] }
  0x91   :  { %722 = vmatprep.mubr.f32.mxu1 %v12111_v0  ;;  %7495 = vmatprep.subr.bf16.mxu0 %v10326_v43  ;;  %v1038_v62 = vld [vmem:[#allocation12 + $0xa0] sm:$0xff] }
  0x92   :  { %610 = vmatmul.mubr.f32.gmra.mrb[28].mxu0 %v10220_v63  ;;  %7527 = vmatprep.subr.bf16.mxu1 %v10330_v47  ;;  %v10396_v18 = vpack.c.bf16 %v1038_v62, %v1034_v49  ;;  %v10412_v49 = vpack.c.bf16 %v1048_v42, %v1044_v37  ;;  %v10414_v62 = vpack.c.bf16 %v1055_v45, %v1051_v35  ;;  %v1058_v35 = vld [vmem:[#allocation12 + $0x140] sm:$0xff] }
  0x93   :  { %723 = vmatmul.mubr.f32.gmra.mrb[28].mxu1 %v10220_v63  ;;  %7497 = vmatpush1.bf16.msra.mxu0 %v10334_v52  ;;  %v10358_v63 = vpack.c.bf16 %v1023_v5, %v1019_v3  ;;  %v1036_v3 = vld [vmem:[#allocation12 + $0x90] sm:$0xff]  ;;  %v10391_v5 = vpack.c.bf16 %v1041_v53, %v1037_v50  ;;  %v1057_v50 = vld [vmem:[#allocation12 + $0x138] sm:$0xff]  ;;  %v10424_v37 = vpack.c.bf16 %v1056_v15, %v1052_v10  ;;  %v1062_v45 = vld [vmem:[#allocation12 + $0x160] sm:$0xff] }
  0x94   :  { %7529 = vmatpush1.bf16.msra.mxu1 %v10338_v56  ;;  %615 = vmatprep.mubr.f32.mxu0 %v12111_v0  ;;  %v10400_v19 = vpack.c.bf16 %v1040_v8, %v1036_v3  ;;  %12227 = vst [vmem:[#allocation30_spill] sm:$0xff] %v10412_v49  ;;  %12228 = vst [vmem:[#allocation31_spill] sm:$0xff] %v10414_v62  ;;  %v1050_v3 = vld [vmem:[#allocation12 + $0x100] sm:$0xff]  ;;  %v10417_v12 = vpack.c.bf16 %v1057_v50, %v1053_v46  ;;  %v1060_v46 = vld [vmem:[#allocation12 + $0x150] sm:$0xff] }
  0x95   :  { %728 = vmatprep.mubr.f32.mxu1 %v12111_v0  ;;  %7499 = vmatprep.subr.bf16.mxu0 %v10342_v59  ;;  %v1054_v8 = vld [vmem:[#allocation12 + $0x120] sm:$0xff]  ;;  %12231 = vst [vmem:[#allocation34_spill] sm:$0xff] %v10424_v37 }
  0x96   :  { %616 = vmatmul.mubr.f32.gmra.mrb[30].mxu0 %v10229_v14  ;;  %7531 = vmatprep.subr.bf16.mxu1 %v10346_v2  ;;  %12223 = vst [vmem:[#allocation26_spill] sm:$0xff] %v10400_v19  ;;  %12229 = vst [vmem:[#allocation32_spill] sm:$0xff] %v10417_v12  ;;  %v1066_v15 = vld [vmem:[#allocation12 + $0x180] sm:$0xff] }
  0x97   :  { %729 = vmatmul.mubr.f32.gmra.mrb[30].mxu1 %v10229_v14  ;;  %7501 = vmatpush1.bf16.msra.mxu0 %v10350_v6  ;;  %v10376_v14 = vpack.c.bf16 %v1033_v27, %v1029_v22  ;;  %v1042_v22 = vld [vmem:[#allocation12 + $0xc0] sm:$0xff] }
  0x98   :  { %7533 = vmatpush1.bf16.msra.mxu1 %v10354_v9  ;;  %931 = vmatprep.mubr.f32.mxu0 %v12111_v0  ;;  %v1046_v27 = vld [vmem:[#allocation12 + $0xe0] sm:$0xff] }
  0x99   :  { %1002 = vmatprep.mubr.f32.mxu1 %v12111_v0  ;;  %7535 = vmatprep.subr.bf16.mxu0 %v10358_v63  ;;  %v10408_v53 = vpack.c.bf16 %v1046_v27, %v1042_v22  ;;  %v1061_v22 = vld [vmem:[#allocation12 + $0x158] sm:$0xff] }
  0x9a   :  { %932 = vmatmul.mubr.f32.vlgmr.msra.gmra.mrb[0].mxu0 %v12111_v0  ;;  %7567 = vmatprep.subr.bf16.mxu1 %v10362_v24  ;;  %v1065_v27 = vld [vmem:[#allocation12 + $0x178] sm:$0xff] }
  0x9b   :  { %1003 = vmatmul.mubr.f32.vlgmr.msra.gmra.mrb[0].mxu1 %v12111_v0  ;;  %7537 = vmatpush1.bf16.msra.mxu0 %v10366_v30  ;;  %12226 = vst [vmem:[#allocation29_spill] sm:$0xff] %v10408_v53  ;;  %v10429_v50 = vpack.c.bf16 %v1065_v27, %v1061_v22  ;;  %v1068_v22 = vld [vmem:[#allocation12 + $0x190] sm:$0xff] }
  0x9c   :  { %7569 = vmatpush1.bf16.msra.mxu1 %v10370_v32  ;;  %7539 = vmatprep.subr.bf16.mxu0 %v10372_v36 }
  0x9d   :  { %7571 = vmatprep.subr.bf16.mxu1 %v10376_v14  ;;  %1146 = vmatprep.mubr.f32.mxu0 %v12111_v0  ;;  %12232 = vst [vmem:[#allocation35_spill] sm:$0xff] %v10429_v50 }
  0x9e   :  { %1217 = vmatprep.mubr.f32.mxu1 %v12111_v0  ;;  %v1063_v0 = vld [vmem:[#allocation12 + $0x168] sm:$0xff] }
  0x9f   :  { %7541 = vmatpush1.bf16.msra.mxu0 %v10382_v55  ;;  %v10426_v42 = vpack.c.bf16 %v1063_v0, %v1059_v16  ;;  %v1070_v16 = vld [vmem:[#allocation12 + $0x1a0] sm:$0xff] }
  0xa0   :  { %7573 = vmatpush1.bf16.msra.mxu1 %v10386_v58  ;;  %7543 = vmatprep.subr.bf16.mxu0 %v10388_v60 }
  0xa1   :  { %7575 = vmatprep.subr.bf16.mxu1 %v10391_v5 }
  0xa3   :  { %7545 = vmatpush1.bf16.msra.mxu0 %v10396_v18 }
  0xa4   :  { %7577 = vmatpush1.bf16.msra.mxu1 %v10400_v19  ;;  %7547 = vmatprep.subr.bf16.mxu0 %v10402_v23  ;;  %v10420_v19 = vpack.c.bf16 %v1054_v8, %v1050_v3  ;;  %v1067_v23 = vld [vmem:[#allocation12 + $0x188] sm:$0xff]  ;;  %v1069_v3 = vld [vmem:[#allocation12 + $0x198] sm:$0xff] }
  0xa5   :  { %7579 = vmatprep.subr.bf16.mxu1 %v10405_v40  ;;  %v1064_v40 = vld [vmem:[#allocation12 + $0x170] sm:$0xff]  ;;  %v1073_v8 = vld [vmem:[#allocation12 + $0x1b8] sm:$0xff] }
  0xa6   :  { %12230 = vst [vmem:[#allocation33_spill] sm:$0xff] %v10420_v19  ;;  %v10436_v0 = vpack.c.bf16 %v1064_v40, %v1060_v46  ;;  %v10441_v27 = vpack.c.bf16 %v1073_v8, %v1069_v3  ;;  %v1078_v46 = vld [vmem:[#allocation12 + $0x1e0] sm:$0xff]  ;;  %v1076_v8 = vld [vmem:[#allocation12 + $0x1d0] sm:$0xff] }
  0xa7   :  { %7549 = vmatpush1.bf16.msra.mxu0 %v10408_v53  ;;  %v1071_v53 = vld [vmem:[#allocation12 + $0x1a8] sm:$0xff] }
  0xa8   :  { %7581 = vmatpush1.bf16.msra.mxu1 %v10412_v49  ;;  %7551 = vmatprep.subr.bf16.mxu0 %v10414_v62  ;;  %v10432_v49 = vpack.c.bf16 %v1062_v45, %v1058_v35  ;;  %v10438_v10 = vpack.c.bf16 %v1071_v53, %v1067_v23  ;;  %v1075_v62 = vld [vmem:[#allocation12 + $0x1c8] sm:$0xff]  ;;  %v1077_v35 = vld [vmem:[#allocation12 + $0x1d8] sm:$0xff]  ;;  %v1074_v53 = vld [vmem:[#allocation12 + $0x1c0] sm:$0xff] }
  0xa9   :  { %7583 = vmatprep.subr.bf16.mxu1 %v10417_v12  ;;  %v1072_v12 = vld [vmem:[#allocation12 + $0x1b0] sm:$0xff]  ;;  %v1081_v45 = vld [vmem:[#allocation12 + $0x1f8] sm:$0xff] }
  0xaa   :  { %v10448_v23 = vpack.c.bf16 %v1072_v12, %v1068_v22  ;;  %v10453_v3 = vpack.c.bf16 %v1081_v45, %v1077_v35 }
  0xab   :  { %7553 = vmatpush1.bf16.msra.mxu0 %v10420_v19  ;;  %v1079_v19 = vld [vmem:[#allocation12 + $0x1e8] sm:$0xff] }
  0xac   :  { %7585 = vmatpush1.bf16.msra.mxu1 %v10424_v37  ;;  %7555 = vmatprep.subr.bf16.mxu0 %v10426_v42  ;;  %v10444_v37 = vpack.c.bf16 %v1070_v16, %v1066_v15  ;;  %v10450_v40 = vpack.c.bf16 %v1079_v19, %v1075_v62  ;;  %v10456_v15 = vpack.c.bf16 %v1078_v46, %v1074_v53  ;;  %v12233_v19 = vmov 0.0  }
  0xad   :  { %7587 = vmatprep.subr.bf16.mxu1 %v10429_v50  ;;  %v1080_v50 = vld [vmem:[#allocation12 + $0x1f0] sm:$0xff] }
  0xae   :  { %v10460_v12 = vpack.c.bf16 %v1080_v50, %v1076_v8 }
  0xaf   :  { %7557 = vmatpush1.bf16.msra.mxu0 %v10432_v49 }
  0xb0   :  { %7589 = vmatpush1.bf16.msra.mxu1 %v10436_v0  ;;  %7559 = vmatprep.subr.bf16.mxu0 %v10438_v10 }
  0xb1   :  { %7591 = vmatprep.subr.bf16.mxu1 %v10441_v27 }
  0xb3   :  { %7561 = vmatpush1.bf16.msra.mxu0 %v10444_v37 }
  0xb4   :  { %7593 = vmatpush1.bf16.msra.mxu1 %v10448_v23  ;;  %7563 = vmatprep.subr.bf16.mxu0 %v10450_v40 }
  0xb5   :  { %7595 = vmatprep.subr.bf16.mxu1 %v10453_v3 }
  0xb7   :  { %7565 = vmatpush1.bf16.msra.mxu0 %v10456_v15 }
  0xb8   :  { %7597 = vmatpush1.bf16.msra.mxu1 %v10460_v12  ;;  %7599 = vmatprep.subr.bf16.mxu0 %v10233_v21  ;;  %v243_v21 = vlaneseq }
  0xb9   :  { %7631 = vmatprep.subr.bf16.mxu1 %v10236_v25 }
  0xba   :  { %1147 = vmatmul.mubr.f32.vlgmr.msra.gmra.mrb[30].mxu0 %v12233_v19  ;;  %v10503_v25 = vshrl.u32 %v243_v21, 7 }
  0xbb   :  { %1218 = vmatmul.mubr.f32.vlgmr.msra.gmra.mrb[30].mxu1 %v12233_v19  ;;  %7601 = vmatpush1.bf16.msra.mxu0 %v10239_v28 }
  0xbc   :  { %7633 = vmatpush1.bf16.msra.mxu1 %v10242_v31  ;;  %7603 = vmatprep.subr.bf16.mxu0 %v10246_v34  ;;  %12234 = vst [vmem:[#allocation36_spill] sm:$0xff] %v10503_v25  ;;  %v12126_v28 = vsub.s32 0, %v10503_v25  ;;  %v241_v31 = vld [vmem:[%s12102_s2] sm:$0xff]  ;;  %v12125_v34 = vsub.s32 1, %v10503_v25  ;;  %v12127_v45 = vsub.s32 7, %v10503_v25  ;;  %s10061_s2 = smov [#allocation4]  }
  0xbd   :  { %7635 = vmatprep.subr.bf16.mxu1 %v10250_v38  ;;  %1412 = vmatprep.mubr.f32.mxu0 %v12233_v19  ;;  %s77_s29 = sshll.u32 %s10061_s2, 4  ;;  %s78_s29 = int_to_ptr.vmem [resolvable:$true] %s77_s29 }
  0xbe   :  { %1483 = vmatprep.mubr.f32.mxu1 %v12233_v19  ;;  %v10512_v38 = vrot.slane %v241_v31, %v12126_v28 }
  0xbf   :  { %7605 = vmatpush1.bf16.msra.mxu0 %v10254_v41  ;;  %v10516_v41 = vrot.slane %v241_v31, %v12125_v34 }
  0xc0   :  { %7637 = vmatpush1.bf16.msra.mxu1 %v10258_v44  ;;  %7607 = vmatprep.subr.bf16.mxu0 %v10262_v48  ;;  %v12124_v48 = vsub.s32 3, %v10503_v25 }
  0xc1   :  { %7639 = vmatprep.subr.bf16.mxu1 %v10266_v51  ;;  %12235 = vst [vmem:[#allocation37_spill] sm:$0xff] %v10516_v41 }
  0xc3   :  { %7609 = vmatpush1.bf16.msra.mxu0 %v10270_v54 }
  0xc4   :  { %7641 = vmatpush1.bf16.msra.mxu1 %v10274_v57  ;;  %7611 = vmatprep.subr.bf16.mxu0 %v10278_v61 }
  0xc5   :  { %7643 = vmatprep.subr.bf16.mxu1 %v10282_v1 }
  0xc7   :  { %7613 = vmatpush1.bf16.msra.mxu0 %v10286_v4 }
  0xc8   :  { %7645 = vmatpush1.bf16.msra.mxu1 %v10290_v7  ;;  %7615 = vmatprep.subr.bf16.mxu0 %v10294_v11  ;;  %v10523_v11 = vrot.slane %v241_v31, %v12124_v48 }
  0xc9   :  { %7647 = vmatprep.subr.bf16.mxu1 %v10298_v13  ;;  %v12123_v13 = vsub.s32 2, %v10503_v25 }
  0xca   :  { %12236 = vst [vmem:[#allocation38_spill] sm:$0xff] %v10523_v11 }
  0xcb   :  { %7617 = vmatpush1.bf16.msra.mxu0 %v10302_v17 }
  0xcc   :  { %7649 = vmatpush1.bf16.msra.mxu1 %v10306_v20  ;;  %7619 = vmatprep.subr.bf16.mxu0 %v10310_v26  ;;  %v10529_v20 = vrot.slane %v241_v31, %v12123_v13 }
  0xcd   :  { %7651 = vmatprep.subr.bf16.mxu1 %v10314_v29 }
  0xce   :  { %12237 = vst [vmem:[#allocation39_spill] sm:$0xff] %v10529_v20 }
  0xcf   :  { %7621 = vmatpush1.bf16.msra.mxu0 %v10318_v33 }
  0xd0   :  { %7653 = vmatpush1.bf16.msra.mxu1 %v10322_v39  ;;  %7623 = vmatprep.subr.bf16.mxu0 %v10326_v43 }
  0xd1   :  { %7655 = vmatprep.subr.bf16.mxu1 %v10330_v47 }
  0xd3   :  { %7625 = vmatpush1.bf16.msra.mxu0 %v10334_v52  ;;  %v12129_v52 = vsub.s32 4, %v10503_v25 }
  0xd4   :  { %7657 = vmatpush1.bf16.msra.mxu1 %v10338_v56  ;;  %7627 = vmatprep.subr.bf16.mxu0 %v10342_v59  ;;  %v265_v59 = vsub.s32 5, %v10503_v25 }
  0xd5   :  { %7659 = vmatprep.subr.bf16.mxu1 %v10346_v2  ;;  %v10536_v62 = vrot.slane %v241_v31, %v12129_v52 }
  0xd6   :  { %v10538_v16 = vrot.slane %v241_v31, %v265_v59 }
  0xd7   :  { %7629 = vmatpush1.bf16.msra.mxu0 %v10350_v6  ;;  %12238 = vst [vmem:[#allocation40_spill] sm:$0xff] %v10536_v62 }
  0xd8   :  { %7661 = vmatpush1.bf16.msra.mxu1 %v10354_v9  ;;  %7663 = vmatprep.subr.bf16.mxu0 %v10358_v63  ;;  %12239 = vst [vmem:[#allocation41_spill] sm:$0xff] %v10538_v16 }
  0xd9   :  { %7695 = vmatprep.subr.bf16.mxu1 %v10362_v24 }
 0x16d   :  { %v933_v44 = vpop.f32.mrb[0].mxu0 }
 0x16e   :  { %v9310_v51 = vadd.f32 %v933_v44, %v10512_v38  ;;  %v1004_v54 = vpop.f32.mrb[0].mxu1  ;;  %v935_v57 = vpop.f32.mrb[1].mxu0 }
 0x16f   :  { %v9311_v61 = vadd.f32 %v935_v57, %v10516_v41  ;;  %v1006_v1 = vpop.f32.mrb[1].mxu1  ;;  %v9326_v29 = vadd.f32 %v1004_v54, %v10529_v20  ;;  %v10548_v57 = vrot.slane %v241_v31, %v12127_v45 }
 0x170   :  { %v7160_v4 = vmul.f32 -1.442695, %v9310_v51  ;;  %v9327_v17 = vadd.f32 %v1006_v1, %v10523_v11 }
 0x171   :  { %v7161_v7 = vmul.f32 -1.442695, %v9311_v61  ;;  %12240 = vst [vmem:[#allocation42_spill] sm:$0xff] %v10548_v57  ;;  %v12128_v61 = vsub.s32 6, %v10503_v25 }
 0x172   :  { %9515 = vpow2.f32 %v7160_v4  ;;  %v7162_v26 = vmul.f32 -1.442695, %v9327_v17 }
 0x173   :  { %9517 = vpow2.f32 %v7161_v7  ;;  %v10554_v4 = vrot.slane %v241_v31, %v12128_v61 }
 0x174   :  { %9519 = vpow2.f32 %v7162_v26 }
 0x175   :  { %9521 = vtanh.f32 %v9326_v29 }
 0x17c   :  { %v9516_v33 = vpop.eup %9515 }
 0x17d   :  { %v9518_v39 = vpop.eup %9517  ;;  %v1231_v43 = vadd.f32 1.0, %v9516_v33 }
 0x17e   :  { %v1237_v47 = vadd.f32 1.0, %v9518_v39  ;;  %v9520_v56 = vpop.eup %9519 }
 0x17f   :  { %9523 = vrcp.f32 %v1231_v43  ;;  %v9522_v2 = vpop.eup %9521  ;;  %v1244_v24 = vadd.f32 1.0, %v9520_v56 }
 0x180   :  { %9525 = vrcp.f32 %v1237_v47 }
 0x181   :  { %9527 = vrcp.f32 %v1244_v24  ;;  %v12249_v24 = vld [vmem:[#allocation33_spill] sm:$0xff] }
 0x189   :  { %v9524_v6 = vpop.eup %9523 }
 0x18a   :  { %v9526_v9 = vpop.eup %9525  ;;  %v1248_v63 = vmul.f32 %v9524_v6, %v9522_v2  ;;  %v12245_v2 = vld [vmem:[#allocation29_spill] sm:$0xff] }
 0x18b   :  { %v1247_v50 = vmul.f32 0.0, %v9526_v9  ;;  %v9528_v7 = vpop.eup %9527  ;;  %v12247_v9 = vld [vmem:[#allocation31_spill] sm:$0xff] }
 0x18d   :  { %v10540_v22 = vadd.f32 %v1248_v63, %v1247_v50  ;;  %v1148_v35 = vpop.f32.mrb[30].mxu0  ;;  %v12250_v50 = vld [vmem:[#allocation34_spill] sm:$0xff] }
 0x18e   :  { %v9356_v53 = vadd.f32 %v1148_v35, %v10536_v62  ;;  %v1219_v46 = vpop.f32.mrb[30].mxu1  ;;  %v1150_v8 = vpop.f32.mrb[31].mxu0  ;;  %v12251_v35 = vld [vmem:[#allocation35_spill] sm:$0xff] }
 0x18f   :  { %9529 = vtanh.f32 %v10540_v22  ;;  %v9357_v21 = vadd.f32 %v1150_v8, %v10538_v16  ;;  %v1221_v44 = vpop.f32.mrb[31].mxu1  ;;  %v9372_v29 = vadd.f32 %v1219_v46, %v10554_v4  ;;  %v1768_v46 = vld [vmem:[#allocation10 + $0x10] sm:$0xff] }
 0x190   :  { %v7163_v51 = vmul.f32 -1.442695, %v9356_v53  ;;  %v9373_v1 = vadd.f32 %v1221_v44, %v10548_v57  ;;  %v1772_v8 = vld [vmem:[#allocation10 + $0x30] sm:$0xff]  ;;  %v1775_v44 = vld [vmem:[#allocation10 + $0x48] sm:$0xff] }
 0x191   :  { %v7164_v54 = vmul.f32 -1.442695, %v9357_v21  ;;  %v10609_v21 = vpack.c.bf16 %v1772_v8, %v1768_v46  ;;  %v1803_v46 = vld [vmem:[#allocation10 + $0x128] sm:$0xff]  ;;  %v1801_v8 = vld [vmem:[#allocation10 + $0x118] sm:$0xff] }
 0x192   :  { %9531 = vpow2.f32 %v7163_v51  ;;  %v7165_v26 = vmul.f32 -1.442695, %v9373_v1  ;;  %v1779_v51 = vld [vmem:[#allocation10 + $0x68] sm:$0xff] }
 0x193   :  { %9533 = vpow2.f32 %v7164_v54  ;;  %v1777_v54 = vld [vmem:[#allocation10 + $0x58] sm:$0xff]  ;;  %v10614_v1 = vpack.c.bf16 %v1779_v51, %v1775_v44 }
 0x194   :  { %9535 = vpow2.f32 %v7165_v26  ;;  %v1778_v26 = vld [vmem:[#allocation10 + $0x60] sm:$0xff]  ;;  %v1805_v51 = vld [vmem:[#allocation10 + $0x138] sm:$0xff] }
 0x195   :  { %9537 = vtanh.f32 %v9372_v29 }
 0x199   :  { %v9530_v17 = vpop.eup %9529 }
 0x19a   :  { %v10557_v33 = vmul.f32 %v9530_v17, %v9528_v7  ;;  %v1781_v7 = vld [vmem:[#allocation10 + $0x78] sm:$0xff]  ;;  %v1774_v17 = vld [vmem:[#allocation10 + $0x40] sm:$0xff] }
 0x19b   :  { %v10616_v29 = vpack.c.bf16 %v1781_v7, %v1777_v54  ;;  %v1798_v54 = vld [vmem:[#allocation10 + $0x100] sm:$0xff] }
 0x19c   :  { %12241 = vst [vmem:[#allocation43_spill] sm:$0xff] %v10557_v33  ;;  %v9532_v39 = vpop.eup %9531  ;;  %1413 = vmatmul.mubr.f32.vlgmr.msra.gmra.mrb[2].mxu0 %v10557_v33  ;;  %1484 = vmatmul.mubr.f32.vlgmr.msra.gmra.mrb[2].mxu1 %v10557_v33  ;;  %v1802_v7 = vld [vmem:[#allocation10 + $0x120] sm:$0xff] }
 0x19d   :  { %v9534_v43 = vpop.eup %9533  ;;  %v1255_v47 = vadd.f32 1.0, %v9532_v39  ;;  %7665 = vmatpush1.bf16.msra.mxu0 %v10366_v30  ;;  %7697 = vmatpush1.bf16.msra.mxu1 %v10370_v32  ;;  %v12242_v30 = vld [vmem:[#allocation26_spill] sm:$0xff]  ;;  %v12243_v32 = vld [vmem:[#allocation27_spill] sm:$0xff]  ;;  %v10618_v39 = vpack.c.bf16 %v1778_v26, %v1774_v17  ;;  %v10652_v17 = vpack.c.bf16 %v1805_v51, %v1801_v8  ;;  %v10654_v26 = vpack.c.bf16 %v1802_v7, %v1798_v54 }
 0x19e   :  { %v1261_v31 = vadd.f32 1.0, %v9534_v43  ;;  %7667 = vmatprep.subr.bf16.mxu0 %v10372_v36  ;;  %7699 = vmatprep.subr.bf16.mxu1 %v10376_v14  ;;  %v12244_v36 = vld [vmem:[#allocation28_spill] sm:$0xff]  ;;  %v9536_v14 = vpop.eup %9535  ;;  %v1814_v8 = vld [vmem:[#allocation10 + $0x180] sm:$0xff] }
 0x19f   :  { %9539 = vrcp.f32 %v1255_v47  ;;  %1627 = vmatprep.mubr.f32.mxu0 %v12233_v19  ;;  %1698 = vmatprep.mubr.f32.mxu1 %v12233_v19  ;;  %v9538_v56 = vpop.eup %9537  ;;  %v1776_v43 = vld [vmem:[#allocation10 + $0x50] sm:$0xff]  ;;  %v1818_v51 = vld [vmem:[#allocation10 + $0x1a0] sm:$0xff] }
 0x1a0   :  { %9541 = vrcp.f32 %v1261_v31  ;;  %v1780_v47 = vld [vmem:[#allocation10 + $0x70] sm:$0xff]  ;;  %v10678_v7 = vpack.c.bf16 %v1818_v51, %v1814_v8  ;;  %v1982_v51 = vld [vmem:[#allocation12 + $0x8] sm:$0xff] }
 0x1a1   :  { %7669 = vmatpush1.bf16.msra.mxu0 %v10382_v55  ;;  %7701 = vmatpush1.bf16.msra.mxu1 %v10386_v58  ;;  %v12246_v55 = vld [vmem:[#allocation30_spill] sm:$0xff]  ;;  %v10621_v31 = vpack.c.bf16 %v1780_v47, %v1776_v43  ;;  %v1800_v43 = vld [vmem:[#allocation10 + $0x110] sm:$0xff] }
 0x1a2   :  { %7671 = vmatprep.subr.bf16.mxu0 %v10388_v60  ;;  %7703 = vmatprep.subr.bf16.mxu1 %v10391_v5  ;;  %v1268_v60 = vadd.f32 1.0, %v9536_v14  ;;  %v12248_v5 = vld [vmem:[#allocation32_spill] sm:$0xff] }
 0x1a3   :  { %v1804_v47 = vld [vmem:[#allocation10 + $0x130] sm:$0xff] }
 0x1a4   :  { %9543 = vrcp.f32 %v1268_v60  ;;  %v1788_v60 = vld [vmem:[#allocation10 + $0xb0] sm:$0xff] }
 0x1a5   :  { %7673 = vmatpush1.bf16.msra.mxu0 %v10396_v18  ;;  %7705 = vmatpush1.bf16.msra.mxu1 %v12242_v30  ;;  %v1783_v30 = vld [vmem:[#allocation10 + $0x88] sm:$0xff] }
 0x1a6   :  { %7675 = vmatprep.subr.bf16.mxu0 %v12243_v32  ;;  %7707 = vmatprep.subr.bf16.mxu1 %v12244_v36  ;;  %v1787_v32 = vld [vmem:[#allocation10 + $0xa8] sm:$0xff]  ;;  %v1785_v36 = vld [vmem:[#allocation10 + $0x98] sm:$0xff] }
 0x1a7   :  { %v10626_v14 = vpack.c.bf16 %v1787_v32, %v1783_v30  ;;  %v10657_v30 = vpack.c.bf16 %v1804_v47, %v1800_v43  ;;  %v1807_v32 = vld [vmem:[#allocation10 + $0x148] sm:$0xff]  ;;  %v1816_v43 = vld [vmem:[#allocation10 + $0x190] sm:$0xff] }
 0x1a8   :  { %v1820_v47 = vld [vmem:[#allocation10 + $0x1b0] sm:$0xff] }
 0x1a9   :  { %v9540_v59 = vpop.eup %9539  ;;  %7677 = vmatpush1.bf16.msra.mxu0 %v12245_v2  ;;  %7709 = vmatpush1.bf16.msra.mxu1 %v12246_v55  ;;  %v1786_v2 = vld [vmem:[#allocation10 + $0xa0] sm:$0xff] }
 0x1aa   :  { %v9542_v58 = vpop.eup %9541  ;;  %v1272_v6 = vmul.f32 %v9540_v59, %v9538_v56  ;;  %7679 = vmatprep.subr.bf16.mxu0 %v12247_v9  ;;  %7711 = vmatprep.subr.bf16.mxu1 %v12248_v5  ;;  %v1789_v56 = vld [vmem:[#allocation10 + $0xb8] sm:$0xff]  ;;  %v1782_v59 = vld [vmem:[#allocation10 + $0x80] sm:$0xff]  ;;  %v1791_v5 = vld [vmem:[#allocation10 + $0xc8] sm:$0xff] }
 0x1ab   :  { %v1271_v18 = vmul.f32 0.0, %v9542_v58  ;;  %v10628_v55 = vpack.c.bf16 %v1789_v56, %v1785_v36  ;;  %v10630_v58 = vpack.c.bf16 %v1786_v2, %v1782_v59  ;;  %v1811_v36 = vld [vmem:[#allocation10 + $0x168] sm:$0xff]  ;;  %v1809_v56 = vld [vmem:[#allocation10 + $0x158] sm:$0xff] }
 0x1ac   :  { %v10662_v59 = vpack.c.bf16 %v1811_v36, %v1807_v32  ;;  %v1813_v2 = vld [vmem:[#allocation10 + $0x178] sm:$0xff]  ;;  %v10681_v32 = vpack.c.bf16 %v1820_v47, %v1816_v43  ;;  %v1823_v36 = vld [vmem:[#allocation10 + $0x1c8] sm:$0xff] }
 0x1ad   :  { %v10579_v63 = vadd.f32 %v1272_v6, %v1271_v18  ;;  %7681 = vmatpush1.bf16.msra.mxu0 %v12249_v24  ;;  %7713 = vmatpush1.bf16.msra.mxu1 %v12250_v50  ;;  %v1784_v6 = vld [vmem:[#allocation10 + $0x90] sm:$0xff]  ;;  %v1795_v18 = vld [vmem:[#allocation10 + $0xe8] sm:$0xff]  ;;  %v1793_v24 = vld [vmem:[#allocation10 + $0xd8] sm:$0xff] }
 0x1ae   :  { %7683 = vmatprep.subr.bf16.mxu0 %v10426_v42  ;;  %7715 = vmatprep.subr.bf16.mxu1 %v12251_v35  ;;  %v9544_v42 = vpop.eup %9543  ;;  %v10633_v9 = vpack.c.bf16 %v1788_v60, %v1784_v6  ;;  %v10638_v50 = vpack.c.bf16 %v1795_v18, %v1791_v5  ;;  %v1797_v35 = vld [vmem:[#allocation10 + $0xf8] sm:$0xff]  ;;  %v1806_v6 = vld [vmem:[#allocation10 + $0x140] sm:$0xff]  ;;  %v10664_v5 = vpack.c.bf16 %v1813_v2, %v1809_v56  ;;  %v1827_v56 = vld [vmem:[#allocation10 + $0x1e8] sm:$0xff] }
 0x1af   :  { %9545 = vtanh.f32 %v10579_v63  ;;  %v1810_v60 = vld [vmem:[#allocation10 + $0x160] sm:$0xff]  ;;  %v1825_v2 = vld [vmem:[#allocation10 + $0x1d8] sm:$0xff]  ;;  %v1986_v43 = vld [vmem:[#allocation12 + $0x28] sm:$0xff] }
 0x1b0   :  { %v10666_v18 = vpack.c.bf16 %v1810_v60, %v1806_v6  ;;  %v10686_v6 = vpack.c.bf16 %v1827_v56, %v1823_v36  ;;  %v1829_v60 = vld [vmem:[#allocation10 + $0x1f8] sm:$0xff]  ;;  %v10698_v36 = vpack.c.bf16 %v1986_v43, %v1982_v51 }
 0x1b1   :  { %7685 = vmatpush1.bf16.msra.mxu0 %v10432_v49  ;;  %7717 = vmatpush1.bf16.msra.mxu1 %v10436_v0  ;;  %v1771_v0 = vld [vmem:[#allocation10 + $0x28] sm:$0xff]  ;;  %v1984_v47 = vld [vmem:[#allocation12 + $0x18] sm:$0xff] }
 0x1b2   :  { %7687 = vmatprep.subr.bf16.mxu0 %v10438_v10  ;;  %7719 = vmatprep.subr.bf16.mxu1 %v10441_v27  ;;  %v1769_v10 = vld [vmem:[#allocation10 + $0x18] sm:$0xff] }
 0x1b3   :  { %v1988_v56 = vld [vmem:[#allocation12 + $0x38] sm:$0xff] }
 0x1b5   :  { %7689 = vmatpush1.bf16.msra.mxu0 %v10444_v37  ;;  %7721 = vmatpush1.bf16.msra.mxu1 %v10448_v23  ;;  %v1767_v37 = vld [vmem:[#allocation10 + $0x8] sm:$0xff]  ;;  %v1773_v23 = vld [vmem:[#allocation10 + $0x38] sm:$0xff] }
 0x1b6   :  { %7691 = vmatprep.subr.bf16.mxu0 %v10450_v40  ;;  %7723 = vmatprep.subr.bf16.mxu1 %v10453_v3  ;;  %v10602_v27 = vpack.c.bf16 %v1771_v0, %v1767_v37  ;;  %v1766_v40 = vld [vmem:[#allocation10] sm:$0xff]  ;;  %v10640_v37 = vpack.c.bf16 %v1797_v35, %v1793_v24  ;;  %v1808_v24 = vld [vmem:[#allocation10 + $0x150] sm:$0xff] }
 0x1b7   :  { %v1770_v3 = vld [vmem:[#allocation10 + $0x20] sm:$0xff]  ;;  %v1812_v35 = vld [vmem:[#allocation10 + $0x170] sm:$0xff] }
 0x1b9   :  { %v9546_v53 = vpop.eup %9545  ;;  %7693 = vmatpush1.bf16.msra.mxu0 %v10456_v15  ;;  %7725 = vmatpush1.bf16.msra.mxu1 %v10460_v12  ;;  %v10604_v15 = vpack.c.bf16 %v1773_v23, %v1769_v10  ;;  %v10606_v12 = vpack.c.bf16 %v1770_v3, %v1766_v40  ;;  %v1792_v10 = vld [vmem:[#allocation10 + $0xd0] sm:$0xff]  ;;  %v1799_v3 = vld [vmem:[#allocation10 + $0x108] sm:$0xff] }
 0x1ba   :  { %v10596_v49 = vmul.f32 %v9546_v53, %v9544_v42  ;;  %7727 = vmatprep.subr.bf16.mxu0 %v10602_v27  ;;  %v1790_v42 = vld [vmem:[#allocation10 + $0xc0] sm:$0xff]  ;;  %v1796_v23 = vld [vmem:[#allocation10 + $0xf0] sm:$0xff]  ;;  %v10650_v44 = vpack.c.bf16 %v1803_v46, %v1799_v3  ;;  %v1821_v46 = vld [vmem:[#allocation10 + $0x1b8] sm:$0xff] }
 0x1bb   :  { %7759 = vmatprep.subr.bf16.mxu1 %v10604_v15  ;;  %v1794_v53 = vld [vmem:[#allocation10 + $0xe0] sm:$0xff]  ;;  %v10645_v40 = vpack.c.bf16 %v1796_v23, %v1792_v10  ;;  %v1819_v10 = vld [vmem:[#allocation10 + $0x1a8] sm:$0xff]  ;;  %v1817_v23 = vld [vmem:[#allocation10 + $0x198] sm:$0xff] }
 0x1bc   :  { %12252 = vst [vmem:[#allocation26_spill] sm:$0xff] %v10596_v49  ;;  %1628 = vmatmul.mubr.f32.vlgmr.msra.gmra.mrb[28].mxu0 %v10596_v49  ;;  %1699 = vmatmul.mubr.f32.vlgmr.msra.gmra.mrb[28].mxu1 %v10596_v49  ;;  %v10642_v0 = vpack.c.bf16 %v1794_v53, %v1790_v42  ;;  %v10669_v42 = vpack.c.bf16 %v1812_v35, %v1808_v24  ;;  %v1815_v53 = vld [vmem:[#allocation10 + $0x188] sm:$0xff]  ;;  %v1822_v24 = vld [vmem:[#allocation10 + $0x1c0] sm:$0xff] }
 0x1bd   :  { %1894 = vmatprep.mubr.f32.mxu0 %v12233_v19  ;;  %1965 = vmatprep.mubr.f32.mxu1 %v12233_v19  ;;  %v10674_v3 = vpack.c.bf16 %v1819_v10, %v1815_v53  ;;  %v10676_v54 = vpack.c.bf16 %v1821_v46, %v1817_v23  ;;  %v1826_v35 = vld [vmem:[#allocation10 + $0x1e0] sm:$0xff]  ;;  %v10688_v53 = vpack.c.bf16 %v1829_v60, %v1825_v2  ;;  %v1824_v23 = vld [vmem:[#allocation10 + $0x1d0] sm:$0xff] }
 0x1be   :  { %7729 = vmatpush1.bf16.msra.mxu0 %v10606_v12  ;;  %7761 = vmatpush1.bf16.msra.mxu1 %v10609_v21  ;;  %v10690_v10 = vpack.c.bf16 %v1826_v35, %v1822_v24  ;;  %v1828_v46 = vld [vmem:[#allocation10 + $0x1f0] sm:$0xff]  ;;  %v10700_v2 = vpack.c.bf16 %v1988_v56, %v1984_v47 }
 0x1bf   :  { %7731 = vmatprep.subr.bf16.mxu0 %v10614_v1  ;;  %7763 = vmatprep.subr.bf16.mxu1 %v10616_v29  ;;  %v10693_v8 = vpack.c.bf16 %v1828_v46, %v1824_v23 }
 0x1c2   :  { %7733 = vmatpush1.bf16.msra.mxu0 %v10618_v39  ;;  %7765 = vmatpush1.bf16.msra.mxu1 %v10621_v31 }
 0x1c3   :  { %7735 = vmatprep.subr.bf16.mxu0 %v10626_v14  ;;  %7767 = vmatprep.subr.bf16.mxu1 %v10628_v55 }
 0x1c6   :  { %7737 = vmatpush1.bf16.msra.mxu0 %v10630_v58  ;;  %7769 = vmatpush1.bf16.msra.mxu1 %v10633_v9 }
 0x1c7   :  { %7739 = vmatprep.subr.bf16.mxu0 %v10638_v50  ;;  %7771 = vmatprep.subr.bf16.mxu1 %v10640_v37 }
 0x1ca   :  { %7741 = vmatpush1.bf16.msra.mxu0 %v10642_v0  ;;  %7773 = vmatpush1.bf16.msra.mxu1 %v10645_v40 }
 0x1cb   :  { %7743 = vmatprep.subr.bf16.mxu0 %v10650_v44  ;;  %7775 = vmatprep.subr.bf16.mxu1 %v10652_v17 }
 0x1ce   :  { %7745 = vmatpush1.bf16.msra.mxu0 %v10654_v26  ;;  %7777 = vmatpush1.bf16.msra.mxu1 %v10657_v30 }
 0x1cf   :  { %7747 = vmatprep.subr.bf16.mxu0 %v10662_v59  ;;  %7779 = vmatprep.subr.bf16.mxu1 %v10664_v5 }
 0x1d2   :  { %7749 = vmatpush1.bf16.msra.mxu0 %v10666_v18  ;;  %7781 = vmatpush1.bf16.msra.mxu1 %v10669_v42 }
 0x1d3   :  { %7751 = vmatprep.subr.bf16.mxu0 %v10674_v3  ;;  %7783 = vmatprep.subr.bf16.mxu1 %v10676_v54 }
 0x1d6   :  { %7753 = vmatpush1.bf16.msra.mxu0 %v10678_v7  ;;  %7785 = vmatpush1.bf16.msra.mxu1 %v10681_v32 }
 0x1d7   :  { %7755 = vmatprep.subr.bf16.mxu0 %v10686_v6  ;;  %7787 = vmatprep.subr.bf16.mxu1 %v10688_v53 }
 0x1da   :  { %7757 = vmatpush1.bf16.msra.mxu0 %v10690_v10  ;;  %7789 = vmatpush1.bf16.msra.mxu1 %v10693_v8 }
 0x1db   :  { %7791 = vmatprep.subr.bf16.mxu0 %v10698_v36  ;;  %7823 = vmatprep.subr.bf16.mxu1 %v10700_v2 }
 0x26f   :  { %v1414_v60 = vpop.f32.mrb[2].mxu0  ;;  %v1485_v24 = vpop.f32.mrb[2].mxu1 }
 0x270   :  { %v9312_v35 = vadd.f32 %v1414_v60, %v10512_v38  ;;  %v1416_v23 = vpop.f32.mrb[3].mxu0  ;;  %v1487_v46 = vpop.f32.mrb[3].mxu1  ;;  %v9328_v47 = vadd.f32 %v1485_v24, %v10529_v20  ;;  %v1998_v20 = vld [vmem:[#allocation12 + $0x88] sm:$0xff] }
 0x271   :  { %v9313_v13 = vadd.f32 %v1416_v23, %v10516_v41  ;;  %v9329_v51 = vadd.f32 %v1487_v46, %v10523_v11  ;;  %v2002_v11 = vld [vmem:[#allocation12 + $0xa8] sm:$0xff]  ;;  %v2000_v41 = vld [vmem:[#allocation12 + $0x98] sm:$0xff] }
 0x272   :  { %v7166_v48 = vmul.f32 -1.442695, %v9312_v35 }
 0x273   :  { %v7167_v34 = vmul.f32 -1.442695, %v9313_v13  ;;  %v7168_v43 = vmul.f32 -1.442695, %v9329_v51 }
 0x274   :  { %9547 = vpow2.f32 %v7166_v48 }
 0x275   :  { %9549 = vpow2.f32 %v7167_v34 }
 0x276   :  { %9551 = vpow2.f32 %v7168_v43 }
 0x277   :  { %9553 = vtanh.f32 %v9328_v47 }
 0x27e   :  { %v9548_v56 = vpop.eup %9547 }
 0x27f   :  { %v9550_v28 = vpop.eup %9549  ;;  %v1712_v45 = vadd.f32 1.0, %v9548_v56 }
 0x280   :  { %v1718_v61 = vadd.f32 1.0, %v9550_v28  ;;  %v9552_v60 = vpop.eup %9551 }
 0x281   :  { %9555 = vrcp.f32 %v1712_v45  ;;  %v9554_v52 = vpop.eup %9553  ;;  %v1725_v48 = vadd.f32 1.0, %v9552_v60  ;;  %v1985_v60 = vld [vmem:[#allocation12 + $0x20] sm:$0xff] }
 0x282   :  { %9557 = vrcp.f32 %v1718_v61 }
 0x283   :  { %9559 = vrcp.f32 %v1725_v48  ;;  %v1994_v48 = vld [vmem:[#allocation12 + $0x68] sm:$0xff] }
 0x28b   :  { %v9556_v23 = vpop.eup %9555 }
 0x28c   :  { %v9558_v35 = vpop.eup %9557  ;;  %v1729_v13 = vmul.f32 %v9556_v23, %v9554_v52  ;;  %v1983_v23 = vld [vmem:[#allocation12 + $0x10] sm:$0xff] }
 0x28d   :  { %v1728_v34 = vmul.f32 %v9558_v35, %v10540_v22  ;;  %v1981_v22 = vld [vmem:[#allocation12] sm:$0xff]  ;;  %v1987_v35 = vld [vmem:[#allocation12 + $0x30] sm:$0xff]  ;;  %v9560_v25 = vpop.eup %9559 }
 0x28f   :  { %v10709_v46 = vadd.f32 %v1729_v13, %v1728_v34  ;;  %v1629_v51 = vpop.f32.mrb[28].mxu0  ;;  %v1700_v24 = vpop.f32.mrb[28].mxu1  ;;  %v1990_v13 = vld [vmem:[#allocation12 + $0x48] sm:$0xff]  ;;  %v1992_v34 = vld [vmem:[#allocation12 + $0x58] sm:$0xff] }
 0x290   :  { %v9354_v56 = vadd.f32 %v1629_v51, %v10536_v62  ;;  %v1631_v43 = vpop.f32.mrb[29].mxu0  ;;  %v1702_v47 = vpop.f32.mrb[29].mxu1  ;;  %v1996_v51 = vld [vmem:[#allocation12 + $0x78] sm:$0xff]  ;;  %v1991_v62 = vld [vmem:[#allocation12 + $0x50] sm:$0xff] }
 0x291   :  { %12253 = vst [vmem:[#allocation27_spill] sm:$0xff] %v10709_v46  ;;  %v9355_v28 = vadd.f32 %v1631_v43, %v10538_v16  ;;  %9561 = vtanh.f32 %v10709_v46  ;;  %v9371_v52 = vadd.f32 %v1702_v47, %v10548_v57  ;;  %v10715_v43 = vpack.c.bf16 %v1985_v60, %v1981_v22  ;;  %v1995_v46 = vld [vmem:[#allocation12 + $0x70] sm:$0xff] }
 0x292   :  { %v7169_v45 = vmul.f32 -1.442695, %v9354_v56  ;;  %v10717_v16 = vpack.c.bf16 %v1987_v35, %v1983_v23  ;;  %v1989_v56 = vld [vmem:[#allocation12 + $0x40] sm:$0xff]  ;;  %v10724_v57 = vpack.c.bf16 %v1996_v51, %v1992_v34  ;;  %v2003_v51 = vld [vmem:[#allocation12 + $0xb0] sm:$0xff] }
 0x293   :  { %v7170_v61 = vmul.f32 -1.442695, %v9355_v28  ;;  %v7171_v33 = vmul.f32 -1.442695, %v9371_v52  ;;  %12254 = vst [vmem:[#allocation28_spill] sm:$0xff] %v10715_v43  ;;  %v1993_v28 = vld [vmem:[#allocation12 + $0x60] sm:$0xff] }
 0x294   :  { %9563 = vpow2.f32 %v7169_v45  ;;  %12255 = vst [vmem:[#allocation29_spill] sm:$0xff] %v10717_v16  ;;  %v9370_v45 = vadd.f32 %v1700_v24, %v10554_v4  ;;  %12258 = vst [vmem:[#allocation32_spill] sm:$0xff] %v10724_v57  ;;  %v2004_v52 = vld [vmem:[#allocation12 + $0xb8] sm:$0xff]  ;;  %v1997_v24 = vld [vmem:[#allocation12 + $0x80] sm:$0xff] }
 0x295   :  { %9565 = vpow2.f32 %v7170_v61  ;;  %v10722_v61 = vpack.c.bf16 %v1994_v48, %v1990_v13  ;;  %v2001_v35 = vld [vmem:[#allocation12 + $0xa0] sm:$0xff]  ;;  %v10736_v48 = vpack.c.bf16 %v2002_v11, %v1998_v20  ;;  %v10738_v34 = vpack.c.bf16 %v2004_v52, %v2000_v41 }
 0x296   :  { %9567 = vpow2.f32 %v7171_v33  ;;  %v1999_v33 = vld [vmem:[#allocation12 + $0x90] sm:$0xff]  ;;  %v10744_v11 = vpack.c.bf16 %v2001_v35, %v1997_v24  ;;  %v2005_v20 = vld [vmem:[#allocation12 + $0xc0] sm:$0xff] }
 0x297   :  { %12257 = vst [vmem:[#allocation31_spill] sm:$0xff] %v10722_v61  ;;  %9569 = vtanh.f32 %v9370_v45  ;;  %12261 = vst [vmem:[#allocation35_spill] sm:$0xff] %v10736_v48  ;;  %v10746_v41 = vpack.c.bf16 %v2003_v51, %v1999_v33  ;;  %v2013_v33 = vld [vmem:[#allocation12 + $0x100] sm:$0xff] }
 0x298   :  { %12262 = vst [vmem:[#allocation44_spill] sm:$0xff] %v10738_v34  ;;  %12263 = vst [vmem:[#allocation45_spill] sm:$0xff] %v10744_v11  ;;  %v2017_v51 = vld [vmem:[#allocation12 + $0x120] sm:$0xff] }
 0x299   :  { %12264 = vst [vmem:[#allocation46_spill] sm:$0xff] %v10746_v41 }
 0x29b   :  { %v9562_v49 = vpop.eup %9561 }
 0x29c   :  { %v10720_v47 = vmul.f32 %v9562_v49, %v9560_v25  ;;  %v10730_v25 = vpack.c.bf16 %v1993_v28, %v1989_v56  ;;  %v10732_v49 = vpack.c.bf16 %v1995_v46, %v1991_v62  ;;  %v2010_v56 = vld [vmem:[#allocation12 + $0xe8] sm:$0xff]  ;;  %v2008_v28 = vld [vmem:[#allocation12 + $0xd8] sm:$0xff]  ;;  %v2009_v46 = vld [vmem:[#allocation12 + $0xe0] sm:$0xff] }
 0x29d   :  { %v2012_v62 = vld [vmem:[#allocation12 + $0xf8] sm:$0xff]  ;;  %v10756_v24 = vpack.c.bf16 %v2009_v46, %v2005_v20 }
 0x29e   :  { %12256 = vst [vmem:[#allocation30_spill] sm:$0xff] %v10720_v47  ;;  %v9564_v22 = vpop.eup %9563  ;;  %1895 = vmatmul.mubr.f32.vlgmr.msra.gmra.mrb[4].mxu0 %v10720_v47  ;;  %1966 = vmatmul.mubr.f32.vlgmr.msra.gmra.mrb[4].mxu1 %v10720_v47  ;;  %12259 = vst [vmem:[#allocation33_spill] sm:$0xff] %v10730_v25  ;;  %v10752_v52 = vpack.c.bf16 %v2012_v62, %v2008_v28  ;;  %v2018_v47 = vld [vmem:[#allocation12 + $0x128] sm:$0xff]  ;;  %v2015_v28 = vld [vmem:[#allocation12 + $0x110] sm:$0xff] }
 0x29f   :  { %v9566_v60 = vpop.eup %9565  ;;  %v1736_v23 = vadd.f32 1.0, %v9564_v22  ;;  %7793 = vmatpush1.bf16.msra.mxu0 %v10715_v43  ;;  %7825 = vmatpush1.bf16.msra.mxu1 %v10717_v16  ;;  %12260 = vst [vmem:[#allocation34_spill] sm:$0xff] %v10732_v49  ;;  %v2006_v22 = vld [vmem:[#allocation12 + $0xc8] sm:$0xff]  ;;  %12267 = vst [vmem:[#allocation49_spill] sm:$0xff] %v10756_v24  ;;  %v2019_v62 = vld [vmem:[#allocation12 + $0x130] sm:$0xff] }
 0x2a0   :  { %v1742_v13 = vadd.f32 1.0, %v9566_v60  ;;  %7795 = vmatprep.subr.bf16.mxu0 %v10722_v61  ;;  %7827 = vmatprep.subr.bf16.mxu1 %v10724_v57  ;;  %v10750_v45 = vpack.c.bf16 %v2010_v56, %v2006_v22  ;;  %12266 = vst [vmem:[#allocation48_spill] sm:$0xff] %v10752_v52  ;;  %v2007_v60 = vld [vmem:[#allocation12 + $0xd0] sm:$0xff]  ;;  %v2028_v20 = vld [vmem:[#allocation12 + $0x178] sm:$0xff] }
 0x2a1   :  { %9571 = vrcp.f32 %v1736_v23  ;;  %2109 = vmatprep.mubr.f32.mxu0 %v12233_v19  ;;  %2180 = vmatprep.mubr.f32.mxu1 %v12233_v19  ;;  %v2011_v23 = vld [vmem:[#allocation12 + $0xf0] sm:$0xff] }
 0x2a2   :  { %9573 = vrcp.f32 %v1742_v13  ;;  %12265 = vst [vmem:[#allocation47_spill] sm:$0xff] %v10750_v45  ;;  %v2014_v13 = vld [vmem:[#allocation12 + $0x108] sm:$0xff]  ;;  %v10758_v35 = vpack.c.bf16 %v2011_v23, %v2007_v60  ;;  %v10768_v23 = vpack.c.bf16 %v2017_v51, %v2013_v33  ;;  %v2027_v16 = vld [vmem:[#allocation12 + $0x170] sm:$0xff] }
 0x2a3   :  { %7797 = vmatpush1.bf16.msra.mxu0 %v10730_v25  ;;  %7829 = vmatpush1.bf16.msra.mxu1 %v10732_v49  ;;  %v2016_v25 = vld [vmem:[#allocation12 + $0x118] sm:$0xff]  ;;  %v10762_v22 = vpack.c.bf16 %v2018_v47, %v2014_v13  ;;  %v2021_v47 = vld [vmem:[#allocation12 + $0x140] sm:$0xff]  ;;  %v2034_v51 = vld [vmem:[#allocation12 + $0x1a8] sm:$0xff] }
 0x2a4   :  { %7799 = vmatprep.subr.bf16.mxu0 %v10736_v48  ;;  %7831 = vmatprep.subr.bf16.mxu1 %v10738_v34  ;;  %v2020_v49 = vld [vmem:[#allocation12 + $0x138] sm:$0xff]  ;;  %12268 = vst [vmem:[#allocation50_spill] sm:$0xff] %v10758_v35  ;;  %v2022_v34 = vld [vmem:[#allocation12 + $0x148] sm:$0xff] }
 0x2a5   :  { %v10764_v56 = vpack.c.bf16 %v2020_v49, %v2016_v25  ;;  %v2026_v48 = vld [vmem:[#allocation12 + $0x168] sm:$0xff]  ;;  %v2025_v25 = vld [vmem:[#allocation12 + $0x160] sm:$0xff] }
 0x2a6   :  { %v10774_v57 = vpack.c.bf16 %v2026_v48, %v2022_v34  ;;  %v2029_v34 = vld [vmem:[#allocation12 + $0x180] sm:$0xff] }
 0x2a7   :  { %7801 = vmatpush1.bf16.msra.mxu0 %v10744_v11  ;;  %7833 = vmatpush1.bf16.msra.mxu1 %v10746_v41  ;;  %v9568_v11 = vpop.eup %9567  ;;  %v2024_v41 = vld [vmem:[#allocation12 + $0x158] sm:$0xff] }
 0x2a8   :  { %7803 = vmatprep.subr.bf16.mxu0 %v10750_v45  ;;  %7835 = vmatprep.subr.bf16.mxu1 %v10752_v52  ;;  %v9570_v46 = vpop.eup %9569  ;;  %v10770_v52 = vpack.c.bf16 %v2019_v62, %v2015_v28  ;;  %v1749_v45 = vadd.f32 1.0, %v9568_v11  ;;  %v10776_v61 = vpack.c.bf16 %v2028_v20, %v2024_v41  ;;  %v2032_v28 = vld [vmem:[#allocation12 + $0x198] sm:$0xff]  ;;  %v10783_v11 = vpack.c.bf16 %v2025_v25, %v2021_v47  ;;  %v2033_v41 = vld [vmem:[#allocation12 + $0x1a0] sm:$0xff] }
 0x2a9   :  { %v2036_v62 = vld [vmem:[#allocation12 + $0x1b8] sm:$0xff] }
 0x2aa   :  { %9575 = vrcp.f32 %v1749_v45  ;;  %v10791_v20 = vpack.c.bf16 %v2036_v62, %v2032_v28  ;;  %v2044_v47 = vld [vmem:[#allocation12 + $0x1f8] sm:$0xff]  ;;  %v2039_v28 = vld [vmem:[#allocation12 + $0x1d0] sm:$0xff] }
 0x2ab   :  { %v9572_v60 = vpop.eup %9571  ;;  %7805 = vmatpush1.bf16.msra.mxu0 %v10756_v24  ;;  %7837 = vmatpush1.bf16.msra.mxu1 %v10758_v35  ;;  %v2023_v24 = vld [vmem:[#allocation12 + $0x150] sm:$0xff]  ;;  %v2030_v35 = vld [vmem:[#allocation12 + $0x188] sm:$0xff] }
 0x2ac   :  { %v9574_v49 = vpop.eup %9573  ;;  %v1753_v13 = vmul.f32 %v9572_v60, %v9570_v46  ;;  %7807 = vmatprep.subr.bf16.mxu0 %v10762_v22  ;;  %7839 = vmatprep.subr.bf16.mxu1 %v10764_v56  ;;  %v10785_v48 = vpack.c.bf16 %v2027_v16, %v2023_v24  ;;  %v2031_v46 = vld [vmem:[#allocation12 + $0x190] sm:$0xff]  ;;  %v10796_v16 = vpack.c.bf16 %v2033_v41, %v2029_v34  ;;  %v2037_v24 = vld [vmem:[#allocation12 + $0x1c0] sm:$0xff] }
 0x2ad   :  { %v1752_v33 = vmul.f32 %v9574_v49, %v10579_v63  ;;  %v10789_v63 = vpack.c.bf16 %v2034_v51, %v2030_v35  ;;  %v2035_v60 = vld [vmem:[#allocation12 + $0x1b0] sm:$0xff]  ;;  %v2038_v49 = vld [vmem:[#allocation12 + $0x1c8] sm:$0xff]  ;;  %v2041_v51 = vld [vmem:[#allocation12 + $0x1e0] sm:$0xff] }
 0x2ae   :  { %v10798_v45 = vpack.c.bf16 %v2035_v60, %v2031_v46  ;;  %v2043_v62 = vld [vmem:[#allocation12 + $0x1f0] sm:$0xff]  ;;  %v10808_v34 = vpack.c.bf16 %v2041_v51, %v2037_v24  ;;  %v12276_v24 = vld [vmem:[#allocation42_spill] sm:$0xff] }
 0x2af   :  { %v10779_v43 = vadd.f32 %v1753_v13, %v1752_v33  ;;  %7809 = vmatpush1.bf16.msra.mxu0 %v10768_v23  ;;  %7841 = vmatpush1.bf16.msra.mxu1 %v10770_v52  ;;  %v2042_v13 = vld [vmem:[#allocation12 + $0x1e8] sm:$0xff]  ;;  %v2040_v33 = vld [vmem:[#allocation12 + $0x1d8] sm:$0xff]  ;;  %v10810_v41 = vpack.c.bf16 %v2043_v62, %v2039_v28 }
 0x2b0   :  { %7811 = vmatprep.subr.bf16.mxu0 %v10774_v57  ;;  %7843 = vmatprep.subr.bf16.mxu1 %v10776_v61  ;;  %v10802_v35 = vpack.c.bf16 %v2042_v13, %v2038_v49  ;;  %v10804_v25 = vpack.c.bf16 %v2044_v47, %v2040_v33 }
 0x2b1   :  { %9577 = vtanh.f32 %v10779_v43 }
 0x2b3   :  { %7813 = vmatpush1.bf16.msra.mxu0 %v10783_v11  ;;  %7845 = vmatpush1.bf16.msra.mxu1 %v10785_v48 }
 0x2b4   :  { %7815 = vmatprep.subr.bf16.mxu0 %v10789_v63  ;;  %7847 = vmatprep.subr.bf16.mxu1 %v10791_v20  ;;  %v9576_v46 = vpop.eup %9575 }
 0x2b7   :  { %7817 = vmatpush1.bf16.msra.mxu0 %v10796_v16  ;;  %7849 = vmatpush1.bf16.msra.mxu1 %v10798_v45 }
 0x2b8   :  { %7819 = vmatprep.subr.bf16.mxu0 %v10802_v35  ;;  %7851 = vmatprep.subr.bf16.mxu1 %v10804_v25 }
 0x2bb   :  { %v9578_v60 = vpop.eup %9577  ;;  %7821 = vmatpush1.bf16.msra.mxu0 %v10808_v34  ;;  %7853 = vmatpush1.bf16.msra.mxu1 %v10810_v41 }
 0x2bc   :  { %v10816_v49 = vmul.f32 %v9578_v60, %v9576_v46  ;;  %7855 = vmatprep.subr.bf16.mxu0 %v10602_v27  ;;  %7887 = vmatprep.subr.bf16.mxu1 %v10604_v15 }
 0x2be   :  { %12269 = vst [vmem:[#allocation51_spill] sm:$0xff] %v10816_v49  ;;  %2110 = vmatmul.mubr.f32.vlgmr.msra.gmra.mrb[26].mxu0 %v10816_v49  ;;  %2181 = vmatmul.mubr.f32.vlgmr.msra.gmra.mrb[26].mxu1 %v10816_v49 }
 0x2bf   :  { %7857 = vmatpush1.bf16.msra.mxu0 %v10606_v12  ;;  %7889 = vmatpush1.bf16.msra.mxu1 %v10609_v21 }
 0x2c0   :  { %7859 = vmatprep.subr.bf16.mxu0 %v10614_v1  ;;  %7891 = vmatprep.subr.bf16.mxu1 %v10616_v29  ;;  %v12270_v29 = vld [vmem:[#allocation37_spill] sm:$0xff] }
 0x2c1   :  { %2376 = vmatprep.mubr.f32.mxu0 %v12233_v19  ;;  %2447 = vmatprep.mubr.f32.mxu1 %v12233_v19 }
 0x2c3   :  { %7861 = vmatpush1.bf16.msra.mxu0 %v10618_v39  ;;  %7893 = vmatpush1.bf16.msra.mxu1 %v10621_v31 }
 0x2c4   :  { %7863 = vmatprep.subr.bf16.mxu0 %v10626_v14  ;;  %7895 = vmatprep.subr.bf16.mxu1 %v10628_v55  ;;  %v12271_v55 = vld [vmem:[#allocation38_spill] sm:$0xff] }
 0x2c7   :  { %7865 = vmatpush1.bf16.msra.mxu0 %v10630_v58  ;;  %7897 = vmatpush1.bf16.msra.mxu1 %v10633_v9 }
 0x2c8   :  { %7867 = vmatprep.subr.bf16.mxu0 %v10638_v50  ;;  %7899 = vmatprep.subr.bf16.mxu1 %v10640_v37  ;;  %v12272_v50 = vld [vmem:[#allocation39_spill] sm:$0xff] }
 0x2cb   :  { %7869 = vmatpush1.bf16.msra.mxu0 %v10642_v0  ;;  %7901 = vmatpush1.bf16.msra.mxu1 %v10645_v40 }
 0x2cc   :  { %7871 = vmatprep.subr.bf16.mxu0 %v10650_v44  ;;  %7903 = vmatprep.subr.bf16.mxu1 %v10652_v17 }
 0x2cf   :  { %7873 = vmatpush1.bf16.msra.mxu0 %v10654_v26  ;;  %7905 = vmatpush1.bf16.msra.mxu1 %v10657_v30 }
 0x2d0   :  { %7875 = vmatprep.subr.bf16.mxu0 %v10662_v59  ;;  %7907 = vmatprep.subr.bf16.mxu1 %v10664_v5 }
 0x2d3   :  { %7877 = vmatpush1.bf16.msra.mxu0 %v10666_v18  ;;  %7909 = vmatpush1.bf16.msra.mxu1 %v10669_v42 }
 0x2d4   :  { %7879 = vmatprep.subr.bf16.mxu0 %v10674_v3  ;;  %7911 = vmatprep.subr.bf16.mxu1 %v10676_v54  ;;  %v12273_v3 = vld [vmem:[#allocation27_spill] sm:$0xff] }
 0x2d7   :  { %7881 = vmatpush1.bf16.msra.mxu0 %v10678_v7  ;;  %7913 = vmatpush1.bf16.msra.mxu1 %v10681_v32 }
 0x2d8   :  { %7883 = vmatprep.subr.bf16.mxu0 %v10686_v6  ;;  %7915 = vmatprep.subr.bf16.mxu1 %v10688_v53  ;;  %v12274_v53 = vld [vmem:[#allocation40_spill] sm:$0xff] }
 0x2db   :  { %7885 = vmatpush1.bf16.msra.mxu0 %v10690_v10  ;;  %7917 = vmatpush1.bf16.msra.mxu1 %v10693_v8 }
 0x2dc   :  { %7919 = vmatprep.subr.bf16.mxu0 %v10698_v36  ;;  %7951 = vmatprep.subr.bf16.mxu1 %v10700_v2  ;;  %v12275_v2 = vld [vmem:[#allocation41_spill] sm:$0xff] }
 0x371   :  { %v1896_v27 = vpop.f32.mrb[4].mxu0  ;;  %v1967_v15 = vpop.f32.mrb[4].mxu1 }
 0x372   :  { %v9314_v12 = vadd.f32 %v1896_v27, %v10512_v38  ;;  %v1898_v21 = vpop.f32.mrb[5].mxu0  ;;  %v1969_v1 = vpop.f32.mrb[5].mxu1  ;;  %v9330_v37 = vadd.f32 %v1967_v15, %v12272_v50 }
 0x373   :  { %v9315_v39 = vadd.f32 %v1898_v21, %v12270_v29  ;;  %v9331_v58 = vadd.f32 %v1969_v1, %v12271_v55  ;;  %v12278_v1 = vld [vmem:[#allocation28_spill] sm:$0xff] }
 0x374   :  { %v7172_v31 = vmul.f32 -1.442695, %v9314_v12 }
 0x375   :  { %v7173_v14 = vmul.f32 -1.442695, %v9315_v39  ;;  %v7174_v9 = vmul.f32 -1.442695, %v9331_v58  ;;  %v12279_v39 = vld [vmem:[#allocation29_spill] sm:$0xff]  ;;  %v12281_v58 = vld [vmem:[#allocation32_spill] sm:$0xff] }
 0x376   :  { %9579 = vpow2.f32 %v7172_v31 }
 0x377   :  { %9581 = vpow2.f32 %v7173_v14  ;;  %v12280_v14 = vld [vmem:[#allocation31_spill] sm:$0xff] }
 0x378   :  { %9583 = vpow2.f32 %v7174_v9  ;;  %v12282_v9 = vld [vmem:[#allocation33_spill] sm:$0xff] }
 0x379   :  { %9585 = vtanh.f32 %v9330_v37  ;;  %v12283_v37 = vld [vmem:[#allocation34_spill] sm:$0xff] }
 0x380   :  { %v9580_v0 = vpop.eup %9579 }
 0x381   :  { %v9582_v40 = vpop.eup %9581  ;;  %v2194_v44 = vadd.f32 1.0, %v9580_v0  ;;  %v12284_v0 = vld [vmem:[#allocation35_spill] sm:$0xff] }
 0x382   :  { %v2200_v17 = vadd.f32 1.0, %v9582_v40  ;;  %v9584_v26 = vpop.eup %9583  ;;  %v12285_v40 = vld [vmem:[#allocation44_spill] sm:$0xff] }
 0x383   :  { %9587 = vrcp.f32 %v2194_v44  ;;  %v9586_v30 = vpop.eup %9585  ;;  %v2207_v42 = vadd.f32 1.0, %v9584_v26  ;;  %v12286_v44 = vld [vmem:[#allocation45_spill] sm:$0xff]  ;;  %v12288_v26 = vld [vmem:[#allocation47_spill] sm:$0xff] }
 0x384   :  { %9589 = vrcp.f32 %v2200_v17  ;;  %v12287_v17 = vld [vmem:[#allocation46_spill] sm:$0xff] }
 0x385   :  { %9591 = vrcp.f32 %v2207_v42  ;;  %v12290_v42 = vld [vmem:[#allocation49_spill] sm:$0xff] }
 0x38d   :  { %v9588_v59 = vpop.eup %9587 }
 0x38e   :  { %v9590_v5 = vpop.eup %9589  ;;  %v2211_v18 = vmul.f32 %v9588_v59, %v9586_v30  ;;  %v12289_v30 = vld [vmem:[#allocation48_spill] sm:$0xff] }
 0x38f   :  { %v2210_v54 = vmul.f32 %v9590_v5, %v12273_v3  ;;  %v9592_v28 = vpop.eup %9591  ;;  %v12291_v3 = vld [vmem:[#allocation50_spill] sm:$0xff] }
 0x391   :  { %v10861_v7 = vadd.f32 %v2211_v18, %v2210_v54  ;;  %v2111_v32 = vpop.f32.mrb[26].mxu0  ;;  %v2182_v6 = vpop.f32.mrb[26].mxu1 }
 0x392   :  { %v9352_v10 = vadd.f32 %v2111_v32, %v12274_v53  ;;  %v2113_v8 = vpop.f32.mrb[27].mxu0  ;;  %v2184_v36 = vpop.f32.mrb[27].mxu1  ;;  %v9368_v60 = vadd.f32 %v2182_v6, %v10554_v4 }
 0x393   :  { %v9353_v13 = vadd.f32 %v2113_v8, %v12275_v2  ;;  %9593 = vtanh.f32 %v10861_v7  ;;  %v9369_v51 = vadd.f32 %v2184_v36, %v12276_v24  ;;  %v2740_v36 = vld [vmem:[#allocation10 + $0x58] sm:$0xff] }
 0x394   :  { %v7175_v33 = vmul.f32 -1.442695, %v9352_v10 }
 0x395   :  { %v7176_v47 = vmul.f32 -1.442695, %v9353_v13  ;;  %v7177_v46 = vmul.f32 -1.442695, %v9369_v51  ;;  %v2741_v51 = vld [vmem:[#allocation10 + $0x60] sm:$0xff] }
 0x396   :  { %9595 = vpow2.f32 %v7175_v33  ;;  %v2744_v33 = vld [vmem:[#allocation10 + $0x78] sm:$0xff] }
 0x397   :  { %9597 = vpow2.f32 %v7176_v47  ;;  %v2737_v47 = vld [vmem:[#allocation10 + $0x40] sm:$0xff] }
 0x398   :  { %9599 = vpow2.f32 %v7177_v46  ;;  %v2739_v46 = vld [vmem:[#allocation10 + $0x50] sm:$0xff] }
 0x399   :  { %9601 = vtanh.f32 %v9368_v60  ;;  %v2743_v60 = vld [vmem:[#allocation10 + $0x70] sm:$0xff] }
 0x39d   :  { %v9594_v62 = vpop.eup %9593 }
 0x39e   :  { %v10868_v27 = vmul.f32 %v9594_v62, %v9592_v28  ;;  %v10928_v28 = vpack.c.bf16 %v2744_v33, %v2740_v36  ;;  %v10930_v62 = vpack.c.bf16 %v2741_v51, %v2737_v47  ;;  %v2770_v36 = vld [vmem:[#allocation10 + $0x148] sm:$0xff]  ;;  %v2772_v47 = vld [vmem:[#allocation10 + $0x158] sm:$0xff] }
 0x39f   :  { %v2774_v33 = vld [vmem:[#allocation10 + $0x168] sm:$0xff] }
 0x3a0   :  { %12277 = vst [vmem:[#allocation27_spill] sm:$0xff] %v10868_v27  ;;  %v9596_v15 = vpop.eup %9595  ;;  %2377 = vmatmul.mubr.f32.vlgmr.msra.gmra.mrb[6].mxu0 %v10868_v27  ;;  %2448 = vmatmul.mubr.f32.vlgmr.msra.gmra.mrb[6].mxu1 %v10868_v27  ;;  %v10974_v51 = vpack.c.bf16 %v2774_v33, %v2770_v36  ;;  %v2789_v36 = vld [vmem:[#allocation10 + $0x1e0] sm:$0xff] }
 0x3a1   :  { %v9598_v12 = vpop.eup %9597  ;;  %v2218_v21 = vadd.f32 1.0, %v9596_v15  ;;  %7921 = vmatpush1.bf16.msra.mxu0 %v12278_v1  ;;  %7953 = vmatpush1.bf16.msra.mxu1 %v12279_v39  ;;  %v10933_v15 = vpack.c.bf16 %v2743_v60, %v2739_v46  ;;  %v2748_v1 = vld [vmem:[#allocation10 + $0x98] sm:$0xff]  ;;  %v2769_v60 = vld [vmem:[#allocation10 + $0x140] sm:$0xff] }
 0x3a2   :  { %v2224_v31 = vadd.f32 1.0, %v9598_v12  ;;  %7923 = vmatprep.subr.bf16.mxu0 %v12280_v14  ;;  %7955 = vmatprep.subr.bf16.mxu1 %v12281_v58  ;;  %v9600_v59 = vpop.eup %9599  ;;  %v2746_v12 = vld [vmem:[#allocation10 + $0x88] sm:$0xff]  ;;  %v2745_v14 = vld [vmem:[#allocation10 + $0x80] sm:$0xff]  ;;  %v2776_v46 = vld [vmem:[#allocation10 + $0x178] sm:$0xff] }
 0x3a3   :  { %9603 = vrcp.f32 %v2218_v21  ;;  %2591 = vmatprep.mubr.f32.mxu0 %v12233_v19  ;;  %2662 = vmatprep.mubr.f32.mxu1 %v12233_v19  ;;  %v9602_v5 = vpop.eup %9601  ;;  %v2231_v6 = vadd.f32 1.0, %v9600_v59  ;;  %v2750_v21 = vld [vmem:[#allocation10 + $0xa8] sm:$0xff]  ;;  %v2749_v58 = vld [vmem:[#allocation10 + $0xa0] sm:$0xff] }
 0x3a4   :  { %9605 = vrcp.f32 %v2224_v31  ;;  %v10938_v39 = vpack.c.bf16 %v2750_v21, %v2746_v12  ;;  %v2752_v31 = vld [vmem:[#allocation10 + $0xb8] sm:$0xff]  ;;  %v2773_v12 = vld [vmem:[#allocation10 + $0x160] sm:$0xff]  ;;  %v10976_v21 = vpack.c.bf16 %v2776_v46, %v2772_v47  ;;  %v2787_v46 = vld [vmem:[#allocation10 + $0x1d0] sm:$0xff] }
 0x3a5   :  { %7925 = vmatpush1.bf16.msra.mxu0 %v12282_v9  ;;  %7957 = vmatpush1.bf16.msra.mxu1 %v12283_v37  ;;  %9607 = vrcp.f32 %v2231_v6  ;;  %v10940_v9 = vpack.c.bf16 %v2752_v31, %v2748_v1  ;;  %v10942_v37 = vpack.c.bf16 %v2749_v58, %v2745_v14  ;;  %v2759_v6 = vld [vmem:[#allocation10 + $0xf0] sm:$0xff]  ;;  %v10978_v1 = vpack.c.bf16 %v2773_v12, %v2769_v60 }
 0x3a6   :  { %7927 = vmatprep.subr.bf16.mxu0 %v12284_v0  ;;  %7959 = vmatprep.subr.bf16.mxu1 %v12285_v40  ;;  %v2747_v0 = vld [vmem:[#allocation10 + $0x90] sm:$0xff] }
 0x3a7   :  { %v2751_v40 = vld [vmem:[#allocation10 + $0xb0] sm:$0xff] }
 0x3a8   :  { %v2771_v31 = vld [vmem:[#allocation10 + $0x150] sm:$0xff] }
 0x3a9   :  { %7929 = vmatpush1.bf16.msra.mxu0 %v12286_v44  ;;  %7961 = vmatpush1.bf16.msra.mxu1 %v12287_v17  ;;  %v10945_v44 = vpack.c.bf16 %v2751_v40, %v2747_v0  ;;  %v2754_v17 = vld [vmem:[#allocation10 + $0xc8] sm:$0xff]  ;;  %v2775_v14 = vld [vmem:[#allocation10 + $0x170] sm:$0xff] }
 0x3aa   :  { %7931 = vmatprep.subr.bf16.mxu0 %v12288_v26  ;;  %7963 = vmatprep.subr.bf16.mxu1 %v12289_v30  ;;  %v2758_v26 = vld [vmem:[#allocation10 + $0xe8] sm:$0xff]  ;;  %v2756_v30 = vld [vmem:[#allocation10 + $0xd8] sm:$0xff]  ;;  %v10981_v58 = vpack.c.bf16 %v2775_v14, %v2771_v31  ;;  %v2791_v60 = vld [vmem:[#allocation10 + $0x1f0] sm:$0xff] }
 0x3ab   :  { %v10950_v59 = vpack.c.bf16 %v2758_v26, %v2754_v17  ;;  %v2778_v0 = vld [vmem:[#allocation10 + $0x188] sm:$0xff]  ;;  %v2780_v17 = vld [vmem:[#allocation10 + $0x198] sm:$0xff]  ;;  %v11005_v12 = vpack.c.bf16 %v2791_v60, %v2787_v46 }
 0x3ac   :  { %v2782_v40 = vld [vmem:[#allocation10 + $0x1a8] sm:$0xff] }
 0x3ad   :  { %v9604_v18 = vpop.eup %9603  ;;  %7933 = vmatpush1.bf16.msra.mxu0 %v12290_v42  ;;  %7965 = vmatpush1.bf16.msra.mxu1 %v12291_v3  ;;  %v2757_v42 = vld [vmem:[#allocation10 + $0xe0] sm:$0xff]  ;;  %v10986_v26 = vpack.c.bf16 %v2782_v40, %v2778_v0  ;;  %v2944_v31 = vld [vmem:[#allocation12 + $0x8] sm:$0xff]  ;;  %v2946_v0 = vld [vmem:[#allocation12 + $0x18] sm:$0xff] }
 0x3ae   :  { %v9606_v54 = vpop.eup %9605  ;;  %v2235_v32 = vmul.f32 %v9604_v18, %v9602_v5  ;;  %7935 = vmatprep.subr.bf16.mxu0 %v10762_v22  ;;  %7967 = vmatprep.subr.bf16.mxu1 %v10764_v56  ;;  %v2734_v22 = vld [vmem:[#allocation10 + $0x28] sm:$0xff]  ;;  %v2732_v56 = vld [vmem:[#allocation10 + $0x18] sm:$0xff]  ;;  %v2753_v18 = vld [vmem:[#allocation10 + $0xc0] sm:$0xff] }
 0x3af   :  { %v2234_v10 = vmul.f32 %v9606_v54, %v10779_v43  ;;  %v2760_v5 = vld [vmem:[#allocation10 + $0xf8] sm:$0xff]  ;;  %v10954_v54 = vpack.c.bf16 %v2757_v42, %v2753_v18  ;;  %v2781_v18 = vld [vmem:[#allocation10 + $0x1a0] sm:$0xff]  ;;  %v2948_v14 = vld [vmem:[#allocation12 + $0x28] sm:$0xff] }
 0x3b0   :  { %v10952_v3 = vpack.c.bf16 %v2760_v5, %v2756_v30  ;;  %v2784_v30 = vld [vmem:[#allocation10 + $0x1b8] sm:$0xff]  ;;  %v2777_v5 = vld [vmem:[#allocation10 + $0x180] sm:$0xff]  ;;  %v11010_v40 = vpack.c.bf16 %v2948_v14, %v2944_v31 }
 0x3b1   :  { %v10891_v8 = vadd.f32 %v2235_v32, %v2234_v10  ;;  %7937 = vmatpush1.bf16.msra.mxu0 %v10768_v23  ;;  %7969 = vmatpush1.bf16.msra.mxu1 %v10770_v52  ;;  %v2730_v52 = vld [vmem:[#allocation10 + $0x8] sm:$0xff]  ;;  %v2755_v32 = vld [vmem:[#allocation10 + $0xd0] sm:$0xff]  ;;  %v10988_v42 = vpack.c.bf16 %v2784_v30, %v2780_v17  ;;  %v2950_v17 = vld [vmem:[#allocation12 + $0x38] sm:$0xff] }
 0x3b2   :  { %7939 = vmatprep.subr.bf16.mxu0 %v10774_v57  ;;  %7971 = vmatprep.subr.bf16.mxu1 %v10776_v61  ;;  %v9608_v57 = vpop.eup %9607  ;;  %v10914_v23 = vpack.c.bf16 %v2734_v22, %v2730_v52  ;;  %v10957_v10 = vpack.c.bf16 %v2759_v6, %v2755_v32  ;;  %v2764_v52 = vld [vmem:[#allocation10 + $0x118] sm:$0xff]  ;;  %v10990_v32 = vpack.c.bf16 %v2781_v18, %v2777_v5  ;;  %v2779_v6 = vld [vmem:[#allocation10 + $0x190] sm:$0xff] }
 0x3b3   :  { %9609 = vtanh.f32 %v10891_v8  ;;  %v11012_v30 = vpack.c.bf16 %v2950_v17, %v2946_v0 }
 0x3b5   :  { %7941 = vmatpush1.bf16.msra.mxu0 %v10783_v11  ;;  %7973 = vmatpush1.bf16.msra.mxu1 %v10785_v48  ;;  %v2736_v11 = vld [vmem:[#allocation10 + $0x38] sm:$0xff]  ;;  %v2729_v48 = vld [vmem:[#allocation10] sm:$0xff] }
 0x3b6   :  { %7943 = vmatprep.subr.bf16.mxu0 %v10789_v63  ;;  %7975 = vmatprep.subr.bf16.mxu1 %v10791_v20  ;;  %v2733_v63 = vld [vmem:[#allocation10 + $0x20] sm:$0xff]  ;;  %v10916_v20 = vpack.c.bf16 %v2736_v11, %v2732_v56  ;;  %v2768_v56 = vld [vmem:[#allocation10 + $0x138] sm:$0xff] }
 0x3b7   :  { %v2761_v11 = vld [vmem:[#allocation10 + $0x100] sm:$0xff] }
 0x3b9   :  { %7945 = vmatpush1.bf16.msra.mxu0 %v10796_v16  ;;  %7977 = vmatpush1.bf16.msra.mxu1 %v10798_v45  ;;  %v10918_v16 = vpack.c.bf16 %v2733_v63, %v2729_v48  ;;  %v2731_v45 = vld [vmem:[#allocation10 + $0x10] sm:$0xff]  ;;  %v2765_v48 = vld [vmem:[#allocation10 + $0x120] sm:$0xff]  ;;  %v10964_v63 = vpack.c.bf16 %v2768_v56, %v2764_v52  ;;  %v2786_v52 = vld [vmem:[#allocation10 + $0x1c8] sm:$0xff] }
 0x3ba   :  { %7947 = vmatprep.subr.bf16.mxu0 %v10802_v35  ;;  %7979 = vmatprep.subr.bf16.mxu1 %v10804_v25  ;;  %v2735_v35 = vld [vmem:[#allocation10 + $0x30] sm:$0xff]  ;;  %v2790_v56 = vld [vmem:[#allocation10 + $0x1e8] sm:$0xff] }
 0x3bb   :  { %v10921_v25 = vpack.c.bf16 %v2735_v35, %v2731_v45  ;;  %v10966_v45 = vpack.c.bf16 %v2765_v48, %v2761_v11  ;;  %v2763_v35 = vld [vmem:[#allocation10 + $0x110] sm:$0xff]  ;;  %v2788_v11 = vld [vmem:[#allocation10 + $0x1d8] sm:$0xff]  ;;  %v10998_v48 = vpack.c.bf16 %v2790_v56, %v2786_v52 }
 0x3bd   :  { %v9610_v43 = vpop.eup %9609  ;;  %7949 = vmatpush1.bf16.msra.mxu0 %v10808_v34  ;;  %7981 = vmatpush1.bf16.msra.mxu1 %v10810_v41  ;;  %v2738_v34 = vld [vmem:[#allocation10 + $0x48] sm:$0xff] }
 0x3be   :  { %v10908_v61 = vmul.f32 %v9610_v43, %v9608_v57  ;;  %7983 = vmatprep.subr.bf16.mxu0 %v10914_v23  ;;  %8015 = vmatprep.subr.bf16.mxu1 %v10916_v20  ;;  %v2742_v41 = vld [vmem:[#allocation10 + $0x68] sm:$0xff] }
 0x3bf   :  { %v10926_v13 = vpack.c.bf16 %v2742_v41, %v2738_v34  ;;  %v2762_v57 = vld [vmem:[#allocation10 + $0x108] sm:$0xff]  ;;  %v2767_v34 = vld [vmem:[#allocation10 + $0x130] sm:$0xff] }
 0x3c0   :  { %12292 = vst [vmem:[#allocation28_spill] sm:$0xff] %v10908_v61  ;;  %2592 = vmatmul.mubr.f32.vlgmr.msra.gmra.mrb[24].mxu0 %v10908_v61  ;;  %2663 = vmatmul.mubr.f32.vlgmr.msra.gmra.mrb[24].mxu1 %v10908_v61  ;;  %v2766_v43 = vld [vmem:[#allocation10 + $0x128] sm:$0xff]  ;;  %v10969_v41 = vpack.c.bf16 %v2767_v34, %v2763_v35  ;;  %v2792_v35 = vld [vmem:[#allocation10 + $0x1f8] sm:$0xff]  ;;  %v2785_v34 = vld [vmem:[#allocation10 + $0x1c0] sm:$0xff] }
 0x3c1   :  { %2857 = vmatprep.mubr.f32.mxu0 %v12233_v19  ;;  %2928 = vmatprep.mubr.f32.mxu1 %v12233_v19  ;;  %v10962_v22 = vpack.c.bf16 %v2766_v43, %v2762_v57  ;;  %v2783_v57 = vld [vmem:[#allocation10 + $0x1b0] sm:$0xff]  ;;  %v11000_v33 = vpack.c.bf16 %v2792_v35, %v2788_v11  ;;  %v11002_v47 = vpack.c.bf16 %v2789_v36, %v2785_v34 }
 0x3c2   :  { %7985 = vmatpush1.bf16.msra.mxu0 %v10918_v16  ;;  %8017 = vmatpush1.bf16.msra.mxu1 %v10921_v25  ;;  %v10993_v43 = vpack.c.bf16 %v2783_v57, %v2779_v6 }
 0x3c3   :  { %7987 = vmatprep.subr.bf16.mxu0 %v10926_v13  ;;  %8019 = vmatprep.subr.bf16.mxu1 %v10928_v28 }
 0x3c6   :  { %7989 = vmatpush1.bf16.msra.mxu0 %v10930_v62  ;;  %8021 = vmatpush1.bf16.msra.mxu1 %v10933_v15 }
 0x3c7   :  { %7991 = vmatprep.subr.bf16.mxu0 %v10938_v39  ;;  %8023 = vmatprep.subr.bf16.mxu1 %v10940_v9 }
 0x3ca   :  { %7993 = vmatpush1.bf16.msra.mxu0 %v10942_v37  ;;  %8025 = vmatpush1.bf16.msra.mxu1 %v10945_v44 }
 0x3cb   :  { %7995 = vmatprep.subr.bf16.mxu0 %v10950_v59  ;;  %8027 = vmatprep.subr.bf16.mxu1 %v10952_v3 }
 0x3ce   :  { %7997 = vmatpush1.bf16.msra.mxu0 %v10954_v54  ;;  %8029 = vmatpush1.bf16.msra.mxu1 %v10957_v10 }
 0x3cf   :  { %7999 = vmatprep.subr.bf16.mxu0 %v10962_v22  ;;  %8031 = vmatprep.subr.bf16.mxu1 %v10964_v63 }
 0x3d2   :  { %8001 = vmatpush1.bf16.msra.mxu0 %v10966_v45  ;;  %8033 = vmatpush1.bf16.msra.mxu1 %v10969_v41 }
 0x3d3   :  { %8003 = vmatprep.subr.bf16.mxu0 %v10974_v51  ;;  %8035 = vmatprep.subr.bf16.mxu1 %v10976_v21 }
 0x3d6   :  { %8005 = vmatpush1.bf16.msra.mxu0 %v10978_v1  ;;  %8037 = vmatpush1.bf16.msra.mxu1 %v10981_v58 }
 0x3d7   :  { %8007 = vmatprep.subr.bf16.mxu0 %v10986_v26  ;;  %8039 = vmatprep.subr.bf16.mxu1 %v10988_v42 }
 0x3da   :  { %8009 = vmatpush1.bf16.msra.mxu0 %v10990_v32  ;;  %8041 = vmatpush1.bf16.msra.mxu1 %v10993_v43 }
 0x3db   :  { %8011 = vmatprep.subr.bf16.mxu0 %v10998_v48  ;;  %8043 = vmatprep.subr.bf16.mxu1 %v11000_v33 }
 0x3de   :  { %8013 = vmatpush1.bf16.msra.mxu0 %v11002_v47  ;;  %8045 = vmatpush1.bf16.msra.mxu1 %v11005_v12 }
 0x3df   :  { %8047 = vmatprep.subr.bf16.mxu0 %v11010_v40  ;;  %8079 = vmatprep.subr.bf16.mxu1 %v11012_v30 }
 0x473   :  { %v2378_v5 = vpop.f32.mrb[6].mxu0  ;;  %v2449_v18 = vpop.f32.mrb[6].mxu1 }
 0x474   :  { %v9316_v6 = vadd.f32 %v2378_v5, %v10512_v38  ;;  %v2380_v57 = vpop.f32.mrb[7].mxu0  ;;  %v2451_v52 = vpop.f32.mrb[7].mxu1  ;;  %v9332_v46 = vadd.f32 %v2449_v18, %v12272_v50  ;;  %v2960_v50 = vld [vmem:[#allocation12 + $0x88] sm:$0xff] }
 0x475   :  { %v9317_v56 = vadd.f32 %v2380_v57, %v12270_v29  ;;  %v9333_v34 = vadd.f32 %v2451_v52, %v12271_v55  ;;  %v2964_v55 = vld [vmem:[#allocation12 + $0xa8] sm:$0xff]  ;;  %v2962_v29 = vld [vmem:[#allocation12 + $0x98] sm:$0xff] }
 0x476   :  { %v7178_v11 = vmul.f32 -1.442695, %v9316_v6 }
 0x477   :  { %v7179_v35 = vmul.f32 -1.442695, %v9317_v56  ;;  %v7180_v36 = vmul.f32 -1.442695, %v9333_v34 }
 0x478   :  { %9611 = vpow2.f32 %v7178_v11 }
 0x479   :  { %9613 = vpow2.f32 %v7179_v35 }
 0x47a   :  { %9615 = vpow2.f32 %v7180_v36 }
 0x47b   :  { %9617 = vtanh.f32 %v9332_v46 }
 0x482   :  { %v9612_v60 = vpop.eup %9611 }
 0x483   :  { %v9614_v31 = vpop.eup %9613  ;;  %v2676_v14 = vadd.f32 1.0, %v9612_v60 }
 0x484   :  { %v2682_v0 = vadd.f32 1.0, %v9614_v31  ;;  %v9616_v17 = vpop.eup %9615 }
 0x485   :  { %9619 = vrcp.f32 %v2676_v14  ;;  %v9618_v5 = vpop.eup %9617  ;;  %v2689_v11 = vadd.f32 1.0, %v9616_v17 }
 0x486   :  { %9621 = vrcp.f32 %v2682_v0 }
 0x487   :  { %9623 = vrcp.f32 %v2689_v11  ;;  %v2956_v11 = vld [vmem:[#allocation12 + $0x68] sm:$0xff] }
 0x48f   :  { %v9620_v57 = vpop.eup %9619 }
 0x490   :  { %v9622_v6 = vpop.eup %9621  ;;  %v2693_v56 = vmul.f32 %v9620_v57, %v9618_v5  ;;  %v2947_v5 = vld [vmem:[#allocation12 + $0x20] sm:$0xff]  ;;  %v2945_v57 = vld [vmem:[#allocation12 + $0x10] sm:$0xff] }
 0x491   :  { %v2692_v35 = vmul.f32 %v9622_v6, %v10861_v7  ;;  %v2943_v7 = vld [vmem:[#allocation12] sm:$0xff]  ;;  %v2949_v6 = vld [vmem:[#allocation12 + $0x30] sm:$0xff]  ;;  %v9624_v49 = vpop.eup %9623 }
 0x493   :  { %v11021_v52 = vadd.f32 %v2693_v56, %v2692_v35  ;;  %v2593_v34 = vpop.f32.mrb[24].mxu0  ;;  %v2664_v18 = vpop.f32.mrb[24].mxu1  ;;  %v2952_v56 = vld [vmem:[#allocation12 + $0x48] sm:$0xff]  ;;  %v2954_v35 = vld [vmem:[#allocation12 + $0x58] sm:$0xff] }
 0x494   :  { %v9350_v60 = vadd.f32 %v2593_v34, %v12274_v53  ;;  %v2595_v36 = vpop.f32.mrb[25].mxu0  ;;  %v2666_v46 = vpop.f32.mrb[25].mxu1  ;;  %v2958_v34 = vld [vmem:[#allocation12 + $0x78] sm:$0xff]  ;;  %v2953_v53 = vld [vmem:[#allocation12 + $0x50] sm:$0xff] }
 0x495   :  { %12293 = vst [vmem:[#allocation29_spill] sm:$0xff] %v11021_v52  ;;  %v9351_v31 = vadd.f32 %v2595_v36, %v12275_v2  ;;  %9625 = vtanh.f32 %v11021_v52  ;;  %v9367_v17 = vadd.f32 %v2666_v46, %v12276_v24  ;;  %v11027_v36 = vpack.c.bf16 %v2947_v5, %v2943_v7  ;;  %v2957_v52 = vld [vmem:[#allocation12 + $0x70] sm:$0xff] }
 0x496   :  { %v7181_v14 = vmul.f32 -1.442695, %v9350_v60  ;;  %v11029_v2 = vpack.c.bf16 %v2949_v6, %v2945_v57  ;;  %v2951_v60 = vld [vmem:[#allocation12 + $0x40] sm:$0xff]  ;;  %v11036_v24 = vpack.c.bf16 %v2958_v34, %v2954_v35  ;;  %v2965_v34 = vld [vmem:[#allocation12 + $0xb0] sm:$0xff] }
 0x497   :  { %v7182_v0 = vmul.f32 -1.442695, %v9351_v31  ;;  %v7183_v27 = vmul.f32 -1.442695, %v9367_v17  ;;  %12294 = vst [vmem:[#allocation31_spill] sm:$0xff] %v11027_v36  ;;  %v2955_v31 = vld [vmem:[#allocation12 + $0x60] sm:$0xff] }
 0x498   :  { %9627 = vpow2.f32 %v7181_v14  ;;  %12295 = vst [vmem:[#allocation32_spill] sm:$0xff] %v11029_v2  ;;  %v9366_v14 = vadd.f32 %v2664_v18, %v10554_v4  ;;  %12298 = vst [vmem:[#allocation35_spill] sm:$0xff] %v11036_v24  ;;  %v2966_v17 = vld [vmem:[#allocation12 + $0xb8] sm:$0xff]  ;;  %v2959_v18 = vld [vmem:[#allocation12 + $0x80] sm:$0xff] }
 0x499   :  { %9629 = vpow2.f32 %v7182_v0  ;;  %v11034_v0 = vpack.c.bf16 %v2956_v11, %v2952_v56  ;;  %v2963_v6 = vld [vmem:[#allocation12 + $0xa0] sm:$0xff]  ;;  %v11048_v11 = vpack.c.bf16 %v2964_v55, %v2960_v50  ;;  %v11050_v35 = vpack.c.bf16 %v2966_v17, %v2962_v29 }
 0x49a   :  { %9631 = vpow2.f32 %v7183_v27  ;;  %v2961_v27 = vld [vmem:[#allocation12 + $0x90] sm:$0xff]  ;;  %v11056_v55 = vpack.c.bf16 %v2963_v6, %v2959_v18  ;;  %v2967_v50 = vld [vmem:[#allocation12 + $0xc0] sm:$0xff] }
 0x49b   :  { %12297 = vst [vmem:[#allocation34_spill] sm:$0xff] %v11034_v0  ;;  %9633 = vtanh.f32 %v9366_v14  ;;  %12301 = vst [vmem:[#allocation46_spill] sm:$0xff] %v11048_v11  ;;  %v11058_v29 = vpack.c.bf16 %v2965_v34, %v2961_v27  ;;  %v2975_v27 = vld [vmem:[#allocation12 + $0x100] sm:$0xff] }
 0x49c   :  { %12302 = vst [vmem:[#allocation47_spill] sm:$0xff] %v11050_v35  ;;  %12303 = vst [vmem:[#allocation48_spill] sm:$0xff] %v11056_v55  ;;  %v2979_v34 = vld [vmem:[#allocation12 + $0x120] sm:$0xff] }
 0x49d   :  { %12304 = vst [vmem:[#allocation49_spill] sm:$0xff] %v11058_v29 }
 0x49f   :  { %v9626_v61 = vpop.eup %9625 }
 0x4a0   :  { %v11032_v46 = vmul.f32 %v9626_v61, %v9624_v49  ;;  %v11042_v49 = vpack.c.bf16 %v2955_v31, %v2951_v60  ;;  %v11044_v61 = vpack.c.bf16 %v2957_v52, %v2953_v53  ;;  %v2972_v60 = vld [vmem:[#allocation12 + $0xe8] sm:$0xff]  ;;  %v2970_v31 = vld [vmem:[#allocation12 + $0xd8] sm:$0xff]  ;;  %v2971_v52 = vld [vmem:[#allocation12 + $0xe0] sm:$0xff] }
 0x4a1   :  { %v2974_v53 = vld [vmem:[#allocation12 + $0xf8] sm:$0xff]  ;;  %v11068_v18 = vpack.c.bf16 %v2971_v52, %v2967_v50 }
 0x4a2   :  { %12296 = vst [vmem:[#allocation33_spill] sm:$0xff] %v11032_v46  ;;  %v9628_v7 = vpop.eup %9627  ;;  %2858 = vmatmul.mubr.f32.vlgmr.msra.gmra.mrb[8].mxu0 %v11032_v46  ;;  %2929 = vmatmul.mubr.f32.vlgmr.msra.gmra.mrb[8].mxu1 %v11032_v46  ;;  %12299 = vst [vmem:[#allocation44_spill] sm:$0xff] %v11042_v49  ;;  %v11064_v17 = vpack.c.bf16 %v2974_v53, %v2970_v31  ;;  %v2980_v46 = vld [vmem:[#allocation12 + $0x128] sm:$0xff]  ;;  %v2977_v31 = vld [vmem:[#allocation12 + $0x110] sm:$0xff] }
 0x4a3   :  { %v9630_v5 = vpop.eup %9629  ;;  %v2700_v57 = vadd.f32 1.0, %v9628_v7  ;;  %8049 = vmatpush1.bf16.msra.mxu0 %v11027_v36  ;;  %8081 = vmatpush1.bf16.msra.mxu1 %v11029_v2  ;;  %12300 = vst [vmem:[#allocation45_spill] sm:$0xff] %v11044_v61  ;;  %v2968_v7 = vld [vmem:[#allocation12 + $0xc8] sm:$0xff]  ;;  %12307 = vst [vmem:[#allocation53_spill] sm:$0xff] %v11068_v18  ;;  %v2981_v53 = vld [vmem:[#allocation12 + $0x130] sm:$0xff] }
 0x4a4   :  { %v2706_v56 = vadd.f32 1.0, %v9630_v5  ;;  %8051 = vmatprep.subr.bf16.mxu0 %v11034_v0  ;;  %8083 = vmatprep.subr.bf16.mxu1 %v11036_v24  ;;  %v11062_v14 = vpack.c.bf16 %v2972_v60, %v2968_v7  ;;  %12306 = vst [vmem:[#allocation52_spill] sm:$0xff] %v11064_v17  ;;  %v2969_v5 = vld [vmem:[#allocation12 + $0xd0] sm:$0xff]  ;;  %v2990_v50 = vld [vmem:[#allocation12 + $0x178] sm:$0xff] }
 0x4a5   :  { %9635 = vrcp.f32 %v2700_v57  ;;  %3071 = vmatprep.mubr.f32.mxu0 %v12233_v19  ;;  %3142 = vmatprep.mubr.f32.mxu1 %v12233_v19  ;;  %v2973_v57 = vld [vmem:[#allocation12 + $0xf0] sm:$0xff] }
 0x4a6   :  { %9637 = vrcp.f32 %v2706_v56  ;;  %12305 = vst [vmem:[#allocation50_spill] sm:$0xff] %v11062_v14  ;;  %v2976_v56 = vld [vmem:[#allocation12 + $0x108] sm:$0xff]  ;;  %v11070_v6 = vpack.c.bf16 %v2973_v57, %v2969_v5  ;;  %v11080_v57 = vpack.c.bf16 %v2979_v34, %v2975_v27  ;;  %v2989_v2 = vld [vmem:[#allocation12 + $0x170] sm:$0xff] }
 0x4a7   :  { %8053 = vmatpush1.bf16.msra.mxu0 %v11042_v49  ;;  %8085 = vmatpush1.bf16.msra.mxu1 %v11044_v61  ;;  %v2978_v49 = vld [vmem:[#allocation12 + $0x118] sm:$0xff]  ;;  %v11074_v7 = vpack.c.bf16 %v2980_v46, %v2976_v56  ;;  %v2983_v46 = vld [vmem:[#allocation12 + $0x140] sm:$0xff]  ;;  %v2996_v34 = vld [vmem:[#allocation12 + $0x1a8] sm:$0xff] }
 0x4a8   :  { %8055 = vmatprep.subr.bf16.mxu0 %v11048_v11  ;;  %8087 = vmatprep.subr.bf16.mxu1 %v11050_v35  ;;  %v2982_v61 = vld [vmem:[#allocation12 + $0x138] sm:$0xff]  ;;  %12308 = vst [vmem:[#allocation54_spill] sm:$0xff] %v11070_v6  ;;  %v2984_v35 = vld [vmem:[#allocation12 + $0x148] sm:$0xff] }
 0x4a9   :  { %v11076_v60 = vpack.c.bf16 %v2982_v61, %v2978_v49  ;;  %v2988_v11 = vld [vmem:[#allocation12 + $0x168] sm:$0xff]  ;;  %v2987_v49 = vld [vmem:[#allocation12 + $0x160] sm:$0xff] }
 0x4aa   :  { %v11086_v24 = vpack.c.bf16 %v2988_v11, %v2984_v35  ;;  %v2991_v35 = vld [vmem:[#allocation12 + $0x180] sm:$0xff] }
 0x4ab   :  { %8057 = vmatpush1.bf16.msra.mxu0 %v11056_v55  ;;  %8089 = vmatpush1.bf16.msra.mxu1 %v11058_v29  ;;  %v9632_v55 = vpop.eup %9631  ;;  %v2986_v29 = vld [vmem:[#allocation12 + $0x158] sm:$0xff] }
 0x4ac   :  { %8059 = vmatprep.subr.bf16.mxu0 %v11062_v14  ;;  %8091 = vmatprep.subr.bf16.mxu1 %v11064_v17  ;;  %v9634_v52 = vpop.eup %9633  ;;  %v11082_v17 = vpack.c.bf16 %v2981_v53, %v2977_v31  ;;  %v2713_v14 = vadd.f32 1.0, %v9632_v55  ;;  %v11088_v0 = vpack.c.bf16 %v2990_v50, %v2986_v29  ;;  %v2994_v31 = vld [vmem:[#allocation12 + $0x198] sm:$0xff]  ;;  %v11095_v55 = vpack.c.bf16 %v2987_v49, %v2983_v46  ;;  %v2995_v29 = vld [vmem:[#allocation12 + $0x1a0] sm:$0xff] }
 0x4ad   :  { %v2998_v53 = vld [vmem:[#allocation12 + $0x1b8] sm:$0xff] }
 0x4ae   :  { %9639 = vrcp.f32 %v2713_v14  ;;  %v11103_v50 = vpack.c.bf16 %v2998_v53, %v2994_v31  ;;  %v3006_v46 = vld [vmem:[#allocation12 + $0x1f8] sm:$0xff]  ;;  %v3001_v31 = vld [vmem:[#allocation12 + $0x1d0] sm:$0xff] }
 0x4af   :  { %v9636_v5 = vpop.eup %9635  ;;  %8061 = vmatpush1.bf16.msra.mxu0 %v11068_v18  ;;  %8093 = vmatpush1.bf16.msra.mxu1 %v11070_v6  ;;  %v2985_v18 = vld [vmem:[#allocation12 + $0x150] sm:$0xff]  ;;  %v2992_v6 = vld [vmem:[#allocation12 + $0x188] sm:$0xff] }
 0x4b0   :  { %v9638_v61 = vpop.eup %9637  ;;  %v2717_v56 = vmul.f32 %v9636_v5, %v9634_v52  ;;  %8063 = vmatprep.subr.bf16.mxu0 %v11074_v7  ;;  %8095 = vmatprep.subr.bf16.mxu1 %v11076_v60  ;;  %v11097_v11 = vpack.c.bf16 %v2989_v2, %v2985_v18  ;;  %v2993_v52 = vld [vmem:[#allocation12 + $0x190] sm:$0xff]  ;;  %v11108_v2 = vpack.c.bf16 %v2995_v29, %v2991_v35  ;;  %v2999_v18 = vld [vmem:[#allocation12 + $0x1c0] sm:$0xff] }
 0x4b1   :  { %v2716_v27 = vmul.f32 %v9638_v61, %v10891_v8  ;;  %v11101_v8 = vpack.c.bf16 %v2996_v34, %v2992_v6  ;;  %v2997_v5 = vld [vmem:[#allocation12 + $0x1b0] sm:$0xff]  ;;  %v3000_v61 = vld [vmem:[#allocation12 + $0x1c8] sm:$0xff]  ;;  %v3003_v34 = vld [vmem:[#allocation12 + $0x1e0] sm:$0xff] }
 0x4b2   :  { %v11110_v14 = vpack.c.bf16 %v2997_v5, %v2993_v52  ;;  %v3005_v53 = vld [vmem:[#allocation12 + $0x1f0] sm:$0xff]  ;;  %v11120_v35 = vpack.c.bf16 %v3003_v34, %v2999_v18  ;;  %v12316_v18 = vld [vmem:[#allocation42_spill] sm:$0xff] }
 0x4b3   :  { %v11091_v36 = vadd.f32 %v2717_v56, %v2716_v27  ;;  %8065 = vmatpush1.bf16.msra.mxu0 %v11080_v57  ;;  %8097 = vmatpush1.bf16.msra.mxu1 %v11082_v17  ;;  %v3004_v56 = vld [vmem:[#allocation12 + $0x1e8] sm:$0xff]  ;;  %v3002_v27 = vld [vmem:[#allocation12 + $0x1d8] sm:$0xff]  ;;  %v11122_v29 = vpack.c.bf16 %v3005_v53, %v3001_v31 }
 0x4b4   :  { %8067 = vmatprep.subr.bf16.mxu0 %v11086_v24  ;;  %8099 = vmatprep.subr.bf16.mxu1 %v11088_v0  ;;  %v11114_v6 = vpack.c.bf16 %v3004_v56, %v3000_v61  ;;  %v11116_v49 = vpack.c.bf16 %v3006_v46, %v3002_v27 }
 0x4b5   :  { %9641 = vtanh.f32 %v11091_v36 }
 0x4b7   :  { %8069 = vmatpush1.bf16.msra.mxu0 %v11095_v55  ;;  %8101 = vmatpush1.bf16.msra.mxu1 %v11097_v11 }
 0x4b8   :  { %8071 = vmatprep.subr.bf16.mxu0 %v11101_v8  ;;  %8103 = vmatprep.subr.bf16.mxu1 %v11103_v50  ;;  %v9640_v52 = vpop.eup %9639 }
 0x4bb   :  { %8073 = vmatpush1.bf16.msra.mxu0 %v11108_v2  ;;  %8105 = vmatpush1.bf16.msra.mxu1 %v11110_v14 }
 0x4bc   :  { %8075 = vmatprep.subr.bf16.mxu0 %v11114_v6  ;;  %8107 = vmatprep.subr.bf16.mxu1 %v11116_v49 }
 0x4bf   :  { %v9642_v5 = vpop.eup %9641  ;;  %8077 = vmatpush1.bf16.msra.mxu0 %v11120_v35  ;;  %8109 = vmatpush1.bf16.msra.mxu1 %v11122_v29 }
 0x4c0   :  { %v11128_v61 = vmul.f32 %v9642_v5, %v9640_v52  ;;  %8111 = vmatprep.subr.bf16.mxu0 %v10914_v23  ;;  %8143 = vmatprep.subr.bf16.mxu1 %v10916_v20 }
 0x4c2   :  { %12309 = vst [vmem:[#allocation55_spill] sm:$0xff] %v11128_v61  ;;  %3072 = vmatmul.mubr.f32.vlgmr.msra.gmra.mrb[22].mxu0 %v11128_v61  ;;  %3143 = vmatmul.mubr.f32.vlgmr.msra.gmra.mrb[22].mxu1 %v11128_v61 }
 0x4c3   :  { %8113 = vmatpush1.bf16.msra.mxu0 %v10918_v16  ;;  %8145 = vmatpush1.bf16.msra.mxu1 %v10921_v25 }
 0x4c4   :  { %8115 = vmatprep.subr.bf16.mxu0 %v10926_v13  ;;  %8147 = vmatprep.subr.bf16.mxu1 %v10928_v28  ;;  %v12310_v28 = vld [vmem:[#allocation37_spill] sm:$0xff] }
 0x4c5   :  { %3335 = vmatprep.mubr.f32.mxu0 %v12233_v19  ;;  %3406 = vmatprep.mubr.f32.mxu1 %v12233_v19 }
 0x4c7   :  { %8117 = vmatpush1.bf16.msra.mxu0 %v10930_v62  ;;  %8149 = vmatpush1.bf16.msra.mxu1 %v10933_v15 }
 0x4c8   :  { %8119 = vmatprep.subr.bf16.mxu0 %v10938_v39  ;;  %8151 = vmatprep.subr.bf16.mxu1 %v10940_v9  ;;  %v12311_v9 = vld [vmem:[#allocation38_spill] sm:$0xff] }
 0x4cb   :  { %8121 = vmatpush1.bf16.msra.mxu0 %v10942_v37  ;;  %8153 = vmatpush1.bf16.msra.mxu1 %v10945_v44 }
 0x4cc   :  { %8123 = vmatprep.subr.bf16.mxu0 %v10950_v59  ;;  %8155 = vmatprep.subr.bf16.mxu1 %v10952_v3  ;;  %v12312_v59 = vld [vmem:[#allocation39_spill] sm:$0xff] }
 0x4cf   :  { %8125 = vmatpush1.bf16.msra.mxu0 %v10954_v54  ;;  %8157 = vmatpush1.bf16.msra.mxu1 %v10957_v10 }
 0x4d0   :  { %8127 = vmatprep.subr.bf16.mxu0 %v10962_v22  ;;  %8159 = vmatprep.subr.bf16.mxu1 %v10964_v63 }
 0x4d3   :  { %8129 = vmatpush1.bf16.msra.mxu0 %v10966_v45  ;;  %8161 = vmatpush1.bf16.msra.mxu1 %v10969_v41 }
 0x4d4   :  { %8131 = vmatprep.subr.bf16.mxu0 %v10974_v51  ;;  %8163 = vmatprep.subr.bf16.mxu1 %v10976_v21 }
 0x4d7   :  { %8133 = vmatpush1.bf16.msra.mxu0 %v10978_v1  ;;  %8165 = vmatpush1.bf16.msra.mxu1 %v10981_v58 }
 0x4d8   :  { %8135 = vmatprep.subr.bf16.mxu0 %v10986_v26  ;;  %8167 = vmatprep.subr.bf16.mxu1 %v10988_v42  ;;  %v12313_v26 = vld [vmem:[#allocation29_spill] sm:$0xff] }
 0x4db   :  { %8137 = vmatpush1.bf16.msra.mxu0 %v10990_v32  ;;  %8169 = vmatpush1.bf16.msra.mxu1 %v10993_v43 }
 0x4dc   :  { %8139 = vmatprep.subr.bf16.mxu0 %v10998_v48  ;;  %8171 = vmatprep.subr.bf16.mxu1 %v11000_v33  ;;  %v12314_v33 = vld [vmem:[#allocation40_spill] sm:$0xff] }
 0x4df   :  { %8141 = vmatpush1.bf16.msra.mxu0 %v11002_v47  ;;  %8173 = vmatpush1.bf16.msra.mxu1 %v11005_v12 }
 0x4e0   :  { %8175 = vmatprep.subr.bf16.mxu0 %v11010_v40  ;;  %8207 = vmatprep.subr.bf16.mxu1 %v11012_v30  ;;  %v12315_v30 = vld [vmem:[#allocation41_spill] sm:$0xff] }
 0x575   :  { %v2859_v23 = vpop.f32.mrb[8].mxu0  ;;  %v2930_v20 = vpop.f32.mrb[8].mxu1 }
 0x576   :  { %v9318_v16 = vadd.f32 %v2859_v23, %v10512_v38  ;;  %v2861_v25 = vpop.f32.mrb[9].mxu0  ;;  %v2932_v13 = vpop.f32.mrb[9].mxu1  ;;  %v9334_v3 = vadd.f32 %v2930_v20, %v12312_v59 }
 0x577   :  { %v9319_v62 = vadd.f32 %v2861_v25, %v12310_v28  ;;  %v9335_v37 = vadd.f32 %v2932_v13, %v12311_v9  ;;  %v12318_v13 = vld [vmem:[#allocation31_spill] sm:$0xff] }
 0x578   :  { %v7184_v15 = vmul.f32 -1.442695, %v9318_v16 }
 0x579   :  { %v7185_v39 = vmul.f32 -1.442695, %v9319_v62  ;;  %v7186_v44 = vmul.f32 -1.442695, %v9335_v37  ;;  %v12319_v62 = vld [vmem:[#allocation32_spill] sm:$0xff]  ;;  %v12321_v37 = vld [vmem:[#allocation35_spill] sm:$0xff] }
 0x57a   :  { %9643 = vpow2.f32 %v7184_v15 }
 0x57b   :  { %9645 = vpow2.f32 %v7185_v39  ;;  %v12320_v39 = vld [vmem:[#allocation34_spill] sm:$0xff] }
 0x57c   :  { %9647 = vpow2.f32 %v7186_v44  ;;  %v12322_v44 = vld [vmem:[#allocation44_spill] sm:$0xff] }
 0x57d   :  { %9649 = vtanh.f32 %v9334_v3  ;;  %v12323_v3 = vld [vmem:[#allocation45_spill] sm:$0xff] }
 0x584   :  { %v9644_v54 = vpop.eup %9643 }
 0x585   :  { %v9646_v10 = vpop.eup %9645  ;;  %v3156_v22 = vadd.f32 1.0, %v9644_v54  ;;  %v12324_v54 = vld [vmem:[#allocation46_spill] sm:$0xff] }
 0x586   :  { %v3162_v63 = vadd.f32 1.0, %v9646_v10  ;;  %v9648_v45 = vpop.eup %9647  ;;  %v12325_v10 = vld [vmem:[#allocation47_spill] sm:$0xff] }
 0x587   :  { %9651 = vrcp.f32 %v3156_v22  ;;  %v9650_v41 = vpop.eup %9649  ;;  %v3169_v58 = vadd.f32 1.0, %v9648_v45  ;;  %v12326_v22 = vld [vmem:[#allocation48_spill] sm:$0xff]  ;;  %v12328_v45 = vld [vmem:[#allocation50_spill] sm:$0xff] }
 0x588   :  { %9653 = vrcp.f32 %v3162_v63  ;;  %v12327_v63 = vld [vmem:[#allocation49_spill] sm:$0xff] }
 0x589   :  { %9655 = vrcp.f32 %v3169_v58  ;;  %v12330_v58 = vld [vmem:[#allocation53_spill] sm:$0xff] }
 0x591   :  { %v9652_v51 = vpop.eup %9651 }
 0x592   :  { %v9654_v21 = vpop.eup %9653  ;;  %v3173_v1 = vmul.f32 %v9652_v51, %v9650_v41  ;;  %v12329_v41 = vld [vmem:[#allocation52_spill] sm:$0xff] }
 0x593   :  { %v3172_v42 = vmul.f32 %v9654_v21, %v12313_v26  ;;  %v9656_v31 = vpop.eup %9655  ;;  %v12331_v26 = vld [vmem:[#allocation54_spill] sm:$0xff] }
 0x595   :  { %v11173_v32 = vadd.f32 %v3173_v1, %v3172_v42  ;;  %v3073_v43 = vpop.f32.mrb[22].mxu0  ;;  %v3144_v48 = vpop.f32.mrb[22].mxu1 }
 0x596   :  { %v9348_v47 = vadd.f32 %v3073_v43, %v12314_v33  ;;  %v3075_v12 = vpop.f32.mrb[23].mxu0  ;;  %v3146_v40 = vpop.f32.mrb[23].mxu1  ;;  %v9364_v5 = vadd.f32 %v3144_v48, %v10554_v4 }
 0x597   :  { %v9349_v56 = vadd.f32 %v3075_v12, %v12315_v30  ;;  %9657 = vtanh.f32 %v11173_v32  ;;  %v9365_v34 = vadd.f32 %v3146_v40, %v12316_v18  ;;  %v3696_v40 = vld [vmem:[#allocation10 + $0x58] sm:$0xff] }
 0x598   :  { %v7187_v27 = vmul.f32 -1.442695, %v9348_v47 }
 0x599   :  { %v7188_v46 = vmul.f32 -1.442695, %v9349_v56  ;;  %v7189_v52 = vmul.f32 -1.442695, %v9365_v34  ;;  %v3697_v34 = vld [vmem:[#allocation10 + $0x60] sm:$0xff] }
 0x59a   :  { %9659 = vpow2.f32 %v7187_v27  ;;  %v3700_v27 = vld [vmem:[#allocation10 + $0x78] sm:$0xff] }
 0x59b   :  { %9661 = vpow2.f32 %v7188_v46  ;;  %v3693_v46 = vld [vmem:[#allocation10 + $0x40] sm:$0xff] }
 0x59c   :  { %9663 = vpow2.f32 %v7189_v52  ;;  %v3695_v52 = vld [vmem:[#allocation10 + $0x50] sm:$0xff] }
 0x59d   :  { %9665 = vtanh.f32 %v9364_v5  ;;  %v3699_v5 = vld [vmem:[#allocation10 + $0x70] sm:$0xff] }
 0x5a1   :  { %v9658_v53 = vpop.eup %9657 }
 0x5a2   :  { %v11180_v23 = vmul.f32 %v9658_v53, %v9656_v31  ;;  %v11240_v31 = vpack.c.bf16 %v3700_v27, %v3696_v40  ;;  %v11242_v53 = vpack.c.bf16 %v3697_v34, %v3693_v46  ;;  %v3726_v40 = vld [vmem:[#allocation10 + $0x148] sm:$0xff]  ;;  %v3728_v46 = vld [vmem:[#allocation10 + $0x158] sm:$0xff] }
 0x5a3   :  { %v3730_v27 = vld [vmem:[#allocation10 + $0x168] sm:$0xff] }
 0x5a4   :  { %12317 = vst [vmem:[#allocation29_spill] sm:$0xff] %v11180_v23  ;;  %v9660_v20 = vpop.eup %9659  ;;  %3336 = vmatmul.mubr.f32.vlgmr.msra.gmra.mrb[10].mxu0 %v11180_v23  ;;  %3407 = vmatmul.mubr.f32.vlgmr.msra.gmra.mrb[10].mxu1 %v11180_v23  ;;  %v11286_v34 = vpack.c.bf16 %v3730_v27, %v3726_v40  ;;  %v3745_v40 = vld [vmem:[#allocation10 + $0x1e0] sm:$0xff] }
 0x5a5   :  { %v9662_v16 = vpop.eup %9661  ;;  %v3180_v25 = vadd.f32 1.0, %v9660_v20  ;;  %8177 = vmatpush1.bf16.msra.mxu0 %v12318_v13  ;;  %8209 = vmatpush1.bf16.msra.mxu1 %v12319_v62  ;;  %v11245_v20 = vpack.c.bf16 %v3699_v5, %v3695_v52  ;;  %v3704_v13 = vld [vmem:[#allocation10 + $0x98] sm:$0xff]  ;;  %v3725_v5 = vld [vmem:[#allocation10 + $0x140] sm:$0xff] }
 0x5a6   :  { %v3186_v15 = vadd.f32 1.0, %v9662_v16  ;;  %8179 = vmatprep.subr.bf16.mxu0 %v12320_v39  ;;  %8211 = vmatprep.subr.bf16.mxu1 %v12321_v37  ;;  %v9664_v51 = vpop.eup %9663  ;;  %v3702_v16 = vld [vmem:[#allocation10 + $0x88] sm:$0xff]  ;;  %v3701_v39 = vld [vmem:[#allocation10 + $0x80] sm:$0xff]  ;;  %v3732_v52 = vld [vmem:[#allocation10 + $0x178] sm:$0xff] }
 0x5a7   :  { %9667 = vrcp.f32 %v3180_v25  ;;  %3549 = vmatprep.mubr.f32.mxu0 %v12233_v19  ;;  %3620 = vmatprep.mubr.f32.mxu1 %v12233_v19  ;;  %v9666_v21 = vpop.eup %9665  ;;  %v3193_v48 = vadd.f32 1.0, %v9664_v51  ;;  %v3706_v25 = vld [vmem:[#allocation10 + $0xa8] sm:$0xff]  ;;  %v3705_v37 = vld [vmem:[#allocation10 + $0xa0] sm:$0xff] }
 0x5a8   :  { %9669 = vrcp.f32 %v3186_v15  ;;  %v11250_v62 = vpack.c.bf16 %v3706_v25, %v3702_v16  ;;  %v3708_v15 = vld [vmem:[#allocation10 + $0xb8] sm:$0xff]  ;;  %v3729_v16 = vld [vmem:[#allocation10 + $0x160] sm:$0xff]  ;;  %v11288_v25 = vpack.c.bf16 %v3732_v52, %v3728_v46  ;;  %v3743_v52 = vld [vmem:[#allocation10 + $0x1d0] sm:$0xff] }
 0x5a9   :  { %8181 = vmatpush1.bf16.msra.mxu0 %v12322_v44  ;;  %8213 = vmatpush1.bf16.msra.mxu1 %v12323_v3  ;;  %9671 = vrcp.f32 %v3193_v48  ;;  %v11252_v44 = vpack.c.bf16 %v3708_v15, %v3704_v13  ;;  %v11254_v3 = vpack.c.bf16 %v3705_v37, %v3701_v39  ;;  %v3715_v48 = vld [vmem:[#allocation10 + $0xf0] sm:$0xff]  ;;  %v11290_v13 = vpack.c.bf16 %v3729_v16, %v3725_v5 }
 0x5aa   :  { %8183 = vmatprep.subr.bf16.mxu0 %v12324_v54  ;;  %8215 = vmatprep.subr.bf16.mxu1 %v12325_v10  ;;  %v3703_v54 = vld [vmem:[#allocation10 + $0x90] sm:$0xff] }
 0x5ab   :  { %v3707_v10 = vld [vmem:[#allocation10 + $0xb0] sm:$0xff] }
 0x5ac   :  { %v3727_v15 = vld [vmem:[#allocation10 + $0x150] sm:$0xff] }
 0x5ad   :  { %8185 = vmatpush1.bf16.msra.mxu0 %v12326_v22  ;;  %8217 = vmatpush1.bf16.msra.mxu1 %v12327_v63  ;;  %v11257_v22 = vpack.c.bf16 %v3707_v10, %v3703_v54  ;;  %v3710_v63 = vld [vmem:[#allocation10 + $0xc8] sm:$0xff]  ;;  %v3731_v39 = vld [vmem:[#allocation10 + $0x170] sm:$0xff] }
 0x5ae   :  { %8187 = vmatprep.subr.bf16.mxu0 %v12328_v45  ;;  %8219 = vmatprep.subr.bf16.mxu1 %v12329_v41  ;;  %v3714_v45 = vld [vmem:[#allocation10 + $0xe8] sm:$0xff]  ;;  %v3712_v41 = vld [vmem:[#allocation10 + $0xd8] sm:$0xff]  ;;  %v11293_v37 = vpack.c.bf16 %v3731_v39, %v3727_v15  ;;  %v3747_v5 = vld [vmem:[#allocation10 + $0x1f0] sm:$0xff] }
 0x5af   :  { %v11262_v51 = vpack.c.bf16 %v3714_v45, %v3710_v63  ;;  %v3734_v54 = vld [vmem:[#allocation10 + $0x188] sm:$0xff]  ;;  %v3736_v63 = vld [vmem:[#allocation10 + $0x198] sm:$0xff]  ;;  %v11317_v16 = vpack.c.bf16 %v3747_v5, %v3743_v52 }
 0x5b0   :  { %v3738_v10 = vld [vmem:[#allocation10 + $0x1a8] sm:$0xff] }
 0x5b1   :  { %v9668_v1 = vpop.eup %9667  ;;  %8189 = vmatpush1.bf16.msra.mxu0 %v12330_v58  ;;  %8221 = vmatpush1.bf16.msra.mxu1 %v12331_v26  ;;  %v3713_v58 = vld [vmem:[#allocation10 + $0xe0] sm:$0xff]  ;;  %v11298_v45 = vpack.c.bf16 %v3738_v10, %v3734_v54  ;;  %v3900_v15 = vld [vmem:[#allocation12 + $0x8] sm:$0xff]  ;;  %v3902_v54 = vld [vmem:[#allocation12 + $0x18] sm:$0xff] }
 0x5b2   :  { %v9670_v42 = vpop.eup %9669  ;;  %v3197_v43 = vmul.f32 %v9668_v1, %v9666_v21  ;;  %8191 = vmatprep.subr.bf16.mxu0 %v11074_v7  ;;  %8223 = vmatprep.subr.bf16.mxu1 %v11076_v60  ;;  %v3690_v7 = vld [vmem:[#allocation10 + $0x28] sm:$0xff]  ;;  %v3688_v60 = vld [vmem:[#allocation10 + $0x18] sm:$0xff]  ;;  %v3709_v1 = vld [vmem:[#allocation10 + $0xc0] sm:$0xff] }
 0x5b3   :  { %v3196_v47 = vmul.f32 %v9670_v42, %v11091_v36  ;;  %v3716_v21 = vld [vmem:[#allocation10 + $0xf8] sm:$0xff]  ;;  %v11266_v42 = vpack.c.bf16 %v3713_v58, %v3709_v1  ;;  %v3737_v1 = vld [vmem:[#allocation10 + $0x1a0] sm:$0xff]  ;;  %v3904_v39 = vld [vmem:[#allocation12 + $0x28] sm:$0xff] }
 0x5b4   :  { %v11264_v26 = vpack.c.bf16 %v3716_v21, %v3712_v41  ;;  %v3740_v41 = vld [vmem:[#allocation10 + $0x1b8] sm:$0xff]  ;;  %v3733_v21 = vld [vmem:[#allocation10 + $0x180] sm:$0xff]  ;;  %v11322_v10 = vpack.c.bf16 %v3904_v39, %v3900_v15 }
 0x5b5   :  { %v11203_v12 = vadd.f32 %v3197_v43, %v3196_v47  ;;  %8193 = vmatpush1.bf16.msra.mxu0 %v11080_v57  ;;  %8225 = vmatpush1.bf16.msra.mxu1 %v11082_v17  ;;  %v3686_v17 = vld [vmem:[#allocation10 + $0x8] sm:$0xff]  ;;  %v3711_v43 = vld [vmem:[#allocation10 + $0xd0] sm:$0xff]  ;;  %v11300_v58 = vpack.c.bf16 %v3740_v41, %v3736_v63  ;;  %v3906_v63 = vld [vmem:[#allocation12 + $0x38] sm:$0xff] }
 0x5b6   :  { %8195 = vmatprep.subr.bf16.mxu0 %v11086_v24  ;;  %8227 = vmatprep.subr.bf16.mxu1 %v11088_v0  ;;  %v9672_v24 = vpop.eup %9671  ;;  %v11226_v57 = vpack.c.bf16 %v3690_v7, %v3686_v17  ;;  %v11269_v47 = vpack.c.bf16 %v3715_v48, %v3711_v43  ;;  %v3720_v17 = vld [vmem:[#allocation10 + $0x118] sm:$0xff]  ;;  %v11302_v43 = vpack.c.bf16 %v3737_v1, %v3733_v21  ;;  %v3735_v48 = vld [vmem:[#allocation10 + $0x190] sm:$0xff] }
 0x5b7   :  { %9673 = vtanh.f32 %v11203_v12  ;;  %v11324_v41 = vpack.c.bf16 %v3906_v63, %v3902_v54 }
 0x5b9   :  { %8197 = vmatpush1.bf16.msra.mxu0 %v11095_v55  ;;  %8229 = vmatpush1.bf16.msra.mxu1 %v11097_v11  ;;  %v3692_v55 = vld [vmem:[#allocation10 + $0x38] sm:$0xff]  ;;  %v3685_v11 = vld [vmem:[#allocation10] sm:$0xff] }
 0x5ba   :  { %8199 = vmatprep.subr.bf16.mxu0 %v11101_v8  ;;  %8231 = vmatprep.subr.bf16.mxu1 %v11103_v50  ;;  %v3689_v8 = vld [vmem:[#allocation10 + $0x20] sm:$0xff]  ;;  %v11228_v50 = vpack.c.bf16 %v3692_v55, %v3688_v60  ;;  %v3724_v60 = vld [vmem:[#allocation10 + $0x138] sm:$0xff] }
 0x5bb   :  { %v3717_v55 = vld [vmem:[#allocation10 + $0x100] sm:$0xff] }
 0x5bd   :  { %8201 = vmatpush1.bf16.msra.mxu0 %v11108_v2  ;;  %8233 = vmatpush1.bf16.msra.mxu1 %v11110_v14  ;;  %v11230_v2 = vpack.c.bf16 %v3689_v8, %v3685_v11  ;;  %v3687_v14 = vld [vmem:[#allocation10 + $0x10] sm:$0xff]  ;;  %v3721_v11 = vld [vmem:[#allocation10 + $0x120] sm:$0xff]  ;;  %v11276_v8 = vpack.c.bf16 %v3724_v60, %v3720_v17  ;;  %v3742_v17 = vld [vmem:[#allocation10 + $0x1c8] sm:$0xff] }
 0x5be   :  { %8203 = vmatprep.subr.bf16.mxu0 %v11114_v6  ;;  %8235 = vmatprep.subr.bf16.mxu1 %v11116_v49  ;;  %v3691_v6 = vld [vmem:[#allocation10 + $0x30] sm:$0xff]  ;;  %v3746_v60 = vld [vmem:[#allocation10 + $0x1e8] sm:$0xff] }
 0x5bf   :  { %v11233_v49 = vpack.c.bf16 %v3691_v6, %v3687_v14  ;;  %v11278_v14 = vpack.c.bf16 %v3721_v11, %v3717_v55  ;;  %v3719_v6 = vld [vmem:[#allocation10 + $0x110] sm:$0xff]  ;;  %v3744_v55 = vld [vmem:[#allocation10 + $0x1d8] sm:$0xff]  ;;  %v11310_v11 = vpack.c.bf16 %v3746_v60, %v3742_v17 }
 0x5c1   :  { %v9674_v36 = vpop.eup %9673  ;;  %8205 = vmatpush1.bf16.msra.mxu0 %v11120_v35  ;;  %8237 = vmatpush1.bf16.msra.mxu1 %v11122_v29  ;;  %v3694_v35 = vld [vmem:[#allocation10 + $0x48] sm:$0xff] }
 0x5c2   :  { %v11220_v0 = vmul.f32 %v9674_v36, %v9672_v24  ;;  %8239 = vmatprep.subr.bf16.mxu0 %v11226_v57  ;;  %8271 = vmatprep.subr.bf16.mxu1 %v11228_v50  ;;  %v3698_v29 = vld [vmem:[#allocation10 + $0x68] sm:$0xff] }
 0x5c3   :  { %v11238_v56 = vpack.c.bf16 %v3698_v29, %v3694_v35  ;;  %v3718_v24 = vld [vmem:[#allocation10 + $0x108] sm:$0xff]  ;;  %v3723_v35 = vld [vmem:[#allocation10 + $0x130] sm:$0xff] }
 0x5c4   :  { %12332 = vst [vmem:[#allocation31_spill] sm:$0xff] %v11220_v0  ;;  %3550 = vmatmul.mubr.f32.vlgmr.msra.gmra.mrb[20].mxu0 %v11220_v0  ;;  %3621 = vmatmul.mubr.f32.vlgmr.msra.gmra.mrb[20].mxu1 %v11220_v0  ;;  %v3722_v36 = vld [vmem:[#allocation10 + $0x128] sm:$0xff]  ;;  %v11281_v29 = vpack.c.bf16 %v3723_v35, %v3719_v6  ;;  %v3748_v6 = vld [vmem:[#allocation10 + $0x1f8] sm:$0xff]  ;;  %v3741_v35 = vld [vmem:[#allocation10 + $0x1c0] sm:$0xff] }
 0x5c5   :  { %3813 = vmatprep.mubr.f32.mxu0 %v12233_v19  ;;  %3884 = vmatprep.mubr.f32.mxu1 %v12233_v19  ;;  %v11274_v7 = vpack.c.bf16 %v3722_v36, %v3718_v24  ;;  %v3739_v24 = vld [vmem:[#allocation10 + $0x1b0] sm:$0xff]  ;;  %v11312_v27 = vpack.c.bf16 %v3748_v6, %v3744_v55  ;;  %v11314_v46 = vpack.c.bf16 %v3745_v40, %v3741_v35 }
 0x5c6   :  { %8241 = vmatpush1.bf16.msra.mxu0 %v11230_v2  ;;  %8273 = vmatpush1.bf16.msra.mxu1 %v11233_v49  ;;  %v11305_v36 = vpack.c.bf16 %v3739_v24, %v3735_v48 }
 0x5c7   :  { %8243 = vmatprep.subr.bf16.mxu0 %v11238_v56  ;;  %8275 = vmatprep.subr.bf16.mxu1 %v11240_v31 }
 0x5ca   :  { %8245 = vmatpush1.bf16.msra.mxu0 %v11242_v53  ;;  %8277 = vmatpush1.bf16.msra.mxu1 %v11245_v20 }
 0x5cb   :  { %8247 = vmatprep.subr.bf16.mxu0 %v11250_v62  ;;  %8279 = vmatprep.subr.bf16.mxu1 %v11252_v44 }
 0x5ce   :  { %8249 = vmatpush1.bf16.msra.mxu0 %v11254_v3  ;;  %8281 = vmatpush1.bf16.msra.mxu1 %v11257_v22 }
 0x5cf   :  { %8251 = vmatprep.subr.bf16.mxu0 %v11262_v51  ;;  %8283 = vmatprep.subr.bf16.mxu1 %v11264_v26 }
 0x5d2   :  { %8253 = vmatpush1.bf16.msra.mxu0 %v11266_v42  ;;  %8285 = vmatpush1.bf16.msra.mxu1 %v11269_v47 }
 0x5d3   :  { %8255 = vmatprep.subr.bf16.mxu0 %v11274_v7  ;;  %8287 = vmatprep.subr.bf16.mxu1 %v11276_v8 }
 0x5d6   :  { %8257 = vmatpush1.bf16.msra.mxu0 %v11278_v14  ;;  %8289 = vmatpush1.bf16.msra.mxu1 %v11281_v29 }
 0x5d7   :  { %8259 = vmatprep.subr.bf16.mxu0 %v11286_v34  ;;  %8291 = vmatprep.subr.bf16.mxu1 %v11288_v25 }
 0x5da   :  { %8261 = vmatpush1.bf16.msra.mxu0 %v11290_v13  ;;  %8293 = vmatpush1.bf16.msra.mxu1 %v11293_v37 }
 0x5db   :  { %8263 = vmatprep.subr.bf16.mxu0 %v11298_v45  ;;  %8295 = vmatprep.subr.bf16.mxu1 %v11300_v58 }
 0x5de   :  { %8265 = vmatpush1.bf16.msra.mxu0 %v11302_v43  ;;  %8297 = vmatpush1.bf16.msra.mxu1 %v11305_v36 }
 0x5df   :  { %8267 = vmatprep.subr.bf16.mxu0 %v11310_v11  ;;  %8299 = vmatprep.subr.bf16.mxu1 %v11312_v27 }
 0x5e2   :  { %8269 = vmatpush1.bf16.msra.mxu0 %v11314_v46  ;;  %8301 = vmatpush1.bf16.msra.mxu1 %v11317_v16 }
 0x5e3   :  { %8303 = vmatprep.subr.bf16.mxu0 %v11322_v10  ;;  %8335 = vmatprep.subr.bf16.mxu1 %v11324_v41 }
 0x677   :  { %v3337_v21 = vpop.f32.mrb[10].mxu0  ;;  %v3408_v1 = vpop.f32.mrb[10].mxu1 }
 0x678   :  { %v9320_v48 = vadd.f32 %v3337_v21, %v10512_v38  ;;  %v3339_v24 = vpop.f32.mrb[11].mxu0  ;;  %v3410_v17 = vpop.f32.mrb[11].mxu1  ;;  %v9336_v52 = vadd.f32 %v3408_v1, %v12312_v59  ;;  %v3916_v59 = vld [vmem:[#allocation12 + $0x88] sm:$0xff] }
 0x679   :  { %v9321_v60 = vadd.f32 %v3339_v24, %v12310_v28  ;;  %v9337_v35 = vadd.f32 %v3410_v17, %v12311_v9  ;;  %v3920_v9 = vld [vmem:[#allocation12 + $0xa8] sm:$0xff]  ;;  %v3918_v28 = vld [vmem:[#allocation12 + $0x98] sm:$0xff] }
 0x67a   :  { %v7190_v55 = vmul.f32 -1.442695, %v9320_v48 }
 0x67b   :  { %v7191_v6 = vmul.f32 -1.442695, %v9321_v60  ;;  %v7192_v40 = vmul.f32 -1.442695, %v9337_v35 }
 0x67c   :  { %9675 = vpow2.f32 %v7190_v55 }
 0x67d   :  { %9677 = vpow2.f32 %v7191_v6 }
 0x67e   :  { %9679 = vpow2.f32 %v7192_v40 }
 0x67f   :  { %9681 = vtanh.f32 %v9336_v52 }
 0x686   :  { %v9676_v5 = vpop.eup %9675 }
 0x687   :  { %v9678_v15 = vpop.eup %9677  ;;  %v3634_v39 = vadd.f32 1.0, %v9676_v5 }
 0x688   :  { %v3640_v54 = vadd.f32 1.0, %v9678_v15  ;;  %v9680_v63 = vpop.eup %9679 }
 0x689   :  { %9683 = vrcp.f32 %v3634_v39  ;;  %v9682_v21 = vpop.eup %9681  ;;  %v3647_v55 = vadd.f32 1.0, %v9680_v63 }
 0x68a   :  { %9685 = vrcp.f32 %v3640_v54 }
 0x68b   :  { %9687 = vrcp.f32 %v3647_v55  ;;  %v3912_v55 = vld [vmem:[#allocation12 + $0x68] sm:$0xff] }
 0x693   :  { %v9684_v24 = vpop.eup %9683 }
 0x694   :  { %v9686_v48 = vpop.eup %9685  ;;  %v3651_v60 = vmul.f32 %v9684_v24, %v9682_v21  ;;  %v3903_v21 = vld [vmem:[#allocation12 + $0x20] sm:$0xff]  ;;  %v3901_v24 = vld [vmem:[#allocation12 + $0x10] sm:$0xff] }
 0x695   :  { %v3650_v6 = vmul.f32 %v9686_v48, %v11173_v32  ;;  %v3899_v32 = vld [vmem:[#allocation12] sm:$0xff]  ;;  %v3905_v48 = vld [vmem:[#allocation12 + $0x30] sm:$0xff]  ;;  %v9688_v23 = vpop.eup %9687 }
 0x697   :  { %v11333_v17 = vadd.f32 %v3651_v60, %v3650_v6  ;;  %v3551_v35 = vpop.f32.mrb[20].mxu0  ;;  %v3622_v1 = vpop.f32.mrb[20].mxu1  ;;  %v3908_v60 = vld [vmem:[#allocation12 + $0x48] sm:$0xff]  ;;  %v3910_v6 = vld [vmem:[#allocation12 + $0x58] sm:$0xff] }
 0x698   :  { %v9346_v5 = vadd.f32 %v3551_v35, %v12314_v33  ;;  %v3553_v40 = vpop.f32.mrb[21].mxu0  ;;  %v3624_v52 = vpop.f32.mrb[21].mxu1  ;;  %v3914_v35 = vld [vmem:[#allocation12 + $0x78] sm:$0xff]  ;;  %v3909_v33 = vld [vmem:[#allocation12 + $0x50] sm:$0xff] }
 0x699   :  { %12333 = vst [vmem:[#allocation32_spill] sm:$0xff] %v11333_v17  ;;  %v9347_v15 = vadd.f32 %v3553_v40, %v12315_v30  ;;  %9689 = vtanh.f32 %v11333_v17  ;;  %v9363_v63 = vadd.f32 %v3624_v52, %v12316_v18  ;;  %v11339_v40 = vpack.c.bf16 %v3903_v21, %v3899_v32  ;;  %v3913_v17 = vld [vmem:[#allocation12 + $0x70] sm:$0xff] }
 0x69a   :  { %v7193_v39 = vmul.f32 -1.442695, %v9346_v5  ;;  %v11341_v30 = vpack.c.bf16 %v3905_v48, %v3901_v24  ;;  %v3907_v5 = vld [vmem:[#allocation12 + $0x40] sm:$0xff]  ;;  %v11348_v18 = vpack.c.bf16 %v3914_v35, %v3910_v6  ;;  %v3921_v35 = vld [vmem:[#allocation12 + $0xb0] sm:$0xff] }
 0x69b   :  { %v7194_v54 = vmul.f32 -1.442695, %v9347_v15  ;;  %v7195_v0 = vmul.f32 -1.442695, %v9363_v63  ;;  %12334 = vst [vmem:[#allocation34_spill] sm:$0xff] %v11339_v40  ;;  %v3911_v15 = vld [vmem:[#allocation12 + $0x60] sm:$0xff] }
 0x69c   :  { %9691 = vpow2.f32 %v7193_v39  ;;  %12335 = vst [vmem:[#allocation35_spill] sm:$0xff] %v11341_v30  ;;  %v9362_v39 = vadd.f32 %v3622_v1, %v10554_v4  ;;  %12338 = vst [vmem:[#allocation46_spill] sm:$0xff] %v11348_v18  ;;  %v3922_v63 = vld [vmem:[#allocation12 + $0xb8] sm:$0xff]  ;;  %v3915_v1 = vld [vmem:[#allocation12 + $0x80] sm:$0xff] }
 0x69d   :  { %9693 = vpow2.f32 %v7194_v54  ;;  %v11346_v54 = vpack.c.bf16 %v3912_v55, %v3908_v60  ;;  %v3919_v48 = vld [vmem:[#allocation12 + $0xa0] sm:$0xff]  ;;  %v11360_v55 = vpack.c.bf16 %v3920_v9, %v3916_v59  ;;  %v11362_v6 = vpack.c.bf16 %v3922_v63, %v3918_v28 }
 0x69e   :  { %9695 = vpow2.f32 %v7195_v0  ;;  %v3917_v0 = vld [vmem:[#allocation12 + $0x90] sm:$0xff]  ;;  %v11368_v9 = vpack.c.bf16 %v3919_v48, %v3915_v1  ;;  %v3923_v59 = vld [vmem:[#allocation12 + $0xc0] sm:$0xff] }
 0x69f   :  { %12337 = vst [vmem:[#allocation45_spill] sm:$0xff] %v11346_v54  ;;  %9697 = vtanh.f32 %v9362_v39  ;;  %12341 = vst [vmem:[#allocation49_spill] sm:$0xff] %v11360_v55  ;;  %v11370_v28 = vpack.c.bf16 %v3921_v35, %v3917_v0  ;;  %v3931_v0 = vld [vmem:[#allocation12 + $0x100] sm:$0xff] }
 0x6a0   :  { %12342 = vst [vmem:[#allocation50_spill] sm:$0xff] %v11362_v6  ;;  %12343 = vst [vmem:[#allocation52_spill] sm:$0xff] %v11368_v9  ;;  %v3935_v35 = vld [vmem:[#allocation12 + $0x120] sm:$0xff] }
 0x6a1   :  { %12344 = vst [vmem:[#allocation53_spill] sm:$0xff] %v11370_v28 }
 0x6a3   :  { %v9690_v61 = vpop.eup %9689 }
 0x6a4   :  { %v11344_v52 = vmul.f32 %v9690_v61, %v9688_v23  ;;  %v11354_v61 = vpack.c.bf16 %v3911_v15, %v3907_v5  ;;  %v11356_v23 = vpack.c.bf16 %v3913_v17, %v3909_v33  ;;  %v3928_v5 = vld [vmem:[#allocation12 + $0xe8] sm:$0xff]  ;;  %v3926_v15 = vld [vmem:[#allocation12 + $0xd8] sm:$0xff]  ;;  %v3927_v17 = vld [vmem:[#allocation12 + $0xe0] sm:$0xff] }
 0x6a5   :  { %v3930_v33 = vld [vmem:[#allocation12 + $0xf8] sm:$0xff]  ;;  %v11380_v1 = vpack.c.bf16 %v3927_v17, %v3923_v59 }
 0x6a6   :  { %12336 = vst [vmem:[#allocation44_spill] sm:$0xff] %v11344_v52  ;;  %v9692_v32 = vpop.eup %9691  ;;  %3814 = vmatmul.mubr.f32.vlgmr.msra.gmra.mrb[12].mxu0 %v11344_v52  ;;  %3885 = vmatmul.mubr.f32.vlgmr.msra.gmra.mrb[12].mxu1 %v11344_v52  ;;  %12339 = vst [vmem:[#allocation47_spill] sm:$0xff] %v11354_v61  ;;  %v11376_v63 = vpack.c.bf16 %v3930_v33, %v3926_v15  ;;  %v3936_v52 = vld [vmem:[#allocation12 + $0x128] sm:$0xff]  ;;  %v3933_v15 = vld [vmem:[#allocation12 + $0x110] sm:$0xff] }
 0x6a7   :  { %v9694_v21 = vpop.eup %9693  ;;  %v3658_v24 = vadd.f32 1.0, %v9692_v32  ;;  %8305 = vmatpush1.bf16.msra.mxu0 %v11339_v40  ;;  %8337 = vmatpush1.bf16.msra.mxu1 %v11341_v30  ;;  %12340 = vst [vmem:[#allocation48_spill] sm:$0xff] %v11356_v23  ;;  %v3924_v32 = vld [vmem:[#allocation12 + $0xc8] sm:$0xff]  ;;  %12347 = vst [vmem:[#allocation57_spill] sm:$0xff] %v11380_v1  ;;  %v3937_v33 = vld [vmem:[#allocation12 + $0x130] sm:$0xff] }
 0x6a8   :  { %v3664_v60 = vadd.f32 1.0, %v9694_v21  ;;  %8307 = vmatprep.subr.bf16.mxu0 %v11346_v54  ;;  %8339 = vmatprep.subr.bf16.mxu1 %v11348_v18  ;;  %v11374_v39 = vpack.c.bf16 %v3928_v5, %v3924_v32  ;;  %12346 = vst [vmem:[#allocation56_spill] sm:$0xff] %v11376_v63  ;;  %v3925_v21 = vld [vmem:[#allocation12 + $0xd0] sm:$0xff]  ;;  %v3946_v59 = vld [vmem:[#allocation12 + $0x178] sm:$0xff] }
 0x6a9   :  { %9699 = vrcp.f32 %v3658_v24  ;;  %4027 = vmatprep.mubr.f32.mxu0 %v12233_v19  ;;  %4098 = vmatprep.mubr.f32.mxu1 %v12233_v19  ;;  %v3929_v24 = vld [vmem:[#allocation12 + $0xf0] sm:$0xff] }
 0x6aa   :  { %9701 = vrcp.f32 %v3664_v60  ;;  %12345 = vst [vmem:[#allocation54_spill] sm:$0xff] %v11374_v39  ;;  %v3932_v60 = vld [vmem:[#allocation12 + $0x108] sm:$0xff]  ;;  %v11382_v48 = vpack.c.bf16 %v3929_v24, %v3925_v21  ;;  %v11392_v24 = vpack.c.bf16 %v3935_v35, %v3931_v0  ;;  %v3945_v30 = vld [vmem:[#allocation12 + $0x170] sm:$0xff] }
 0x6ab   :  { %8309 = vmatpush1.bf16.msra.mxu0 %v11354_v61  ;;  %8341 = vmatpush1.bf16.msra.mxu1 %v11356_v23  ;;  %v3934_v61 = vld [vmem:[#allocation12 + $0x118] sm:$0xff]  ;;  %v11386_v32 = vpack.c.bf16 %v3936_v52, %v3932_v60  ;;  %v3939_v52 = vld [vmem:[#allocation12 + $0x140] sm:$0xff]  ;;  %v3952_v35 = vld [vmem:[#allocation12 + $0x1a8] sm:$0xff] }
 0x6ac   :  { %8311 = vmatprep.subr.bf16.mxu0 %v11360_v55  ;;  %8343 = vmatprep.subr.bf16.mxu1 %v11362_v6  ;;  %v3938_v23 = vld [vmem:[#allocation12 + $0x138] sm:$0xff]  ;;  %12348 = vst [vmem:[#allocation58_spill] sm:$0xff] %v11382_v48  ;;  %v3940_v6 = vld [vmem:[#allocation12 + $0x148] sm:$0xff] }
 0x6ad   :  { %v11388_v5 = vpack.c.bf16 %v3938_v23, %v3934_v61  ;;  %v3944_v55 = vld [vmem:[#allocation12 + $0x168] sm:$0xff]  ;;  %v3943_v61 = vld [vmem:[#allocation12 + $0x160] sm:$0xff] }
 0x6ae   :  { %v11398_v18 = vpack.c.bf16 %v3944_v55, %v3940_v6  ;;  %v3947_v6 = vld [vmem:[#allocation12 + $0x180] sm:$0xff] }
 0x6af   :  { %8313 = vmatpush1.bf16.msra.mxu0 %v11368_v9  ;;  %8345 = vmatpush1.bf16.msra.mxu1 %v11370_v28  ;;  %v9696_v9 = vpop.eup %9695  ;;  %v3942_v28 = vld [vmem:[#allocation12 + $0x158] sm:$0xff] }
 0x6b0   :  { %8315 = vmatprep.subr.bf16.mxu0 %v11374_v39  ;;  %8347 = vmatprep.subr.bf16.mxu1 %v11376_v63  ;;  %v9698_v17 = vpop.eup %9697  ;;  %v11394_v63 = vpack.c.bf16 %v3937_v33, %v3933_v15  ;;  %v3671_v39 = vadd.f32 1.0, %v9696_v9  ;;  %v11400_v54 = vpack.c.bf16 %v3946_v59, %v3942_v28  ;;  %v3950_v15 = vld [vmem:[#allocation12 + $0x198] sm:$0xff]  ;;  %v11407_v9 = vpack.c.bf16 %v3943_v61, %v3939_v52  ;;  %v3951_v28 = vld [vmem:[#allocation12 + $0x1a0] sm:$0xff] }
 0x6b1   :  { %v3954_v33 = vld [vmem:[#allocation12 + $0x1b8] sm:$0xff] }
 0x6b2   :  { %9703 = vrcp.f32 %v3671_v39  ;;  %v11415_v59 = vpack.c.bf16 %v3954_v33, %v3950_v15  ;;  %v3962_v52 = vld [vmem:[#allocation12 + $0x1f8] sm:$0xff]  ;;  %v3957_v15 = vld [vmem:[#allocation12 + $0x1d0] sm:$0xff] }
 0x6b3   :  { %v9700_v21 = vpop.eup %9699  ;;  %8317 = vmatpush1.bf16.msra.mxu0 %v11380_v1  ;;  %8349 = vmatpush1.bf16.msra.mxu1 %v11382_v48  ;;  %v3941_v1 = vld [vmem:[#allocation12 + $0x150] sm:$0xff]  ;;  %v3948_v48 = vld [vmem:[#allocation12 + $0x188] sm:$0xff] }
 0x6b4   :  { %v9702_v23 = vpop.eup %9701  ;;  %v3675_v60 = vmul.f32 %v9700_v21, %v9698_v17  ;;  %8319 = vmatprep.subr.bf16.mxu0 %v11386_v32  ;;  %8351 = vmatprep.subr.bf16.mxu1 %v11388_v5  ;;  %v11409_v55 = vpack.c.bf16 %v3945_v30, %v3941_v1  ;;  %v3949_v17 = vld [vmem:[#allocation12 + $0x190] sm:$0xff]  ;;  %v11420_v30 = vpack.c.bf16 %v3951_v28, %v3947_v6  ;;  %v3955_v1 = vld [vmem:[#allocation12 + $0x1c0] sm:$0xff] }
 0x6b5   :  { %v3674_v0 = vmul.f32 %v9702_v23, %v11203_v12  ;;  %v11413_v12 = vpack.c.bf16 %v3952_v35, %v3948_v48  ;;  %v3953_v21 = vld [vmem:[#allocation12 + $0x1b0] sm:$0xff]  ;;  %v3956_v23 = vld [vmem:[#allocation12 + $0x1c8] sm:$0xff]  ;;  %v3959_v35 = vld [vmem:[#allocation12 + $0x1e0] sm:$0xff] }
 0x6b6   :  { %v11422_v39 = vpack.c.bf16 %v3953_v21, %v3949_v17  ;;  %v3961_v33 = vld [vmem:[#allocation12 + $0x1f0] sm:$0xff]  ;;  %v11432_v6 = vpack.c.bf16 %v3959_v35, %v3955_v1  ;;  %v12355_v1 = vld [vmem:[#allocation42_spill] sm:$0xff] }
 0x6b7   :  { %v11403_v40 = vadd.f32 %v3675_v60, %v3674_v0  ;;  %8321 = vmatpush1.bf16.msra.mxu0 %v11392_v24  ;;  %8353 = vmatpush1.bf16.msra.mxu1 %v11394_v63  ;;  %v3960_v60 = vld [vmem:[#allocation12 + $0x1e8] sm:$0xff]  ;;  %v3958_v0 = vld [vmem:[#allocation12 + $0x1d8] sm:$0xff]  ;;  %v11434_v28 = vpack.c.bf16 %v3961_v33, %v3957_v15 }
 0x6b8   :  { %8323 = vmatprep.subr.bf16.mxu0 %v11398_v18  ;;  %8355 = vmatprep.subr.bf16.mxu1 %v11400_v54  ;;  %v11426_v48 = vpack.c.bf16 %v3960_v60, %v3956_v23  ;;  %v11428_v61 = vpack.c.bf16 %v3962_v52, %v3958_v0 }
 0x6b9   :  { %9705 = vtanh.f32 %v11403_v40 }
 0x6bb   :  { %8325 = vmatpush1.bf16.msra.mxu0 %v11407_v9  ;;  %8357 = vmatpush1.bf16.msra.mxu1 %v11409_v55 }
 0x6bc   :  { %8327 = vmatprep.subr.bf16.mxu0 %v11413_v12  ;;  %8359 = vmatprep.subr.bf16.mxu1 %v11415_v59  ;;  %v9704_v17 = vpop.eup %9703 }
 0x6bf   :  { %8329 = vmatpush1.bf16.msra.mxu0 %v11420_v30  ;;  %8361 = vmatpush1.bf16.msra.mxu1 %v11422_v39 }
 0x6c0   :  { %8331 = vmatprep.subr.bf16.mxu0 %v11426_v48  ;;  %8363 = vmatprep.subr.bf16.mxu1 %v11428_v61 }
 0x6c3   :  { %v9706_v21 = vpop.eup %9705  ;;  %8333 = vmatpush1.bf16.msra.mxu0 %v11432_v6  ;;  %8365 = vmatpush1.bf16.msra.mxu1 %v11434_v28 }
 0x6c4   :  { %v11440_v23 = vmul.f32 %v9706_v21, %v9704_v17  ;;  %8367 = vmatprep.subr.bf16.mxu0 %v11226_v57  ;;  %8399 = vmatprep.subr.bf16.mxu1 %v11228_v50 }
 0x6c6   :  { %4028 = vmatmul.mubr.f32.vlgmr.msra.gmra.mrb[18].mxu0 %v11440_v23  ;;  %4099 = vmatmul.mubr.f32.vlgmr.msra.gmra.mrb[18].mxu1 %v11440_v23 }
 0x6c7   :  { %8369 = vmatpush1.bf16.msra.mxu0 %v11230_v2  ;;  %8401 = vmatpush1.bf16.msra.mxu1 %v11233_v49 }
 0x6c8   :  { %8371 = vmatprep.subr.bf16.mxu0 %v11238_v56  ;;  %8403 = vmatprep.subr.bf16.mxu1 %v11240_v31  ;;  %v12349_v31 = vld [vmem:[#allocation37_spill] sm:$0xff] }
 0x6c9   :  { %4291 = vmatprep.mubr.f32.mxu0 %v12233_v19  ;;  %4362 = vmatprep.mubr.f32.mxu1 %v12233_v19 }
 0x6cb   :  { %8373 = vmatpush1.bf16.msra.mxu0 %v11242_v53  ;;  %8405 = vmatpush1.bf16.msra.mxu1 %v11245_v20 }
 0x6cc   :  { %8375 = vmatprep.subr.bf16.mxu0 %v11250_v62  ;;  %8407 = vmatprep.subr.bf16.mxu1 %v11252_v44  ;;  %v12350_v44 = vld [vmem:[#allocation38_spill] sm:$0xff] }
 0x6cf   :  { %8377 = vmatpush1.bf16.msra.mxu0 %v11254_v3  ;;  %8409 = vmatpush1.bf16.msra.mxu1 %v11257_v22 }
 0x6d0   :  { %8379 = vmatprep.subr.bf16.mxu0 %v11262_v51  ;;  %8411 = vmatprep.subr.bf16.mxu1 %v11264_v26  ;;  %v12351_v51 = vld [vmem:[#allocation39_spill] sm:$0xff] }
 0x6d3   :  { %8381 = vmatpush1.bf16.msra.mxu0 %v11266_v42  ;;  %8413 = vmatpush1.bf16.msra.mxu1 %v11269_v47 }
 0x6d4   :  { %8383 = vmatprep.subr.bf16.mxu0 %v11274_v7  ;;  %8415 = vmatprep.subr.bf16.mxu1 %v11276_v8 }
 0x6d7   :  { %8385 = vmatpush1.bf16.msra.mxu0 %v11278_v14  ;;  %8417 = vmatpush1.bf16.msra.mxu1 %v11281_v29 }
 0x6d8   :  { %8387 = vmatprep.subr.bf16.mxu0 %v11286_v34  ;;  %8419 = vmatprep.subr.bf16.mxu1 %v11288_v25 }
 0x6db   :  { %8389 = vmatpush1.bf16.msra.mxu0 %v11290_v13  ;;  %8421 = vmatpush1.bf16.msra.mxu1 %v11293_v37 }
 0x6dc   :  { %8391 = vmatprep.subr.bf16.mxu0 %v11298_v45  ;;  %8423 = vmatprep.subr.bf16.mxu1 %v11300_v58  ;;  %v12352_v45 = vld [vmem:[#allocation32_spill] sm:$0xff] }
 0x6df   :  { %8393 = vmatpush1.bf16.msra.mxu0 %v11302_v43  ;;  %8425 = vmatpush1.bf16.msra.mxu1 %v11305_v36 }
 0x6e0   :  { %8395 = vmatprep.subr.bf16.mxu0 %v11310_v11  ;;  %8427 = vmatprep.subr.bf16.mxu1 %v11312_v27  ;;  %v12353_v27 = vld [vmem:[#allocation40_spill] sm:$0xff] }
 0x6e3   :  { %8397 = vmatpush1.bf16.msra.mxu0 %v11314_v46  ;;  %8429 = vmatpush1.bf16.msra.mxu1 %v11317_v16 }
 0x6e4   :  { %8431 = vmatprep.subr.bf16.mxu0 %v11322_v10  ;;  %8463 = vmatprep.subr.bf16.mxu1 %v11324_v41  ;;  %v12354_v41 = vld [vmem:[#allocation41_spill] sm:$0xff] }
 0x779   :  { %v3815_v57 = vpop.f32.mrb[12].mxu0  ;;  %v3886_v50 = vpop.f32.mrb[12].mxu1 }
 0x77a   :  { %v9322_v2 = vadd.f32 %v3815_v57, %v10512_v38  ;;  %v3817_v49 = vpop.f32.mrb[13].mxu0  ;;  %v3888_v56 = vpop.f32.mrb[13].mxu1  ;;  %v9338_v26 = vadd.f32 %v3886_v50, %v12351_v51 }
 0x77b   :  { %v9323_v53 = vadd.f32 %v3817_v49, %v12349_v31  ;;  %v9339_v3 = vadd.f32 %v3888_v56, %v12350_v44  ;;  %v12356_v56 = vld [vmem:[#allocation34_spill] sm:$0xff] }
 0x77c   :  { %v7196_v20 = vmul.f32 -1.442695, %v9322_v2 }
 0x77d   :  { %v7197_v62 = vmul.f32 -1.442695, %v9323_v53  ;;  %v7198_v22 = vmul.f32 -1.442695, %v9339_v3  ;;  %v12357_v53 = vld [vmem:[#allocation35_spill] sm:$0xff]  ;;  %v12359_v3 = vld [vmem:[#allocation46_spill] sm:$0xff] }
 0x77e   :  { %9707 = vpow2.f32 %v7196_v20 }
 0x77f   :  { %9709 = vpow2.f32 %v7197_v62  ;;  %v12358_v62 = vld [vmem:[#allocation45_spill] sm:$0xff] }
 0x780   :  { %9711 = vpow2.f32 %v7198_v22  ;;  %v12360_v22 = vld [vmem:[#allocation47_spill] sm:$0xff] }
 0x781   :  { %9713 = vtanh.f32 %v9338_v26  ;;  %v12361_v26 = vld [vmem:[#allocation48_spill] sm:$0xff] }
 0x788   :  { %v9708_v42 = vpop.eup %9707 }
 0x789   :  { %v9710_v47 = vpop.eup %9709  ;;  %v4112_v7 = vadd.f32 1.0, %v9708_v42  ;;  %v12362_v42 = vld [vmem:[#allocation49_spill] sm:$0xff] }
 0x78a   :  { %v4118_v8 = vadd.f32 1.0, %v9710_v47  ;;  %v9712_v14 = vpop.eup %9711  ;;  %v12363_v47 = vld [vmem:[#allocation50_spill] sm:$0xff] }
 0x78b   :  { %9715 = vrcp.f32 %v4112_v7  ;;  %v9714_v29 = vpop.eup %9713  ;;  %v4125_v37 = vadd.f32 1.0, %v9712_v14  ;;  %v12364_v7 = vld [vmem:[#allocation52_spill] sm:$0xff]  ;;  %v12366_v14 = vld [vmem:[#allocation54_spill] sm:$0xff] }
 0x78c   :  { %9717 = vrcp.f32 %v4118_v8  ;;  %v12365_v8 = vld [vmem:[#allocation53_spill] sm:$0xff] }
 0x78d   :  { %9719 = vrcp.f32 %v4125_v37  ;;  %v12368_v37 = vld [vmem:[#allocation57_spill] sm:$0xff] }
 0x795   :  { %v9716_v34 = vpop.eup %9715 }
 0x796   :  { %v9718_v25 = vpop.eup %9717  ;;  %v4129_v13 = vmul.f32 %v9716_v34, %v9714_v29  ;;  %v12367_v29 = vld [vmem:[#allocation56_spill] sm:$0xff] }
 0x797   :  { %v4128_v58 = vmul.f32 %v9718_v25, %v12352_v45  ;;  %v9720_v15 = vpop.eup %9719  ;;  %v12369_v45 = vld [vmem:[#allocation58_spill] sm:$0xff] }
 0x799   :  { %v11485_v43 = vadd.f32 %v4129_v13, %v4128_v58  ;;  %v4029_v36 = vpop.f32.mrb[18].mxu0  ;;  %v4100_v11 = vpop.f32.mrb[18].mxu1 }
 0x79a   :  { %v9344_v46 = vadd.f32 %v4029_v36, %v12353_v27  ;;  %v4031_v16 = vpop.f32.mrb[19].mxu0  ;;  %v4102_v10 = vpop.f32.mrb[19].mxu1  ;;  %v9360_v21 = vadd.f32 %v4100_v11, %v10554_v4 }
 0x79b   :  { %v9345_v60 = vadd.f32 %v4031_v16, %v12354_v41  ;;  %9721 = vtanh.f32 %v11485_v43  ;;  %v9361_v35 = vadd.f32 %v4102_v10, %v12355_v1 }
 0x79c   :  { %v7199_v0 = vmul.f32 -1.442695, %v9344_v46 }
 0x79d   :  { %v7200_v52 = vmul.f32 -1.442695, %v9345_v60  ;;  %v7201_v17 = vmul.f32 -1.442695, %v9361_v35 }
 0x79e   :  { %9723 = vpow2.f32 %v7199_v0 }
 0x79f   :  { %9725 = vpow2.f32 %v7200_v52 }
 0x7a0   :  { %9727 = vpow2.f32 %v7201_v17 }
 0x7a1   :  { %9729 = vtanh.f32 %v9360_v21 }
 0x7a5   :  { %v9722_v33 = vpop.eup %9721 }
 0x7a6   :  { %v11492_v57 = vmul.f32 %v9722_v33, %v9720_v15 }
 0x7a8   :  { %v9724_v50 = vpop.eup %9723  ;;  %4292 = vmatmul.mubr.f32.vlgmr.msra.gmra.mrb[14].mxu0 %v11492_v57  ;;  %4363 = vmatmul.mubr.f32.vlgmr.msra.gmra.mrb[14].mxu1 %v11492_v57 }
 0x7a9   :  { %v9726_v2 = vpop.eup %9725  ;;  %v4136_v49 = vadd.f32 1.0, %v9724_v50  ;;  %8433 = vmatpush1.bf16.msra.mxu0 %v12356_v56  ;;  %8465 = vmatpush1.bf16.msra.mxu1 %v12357_v53 }
 0x7aa   :  { %v4142_v20 = vadd.f32 1.0, %v9726_v2  ;;  %8435 = vmatprep.subr.bf16.mxu0 %v12358_v62  ;;  %8467 = vmatprep.subr.bf16.mxu1 %v12359_v3  ;;  %v9728_v34 = vpop.eup %9727 }
 0x7ab   :  { %9731 = vrcp.f32 %v4136_v49  ;;  %4505 = vmatprep.mubr.f32.mxu0 %v12233_v19  ;;  %4576 = vmatprep.mubr.f32.mxu1 %v12233_v19  ;;  %v9730_v25 = vpop.eup %9729  ;;  %v4149_v11 = vadd.f32 1.0, %v9728_v34 }
 0x7ac   :  { %9733 = vrcp.f32 %v4142_v20 }
 0x7ad   :  { %8437 = vmatpush1.bf16.msra.mxu0 %v12360_v22  ;;  %8469 = vmatpush1.bf16.msra.mxu1 %v12361_v26  ;;  %9735 = vrcp.f32 %v4149_v11 }
 0x7ae   :  { %8439 = vmatprep.subr.bf16.mxu0 %v12362_v42  ;;  %8471 = vmatprep.subr.bf16.mxu1 %v12363_v47 }
 0x7b1   :  { %8441 = vmatpush1.bf16.msra.mxu0 %v12364_v7  ;;  %8473 = vmatpush1.bf16.msra.mxu1 %v12365_v8 }
 0x7b2   :  { %8443 = vmatprep.subr.bf16.mxu0 %v12366_v14  ;;  %8475 = vmatprep.subr.bf16.mxu1 %v12367_v29 }
 0x7b5   :  { %v9732_v13 = vpop.eup %9731  ;;  %8445 = vmatpush1.bf16.msra.mxu0 %v12368_v37  ;;  %8477 = vmatpush1.bf16.msra.mxu1 %v12369_v45 }
 0x7b6   :  { %v9734_v58 = vpop.eup %9733  ;;  %v4153_v36 = vmul.f32 %v9732_v13, %v9730_v25  ;;  %8447 = vmatprep.subr.bf16.mxu0 %v11386_v32  ;;  %8479 = vmatprep.subr.bf16.mxu1 %v11388_v5 }
 0x7b7   :  { %v4152_v46 = vmul.f32 %v9734_v58, %v11403_v40 }
 0x7b9   :  { %v11515_v16 = vadd.f32 %v4153_v36, %v4152_v46  ;;  %8449 = vmatpush1.bf16.msra.mxu0 %v11392_v24  ;;  %8481 = vmatpush1.bf16.msra.mxu1 %v11394_v63 }
 0x7ba   :  { %8451 = vmatprep.subr.bf16.mxu0 %v11398_v18  ;;  %8483 = vmatprep.subr.bf16.mxu1 %v11400_v54  ;;  %v9736_v18 = vpop.eup %9735 }
 0x7bb   :  { %9737 = vtanh.f32 %v11515_v16 }
 0x7bd   :  { %8453 = vmatpush1.bf16.msra.mxu0 %v11407_v9  ;;  %8485 = vmatpush1.bf16.msra.mxu1 %v11409_v55 }
 0x7be   :  { %8455 = vmatprep.subr.bf16.mxu0 %v11413_v12  ;;  %8487 = vmatprep.subr.bf16.mxu1 %v11415_v59 }
 0x7c1   :  { %8457 = vmatpush1.bf16.msra.mxu0 %v11420_v30  ;;  %8489 = vmatpush1.bf16.msra.mxu1 %v11422_v39 }
 0x7c2   :  { %8459 = vmatprep.subr.bf16.mxu0 %v11426_v48  ;;  %8491 = vmatprep.subr.bf16.mxu1 %v11428_v61 }
 0x7c5   :  { %v9738_v40 = vpop.eup %9737  ;;  %8461 = vmatpush1.bf16.msra.mxu0 %v11432_v6  ;;  %8493 = vmatpush1.bf16.msra.mxu1 %v11434_v28 }
 0x7c6   :  { %v11532_v54 = vmul.f32 %v9738_v40, %v9736_v18 }
 0x7c8   :  { %4506 = vmatmul.mubr.f32.vlgmr.msra.gmra.mrb[16].mxu0 %v11532_v54  ;;  %4577 = vmatmul.mubr.f32.vlgmr.msra.gmra.mrb[16].mxu1 %v11532_v54 }
 0x7c9   :  { %9986 = shalt.err (!%p9983_p12)  }
 0x7ca   :  { %s9987_s15 = scalar_lea.vmem %s78_s29, 32768  ;;  %p9992_p0 = scmp.lt.s32.totalorder %s78_s29, %s78_s29 }
 0x7cb   :  { %p9988_p13 = scmp.ne.s32.totalorder %s78_s29, %s9987_s15  ;;  %p9993_p1 = scmp.lt.s32.totalorder %s9987_s15, %s9987_s15 }
 0x7cd   :  { %p9994_p2 = por %p9993_p1, %p9992_p0 }
 0x7cf   :  { %p9995_p3 = pnand %p9994_p2, %p9988_p13 }
 0x7d1   :  { %9998 = shalt.err (!%p9995_p3)  }
 0x7d2   :  { %80 = dma.hbm_to_vmem [thread:$0]  %s12107_s7, 32768, %s78_s29, [#allocation7] }
 0x7d3   :  { %s9999_s18 = scalar_lea.hbm %s12108_s8, 8192 }
 0x7d4   :  { %p10000_p4 = scmp.ne.s32.totalorder %s12108_s8, %s9999_s18  ;;  %p10003_p5 = scmp.lt.u32.totalorder %s9999_s18, %s12108_s8 }
 0x7d6   :  { %p10005_p6 = pnand %p10003_p5, %p10000_p4 }
 0x7d8   :  { %10008 = shalt.err (!%p10005_p6)  }
 0x7d9   :  { %s10009_s25 = scalar_lea.vmem %s90_s11, 8192  ;;  %p10014_p8 = scmp.lt.s32.totalorder %s90_s11, %s90_s11 }
 0x7da   :  { %p10010_p7 = scmp.ne.s32.totalorder %s90_s11, %s10009_s25  ;;  %p10015_p9 = scmp.lt.s32.totalorder %s10009_s25, %s10009_s25 }
 0x7dc   :  { %p10016_p10 = por %p10015_p9, %p10014_p8 }
 0x7de   :  { %p10017_p11 = pnand %p10016_p10, %p10010_p7 }
 0x7e0   :  { %10020 = shalt.err (!%p10017_p11)  }
 0x7e1   :  { %92 = dma.hbm_to_vmem [thread:$0]  %s12108_s8, 8192, %s90_s11, [#allocation7 + $0x1] }
 0x7e2   :  { %s10063_s0 = smov [#allocation6]   ;;  %s10021_s30 = scalar_lea.hbm %s12109_s9, 4096 }
 0x7e3   :  { %s101_s27 = sshll.u32 %s10063_s0, 4  ;;  %p10022_p12 = scmp.ne.s32.totalorder %s12109_s9, %s10021_s30  ;;  %s102_s27 = int_to_ptr.vmem [resolvable:$true] %s101_s27 }
 0x7e4   :  { %p10025_p13 = scmp.lt.u32.totalorder %s10021_s30, %s12109_s9 }
 0x7e6   :  { %p10027_p0 = pnand %p10025_p13, %p10022_p12 }
 0x7e8   :  { %10030 = shalt.err (!%p10027_p0)  }
 0x7e9   :  { %s10031_s23 = scalar_lea.vmem %s102_s27, 4096  ;;  %p10036_p2 = scmp.lt.s32.totalorder %s102_s27, %s102_s27 }
 0x7ea   :  { %p10032_p1 = scmp.ne.s32.totalorder %s102_s27, %s10031_s23  ;;  %p10037_p3 = scmp.lt.s32.totalorder %s10031_s23, %s10031_s23 }
 0x7ec   :  { %p10038_p4 = por %p10037_p3, %p10036_p2 }
 0x7ee   :  { %p10039_p5 = pnand %p10038_p4, %p10032_p1 }
 0x7f0   :  { %10042 = shalt.err (!%p10039_p5)  }
 0x7f1   :  { %104 = dma.hbm_to_vmem [thread:$0]  %s12109_s9, 4096, %s102_s27, [#allocation7 + $0x2] }
 0x87b   :  { %v4293_v63 = vpop.f32.mrb[14].mxu0  ;;  %v4364_v32 = vpop.f32.mrb[14].mxu1 }
 0x87c   :  { %v9324_v5 = vadd.f32 %v4293_v63, %v10512_v38  ;;  %v4295_v24 = vpop.f32.mrb[15].mxu0  ;;  %v4366_v9 = vpop.f32.mrb[15].mxu1  ;;  %v9340_v48 = vadd.f32 %v4364_v32, %v12351_v51 }
 0x87d   :  { %v9325_v55 = vadd.f32 %v4295_v24, %v12349_v31  ;;  %v9341_v30 = vadd.f32 %v4366_v9, %v12350_v44 }
 0x87e   :  { %v7202_v12 = vmul.f32 -1.442695, %v9324_v5 }
 0x87f   :  { %v7203_v59 = vmul.f32 -1.442695, %v9325_v55  ;;  %v7204_v39 = vmul.f32 -1.442695, %v9341_v30 }
 0x880   :  { %9739 = vpow2.f32 %v7202_v12 }
 0x881   :  { %9741 = vpow2.f32 %v7203_v59 }
 0x882   :  { %9743 = vpow2.f32 %v7204_v39 }
 0x883   :  { %9745 = vtanh.f32 %v9340_v48 }
 0x88a   :  { %v9740_v61 = vpop.eup %9739 }
 0x88b   :  { %v9742_v6 = vpop.eup %9741  ;;  %v4590_v28 = vadd.f32 1.0, %v9740_v61 }
 0x88c   :  { %v4596_v10 = vadd.f32 1.0, %v9742_v6  ;;  %v9744_v38 = vpop.eup %9743 }
 0x88d   :  { %9747 = vrcp.f32 %v4590_v28  ;;  %v9746_v60 = vpop.eup %9745  ;;  %v4603_v35 = vadd.f32 1.0, %v9744_v38 }
 0x88e   :  { %9749 = vrcp.f32 %v4596_v10 }
 0x88f   :  { %9751 = vrcp.f32 %v4603_v35 }
 0x897   :  { %v9748_v31 = vpop.eup %9747 }
 0x898   :  { %v9750_v0 = vpop.eup %9749  ;;  %v4607_v52 = vmul.f32 %v9748_v31, %v9746_v60 }
 0x899   :  { %v4606_v15 = vmul.f32 %v9750_v0, %v11485_v43  ;;  %v9752_v20 = vpop.eup %9751 }
 0x89b   :  { %v4608_v44 = vadd.f32 %v4607_v52, %v4606_v15  ;;  %v4507_v33 = vpop.f32.mrb[16].mxu0  ;;  %v4578_v17 = vpop.f32.mrb[16].mxu1 }
 0x89c   :  { %v9342_v51 = vadd.f32 %v4507_v33, %v12353_v27  ;;  %v4509_v21 = vpop.f32.mrb[17].mxu0  ;;  %v4580_v50 = vpop.f32.mrb[17].mxu1  ;;  %v9358_v22 = vadd.f32 %v4578_v17, %v10554_v4 }
 0x89d   :  { %9753 = vtanh.f32 %v4608_v44  ;;  %v9343_v2 = vadd.f32 %v4509_v21, %v12354_v41  ;;  %v9359_v53 = vadd.f32 %v4580_v50, %v12355_v1 }
 0x89e   :  { %v7205_v49 = vmul.f32 -1.442695, %v9342_v51 }
 0x89f   :  { %v7206_v56 = vmul.f32 -1.442695, %v9343_v2  ;;  %v7207_v43 = vmul.f32 -1.442695, %v9359_v53 }
 0x8a0   :  { %9755 = vpow2.f32 %v7205_v49 }
 0x8a1   :  { %9757 = vpow2.f32 %v7206_v56 }
 0x8a2   :  { %9759 = vpow2.f32 %v7207_v43 }
 0x8a3   :  { %9761 = vtanh.f32 %v9358_v22 }
 0x8a7   :  { %v9754_v62 = vpop.eup %9753 }
 0x8a8   :  { %v11580_v3 = vmul.f32 %v9754_v62, %v9752_v20 }
 0x8aa   :  { %v9756_v26 = vpop.eup %9755 }
 0x8ab   :  { %v9758_v27 = vpop.eup %9757  ;;  %v4614_v42 = vadd.f32 1.0, %v9756_v26 }
 0x8ac   :  { %v4620_v47 = vadd.f32 1.0, %v9758_v27  ;;  %v9760_v41 = vpop.eup %9759 }
 0x8ad   :  { %9763 = vrcp.f32 %v4614_v42  ;;  %v9762_v7 = vpop.eup %9761  ;;  %v4627_v29 = vadd.f32 1.0, %v9760_v41 }
 0x8ae   :  { %9765 = vrcp.f32 %v4620_v47 }
 0x8af   :  { %9767 = vrcp.f32 %v4627_v29 }
 0x8b7   :  { %v9764_v8 = vpop.eup %9763 }
 0x8b8   :  { %v9766_v14 = vpop.eup %9765  ;;  %v4631_v1 = vmul.f32 %v9764_v8, %v9762_v7 }
 0x8b9   :  { %v4630_v34 = vmul.f32 %v9766_v14, %v11515_v16  ;;  %v9768_v4 = vpop.eup %9767 }
 0x8bb   :  { %v4632_v25 = vadd.f32 %v4631_v1, %v4630_v34 }
 0x8bd   :  { %9769 = vtanh.f32 %v4632_v25 }
 0x8c7   :  { %v9770_v13 = vpop.eup %9769 }
 0x8c8   :  { %v11584_v37 = vmul.f32 %v9770_v13, %v9768_v4 }
 0x8c9   :  { %10047 = dma.done.wait [#allocation7], 32768 }
 0x8ca   :  { %10048 = vsyncadd [#allocation7], 4294934528 }
 0x8cb   :  { %10049 = dma.done.wait [#allocation7 + $0x1], 8192 }
 0x8cc   :  { %10050 = vsyncadd [#allocation7 + $0x1], 4294959104 }
 0x8cd   :  { %10051 = dma.done.wait [#allocation7 + $0x2], 4096 }
 0x8ce   :  { %10052 = vsyncadd [#allocation7 + $0x2], 4294963200  ;;  %5026 = vmatprep.mubr.f32.mxu0 %v11584_v37  ;;  %5139 = vmatprep.mubr.f32.mxu1 %v11584_v37  ;;  %v4665_v45 = vld [vmem:[#allocation4 + $0x8] sm:$0xff]  ;;  %v4667_v36 = vld [vmem:[#allocation4 + $0x18] sm:$0xff]  ;;  %vm10065_vm0 = vmmov 0  }
 0x8cf   :  { %v4673_v58 = vld [vmem:[#allocation4 + $0x48] sm:$0xff]  ;;  %v4675_v46 = vld [vmem:[#allocation4 + $0x58] sm:$0xff]  ;;  %v4664_v16 = vld [vmem:[#allocation4] sm:$0xff] }
 0x8d0   :  { %v8494_v11 = vpack.c.bf16 %v4673_v58, %v4665_v45  ;;  %v4672_v18 = vld [vmem:[#allocation4 + $0x40] sm:$0xff]  ;;  %v8558_v40 = vpack.c.bf16 %v4675_v46, %v4667_v36  ;;  %v4666_v32 = vld [vmem:[#allocation4 + $0x10] sm:$0xff]  ;;  %v4681_v24 = vld [vmem:[#allocation4 + $0x88] sm:$0xff] }
 0x8d1   :  { %v8496_v63 = vpack.c.bf16 %v4672_v18, %v4664_v16  ;;  %v4674_v5 = vld [vmem:[#allocation4 + $0x50] sm:$0xff]  ;;  %v4689_v55 = vld [vmem:[#allocation4 + $0xc8] sm:$0xff]  ;;  %v4683_v12 = vld [vmem:[#allocation4 + $0x98] sm:$0xff] }
 0x8d2   :  { %8495 = vmatprep.subr.bf16.mxu0 %v8494_v11  ;;  %v8560_v9 = vpack.c.bf16 %v4674_v5, %v4666_v32  ;;  %v4691_v59 = vld [vmem:[#allocation4 + $0xd8] sm:$0xff]  ;;  %8559 = vmatprep.subr.bf16.mxu1 %v8558_v40  ;;  %v8498_v30 = vpack.c.bf16 %v4689_v55, %v4681_v24  ;;  %v4680_v48 = vld [vmem:[#allocation4 + $0x80] sm:$0xff]  ;;  %v4682_v6 = vld [vmem:[#allocation4 + $0x90] sm:$0xff] }
 0x8d3   :  { %8497 = vmatpush1.bf16.msra.mxu0 %v8496_v63  ;;  %v8562_v39 = vpack.c.bf16 %v4691_v59, %v4683_v12  ;;  %v4688_v61 = vld [vmem:[#allocation4 + $0xc0] sm:$0xff]  ;;  %v4690_v10 = vld [vmem:[#allocation4 + $0xd0] sm:$0xff]  ;;  %v4697_v38 = vld [vmem:[#allocation4 + $0x108] sm:$0xff] }
 0x8d4   :  { %8561 = vmatpush1.bf16.msra.mxu1 %v8560_v9  ;;  %v8500_v28 = vpack.c.bf16 %v4688_v61, %v4680_v48  ;;  %v4705_v60 = vld [vmem:[#allocation4 + $0x148] sm:$0xff]  ;;  %8499 = vmatprep.subr.bf16.mxu0 %v8498_v30  ;;  %v8564_v31 = vpack.c.bf16 %v4690_v10, %v4682_v6  ;;  %v4699_v52 = vld [vmem:[#allocation4 + $0x118] sm:$0xff]  ;;  %v4696_v15 = vld [vmem:[#allocation4 + $0x100] sm:$0xff] }
 0x8d5   :  { %8563 = vmatprep.subr.bf16.mxu1 %v8562_v39  ;;  %v8502_v0 = vpack.c.bf16 %v4705_v60, %v4697_v38  ;;  %v4707_v35 = vld [vmem:[#allocation4 + $0x158] sm:$0xff]  ;;  %v4704_v33 = vld [vmem:[#allocation4 + $0x140] sm:$0xff]  ;;  %v4698_v17 = vld [vmem:[#allocation4 + $0x110] sm:$0xff] }
 0x8d6   :  { %v8566_v44 = vpack.c.bf16 %v4707_v35, %v4699_v52  ;;  %v4706_v51 = vld [vmem:[#allocation4 + $0x150] sm:$0xff]  ;;  %v8504_v21 = vpack.c.bf16 %v4704_v33, %v4696_v15  ;;  %v4713_v50 = vld [vmem:[#allocation4 + $0x188] sm:$0xff]  ;;  %v4715_v49 = vld [vmem:[#allocation4 + $0x198] sm:$0xff] }
 0x8d7   :  { %8501 = vmatpush1.bf16.msra.mxu0 %v8500_v28  ;;  %v4721_v2 = vld [vmem:[#allocation4 + $0x1c8] sm:$0xff]  ;;  %v8568_v56 = vpack.c.bf16 %v4706_v51, %v4698_v17  ;;  %v4723_v20 = vld [vmem:[#allocation4 + $0x1d8] sm:$0xff]  ;;  %v4712_v62 = vld [vmem:[#allocation4 + $0x180] sm:$0xff] }
 0x8d8   :  { %8565 = vmatpush1.bf16.msra.mxu1 %v8564_v31  ;;  %8503 = vmatprep.subr.bf16.mxu0 %v8502_v0  ;;  %v8506_v53 = vpack.c.bf16 %v4721_v2, %v4713_v50  ;;  %v4720_v43 = vld [vmem:[#allocation4 + $0x1c0] sm:$0xff]  ;;  %v8570_v22 = vpack.c.bf16 %v4723_v20, %v4715_v49  ;;  %v4714_v26 = vld [vmem:[#allocation4 + $0x190] sm:$0xff]  ;;  %v4729_v42 = vld [vmem:[#allocation4 + $0x208] sm:$0xff] }
 0x8d9   :  { %8567 = vmatprep.subr.bf16.mxu1 %v8566_v44  ;;  %v4722_v27 = vld [vmem:[#allocation4 + $0x1d0] sm:$0xff]  ;;  %v4737_v47 = vld [vmem:[#allocation4 + $0x248] sm:$0xff]  ;;  %v4731_v41 = vld [vmem:[#allocation4 + $0x218] sm:$0xff]  ;;  %v8508_v8 = vpack.c.bf16 %v4720_v43, %v4712_v62 }
 0x8da   :  { %v4739_v7 = vld [vmem:[#allocation4 + $0x258] sm:$0xff]  ;;  %v8572_v14 = vpack.c.bf16 %v4722_v27, %v4714_v26  ;;  %v8510_v1 = vpack.c.bf16 %v4737_v47, %v4729_v42  ;;  %v4728_v29 = vld [vmem:[#allocation4 + $0x200] sm:$0xff]  ;;  %v4730_v25 = vld [vmem:[#allocation4 + $0x210] sm:$0xff] }
 0x8db   :  { %8505 = vmatpush1.bf16.msra.mxu0 %v8504_v21  ;;  %v4736_v34 = vld [vmem:[#allocation4 + $0x240] sm:$0xff]  ;;  %v8574_v4 = vpack.c.bf16 %v4739_v7, %v4731_v41  ;;  %v4738_v13 = vld [vmem:[#allocation4 + $0x250] sm:$0xff]  ;;  %v4745_v45 = vld [vmem:[#allocation4 + $0x288] sm:$0xff] }
 0x8dc   :  { %8569 = vmatpush1.bf16.msra.mxu1 %v8568_v56  ;;  %8507 = vmatprep.subr.bf16.mxu0 %v8506_v53  ;;  %v4753_v58 = vld [vmem:[#allocation4 + $0x2c8] sm:$0xff]  ;;  %v4747_v36 = vld [vmem:[#allocation4 + $0x298] sm:$0xff]  ;;  %v8512_v46 = vpack.c.bf16 %v4736_v34, %v4728_v29  ;;  %v8576_v16 = vpack.c.bf16 %v4738_v13, %v4730_v25  ;;  %v4744_v40 = vld [vmem:[#allocation4 + $0x280] sm:$0xff] }
 0x8dd   :  { %8571 = vmatprep.subr.bf16.mxu1 %v8570_v22  ;;  %v4755_v11 = vld [vmem:[#allocation4 + $0x2d8] sm:$0xff]  ;;  %v8514_v18 = vpack.c.bf16 %v4753_v58, %v4745_v45  ;;  %v4752_v63 = vld [vmem:[#allocation4 + $0x2c0] sm:$0xff]  ;;  %v4746_v32 = vld [vmem:[#allocation4 + $0x290] sm:$0xff] }
 0x8de   :  { %v8578_v5 = vpack.c.bf16 %v4755_v11, %v4747_v36  ;;  %v4754_v24 = vld [vmem:[#allocation4 + $0x2d0] sm:$0xff]  ;;  %v4761_v9 = vld [vmem:[#allocation4 + $0x308] sm:$0xff]  ;;  %v4763_v12 = vld [vmem:[#allocation4 + $0x318] sm:$0xff]  ;;  %v8516_v30 = vpack.c.bf16 %v4752_v63, %v4744_v40 }
 0x8df   :  { %8509 = vmatpush1.bf16.msra.mxu0 %v8508_v8  ;;  %v4769_v55 = vld [vmem:[#allocation4 + $0x348] sm:$0xff]  ;;  %v4771_v59 = vld [vmem:[#allocation4 + $0x358] sm:$0xff]  ;;  %v8580_v39 = vpack.c.bf16 %v4754_v24, %v4746_v32  ;;  %v4760_v61 = vld [vmem:[#allocation4 + $0x300] sm:$0xff] }
 0x8e0   :  { %8573 = vmatpush1.bf16.msra.mxu1 %v8572_v14  ;;  %8511 = vmatprep.subr.bf16.mxu0 %v8510_v1  ;;  %v8518_v48 = vpack.c.bf16 %v4769_v55, %v4761_v9  ;;  %v4768_v6 = vld [vmem:[#allocation4 + $0x340] sm:$0xff]  ;;  %v4762_v28 = vld [vmem:[#allocation4 + $0x310] sm:$0xff]  ;;  %v8582_v10 = vpack.c.bf16 %v4771_v59, %v4763_v12  ;;  %v4777_v60 = vld [vmem:[#allocation4 + $0x388] sm:$0xff] }
 0x8e1   :  { %8575 = vmatprep.subr.bf16.mxu1 %v8574_v4  ;;  %v4770_v38 = vld [vmem:[#allocation4 + $0x350] sm:$0xff]  ;;  %v4785_v31 = vld [vmem:[#allocation4 + $0x3c8] sm:$0xff]  ;;  %v4779_v0 = vld [vmem:[#allocation4 + $0x398] sm:$0xff]  ;;  %v8520_v35 = vpack.c.bf16 %v4768_v6, %v4760_v61 }
 0x8e2   :  { %v4787_v52 = vld [vmem:[#allocation4 + $0x3d8] sm:$0xff]  ;;  %v8584_v15 = vpack.c.bf16 %v4770_v38, %v4762_v28  ;;  %v8522_v44 = vpack.c.bf16 %v4785_v31, %v4777_v60  ;;  %v4776_v33 = vld [vmem:[#allocation4 + $0x380] sm:$0xff]  ;;  %v4778_v51 = vld [vmem:[#allocation4 + $0x390] sm:$0xff] }
 0x8e3   :  { %8513 = vmatpush1.bf16.msra.mxu0 %v8512_v46  ;;  %v4784_v17 = vld [vmem:[#allocation4 + $0x3c0] sm:$0xff]  ;;  %v8586_v21 = vpack.c.bf16 %v4787_v52, %v4779_v0  ;;  %v4786_v50 = vld [vmem:[#allocation4 + $0x3d0] sm:$0xff]  ;;  %v4793_v2 = vld [vmem:[#allocation4 + $0x408] sm:$0xff] }
 0x8e4   :  { %8577 = vmatpush1.bf16.msra.mxu1 %v8576_v16  ;;  %8515 = vmatprep.subr.bf16.mxu0 %v8514_v18  ;;  %v4801_v49 = vld [vmem:[#allocation4 + $0x448] sm:$0xff]  ;;  %v4795_v56 = vld [vmem:[#allocation4 + $0x418] sm:$0xff]  ;;  %v8524_v20 = vpack.c.bf16 %v4784_v17, %v4776_v33  ;;  %v8588_v62 = vpack.c.bf16 %v4786_v50, %v4778_v51  ;;  %v4792_v22 = vld [vmem:[#allocation4 + $0x400] sm:$0xff] }
 0x8e5   :  { %8579 = vmatprep.subr.bf16.mxu1 %v8578_v5  ;;  %v4803_v53 = vld [vmem:[#allocation4 + $0x458] sm:$0xff]  ;;  %v8526_v43 = vpack.c.bf16 %v4801_v49, %v4793_v2  ;;  %v4800_v26 = vld [vmem:[#allocation4 + $0x440] sm:$0xff]  ;;  %v4794_v27 = vld [vmem:[#allocation4 + $0x410] sm:$0xff] }
 0x8e6   :  { %v8590_v42 = vpack.c.bf16 %v4803_v53, %v4795_v56  ;;  %v4802_v47 = vld [vmem:[#allocation4 + $0x450] sm:$0xff]  ;;  %v4809_v41 = vld [vmem:[#allocation4 + $0x488] sm:$0xff]  ;;  %v4811_v8 = vld [vmem:[#allocation4 + $0x498] sm:$0xff]  ;;  %v8528_v1 = vpack.c.bf16 %v4800_v26, %v4792_v22 }
 0x8e7   :  { %8517 = vmatpush1.bf16.msra.mxu0 %v8516_v30  ;;  %v4817_v7 = vld [vmem:[#allocation4 + $0x4c8] sm:$0xff]  ;;  %v4819_v14 = vld [vmem:[#allocation4 + $0x4d8] sm:$0xff]  ;;  %v8592_v29 = vpack.c.bf16 %v4802_v47, %v4794_v27  ;;  %v4808_v25 = vld [vmem:[#allocation4 + $0x480] sm:$0xff] }
 0x8e8   :  { %8581 = vmatpush1.bf16.msra.mxu1 %v8580_v39  ;;  %8519 = vmatprep.subr.bf16.mxu0 %v8518_v48  ;;  %v8530_v34 = vpack.c.bf16 %v4817_v7, %v4809_v41  ;;  %v4816_v4 = vld [vmem:[#allocation4 + $0x4c0] sm:$0xff]  ;;  %v4810_v13 = vld [vmem:[#allocation4 + $0x490] sm:$0xff]  ;;  %v8594_v45 = vpack.c.bf16 %v4819_v14, %v4811_v8  ;;  %v4825_v36 = vld [vmem:[#allocation4 + $0x508] sm:$0xff] }
 0x8e9   :  { %8583 = vmatprep.subr.bf16.mxu1 %v8582_v10  ;;  %v4818_v58 = vld [vmem:[#allocation4 + $0x4d0] sm:$0xff]  ;;  %v4833_v11 = vld [vmem:[#allocation4 + $0x548] sm:$0xff]  ;;  %v4827_v46 = vld [vmem:[#allocation4 + $0x518] sm:$0xff]  ;;  %v8532_v18 = vpack.c.bf16 %v4816_v4, %v4808_v25 }
 0x8ea   :  { %v4835_v16 = vld [vmem:[#allocation4 + $0x558] sm:$0xff]  ;;  %v8596_v40 = vpack.c.bf16 %v4818_v58, %v4810_v13  ;;  %v8534_v63 = vpack.c.bf16 %v4833_v11, %v4825_v36  ;;  %v4824_v32 = vld [vmem:[#allocation4 + $0x500] sm:$0xff]  ;;  %v4826_v24 = vld [vmem:[#allocation4 + $0x510] sm:$0xff] }
 0x8eb   :  { %8521 = vmatpush1.bf16.msra.mxu0 %v8520_v35  ;;  %v4832_v5 = vld [vmem:[#allocation4 + $0x540] sm:$0xff]  ;;  %v8598_v9 = vpack.c.bf16 %v4835_v16, %v4827_v46  ;;  %v4834_v55 = vld [vmem:[#allocation4 + $0x550] sm:$0xff]  ;;  %v4841_v12 = vld [vmem:[#allocation4 + $0x588] sm:$0xff] }
 0x8ec   :  { %8585 = vmatpush1.bf16.msra.mxu1 %v8584_v15  ;;  %8523 = vmatprep.subr.bf16.mxu0 %v8522_v44  ;;  %v4849_v59 = vld [vmem:[#allocation4 + $0x5c8] sm:$0xff]  ;;  %v4843_v30 = vld [vmem:[#allocation4 + $0x598] sm:$0xff]  ;;  %v8536_v48 = vpack.c.bf16 %v4832_v5, %v4824_v32  ;;  %v8600_v61 = vpack.c.bf16 %v4834_v55, %v4826_v24  ;;  %v4840_v28 = vld [vmem:[#allocation4 + $0x580] sm:$0xff] }
 0x8ed   :  { %8587 = vmatprep.subr.bf16.mxu1 %v8586_v21  ;;  %v4851_v39 = vld [vmem:[#allocation4 + $0x5d8] sm:$0xff]  ;;  %v8538_v6 = vpack.c.bf16 %v4849_v59, %v4841_v12  ;;  %v4848_v10 = vld [vmem:[#allocation4 + $0x5c0] sm:$0xff]  ;;  %v4842_v38 = vld [vmem:[#allocation4 + $0x590] sm:$0xff] }
 0x8ee   :  { %v8602_v60 = vpack.c.bf16 %v4851_v39, %v4843_v30  ;;  %v4850_v31 = vld [vmem:[#allocation4 + $0x5d0] sm:$0xff]  ;;  %v4857_v0 = vld [vmem:[#allocation4 + $0x608] sm:$0xff]  ;;  %v4859_v35 = vld [vmem:[#allocation4 + $0x618] sm:$0xff]  ;;  %v8540_v44 = vpack.c.bf16 %v4848_v10, %v4840_v28 }
 0x8ef   :  { %8525 = vmatpush1.bf16.msra.mxu0 %v8524_v20  ;;  %v4865_v52 = vld [vmem:[#allocation4 + $0x648] sm:$0xff]  ;;  %v4867_v15 = vld [vmem:[#allocation4 + $0x658] sm:$0xff]  ;;  %v8604_v33 = vpack.c.bf16 %v4850_v31, %v4842_v38  ;;  %v4856_v51 = vld [vmem:[#allocation4 + $0x600] sm:$0xff] }
 0x8f0   :  { %8589 = vmatpush1.bf16.msra.mxu1 %v8588_v62  ;;  %8527 = vmatprep.subr.bf16.mxu0 %v8526_v43  ;;  %v8542_v17 = vpack.c.bf16 %v4865_v52, %v4857_v0  ;;  %v4864_v21 = vld [vmem:[#allocation4 + $0x640] sm:$0xff]  ;;  %v4858_v50 = vld [vmem:[#allocation4 + $0x610] sm:$0xff]  ;;  %v8606_v2 = vpack.c.bf16 %v4867_v15, %v4859_v35  ;;  %v4873_v56 = vld [vmem:[#allocation4 + $0x688] sm:$0xff] }
 0x8f1   :  { %8591 = vmatprep.subr.bf16.mxu1 %v8590_v42  ;;  %v4866_v49 = vld [vmem:[#allocation4 + $0x650] sm:$0xff]  ;;  %v4881_v53 = vld [vmem:[#allocation4 + $0x6c8] sm:$0xff]  ;;  %v4875_v20 = vld [vmem:[#allocation4 + $0x698] sm:$0xff]  ;;  %v8544_v43 = vpack.c.bf16 %v4864_v21, %v4856_v51 }
 0x8f2   :  { %v4883_v62 = vld [vmem:[#allocation4 + $0x6d8] sm:$0xff]  ;;  %v8608_v22 = vpack.c.bf16 %v4866_v49, %v4858_v50  ;;  %v8546_v26 = vpack.c.bf16 %v4881_v53, %v4873_v56  ;;  %v4872_v27 = vld [vmem:[#allocation4 + $0x680] sm:$0xff]  ;;  %v4874_v47 = vld [vmem:[#allocation4 + $0x690] sm:$0xff] }
 0x8f3   :  { %8529 = vmatpush1.bf16.msra.mxu0 %v8528_v1  ;;  %v4880_v42 = vld [vmem:[#allocation4 + $0x6c0] sm:$0xff]  ;;  %v8610_v41 = vpack.c.bf16 %v4883_v62, %v4875_v20  ;;  %v4882_v7 = vld [vmem:[#allocation4 + $0x6d0] sm:$0xff]  ;;  %v4889_v8 = vld [vmem:[#allocation4 + $0x708] sm:$0xff] }
 0x8f4   :  { %8593 = vmatpush1.bf16.msra.mxu1 %v8592_v29  ;;  %8531 = vmatprep.subr.bf16.mxu0 %v8530_v34  ;;  %v4897_v14 = vld [vmem:[#allocation4 + $0x748] sm:$0xff]  ;;  %v4891_v1 = vld [vmem:[#allocation4 + $0x718] sm:$0xff]  ;;  %v8548_v34 = vpack.c.bf16 %v4880_v42, %v4872_v27  ;;  %v8612_v25 = vpack.c.bf16 %v4882_v7, %v4874_v47  ;;  %v4888_v13 = vld [vmem:[#allocation4 + $0x700] sm:$0xff] }
 0x8f5   :  { %8595 = vmatprep.subr.bf16.mxu1 %v8594_v45  ;;  %v4899_v29 = vld [vmem:[#allocation4 + $0x758] sm:$0xff]  ;;  %v8550_v4 = vpack.c.bf16 %v4897_v14, %v4889_v8  ;;  %v4896_v45 = vld [vmem:[#allocation4 + $0x740] sm:$0xff]  ;;  %v4890_v58 = vld [vmem:[#allocation4 + $0x710] sm:$0xff] }
 0x8f6   :  { %v8614_v36 = vpack.c.bf16 %v4899_v29, %v4891_v1  ;;  %v4898_v11 = vld [vmem:[#allocation4 + $0x750] sm:$0xff]  ;;  %v4905_v46 = vld [vmem:[#allocation4 + $0x788] sm:$0xff]  ;;  %v4904_v24 = vld [vmem:[#allocation4 + $0x780] sm:$0xff] }
 0x8f7   :  { %8533 = vmatpush1.bf16.msra.mxu0 %v8532_v18  ;;  %v4913_v16 = vld [vmem:[#allocation4 + $0x7c8] sm:$0xff]  ;;  %v4907_v18 = vld [vmem:[#allocation4 + $0x798] sm:$0xff]  ;;  %v8616_v32 = vpack.c.bf16 %v4898_v11, %v4890_v58  ;;  %v4906_v55 = vld [vmem:[#allocation4 + $0x790] sm:$0xff] }
 0x8f8   :  { %8597 = vmatpush1.bf16.msra.mxu1 %v8596_v40  ;;  %8535 = vmatprep.subr.bf16.mxu0 %v8534_v63  ;;  %v4915_v40 = vld [vmem:[#allocation4 + $0x7d8] sm:$0xff]  ;;  %v8552_v63 = vpack.c.bf16 %v4896_v45, %v4888_v13  ;;  %v8554_v5 = vpack.c.bf16 %v4913_v16, %v4905_v46  ;;  %v4914_v59 = vld [vmem:[#allocation4 + $0x7d0] sm:$0xff]  ;;  %v4669_v30 = vld [vmem:[#allocation4 + $0x28] sm:$0xff] }
 0x8f9   :  { %8599 = vmatprep.subr.bf16.mxu1 %v8598_v9  ;;  %v4912_v9 = vld [vmem:[#allocation4 + $0x7c0] sm:$0xff]  ;;  %v8618_v12 = vpack.c.bf16 %v4915_v40, %v4907_v18  ;;  %v4677_v39 = vld [vmem:[#allocation4 + $0x68] sm:$0xff]  ;;  %v8620_v28 = vpack.c.bf16 %v4914_v59, %v4906_v55  ;;  %v4670_v31 = vld [vmem:[#allocation4 + $0x30] sm:$0xff] }
 0x8fa   :  { %v8622_v10 = vpack.c.bf16 %v4677_v39, %v4669_v30  ;;  %v4668_v38 = vld [vmem:[#allocation4 + $0x20] sm:$0xff]  ;;  %v4678_v52 = vld [vmem:[#allocation4 + $0x70] sm:$0xff]  ;;  %v4685_v35 = vld [vmem:[#allocation4 + $0xa8] sm:$0xff] }
 0x8fb   :  { %8537 = vmatpush1.bf16.msra.mxu0 %v8536_v48  ;;  %v4671_v48 = vld [vmem:[#allocation4 + $0x38] sm:$0xff]  ;;  %v4693_v15 = vld [vmem:[#allocation4 + $0xe8] sm:$0xff]  ;;  %v8688_v51 = vpack.c.bf16 %v4678_v52, %v4670_v31  ;;  %v4684_v50 = vld [vmem:[#allocation4 + $0xa0] sm:$0xff] }
 0x8fc   :  { %8601 = vmatpush1.bf16.msra.mxu1 %v8600_v61  ;;  %8539 = vmatprep.subr.bf16.mxu0 %v8538_v6  ;;  %v4679_v61 = vld [vmem:[#allocation4 + $0x78] sm:$0xff]  ;;  %v8556_v6 = vpack.c.bf16 %v4912_v9, %v4904_v24  ;;  %v8626_v21 = vpack.c.bf16 %v4693_v15, %v4685_v35  ;;  %v4686_v49 = vld [vmem:[#allocation4 + $0xb0] sm:$0xff]  ;;  %v4701_v20 = vld [vmem:[#allocation4 + $0x128] sm:$0xff] }
 0x8fd   :  { %8603 = vmatprep.subr.bf16.mxu1 %v8602_v60  ;;  %v4676_v60 = vld [vmem:[#allocation4 + $0x60] sm:$0xff]  ;;  %v8686_v0 = vpack.c.bf16 %v4679_v61, %v4671_v48  ;;  %v4694_v53 = vld [vmem:[#allocation4 + $0xf0] sm:$0xff]  ;;  %v4709_v62 = vld [vmem:[#allocation4 + $0x168] sm:$0xff] }
 0x8fe   :  { %v8692_v42 = vpack.c.bf16 %v4694_v53, %v4686_v49  ;;  %v8630_v47 = vpack.c.bf16 %v4709_v62, %v4701_v20  ;;  %v4708_v7 = vld [vmem:[#allocation4 + $0x160] sm:$0xff]  ;;  %v4702_v8 = vld [vmem:[#allocation4 + $0x130] sm:$0xff]  ;;  %v4717_v29 = vld [vmem:[#allocation4 + $0x1a8] sm:$0xff] }
 0x8ff   :  { %8541 = vmatpush1.bf16.msra.mxu0 %v8540_v44  ;;  %v4687_v44 = vld [vmem:[#allocation4 + $0xb8] sm:$0xff]  ;;  %v4710_v1 = vld [vmem:[#allocation4 + $0x170] sm:$0xff]  ;;  %v12371_v13 = vld [vmem:[#allocation30_spill] sm:$0xff] }
 0x900   :  { %8605 = vmatpush1.bf16.msra.mxu1 %v8604_v33  ;;  %8543 = vmatprep.subr.bf16.mxu0 %v8542_v17  ;;  %v4695_v33 = vld [vmem:[#allocation4 + $0xf8] sm:$0xff]  ;;  %v8624_v17 = vpack.c.bf16 %v4676_v60, %v4668_v38  ;;  %v8696_v58 = vpack.c.bf16 %v4710_v1, %v4702_v8  ;;  %v4716_v11 = vld [vmem:[#allocation4 + $0x1a0] sm:$0xff]  ;;  %v4718_v16 = vld [vmem:[#allocation4 + $0x1b0] sm:$0xff] }
 0x901   :  { %8607 = vmatprep.subr.bf16.mxu1 %v8606_v2  ;;  %v4692_v2 = vld [vmem:[#allocation4 + $0xe0] sm:$0xff]  ;;  %v8690_v56 = vpack.c.bf16 %v4695_v33, %v4687_v44  ;;  %v4726_v40 = vld [vmem:[#allocation4 + $0x1f0] sm:$0xff]  ;;  %v4743_v24 = vld [vmem:[#allocation4 + $0x278] sm:$0xff] }
 0x902   :  { %v8628_v27 = vpack.c.bf16 %v4692_v2, %v4684_v50  ;;  %v4724_v46 = vld [vmem:[#allocation4 + $0x1e0] sm:$0xff]  ;;  %v12372_v9 = vld [vmem:[#allocation27_spill] sm:$0xff]  ;;  %v4734_v48 = vld [vmem:[#allocation4 + $0x230] sm:$0xff] }
 0x903   :  { %8545 = vmatpush1.bf16.msra.mxu0 %v8544_v43  ;;  %v12370_v43 = vld [vmem:[#allocation43_spill] sm:$0xff]  ;;  %v8636_v55 = vpack.c.bf16 %v4724_v46, %v4716_v11  ;;  %v4732_v30 = vld [vmem:[#allocation4 + $0x220] sm:$0xff]  ;;  %v4751_v60 = vld [vmem:[#allocation4 + $0x2b8] sm:$0xff] }
 0x904   :  { %8609 = vmatpush1.bf16.msra.mxu1 %v8608_v22  ;;  %8547 = vmatprep.subr.bf16.mxu0 %v8546_v26  ;;  %v4703_v22 = vld [vmem:[#allocation4 + $0x138] sm:$0xff]  ;;  %v4740_v39 = vld [vmem:[#allocation4 + $0x260] sm:$0xff]  ;;  %v12373_v38 = vld [vmem:[#allocation31_spill] sm:$0xff] }
 0x905   :  { %8611 = vmatprep.subr.bf16.mxu1 %v8610_v41  ;;  %v4711_v26 = vld [vmem:[#allocation4 + $0x178] sm:$0xff]  ;;  %v4700_v41 = vld [vmem:[#allocation4 + $0x120] sm:$0xff]  ;;  %v8640_v52 = vpack.c.bf16 %v4740_v39, %v4732_v30  ;;  %v4765_v50 = vld [vmem:[#allocation4 + $0x328] sm:$0xff] }
 0x906   :  { %v8694_v14 = vpack.c.bf16 %v4711_v26, %v4703_v22  ;;  %v8632_v45 = vpack.c.bf16 %v4708_v7, %v4700_v41  ;;  %v4759_v31 = vld [vmem:[#allocation4 + $0x2f8] sm:$0xff]  ;;  %v4748_v44 = vld [vmem:[#allocation4 + $0x2a0] sm:$0xff]  ;;  %v4773_v2 = vld [vmem:[#allocation4 + $0x368] sm:$0xff] }
 0x907   :  { %8549 = vmatpush1.bf16.msra.mxu0 %v8548_v34  ;;  %v4725_v34 = vld [vmem:[#allocation4 + $0x1e8] sm:$0xff]  ;;  %v4756_v33 = vld [vmem:[#allocation4 + $0x2e0] sm:$0xff]  ;;  %v4775_v53 = vld [vmem:[#allocation4 + $0x378] sm:$0xff]  ;;  %v8646_v26 = vpack.c.bf16 %v4773_v2, %v4765_v50 }
 0x908   :  { %8613 = vmatpush1.bf16.msra.mxu1 %v8612_v25  ;;  %8551 = vmatprep.subr.bf16.mxu0 %v8550_v4  ;;  %v4719_v25 = vld [vmem:[#allocation4 + $0x1b8] sm:$0xff]  ;;  %v12375_v49 = vld [vmem:[#allocation55_spill] sm:$0xff]  ;;  %v8644_v62 = vpack.c.bf16 %v4756_v33, %v4748_v44  ;;  %v4774_v7 = vld [vmem:[#allocation4 + $0x370] sm:$0xff] }
 0x909   :  { %8615 = vmatprep.subr.bf16.mxu1 %v8614_v36  ;;  %v4727_v4 = vld [vmem:[#allocation4 + $0x1f8] sm:$0xff]  ;;  %v8634_v36 = vpack.c.bf16 %v4725_v34, %v4717_v29  ;;  %v4781_v8 = vld [vmem:[#allocation4 + $0x3a8] sm:$0xff]  ;;  %v12377_v1 = vld [vmem:[#allocation28_spill] sm:$0xff] }
 0x90a   :  { %v8698_v18 = vpack.c.bf16 %v4727_v4, %v4719_v25  ;;  %v12376_v20 = vld [vmem:[#allocation29_spill] sm:$0xff]  ;;  %v12378_v25 = vld [vmem:[#allocation44_spill] sm:$0xff]  ;;  %v4788_v11 = vld [vmem:[#allocation4 + $0x3e0] sm:$0xff] }
 0x90b   :  { %8553 = vmatpush1.bf16.msra.mxu0 %v8552_v63  ;;  %v4733_v63 = vld [vmem:[#allocation4 + $0x228] sm:$0xff]  ;;  %v4783_v29 = vld [vmem:[#allocation4 + $0x3b8] sm:$0xff]  ;;  %v4782_v46 = vld [vmem:[#allocation4 + $0x3b0] sm:$0xff] }
 0x90c   :  { %8617 = vmatpush1.bf16.msra.mxu1 %v8616_v32  ;;  %8555 = vmatprep.subr.bf16.mxu0 %v8554_v5  ;;  %v4741_v32 = vld [vmem:[#allocation4 + $0x268] sm:$0xff]  ;;  %v4735_v5 = vld [vmem:[#allocation4 + $0x238] sm:$0xff]  ;;  %v4796_v30 = vld [vmem:[#allocation4 + $0x420] sm:$0xff] }
 0x90d   :  { %8619 = vmatprep.subr.bf16.mxu1 %v8618_v12  ;;  %v8700_v12 = vpack.c.bf16 %v4726_v40, %v4718_v16  ;;  %v8638_v59 = vpack.c.bf16 %v4741_v32, %v4733_v63  ;;  %v8702_v61 = vpack.c.bf16 %v4743_v24, %v4735_v5  ;;  %v4791_v34 = vld [vmem:[#allocation4 + $0x3f8] sm:$0xff]  ;;  %v4797_v40 = vld [vmem:[#allocation4 + $0x428] sm:$0xff]  ;;  %v4804_v39 = vld [vmem:[#allocation4 + $0x460] sm:$0xff] }
 0x90e   :  { %v8714_v16 = vpack.c.bf16 %v4791_v34, %v4783_v29  ;;  %v4805_v63 = vld [vmem:[#allocation4 + $0x468] sm:$0xff]  ;;  %v4799_v5 = vld [vmem:[#allocation4 + $0x438] sm:$0xff]  ;;  %v4812_v33 = vld [vmem:[#allocation4 + $0x4a0] sm:$0xff] }
 0x90f   :  { %8557 = vmatpush1.bf16.msra.mxu0 %v8556_v6  ;;  %v4742_v6 = vld [vmem:[#allocation4 + $0x270] sm:$0xff]  ;;  %v12379_v32 = vld [vmem:[#allocation51_spill] sm:$0xff]  ;;  %v4807_v24 = vld [vmem:[#allocation4 + $0x478] sm:$0xff] }
 0x910   :  { %8621 = vmatpush1.bf16.msra.mxu1 %v8620_v28  ;;  %8623 = vmatprep.subr.bf16.mxu0 %v8622_v10  ;;  %v4749_v28 = vld [vmem:[#allocation4 + $0x2a8] sm:$0xff]  ;;  %v8704_v35 = vpack.c.bf16 %v4742_v6, %v4734_v48  ;;  %v4798_v48 = vld [vmem:[#allocation4 + $0x430] sm:$0xff]  ;;  %v4847_v34 = vld [vmem:[#allocation4 + $0x5b8] sm:$0xff] }
 0x911   :  { %8687 = vmatprep.subr.bf16.mxu1 %v8686_v0  ;;  %v4757_v10 = vld [vmem:[#allocation4 + $0x2e8] sm:$0xff]  ;;  %v12374_v0 = vld [vmem:[#allocation33_spill] sm:$0xff]  ;;  %v4806_v6 = vld [vmem:[#allocation4 + $0x470] sm:$0xff] }
 0x912   :  { %5027 = vmatmul.mubr.f32.vlgmr.msra.gmra.mrb[32].mxu0 %v12370_v43  ;;  %v8642_v15 = vpack.c.bf16 %v4757_v10, %v4749_v28  ;;  %v4813_v28 = vld [vmem:[#allocation4 + $0x4a8] sm:$0xff]  ;;  %v4822_v50 = vld [vmem:[#allocation4 + $0x4f0] sm:$0xff] }
 0x913   :  { %5140 = vmatmul.mubr.f32.vlgmr.msra.gmra.mrb[32].mxu1 %v12370_v43  ;;  %8625 = vmatpush1.bf16.msra.mxu0 %v8624_v17  ;;  %v4750_v17 = vld [vmem:[#allocation4 + $0x2b0] sm:$0xff]  ;;  %v4821_v10 = vld [vmem:[#allocation4 + $0x4e8] sm:$0xff] }
 0x914   :  { %8689 = vmatpush1.bf16.msra.mxu1 %v8688_v51  ;;  %8627 = vmatprep.subr.bf16.mxu0 %v8626_v21  ;;  %v8706_v51 = vpack.c.bf16 %v4759_v31, %v4751_v60  ;;  %v4758_v21 = vld [vmem:[#allocation4 + $0x2f0] sm:$0xff]  ;;  %v12380_v60 = vld [vmem:[#allocation26_spill] sm:$0xff]  ;;  %v4815_v31 = vld [vmem:[#allocation4 + $0x4b8] sm:$0xff]  ;;  %v8658_v44 = vpack.c.bf16 %v4821_v10, %v4813_v28 }
 0x915   :  { %8691 = vmatprep.subr.bf16.mxu1 %v8690_v56  ;;  %5032 = vmatprep.mubr.f32.mxu0 %v11532_v54  ;;  %v4767_v56 = vld [vmem:[#allocation4 + $0x338] sm:$0xff]  ;;  %v8708_v22 = vpack.c.bf16 %v4758_v21, %v4750_v17  ;;  %v4820_v17 = vld [vmem:[#allocation4 + $0x4e0] sm:$0xff]  ;;  %v4829_v2 = vld [vmem:[#allocation4 + $0x528] sm:$0xff] }
 0x916   :  { %5145 = vmatprep.mubr.f32.mxu1 %v11532_v54  ;;  %5033 = vmatmul.mubr.f32.gmra.mrb[34].mxu0 %v12371_v13  ;;  %v8710_v41 = vpack.c.bf16 %v4775_v53, %v4767_v56  ;;  %v4837_v56 = vld [vmem:[#allocation4 + $0x568] sm:$0xff]  ;;  %v4831_v53 = vld [vmem:[#allocation4 + $0x538] sm:$0xff] }
 0x917   :  { %8629 = vmatpush1.bf16.msra.mxu0 %v8628_v27  ;;  %5146 = vmatmul.mubr.f32.gmra.mrb[34].mxu1 %v12371_v13  ;;  %v4764_v27 = vld [vmem:[#allocation4 + $0x320] sm:$0xff]  ;;  %v4853_v29 = vld [vmem:[#allocation4 + $0x5e8] sm:$0xff] }
 0x918   :  { %8693 = vmatpush1.bf16.msra.mxu1 %v8692_v42  ;;  %8631 = vmatprep.subr.bf16.mxu0 %v8630_v47  ;;  %v4772_v42 = vld [vmem:[#allocation4 + $0x360] sm:$0xff]  ;;  %v4766_v47 = vld [vmem:[#allocation4 + $0x330] sm:$0xff]  ;;  %v4877_v28 = vld [vmem:[#allocation4 + $0x6a8] sm:$0xff] }
 0x919   :  { %8695 = vmatprep.subr.bf16.mxu1 %v8694_v14  ;;  %5038 = vmatprep.mubr.f32.mxu0 %v11440_v23  ;;  %v4789_v14 = vld [vmem:[#allocation4 + $0x3e8] sm:$0xff]  ;;  %v8648_v4 = vpack.c.bf16 %v4772_v42, %v4764_v27  ;;  %v8662_v27 = vpack.c.bf16 %v4837_v56, %v4829_v2  ;;  %v4828_v42 = vld [vmem:[#allocation4 + $0x520] sm:$0xff] }
 0x91a   :  { %5151 = vmatprep.mubr.f32.mxu1 %v11440_v23  ;;  %5039 = vmatmul.mubr.f32.gmra.mrb[36].mxu0 %v12372_v9  ;;  %v4885_v10 = vld [vmem:[#allocation4 + $0x6e8] sm:$0xff] }
 0x91b   :  { %8633 = vmatpush1.bf16.msra.mxu0 %v8632_v45  ;;  %5152 = vmatmul.mubr.f32.gmra.mrb[36].mxu1 %v12372_v9  ;;  %v8712_v45 = vpack.c.bf16 %v4774_v7, %v4766_v47  ;;  %v4836_v47 = vld [vmem:[#allocation4 + $0x560] sm:$0xff]  ;;  %v4893_v2 = vld [vmem:[#allocation4 + $0x728] sm:$0xff] }
 0x91c   :  { %8697 = vmatpush1.bf16.msra.mxu1 %v8696_v58  ;;  %8635 = vmatprep.subr.bf16.mxu0 %v8634_v36  ;;  %v8650_v58 = vpack.c.bf16 %v4789_v14, %v4781_v8  ;;  %v4780_v36 = vld [vmem:[#allocation4 + $0x3a0] sm:$0xff]  ;;  %v4838_v8 = vld [vmem:[#allocation4 + $0x570] sm:$0xff]  ;;  %v4845_v14 = vld [vmem:[#allocation4 + $0x5a8] sm:$0xff] }
 0x91d   :  { %8699 = vmatprep.subr.bf16.mxu1 %v8698_v18  ;;  %5044 = vmatprep.mubr.f32.mxu0 %v12373_v38  ;;  %v4790_v18 = vld [vmem:[#allocation4 + $0x3f0] sm:$0xff]  ;;  %v4901_v56 = vld [vmem:[#allocation4 + $0x768] sm:$0xff] }
 0x91e   :  { %5157 = vmatprep.mubr.f32.mxu1 %v12373_v38  ;;  %5045 = vmatmul.mubr.f32.gmra.mrb[38].mxu0 %v12374_v0 }
 0x91f   :  { %8637 = vmatpush1.bf16.msra.mxu0 %v8636_v55  ;;  %5158 = vmatmul.mubr.f32.gmra.mrb[38].mxu1 %v12374_v0  ;;  %v8652_v55 = vpack.c.bf16 %v4788_v11, %v4780_v36  ;;  %v4844_v36 = vld [vmem:[#allocation4 + $0x5a0] sm:$0xff] }
 0x920   :  { %8701 = vmatpush1.bf16.msra.mxu1 %v8700_v12  ;;  %8639 = vmatprep.subr.bf16.mxu0 %v8638_v59  ;;  %v8716_v12 = vpack.c.bf16 %v4790_v18, %v4782_v46  ;;  %v8654_v59 = vpack.c.bf16 %v4805_v63, %v4797_v40  ;;  %v4852_v11 = vld [vmem:[#allocation4 + $0x5e0] sm:$0xff]  ;;  %v4846_v46 = vld [vmem:[#allocation4 + $0x5b0] sm:$0xff]  ;;  %v4861_v40 = vld [vmem:[#allocation4 + $0x628] sm:$0xff] }
 0x921   :  { %8703 = vmatprep.subr.bf16.mxu1 %v8702_v61  ;;  %5050 = vmatprep.mubr.f32.mxu0 %v12375_v49  ;;  %v8718_v61 = vpack.c.bf16 %v4807_v24, %v4799_v5  ;;  %v4854_v18 = vld [vmem:[#allocation4 + $0x5f0] sm:$0xff]  ;;  %v4869_v63 = vld [vmem:[#allocation4 + $0x668] sm:$0xff]  ;;  %v4863_v5 = vld [vmem:[#allocation4 + $0x638] sm:$0xff] }
 0x922   :  { %5163 = vmatprep.mubr.f32.mxu1 %v12375_v49  ;;  %5051 = vmatmul.mubr.f32.gmra.mrb[40].mxu0 %v12376_v20  ;;  %v4871_v24 = vld [vmem:[#allocation4 + $0x678] sm:$0xff] }
 0x923   :  { %8641 = vmatpush1.bf16.msra.mxu0 %v8640_v52  ;;  %5164 = vmatmul.mubr.f32.gmra.mrb[40].mxu1 %v12376_v20  ;;  %v4823_v52 = vld [vmem:[#allocation4 + $0x4f8] sm:$0xff] }
 0x924   :  { %8705 = vmatpush1.bf16.msra.mxu1 %v8704_v35  ;;  %8643 = vmatprep.subr.bf16.mxu0 %v8642_v15  ;;  %v8656_v35 = vpack.c.bf16 %v4804_v39, %v4796_v30  ;;  %v8720_v15 = vpack.c.bf16 %v4806_v6, %v4798_v48  ;;  %v8722_v21 = vpack.c.bf16 %v4823_v52, %v4815_v31  ;;  %v4860_v30 = vld [vmem:[#allocation4 + $0x620] sm:$0xff]  ;;  %v4862_v48 = vld [vmem:[#allocation4 + $0x630] sm:$0xff]  ;;  %v4879_v31 = vld [vmem:[#allocation4 + $0x6b8] sm:$0xff] }
 0x925   :  { %8707 = vmatprep.subr.bf16.mxu1 %v8706_v51  ;;  %5056 = vmatprep.mubr.f32.mxu0 %v12377_v1  ;;  %v4814_v51 = vld [vmem:[#allocation4 + $0x4b0] sm:$0xff]  ;;  %v4868_v39 = vld [vmem:[#allocation4 + $0x660] sm:$0xff]  ;;  %v4887_v52 = vld [vmem:[#allocation4 + $0x6f8] sm:$0xff] }
 0x926   :  { %5169 = vmatprep.mubr.f32.mxu1 %v12377_v1  ;;  %5057 = vmatmul.mubr.f32.gmra.mrb[42].mxu0 %v12378_v25  ;;  %v4870_v6 = vld [vmem:[#allocation4 + $0x670] sm:$0xff] }
 0x927   :  { %8645 = vmatpush1.bf16.msra.mxu0 %v8644_v62  ;;  %5170 = vmatmul.mubr.f32.gmra.mrb[42].mxu1 %v12378_v25  ;;  %v4839_v62 = vld [vmem:[#allocation4 + $0x578] sm:$0xff] }
 0x928   :  { %8709 = vmatpush1.bf16.msra.mxu1 %v8708_v22  ;;  %8647 = vmatprep.subr.bf16.mxu0 %v8646_v26  ;;  %v8660_v22 = vpack.c.bf16 %v4820_v17, %v4812_v33  ;;  %v8724_v26 = vpack.c.bf16 %v4822_v50, %v4814_v51  ;;  %v8726_v7 = vpack.c.bf16 %v4839_v62, %v4831_v53  ;;  %v4876_v33 = vld [vmem:[#allocation4 + $0x6a0] sm:$0xff]  ;;  %v4878_v51 = vld [vmem:[#allocation4 + $0x6b0] sm:$0xff]  ;;  %v4895_v53 = vld [vmem:[#allocation4 + $0x738] sm:$0xff] }
 0x929   :  { %8711 = vmatprep.subr.bf16.mxu1 %v8710_v41  ;;  %5062 = vmatprep.mubr.f32.mxu0 %v12379_v32  ;;  %v4830_v41 = vld [vmem:[#allocation4 + $0x530] sm:$0xff]  ;;  %v4884_v17 = vld [vmem:[#allocation4 + $0x6e0] sm:$0xff]  ;;  %v4903_v62 = vld [vmem:[#allocation4 + $0x778] sm:$0xff] }
 0x92a   :  { %5175 = vmatprep.mubr.f32.mxu1 %v12379_v32  ;;  %5063 = vmatmul.mubr.f32.gmra.mrb[44].mxu0 %v11492_v57  ;;  %v4886_v50 = vld [vmem:[#allocation4 + $0x6f0] sm:$0xff] }
 0x92b   :  { %8649 = vmatpush1.bf16.msra.mxu0 %v8648_v4  ;;  %5176 = vmatmul.mubr.f32.gmra.mrb[44].mxu1 %v11492_v57  ;;  %v4855_v4 = vld [vmem:[#allocation4 + $0x5f8] sm:$0xff] }
 0x92c   :  { %8713 = vmatpush1.bf16.msra.mxu1 %v8712_v45  ;;  %8651 = vmatprep.subr.bf16.mxu0 %v8650_v58  ;;  %v8664_v45 = vpack.c.bf16 %v4836_v47, %v4828_v42  ;;  %v8666_v58 = vpack.c.bf16 %v4853_v29, %v4845_v14  ;;  %v4892_v42 = vld [vmem:[#allocation4 + $0x720] sm:$0xff]  ;;  %v4909_v14 = vld [vmem:[#allocation4 + $0x7a8] sm:$0xff] }
 0x92d   :  { %8715 = vmatprep.subr.bf16.mxu1 %v8714_v16  ;;  %5068 = vmatprep.mubr.f32.mxu0 %v12380_v60  ;;  %v8730_v16 = vpack.c.bf16 %v4855_v4, %v4847_v34  ;;  %v4900_v47 = vld [vmem:[#allocation4 + $0x760] sm:$0xff]  ;;  %v4917_v29 = vld [vmem:[#allocation4 + $0x7e8] sm:$0xff]  ;;  %v4911_v34 = vld [vmem:[#allocation4 + $0x7b8] sm:$0xff] }
 0x92e   :  { %5181 = vmatprep.mubr.f32.mxu1 %v12380_v60  ;;  %5069 = vmatmul.mubr.f32.gmra.mrb[46].mxu0 %v11580_v3  ;;  %v4919_v4 = vld [vmem:[#allocation4 + $0x7f8] sm:$0xff] }
 0x92f   :  { %8653 = vmatpush1.bf16.msra.mxu0 %v8652_v55  ;;  %5182 = vmatmul.mubr.f32.gmra.mrb[46].mxu1 %v11580_v3  ;;  %v8668_v55 = vpack.c.bf16 %v4852_v11, %v4844_v36  ;;  %v4908_v36 = vld [vmem:[#allocation4 + $0x7a0] sm:$0xff] }
 0x930   :  { %8717 = vmatpush1.bf16.msra.mxu1 %v8716_v12  ;;  %8655 = vmatprep.subr.bf16.mxu0 %v8654_v59  ;;  %v8732_v12 = vpack.c.bf16 %v4854_v18, %v4846_v46  ;;  %v8670_v59 = vpack.c.bf16 %v4869_v63, %v4861_v40  ;;  %v4916_v11 = vld [vmem:[#allocation4 + $0x7e0] sm:$0xff]  ;;  %v4910_v46 = vld [vmem:[#allocation4 + $0x7b0] sm:$0xff]  ;;  %v5483_v40 = vld [vmem:[#allocation5 + $0x8] sm:$0xff] }
 0x931   :  { %8719 = vmatprep.subr.bf16.mxu1 %v8718_v61  ;;  %5252 = vmatprep.mubr.f32.mxu0 %v11584_v37  ;;  %v8734_v61 = vpack.c.bf16 %v4871_v24, %v4863_v5  ;;  %v4918_v18 = vld [vmem:[#allocation4 + $0x7f0] sm:$0xff]  ;;  %v5487_v63 = vld [vmem:[#allocation5 + $0x28] sm:$0xff]  ;;  %v5485_v5 = vld [vmem:[#allocation5 + $0x18] sm:$0xff] }
 0x932   :  { %5365 = vmatprep.mubr.f32.mxu1 %v11584_v37  ;;  %v8728_v37 = vpack.c.bf16 %v4838_v8, %v4830_v41  ;;  %v4894_v41 = vld [vmem:[#allocation4 + $0x730] sm:$0xff]  ;;  %v5489_v24 = vld [vmem:[#allocation5 + $0x38] sm:$0xff] }
 0x933   :  { %8657 = vmatpush1.bf16.msra.mxu0 %v8656_v35  ;;  %v8672_v35 = vpack.c.bf16 %v4868_v39, %v4860_v30  ;;  %v4902_v8 = vld [vmem:[#allocation4 + $0x770] sm:$0xff]  ;;  %v5482_v30 = vld [vmem:[#allocation5] sm:$0xff] }
 0x934   :  { %8721 = vmatpush1.bf16.msra.mxu1 %v8720_v15  ;;  %8659 = vmatprep.subr.bf16.mxu0 %v8658_v44  ;;  %v8736_v15 = vpack.c.bf16 %v4870_v6, %v4862_v48  ;;  %v8674_v44 = vpack.c.bf16 %v4885_v10, %v4877_v28  ;;  %v5486_v39 = vld [vmem:[#allocation5 + $0x20] sm:$0xff]  ;;  %v11622_v48 = vpack.c.bf16 %v5489_v24, %v5485_v5  ;;  %v5488_v6 = vld [vmem:[#allocation5 + $0x30] sm:$0xff]  ;;  %v5491_v28 = vld [vmem:[#allocation5 + $0x48] sm:$0xff] }
 0x935   :  { %8723 = vmatprep.subr.bf16.mxu1 %v8722_v21  ;;  %v8738_v21 = vpack.c.bf16 %v4887_v52, %v4879_v31  ;;  %v5495_v10 = vld [vmem:[#allocation5 + $0x68] sm:$0xff]  ;;  %v11624_v31 = vpack.c.bf16 %v5486_v39, %v5482_v30  ;;  %v5493_v52 = vld [vmem:[#allocation5 + $0x58] sm:$0xff]  ;;  %v5514_v5 = vld [vmem:[#allocation5 + $0x100] sm:$0xff] }
 0x936   :  { %v5518_v24 = vld [vmem:[#allocation5 + $0x120] sm:$0xff]  ;;  %v5523_v39 = vld [vmem:[#allocation5 + $0x148] sm:$0xff] }
 0x937   :  { %8661 = vmatpush1.bf16.msra.mxu0 %v8660_v22  ;;  %v8676_v22 = vpack.c.bf16 %v4884_v17, %v4876_v33  ;;  %v5494_v33 = vld [vmem:[#allocation5 + $0x60] sm:$0xff]  ;;  %v11630_v17 = vpack.c.bf16 %v5495_v10, %v5491_v28  ;;  %v5529_v28 = vld [vmem:[#allocation5 + $0x178] sm:$0xff] }
 0x938   :  { %8725 = vmatpush1.bf16.msra.mxu1 %v8724_v26  ;;  %8663 = vmatprep.subr.bf16.mxu0 %v8662_v27  ;;  %v8740_v26 = vpack.c.bf16 %v4886_v50, %v4878_v51  ;;  %v8678_v27 = vpack.c.bf16 %v4901_v56, %v4893_v2  ;;  %v5492_v51 = vld [vmem:[#allocation5 + $0x50] sm:$0xff]  ;;  %v5499_v2 = vld [vmem:[#allocation5 + $0x88] sm:$0xff] }
 0x939   :  { %8727 = vmatprep.subr.bf16.mxu1 %v8726_v7  ;;  %v8742_v7 = vpack.c.bf16 %v4903_v62, %v4895_v53  ;;  %v5503_v56 = vld [vmem:[#allocation5 + $0xa8] sm:$0xff]  ;;  %v5501_v62 = vld [vmem:[#allocation5 + $0x98] sm:$0xff] }
 0x93b   :  { %8665 = vmatpush1.bf16.msra.mxu0 %v8664_v45  ;;  %v8680_v45 = vpack.c.bf16 %v4900_v47, %v4892_v42  ;;  %v5502_v42 = vld [vmem:[#allocation5 + $0xa0] sm:$0xff]  ;;  %v11645_v47 = vpack.c.bf16 %v5503_v56, %v5499_v2  ;;  %v5535_v2 = vld [vmem:[#allocation5 + $0x1a8] sm:$0xff] }
 0x93c   :  { %8729 = vmatpush1.bf16.msra.mxu1 %v8728_v37  ;;  %8667 = vmatprep.subr.bf16.mxu0 %v8666_v58  ;;  %v8744_v37 = vpack.c.bf16 %v4902_v8, %v4894_v41  ;;  %v8682_v58 = vpack.c.bf16 %v4917_v29, %v4909_v14  ;;  %v5504_v41 = vld [vmem:[#allocation5 + $0xb0] sm:$0xff]  ;;  %v5507_v8 = vld [vmem:[#allocation5 + $0xc8] sm:$0xff] }
 0x93d   :  { %8731 = vmatprep.subr.bf16.mxu1 %v8730_v16  ;;  %v8746_v16 = vpack.c.bf16 %v4919_v4, %v4911_v34  ;;  %v5511_v14 = vld [vmem:[#allocation5 + $0xe8] sm:$0xff]  ;;  %v5513_v34 = vld [vmem:[#allocation5 + $0xf8] sm:$0xff] }
 0x93f   :  { %8669 = vmatpush1.bf16.msra.mxu0 %v8668_v55  ;;  %v8684_v55 = vpack.c.bf16 %v4916_v11, %v4908_v36  ;;  %v5512_v36 = vld [vmem:[#allocation5 + $0xf0] sm:$0xff] }
 0x940   :  { %8733 = vmatpush1.bf16.msra.mxu1 %v8732_v12  ;;  %8671 = vmatprep.subr.bf16.mxu0 %v8670_v59  ;;  %v8748_v12 = vpack.c.bf16 %v4918_v18, %v4910_v46  ;;  %v11620_v59 = vpack.c.bf16 %v5487_v63, %v5483_v40  ;;  %v5515_v46 = vld [vmem:[#allocation5 + $0x108] sm:$0xff]  ;;  %v5521_v40 = vld [vmem:[#allocation5 + $0x138] sm:$0xff] }
 0x941   :  { %8735 = vmatprep.subr.bf16.mxu1 %v8734_v61  ;;  %v5484_v61 = vld [vmem:[#allocation5 + $0x10] sm:$0xff] }
 0x943   :  { %8673 = vmatpush1.bf16.msra.mxu0 %v8672_v35  ;;  %v5497_v35 = vld [vmem:[#allocation5 + $0x78] sm:$0xff] }
 0x944   :  { %8737 = vmatpush1.bf16.msra.mxu1 %v8736_v15  ;;  %8675 = vmatprep.subr.bf16.mxu0 %v8674_v44  ;;  %v11627_v15 = vpack.c.bf16 %v5488_v6, %v5484_v61  ;;  %v5490_v44 = vld [vmem:[#allocation5 + $0x40] sm:$0xff]  ;;  %v11633_v50 = vpack.c.bf16 %v5497_v35, %v5493_v52  ;;  %v5527_v61 = vld [vmem:[#allocation5 + $0x168] sm:$0xff]  ;;  %v11685_v6 = vpack.c.bf16 %v5518_v24, %v5514_v5 }
 0x945   :  { %8739 = vmatprep.subr.bf16.mxu1 %v8738_v21  ;;  %v5496_v21 = vld [vmem:[#allocation5 + $0x70] sm:$0xff]  ;;  %v11637_v53 = vpack.c.bf16 %v5494_v33, %v5490_v44  ;;  %v5522_v52 = vld [vmem:[#allocation5 + $0x140] sm:$0xff]  ;;  %v11693_v44 = vpack.c.bf16 %v5527_v61, %v5523_v39 }
 0x946   :  { %v5526_v35 = vld [vmem:[#allocation5 + $0x160] sm:$0xff]  ;;  %v5528_v33 = vld [vmem:[#allocation5 + $0x170] sm:$0xff] }
 0x947   :  { %8677 = vmatpush1.bf16.msra.mxu0 %v8676_v22  ;;  %v5505_v22 = vld [vmem:[#allocation5 + $0xb8] sm:$0xff]  ;;  %v11701_v56 = vpack.c.bf16 %v5526_v35, %v5522_v52 }
 0x948   :  { %8741 = vmatpush1.bf16.msra.mxu1 %v8740_v26  ;;  %8679 = vmatprep.subr.bf16.mxu0 %v8678_v27  ;;  %v11641_v26 = vpack.c.bf16 %v5496_v21, %v5492_v51  ;;  %v5498_v27 = vld [vmem:[#allocation5 + $0x80] sm:$0xff]  ;;  %v5531_v21 = vld [vmem:[#allocation5 + $0x188] sm:$0xff] }
 0x949   :  { %8743 = vmatprep.subr.bf16.mxu1 %v8742_v7  ;;  %v11649_v7 = vpack.c.bf16 %v5505_v22, %v5501_v62  ;;  %v11653_v29 = vpack.c.bf16 %v5502_v42, %v5498_v27  ;;  %v5537_v62 = vld [vmem:[#allocation5 + $0x1b8] sm:$0xff]  ;;  %v5530_v27 = vld [vmem:[#allocation5 + $0x180] sm:$0xff] }
 0x94a   :  { %v5534_v42 = vld [vmem:[#allocation5 + $0x1a0] sm:$0xff] }
 0x94b   :  { %8681 = vmatpush1.bf16.msra.mxu0 %v8680_v45  ;;  %v5506_v45 = vld [vmem:[#allocation5 + $0xc0] sm:$0xff] }
 0x94c   :  { %8745 = vmatpush1.bf16.msra.mxu1 %v8744_v37  ;;  %8683 = vmatprep.subr.bf16.mxu0 %v8682_v58  ;;  %v5510_v37 = vld [vmem:[#allocation5 + $0xe0] sm:$0xff]  ;;  %v11661_v58 = vpack.c.bf16 %v5511_v14, %v5507_v8  ;;  %v5539_v14 = vld [vmem:[#allocation5 + $0x1c8] sm:$0xff] }
 0x94d   :  { %8747 = vmatprep.subr.bf16.mxu1 %v8746_v16  ;;  %v5519_v16 = vld [vmem:[#allocation5 + $0x128] sm:$0xff]  ;;  %v11669_v18 = vpack.c.bf16 %v5510_v37, %v5506_v45  ;;  %v5545_v45 = vld [vmem:[#allocation5 + $0x1f8] sm:$0xff] }
 0x94f   :  { %8685 = vmatpush1.bf16.msra.mxu0 %v8684_v55  ;;  %v11677_v55 = vpack.c.bf16 %v5519_v16, %v5515_v46  ;;  %v5544_v16 = vld [vmem:[#allocation5 + $0x1f0] sm:$0xff] }
 0x950   :  { %8749 = vmatpush1.bf16.msra.mxu1 %v8748_v12  ;;  %8751 = vmatprep.subr.bf16.mxu0 %v11620_v59  ;;  %v5520_v12 = vld [vmem:[#allocation5 + $0x130] sm:$0xff] }
 0x951   :  { %8783 = vmatprep.subr.bf16.mxu1 %v11622_v48 }
 0x952   :  { %5253 = vmatmul.mubr.f32.vlgmr.msra.gmra.mrb[48].mxu0 %v12370_v43 }
 0x953   :  { %5366 = vmatmul.mubr.f32.vlgmr.msra.gmra.mrb[48].mxu1 %v12370_v43  ;;  %8753 = vmatpush1.bf16.msra.mxu0 %v11624_v31  ;;  %v5500_v43 = vld [vmem:[#allocation5 + $0x90] sm:$0xff] }
 0x954   :  { %8785 = vmatpush1.bf16.msra.mxu1 %v11627_v15  ;;  %5258 = vmatprep.mubr.f32.mxu0 %v11532_v54  ;;  %v11657_v4 = vpack.c.bf16 %v5504_v41, %v5500_v43  ;;  %v11709_v43 = vpack.c.bf16 %v5535_v2, %v5531_v21  ;;  %v5536_v41 = vld [vmem:[#allocation5 + $0x1b0] sm:$0xff] }
 0x955   :  { %5371 = vmatprep.mubr.f32.mxu1 %v11532_v54  ;;  %8755 = vmatprep.subr.bf16.mxu0 %v11630_v17  ;;  %v5509_v54 = vld [vmem:[#allocation5 + $0xd8] sm:$0xff] }
 0x956   :  { %5259 = vmatmul.mubr.f32.gmra.mrb[50].mxu0 %v12371_v13  ;;  %8787 = vmatprep.subr.bf16.mxu1 %v11633_v50  ;;  %v11665_v11 = vpack.c.bf16 %v5513_v34, %v5509_v54  ;;  %v5543_v54 = vld [vmem:[#allocation5 + $0x1e8] sm:$0xff]  ;;  %v11717_v34 = vpack.c.bf16 %v5534_v42, %v5530_v27 }
 0x957   :  { %5372 = vmatmul.mubr.f32.gmra.mrb[50].mxu1 %v12371_v13  ;;  %8757 = vmatpush1.bf16.msra.mxu0 %v11637_v53  ;;  %v5508_v13 = vld [vmem:[#allocation5 + $0xd0] sm:$0xff]  ;;  %v11725_v46 = vpack.c.bf16 %v5543_v54, %v5539_v14  ;;  %v4920_v54 = vld [vmem:[%s12105_s5] sm:$0xff] }
 0x958   :  { %8789 = vmatpush1.bf16.msra.mxu1 %v11641_v26  ;;  %5264 = vmatprep.mubr.f32.mxu0 %v11440_v23  ;;  %v11673_v63 = vpack.c.bf16 %v5512_v36, %v5508_v13  ;;  %v5538_v13 = vld [vmem:[#allocation5 + $0x1c0] sm:$0xff] }
 0x959   :  { %5377 = vmatprep.mubr.f32.mxu1 %v11440_v23  ;;  %8759 = vmatprep.subr.bf16.mxu0 %v11645_v47  ;;  %v5517_v23 = vld [vmem:[#allocation5 + $0x118] sm:$0xff]  ;;  %v5542_v36 = vld [vmem:[#allocation5 + $0x1e0] sm:$0xff] }
 0x95a   :  { %5265 = vmatmul.mubr.f32.gmra.mrb[52].mxu0 %v12372_v9  ;;  %8791 = vmatprep.subr.bf16.mxu1 %v11649_v7  ;;  %v11681_v30 = vpack.c.bf16 %v5521_v40, %v5517_v23  ;;  %v11733_v40 = vpack.c.bf16 %v5542_v36, %v5538_v13  ;;  %v12381_v13 = vld [vmem:[#allocation36_spill] sm:$0xff] }
 0x95b   :  { %5378 = vmatmul.mubr.f32.gmra.mrb[52].mxu1 %v12372_v9  ;;  %8761 = vmatpush1.bf16.msra.mxu0 %v11653_v29  ;;  %v5516_v9 = vld [vmem:[#allocation5 + $0x110] sm:$0xff]  ;;  %v12382_v36 = vsub.s32 4, %v12381_v13 }
 0x95c   :  { %8793 = vmatpush1.bf16.msra.mxu1 %v11657_v4  ;;  %5270 = vmatprep.mubr.f32.mxu0 %v12373_v38  ;;  %v11689_v10 = vpack.c.bf16 %v5520_v12, %v5516_v9 }
 0x95d   :  { %5383 = vmatprep.mubr.f32.mxu1 %v12373_v38  ;;  %8763 = vmatprep.subr.bf16.mxu0 %v11661_v58  ;;  %v5525_v38 = vld [vmem:[#allocation5 + $0x158] sm:$0xff] }
 0x95e   :  { %5271 = vmatmul.mubr.f32.gmra.mrb[54].mxu0 %v12374_v0  ;;  %8795 = vmatprep.subr.bf16.mxu1 %v11665_v11  ;;  %v11697_v51 = vpack.c.bf16 %v5529_v28, %v5525_v38 }
 0x95f   :  { %5384 = vmatmul.mubr.f32.gmra.mrb[54].mxu1 %v12374_v0  ;;  %8765 = vmatpush1.bf16.msra.mxu0 %v11669_v18  ;;  %v5524_v0 = vld [vmem:[#allocation5 + $0x150] sm:$0xff] }
 0x960   :  { %8797 = vmatpush1.bf16.msra.mxu1 %v11673_v63  ;;  %5276 = vmatprep.mubr.f32.mxu0 %v12375_v49  ;;  %v11705_v22 = vpack.c.bf16 %v5528_v33, %v5524_v0 }
 0x961   :  { %5389 = vmatprep.mubr.f32.mxu1 %v12375_v49  ;;  %8767 = vmatprep.subr.bf16.mxu0 %v11677_v55  ;;  %v5533_v49 = vld [vmem:[#allocation5 + $0x198] sm:$0xff] }
 0x962   :  { %5277 = vmatmul.mubr.f32.gmra.mrb[56].mxu0 %v12376_v20  ;;  %8799 = vmatprep.subr.bf16.mxu1 %v11681_v30  ;;  %v11713_v8 = vpack.c.bf16 %v5537_v62, %v5533_v49 }
 0x963   :  { %5390 = vmatmul.mubr.f32.gmra.mrb[56].mxu1 %v12376_v20  ;;  %8769 = vmatpush1.bf16.msra.mxu0 %v11685_v6  ;;  %v5532_v20 = vld [vmem:[#allocation5 + $0x190] sm:$0xff] }
 0x964   :  { %8801 = vmatpush1.bf16.msra.mxu1 %v11689_v10  ;;  %5282 = vmatprep.mubr.f32.mxu0 %v12377_v1  ;;  %v11721_v37 = vpack.c.bf16 %v5536_v41, %v5532_v20 }
 0x965   :  { %5395 = vmatprep.mubr.f32.mxu1 %v12377_v1  ;;  %8771 = vmatprep.subr.bf16.mxu0 %v11693_v44  ;;  %v5541_v1 = vld [vmem:[#allocation5 + $0x1d8] sm:$0xff] }
 0x966   :  { %5283 = vmatmul.mubr.f32.gmra.mrb[58].mxu0 %v12378_v25  ;;  %8803 = vmatprep.subr.bf16.mxu1 %v11697_v51  ;;  %v11729_v23 = vpack.c.bf16 %v5545_v45, %v5541_v1 }
 0x967   :  { %5396 = vmatmul.mubr.f32.gmra.mrb[58].mxu1 %v12378_v25  ;;  %8773 = vmatpush1.bf16.msra.mxu0 %v11701_v56  ;;  %v5540_v25 = vld [vmem:[#allocation5 + $0x1d0] sm:$0xff] }
 0x968   :  { %8805 = vmatpush1.bf16.msra.mxu1 %v11705_v22  ;;  %5288 = vmatprep.mubr.f32.mxu0 %v12379_v32 }
 0x969   :  { %5401 = vmatprep.mubr.f32.mxu1 %v12379_v32  ;;  %8775 = vmatprep.subr.bf16.mxu0 %v11709_v43  ;;  %v11737_v32 = vpack.c.bf16 %v5544_v16, %v5540_v25  ;;  %v4941_v25 = vrot.slane %v4920_v54, %v12382_v36 }
 0x96a   :  { %5289 = vmatmul.mubr.f32.gmra.mrb[60].mxu0 %v11492_v57  ;;  %8807 = vmatprep.subr.bf16.mxu1 %v11713_v8 }
 0x96b   :  { %5402 = vmatmul.mubr.f32.gmra.mrb[60].mxu1 %v11492_v57  ;;  %8777 = vmatpush1.bf16.msra.mxu0 %v11717_v34 }
 0x96c   :  { %8809 = vmatpush1.bf16.msra.mxu1 %v11721_v37  ;;  %5294 = vmatprep.mubr.f32.mxu0 %v12380_v60 }
 0x96d   :  { %5407 = vmatprep.mubr.f32.mxu1 %v12380_v60  ;;  %8779 = vmatprep.subr.bf16.mxu0 %v11725_v46 }
 0x96e   :  { %5295 = vmatmul.mubr.f32.gmra.mrb[62].mxu0 %v11580_v3  ;;  %8811 = vmatprep.subr.bf16.mxu1 %v11729_v23 }
 0x96f   :  { %5408 = vmatmul.mubr.f32.gmra.mrb[62].mxu1 %v11580_v3  ;;  %8781 = vmatpush1.bf16.msra.mxu0 %v11733_v40 }
 0x970   :  { %8813 = vmatpush1.bf16.msra.mxu1 %v11737_v32  ;;  %5610 = vmatprep.mubr.f32.mxu0 %v12233_v19 }
 0x971   :  { %5681 = vmatprep.mubr.f32.mxu1 %v12233_v19  ;;  %8815 = vmatprep.subr.bf16.mxu0 %v11620_v59 }
 0x972   :  { %5611 = vmatmul.mubr.f32.vlgmr.msra.gmra.mrb[32].mxu0 %v12233_v19  ;;  %8847 = vmatprep.subr.bf16.mxu1 %v11622_v48 }
 0x973   :  { %5682 = vmatmul.mubr.f32.vlgmr.msra.gmra.mrb[32].mxu1 %v12233_v19  ;;  %8817 = vmatpush1.bf16.msra.mxu0 %v11624_v31 }
 0x974   :  { %8849 = vmatpush1.bf16.msra.mxu1 %v11627_v15  ;;  %8819 = vmatprep.subr.bf16.mxu0 %v11630_v17 }
 0x975   :  { %8851 = vmatprep.subr.bf16.mxu1 %v11633_v50  ;;  %5784 = vmatprep.mubr.f32.mxu0 %v12233_v19 }
 0x976   :  { %5855 = vmatprep.mubr.f32.mxu1 %v12233_v19 }
 0x977   :  { %8821 = vmatpush1.bf16.msra.mxu0 %v11637_v53 }
 0x978   :  { %8853 = vmatpush1.bf16.msra.mxu1 %v11641_v26  ;;  %8823 = vmatprep.subr.bf16.mxu0 %v11645_v47 }
 0x979   :  { %8855 = vmatprep.subr.bf16.mxu1 %v11649_v7 }
 0x97b   :  { %8825 = vmatpush1.bf16.msra.mxu0 %v11653_v29 }
 0x97c   :  { %8857 = vmatpush1.bf16.msra.mxu1 %v11657_v4  ;;  %8827 = vmatprep.subr.bf16.mxu0 %v11661_v58 }
 0x97d   :  { %8859 = vmatprep.subr.bf16.mxu1 %v11665_v11 }
 0x97f   :  { %8829 = vmatpush1.bf16.msra.mxu0 %v11669_v18 }
 0x980   :  { %8861 = vmatpush1.bf16.msra.mxu1 %v11673_v63  ;;  %8831 = vmatprep.subr.bf16.mxu0 %v11677_v55 }
 0x981   :  { %8863 = vmatprep.subr.bf16.mxu1 %v11681_v30 }
 0x983   :  { %8833 = vmatpush1.bf16.msra.mxu0 %v11685_v6 }
 0x984   :  { %8865 = vmatpush1.bf16.msra.mxu1 %v11689_v10  ;;  %8835 = vmatprep.subr.bf16.mxu0 %v11693_v44 }
 0x985   :  { %8867 = vmatprep.subr.bf16.mxu1 %v11697_v51 }
 0x987   :  { %8837 = vmatpush1.bf16.msra.mxu0 %v11701_v56 }
 0x988   :  { %8869 = vmatpush1.bf16.msra.mxu1 %v11705_v22  ;;  %8839 = vmatprep.subr.bf16.mxu0 %v11709_v43 }
 0x989   :  { %8871 = vmatprep.subr.bf16.mxu1 %v11713_v8 }
 0x98b   :  { %8841 = vmatpush1.bf16.msra.mxu0 %v11717_v34 }
 0x98c   :  { %8873 = vmatpush1.bf16.msra.mxu1 %v11721_v37  ;;  %8843 = vmatprep.subr.bf16.mxu0 %v11725_v46 }
 0x98d   :  { %8875 = vmatprep.subr.bf16.mxu1 %v11729_v23 }
 0x98f   :  { %8845 = vmatpush1.bf16.msra.mxu0 %v11733_v40 }
 0x990   :  { %8877 = vmatpush1.bf16.msra.mxu1 %v11737_v32  ;;  %8879 = vmatprep.subr.bf16.mxu0 %v11620_v59 }
 0x991   :  { %8911 = vmatprep.subr.bf16.mxu1 %v11622_v48 }
 0xa25   :  { %v5254_v57 = vpop.f32.mrb[48].mxu0 }
 0xa26   :  { %v5256_v3 = vpop.f32.mrb[49].mxu0  ;;  %v5367_v60 = vpop.f32.mrb[48].mxu1 }
 0xa27   :  { %v5369_v5 = vpop.f32.mrb[49].mxu1  ;;  %v12383_v3 = vsub.s32 6, %v12381_v13 }
 0xa28   :  { %v12384_v5 = vsub.s32 7, %v12381_v13 }
 0xa29   :  { %v5260_v24 = vpop.f32.mrb[50].mxu0  ;;  %v4949_v60 = vrot.slane %v4920_v54, %v12383_v3 }
 0xa2a   :  { %v5262_v9 = vpop.f32.mrb[51].mxu0  ;;  %v5373_v12 = vpop.f32.mrb[50].mxu1  ;;  %v4953_v24 = vrot.slane %v4920_v54, %v12384_v5 }
 0xa2b   :  { %v5375_v39 = vpop.f32.mrb[51].mxu1  ;;  %v12385_v12 = vsub.s32 0, %v12381_v13 }
 0xa2d   :  { %v5266_v61 = vpop.f32.mrb[52].mxu0  ;;  %v11797_v39 = vrot.slane %v4920_v54, %v12385_v12 }
 0xa2e   :  { %v5268_v38 = vpop.f32.mrb[53].mxu0  ;;  %v5379_v28 = vpop.f32.mrb[52].mxu1 }
 0xa2f   :  { %v5381_v52 = vpop.f32.mrb[53].mxu1 }
 0xa30   :  { %v12386_v52 = vsub.s32 1, %v12381_v13 }
 0xa31   :  { %v5272_v35 = vpop.f32.mrb[54].mxu0 }
 0xa32   :  { %v5274_v0 = vpop.f32.mrb[55].mxu0  ;;  %v5385_v33 = vpop.f32.mrb[54].mxu1  ;;  %v11801_v35 = vrot.slane %v4920_v54, %v12386_v52 }
 0xa33   :  { %v5387_v21 = vpop.f32.mrb[55].mxu1 }
 0xa35   :  { %v5278_v2 = vpop.f32.mrb[56].mxu0 }
 0xa36   :  { %v5280_v49 = vpop.f32.mrb[57].mxu0  ;;  %v5391_v62 = vpop.f32.mrb[56].mxu1 }
 0xa37   :  { %v5393_v27 = vpop.f32.mrb[57].mxu1 }
 0xa39   :  { %v5284_v42 = vpop.f32.mrb[58].mxu0 }
 0xa3a   :  { %v5286_v20 = vpop.f32.mrb[59].mxu0  ;;  %v5397_v41 = vpop.f32.mrb[58].mxu1 }
 0xa3b   :  { %v5399_v14 = vpop.f32.mrb[59].mxu1 }
 0xa3d   :  { %v5290_v1 = vpop.f32.mrb[60].mxu0 }
 0xa3e   :  { %v5292_v45 = vpop.f32.mrb[61].mxu0  ;;  %v5403_v16 = vpop.f32.mrb[60].mxu1  ;;  %v12387_v1 = vsub.s32 3, %v12381_v13 }
 0xa3f   :  { %v5405_v57 = vpop.f32.mrb[61].mxu1 }
 0xa40   :  { %v11807_v45 = vrot.slane %v4920_v54, %v12387_v1  ;;  %v12388_v57 = vsub.s32 2, %v12381_v13 }
 0xa41   :  { %v5296_v9 = vpop.f32.mrb[62].mxu0 }
 0xa42   :  { %v5297_v61 = vadd.f32 %v5296_v9, %v4941_v25  ;;  %v5298_v38 = vpop.f32.mrb[63].mxu0  ;;  %v5409_v28 = vpop.f32.mrb[62].mxu1  ;;  %v11812_v3 = vrot.slane %v4920_v54, %v12388_v57 }
 0xa43   :  { %v5410_v0 = vadd.f32 %v5409_v28, %v4949_v60  ;;  %v5411_v33 = vpop.f32.mrb[63].mxu1 }
 0xa44   :  { %v7232_v21 = vmul.f32 -1.442695, %v5297_v61  ;;  %v5412_v2 = vadd.f32 %v5411_v33, %v4953_v24 }
 0xa45   :  { %v5612_v49 = vpop.f32.mrb[32].mxu0 }
 0xa46   :  { %9771 = vpow2.f32 %v7232_v21  ;;  %v9374_v62 = vadd.f32 %v5612_v49, %v11797_v39  ;;  %v5683_v27 = vpop.f32.mrb[32].mxu1  ;;  %v5614_v42 = vpop.f32.mrb[33].mxu0  ;;  %v7233_v36 = vmul.f32 -1.442695, %v5412_v2 }
 0xa47   :  { %v9375_v20 = vadd.f32 %v5614_v42, %v11801_v35  ;;  %v5685_v41 = vpop.f32.mrb[33].mxu1  ;;  %v9390_v9 = vadd.f32 %v5683_v27, %v11812_v3 }
 0xa48   :  { %v7208_v14 = vmul.f32 -1.442695, %v9374_v62  ;;  %v9391_v16 = vadd.f32 %v5685_v41, %v11807_v45 }
 0xa49   :  { %v7209_v25 = vmul.f32 -1.442695, %v9375_v20 }
 0xa4a   :  { %9773 = vpow2.f32 %v7208_v14  ;;  %v7210_v24 = vmul.f32 -1.442695, %v9391_v16 }
 0xa4b   :  { %9775 = vpow2.f32 %v7209_v25 }
 0xa4c   :  { %9777 = vpow2.f32 %v7233_v36 }
 0xa4d   :  { %9779 = vtanh.f32 %v5410_v0 }
 0xa50   :  { %v9772_v60 = vpop.eup %9771 }
 0xa51   :  { %v6940_v5 = vadd.f32 1.0, %v9772_v60 }
 0xa53   :  { %9781 = vrcp.f32 %v6940_v5 }
 0xa54   :  { %v9774_v12 = vpop.eup %9773  ;;  %9783 = vpow2.f32 %v7210_v24 }
 0xa55   :  { %v9776_v61 = vpop.eup %9775  ;;  %v5695_v38 = vadd.f32 1.0, %v9774_v12  ;;  %9785 = vtanh.f32 %v9390_v9 }
 0xa56   :  { %v5701_v28 = vadd.f32 1.0, %v9776_v61  ;;  %v9778_v52 = vpop.eup %9777 }
 0xa57   :  { %9787 = vrcp.f32 %v5695_v38  ;;  %v6947_v33 = vadd.f32 1.0, %v9778_v52  ;;  %v9780_v13 = vpop.eup %9779 }
 0xa58   :  { %9789 = vrcp.f32 %v5701_v28 }
 0xa59   :  { %9791 = vrcp.f32 %v6947_v33 }
 0xa5d   :  { %v9782_v54 = vpop.eup %9781 }
 0xa5e   :  { %v6950_v21 = vmul.f32 %v9782_v54, %v9780_v13  ;;  %v9784_v2 = vpop.eup %9783 }
 0xa5f   :  { %v9786_v0 = vpop.eup %9785  ;;  %v5708_v42 = vadd.f32 1.0, %v9784_v2 }
 0xa60   :  { %9793 = vtanh.f32 %v6950_v21 }
 0xa61   :  { %v9788_v49 = vpop.eup %9787  ;;  %9795 = vrcp.f32 %v5708_v42 }
 0xa62   :  { %v9790_v62 = vpop.eup %9789  ;;  %v5712_v27 = vmul.f32 %v9788_v49, %v9786_v0 }
 0xa63   :  { %v5711_v20 = vmul.f32 0.0, %v9790_v62  ;;  %v9792_v14 = vpop.eup %9791 }
 0xa65   :  { %v11815_v41 = vadd.f32 %v5712_v27, %v5711_v20 }
 0xa67   :  { %9797 = vtanh.f32 %v11815_v41 }
 0xa6a   :  { %v9794_v1 = vpop.eup %9793 }
 0xa6b   :  { %v11818_v36 = vmul.f32 %v9794_v1, %v9792_v14  ;;  %v9796_v25 = vpop.eup %9795 }
 0xa71   :  { %v9798_v16 = vpop.eup %9797 }
 0xa72   :  { %v5715_v57 = vmul.f32 %v9798_v16, %v9796_v25 }
 0xa74   :  { %5785 = vmatmul.mubr.f32.vlgmr.msra.gmra.mrb[34].mxu0 %v5715_v57  ;;  %5856 = vmatmul.mubr.f32.vlgmr.msra.gmra.mrb[34].mxu1 %v5715_v57 }
 0xa75   :  { %8881 = vmatpush1.bf16.msra.mxu0 %v11624_v31  ;;  %8913 = vmatpush1.bf16.msra.mxu1 %v11627_v15 }
 0xa76   :  { %8883 = vmatprep.subr.bf16.mxu0 %v11630_v17  ;;  %8915 = vmatprep.subr.bf16.mxu1 %v11633_v50 }
 0xa77   :  { %5958 = vmatprep.mubr.f32.mxu0 %v12233_v19  ;;  %6029 = vmatprep.mubr.f32.mxu1 %v12233_v19 }
 0xa79   :  { %8885 = vmatpush1.bf16.msra.mxu0 %v11637_v53  ;;  %8917 = vmatpush1.bf16.msra.mxu1 %v11641_v26 }
 0xa7a   :  { %8887 = vmatprep.subr.bf16.mxu0 %v11645_v47  ;;  %8919 = vmatprep.subr.bf16.mxu1 %v11649_v7 }
 0xa7d   :  { %8889 = vmatpush1.bf16.msra.mxu0 %v11653_v29  ;;  %8921 = vmatpush1.bf16.msra.mxu1 %v11657_v4 }
 0xa7e   :  { %8891 = vmatprep.subr.bf16.mxu0 %v11661_v58  ;;  %8923 = vmatprep.subr.bf16.mxu1 %v11665_v11 }
 0xa81   :  { %8893 = vmatpush1.bf16.msra.mxu0 %v11669_v18  ;;  %8925 = vmatpush1.bf16.msra.mxu1 %v11673_v63 }
 0xa82   :  { %8895 = vmatprep.subr.bf16.mxu0 %v11677_v55  ;;  %8927 = vmatprep.subr.bf16.mxu1 %v11681_v30 }
 0xa85   :  { %8897 = vmatpush1.bf16.msra.mxu0 %v11685_v6  ;;  %8929 = vmatpush1.bf16.msra.mxu1 %v11689_v10 }
 0xa86   :  { %8899 = vmatprep.subr.bf16.mxu0 %v11693_v44  ;;  %8931 = vmatprep.subr.bf16.mxu1 %v11697_v51 }
 0xa89   :  { %8901 = vmatpush1.bf16.msra.mxu0 %v11701_v56  ;;  %8933 = vmatpush1.bf16.msra.mxu1 %v11705_v22 }
 0xa8a   :  { %8903 = vmatprep.subr.bf16.mxu0 %v11709_v43  ;;  %8935 = vmatprep.subr.bf16.mxu1 %v11713_v8 }
 0xa8d   :  { %8905 = vmatpush1.bf16.msra.mxu0 %v11717_v34  ;;  %8937 = vmatpush1.bf16.msra.mxu1 %v11721_v37 }
 0xa8e   :  { %8907 = vmatprep.subr.bf16.mxu0 %v11725_v46  ;;  %8939 = vmatprep.subr.bf16.mxu1 %v11729_v23 }
 0xa91   :  { %8909 = vmatpush1.bf16.msra.mxu0 %v11733_v40  ;;  %8941 = vmatpush1.bf16.msra.mxu1 %v11737_v32 }
 0xa92   :  { %8943 = vmatprep.subr.bf16.mxu0 %v11620_v59  ;;  %8975 = vmatprep.subr.bf16.mxu1 %v11622_v48 }
 0xb47   :  { %v5786_v60 = vpop.f32.mrb[34].mxu0  ;;  %v5857_v5 = vpop.f32.mrb[34].mxu1 }
 0xb48   :  { %v9376_v24 = vadd.f32 %v5786_v60, %v11797_v39  ;;  %v5788_v9 = vpop.f32.mrb[35].mxu0  ;;  %v5859_v12 = vpop.f32.mrb[35].mxu1  ;;  %v9392_v13 = vadd.f32 %v5857_v5, %v11812_v3 }
 0xb49   :  { %v9377_v61 = vadd.f32 %v5788_v9, %v11801_v35  ;;  %v9393_v52 = vadd.f32 %v5859_v12, %v11807_v45 }
 0xb4a   :  { %v7211_v38 = vmul.f32 -1.442695, %v9376_v24 }
 0xb4b   :  { %v7212_v28 = vmul.f32 -1.442695, %v9377_v61  ;;  %v7213_v33 = vmul.f32 -1.442695, %v9393_v52 }
 0xb4c   :  { %9799 = vpow2.f32 %v7211_v38 }
 0xb4d   :  { %9801 = vpow2.f32 %v7212_v28 }
 0xb4e   :  { %9803 = vpow2.f32 %v7213_v33 }
 0xb4f   :  { %9805 = vtanh.f32 %v9392_v13 }
 0xb56   :  { %v9800_v54 = vpop.eup %9799 }
 0xb57   :  { %v9802_v21 = vpop.eup %9801  ;;  %v5869_v2 = vadd.f32 1.0, %v9800_v54 }
 0xb58   :  { %v5875_v0 = vadd.f32 1.0, %v9802_v21  ;;  %v9804_v49 = vpop.eup %9803 }
 0xb59   :  { %9807 = vrcp.f32 %v5869_v2  ;;  %v9806_v62 = vpop.eup %9805  ;;  %v5882_v14 = vadd.f32 1.0, %v9804_v49 }
 0xb5a   :  { %9809 = vrcp.f32 %v5875_v0 }
 0xb5b   :  { %9811 = vrcp.f32 %v5882_v14 }
 0xb63   :  { %v9808_v27 = vpop.eup %9807 }
 0xb64   :  { %v9810_v42 = vpop.eup %9809  ;;  %v5886_v20 = vmul.f32 %v9808_v27, %v9806_v62 }
 0xb65   :  { %v5885_v1 = vmul.f32 %v9810_v42, %v11815_v41  ;;  %v9812_v16 = vpop.eup %9811 }
 0xb67   :  { %v11859_v25 = vadd.f32 %v5886_v20, %v5885_v1 }
 0xb69   :  { %9813 = vtanh.f32 %v11859_v25 }
 0xb73   :  { %v9814_v57 = vpop.eup %9813 }
 0xb74   :  { %v5889_v60 = vmul.f32 %v9814_v57, %v9812_v16 }
 0xb76   :  { %5959 = vmatmul.mubr.f32.vlgmr.msra.gmra.mrb[36].mxu0 %v5889_v60  ;;  %6030 = vmatmul.mubr.f32.vlgmr.msra.gmra.mrb[36].mxu1 %v5889_v60 }
 0xb77   :  { %8945 = vmatpush1.bf16.msra.mxu0 %v11624_v31  ;;  %8977 = vmatpush1.bf16.msra.mxu1 %v11627_v15 }
 0xb78   :  { %8947 = vmatprep.subr.bf16.mxu0 %v11630_v17  ;;  %8979 = vmatprep.subr.bf16.mxu1 %v11633_v50 }
 0xb79   :  { %6132 = vmatprep.mubr.f32.mxu0 %v12233_v19  ;;  %6203 = vmatprep.mubr.f32.mxu1 %v12233_v19 }
 0xb7b   :  { %8949 = vmatpush1.bf16.msra.mxu0 %v11637_v53  ;;  %8981 = vmatpush1.bf16.msra.mxu1 %v11641_v26 }
 0xb7c   :  { %8951 = vmatprep.subr.bf16.mxu0 %v11645_v47  ;;  %8983 = vmatprep.subr.bf16.mxu1 %v11649_v7 }
 0xb7f   :  { %8953 = vmatpush1.bf16.msra.mxu0 %v11653_v29  ;;  %8985 = vmatpush1.bf16.msra.mxu1 %v11657_v4 }
 0xb80   :  { %8955 = vmatprep.subr.bf16.mxu0 %v11661_v58  ;;  %8987 = vmatprep.subr.bf16.mxu1 %v11665_v11 }
 0xb83   :  { %8957 = vmatpush1.bf16.msra.mxu0 %v11669_v18  ;;  %8989 = vmatpush1.bf16.msra.mxu1 %v11673_v63 }
 0xb84   :  { %8959 = vmatprep.subr.bf16.mxu0 %v11677_v55  ;;  %8991 = vmatprep.subr.bf16.mxu1 %v11681_v30 }
 0xb87   :  { %8961 = vmatpush1.bf16.msra.mxu0 %v11685_v6  ;;  %8993 = vmatpush1.bf16.msra.mxu1 %v11689_v10 }
 0xb88   :  { %8963 = vmatprep.subr.bf16.mxu0 %v11693_v44  ;;  %8995 = vmatprep.subr.bf16.mxu1 %v11697_v51 }
 0xb8b   :  { %8965 = vmatpush1.bf16.msra.mxu0 %v11701_v56  ;;  %8997 = vmatpush1.bf16.msra.mxu1 %v11705_v22 }
 0xb8c   :  { %8967 = vmatprep.subr.bf16.mxu0 %v11709_v43  ;;  %8999 = vmatprep.subr.bf16.mxu1 %v11713_v8 }
 0xb8f   :  { %8969 = vmatpush1.bf16.msra.mxu0 %v11717_v34  ;;  %9001 = vmatpush1.bf16.msra.mxu1 %v11721_v37 }
 0xb90   :  { %8971 = vmatprep.subr.bf16.mxu0 %v11725_v46  ;;  %9003 = vmatprep.subr.bf16.mxu1 %v11729_v23 }
 0xb93   :  { %8973 = vmatpush1.bf16.msra.mxu0 %v11733_v40  ;;  %9005 = vmatpush1.bf16.msra.mxu1 %v11737_v32 }
 0xb94   :  { %9007 = vmatprep.subr.bf16.mxu0 %v11620_v59  ;;  %9039 = vmatprep.subr.bf16.mxu1 %v11622_v48 }
 0xc49   :  { %v5960_v41 = vpop.f32.mrb[36].mxu0  ;;  %v6031_v5 = vpop.f32.mrb[36].mxu1 }
 0xc4a   :  { %v9378_v24 = vadd.f32 %v5960_v41, %v11797_v39  ;;  %v5962_v9 = vpop.f32.mrb[37].mxu0  ;;  %v6033_v12 = vpop.f32.mrb[37].mxu1  ;;  %v9394_v13 = vadd.f32 %v6031_v5, %v11812_v3 }
 0xc4b   :  { %v9379_v61 = vadd.f32 %v5962_v9, %v11801_v35  ;;  %v9395_v52 = vadd.f32 %v6033_v12, %v11807_v45 }
 0xc4c   :  { %v7214_v38 = vmul.f32 -1.442695, %v9378_v24 }
 0xc4d   :  { %v7215_v28 = vmul.f32 -1.442695, %v9379_v61  ;;  %v7216_v33 = vmul.f32 -1.442695, %v9395_v52 }
 0xc4e   :  { %9815 = vpow2.f32 %v7214_v38 }
 0xc4f   :  { %9817 = vpow2.f32 %v7215_v28 }
 0xc50   :  { %9819 = vpow2.f32 %v7216_v33 }
 0xc51   :  { %9821 = vtanh.f32 %v9394_v13 }
 0xc58   :  { %v9816_v54 = vpop.eup %9815 }
 0xc59   :  { %v9818_v21 = vpop.eup %9817  ;;  %v6043_v2 = vadd.f32 1.0, %v9816_v54 }
 0xc5a   :  { %v6049_v0 = vadd.f32 1.0, %v9818_v21  ;;  %v9820_v49 = vpop.eup %9819 }
 0xc5b   :  { %9823 = vrcp.f32 %v6043_v2  ;;  %v9822_v62 = vpop.eup %9821  ;;  %v6056_v14 = vadd.f32 1.0, %v9820_v49 }
 0xc5c   :  { %9825 = vrcp.f32 %v6049_v0 }
 0xc5d   :  { %9827 = vrcp.f32 %v6056_v14 }
 0xc65   :  { %v9824_v27 = vpop.eup %9823 }
 0xc66   :  { %v9826_v42 = vpop.eup %9825  ;;  %v6060_v20 = vmul.f32 %v9824_v27, %v9822_v62 }
 0xc67   :  { %v6059_v1 = vmul.f32 %v9826_v42, %v11859_v25  ;;  %v9828_v57 = vpop.eup %9827 }
 0xc69   :  { %v11901_v16 = vadd.f32 %v6060_v20, %v6059_v1 }
 0xc6b   :  { %9829 = vtanh.f32 %v11901_v16 }
 0xc75   :  { %v9830_v60 = vpop.eup %9829 }
 0xc76   :  { %v6063_v41 = vmul.f32 %v9830_v60, %v9828_v57 }
 0xc78   :  { %6133 = vmatmul.mubr.f32.vlgmr.msra.gmra.mrb[38].mxu0 %v6063_v41  ;;  %6204 = vmatmul.mubr.f32.vlgmr.msra.gmra.mrb[38].mxu1 %v6063_v41 }
 0xc79   :  { %9009 = vmatpush1.bf16.msra.mxu0 %v11624_v31  ;;  %9041 = vmatpush1.bf16.msra.mxu1 %v11627_v15 }
 0xc7a   :  { %9011 = vmatprep.subr.bf16.mxu0 %v11630_v17  ;;  %9043 = vmatprep.subr.bf16.mxu1 %v11633_v50 }
 0xc7b   :  { %6306 = vmatprep.mubr.f32.mxu0 %v12233_v19  ;;  %6377 = vmatprep.mubr.f32.mxu1 %v12233_v19 }
 0xc7d   :  { %9013 = vmatpush1.bf16.msra.mxu0 %v11637_v53  ;;  %9045 = vmatpush1.bf16.msra.mxu1 %v11641_v26 }
 0xc7e   :  { %9015 = vmatprep.subr.bf16.mxu0 %v11645_v47  ;;  %9047 = vmatprep.subr.bf16.mxu1 %v11649_v7 }
 0xc81   :  { %9017 = vmatpush1.bf16.msra.mxu0 %v11653_v29  ;;  %9049 = vmatpush1.bf16.msra.mxu1 %v11657_v4 }
 0xc82   :  { %9019 = vmatprep.subr.bf16.mxu0 %v11661_v58  ;;  %9051 = vmatprep.subr.bf16.mxu1 %v11665_v11 }
 0xc85   :  { %9021 = vmatpush1.bf16.msra.mxu0 %v11669_v18  ;;  %9053 = vmatpush1.bf16.msra.mxu1 %v11673_v63 }
 0xc86   :  { %9023 = vmatprep.subr.bf16.mxu0 %v11677_v55  ;;  %9055 = vmatprep.subr.bf16.mxu1 %v11681_v30 }
 0xc89   :  { %9025 = vmatpush1.bf16.msra.mxu0 %v11685_v6  ;;  %9057 = vmatpush1.bf16.msra.mxu1 %v11689_v10 }
 0xc8a   :  { %9027 = vmatprep.subr.bf16.mxu0 %v11693_v44  ;;  %9059 = vmatprep.subr.bf16.mxu1 %v11697_v51 }
 0xc8d   :  { %9029 = vmatpush1.bf16.msra.mxu0 %v11701_v56  ;;  %9061 = vmatpush1.bf16.msra.mxu1 %v11705_v22 }
 0xc8e   :  { %9031 = vmatprep.subr.bf16.mxu0 %v11709_v43  ;;  %9063 = vmatprep.subr.bf16.mxu1 %v11713_v8 }
 0xc91   :  { %9033 = vmatpush1.bf16.msra.mxu0 %v11717_v34  ;;  %9065 = vmatpush1.bf16.msra.mxu1 %v11721_v37 }
 0xc92   :  { %9035 = vmatprep.subr.bf16.mxu0 %v11725_v46  ;;  %9067 = vmatprep.subr.bf16.mxu1 %v11729_v23 }
 0xc95   :  { %9037 = vmatpush1.bf16.msra.mxu0 %v11733_v40  ;;  %9069 = vmatpush1.bf16.msra.mxu1 %v11737_v32 }
 0xc96   :  { %9071 = vmatprep.subr.bf16.mxu0 %v11620_v59  ;;  %9103 = vmatprep.subr.bf16.mxu1 %v11622_v48 }
 0xd4b   :  { %v6134_v25 = vpop.f32.mrb[38].mxu0  ;;  %v6205_v5 = vpop.f32.mrb[38].mxu1 }
 0xd4c   :  { %v9380_v24 = vadd.f32 %v6134_v25, %v11797_v39  ;;  %v6136_v9 = vpop.f32.mrb[39].mxu0  ;;  %v6207_v12 = vpop.f32.mrb[39].mxu1  ;;  %v9396_v13 = vadd.f32 %v6205_v5, %v11812_v3 }
 0xd4d   :  { %v9381_v61 = vadd.f32 %v6136_v9, %v11801_v35  ;;  %v9397_v52 = vadd.f32 %v6207_v12, %v11807_v45 }
 0xd4e   :  { %v7217_v38 = vmul.f32 -1.442695, %v9380_v24 }
 0xd4f   :  { %v7218_v28 = vmul.f32 -1.442695, %v9381_v61  ;;  %v7219_v33 = vmul.f32 -1.442695, %v9397_v52 }
 0xd50   :  { %9831 = vpow2.f32 %v7217_v38 }
 0xd51   :  { %9833 = vpow2.f32 %v7218_v28 }
 0xd52   :  { %9835 = vpow2.f32 %v7219_v33 }
 0xd53   :  { %9837 = vtanh.f32 %v9396_v13 }
 0xd5a   :  { %v9832_v54 = vpop.eup %9831 }
 0xd5b   :  { %v9834_v21 = vpop.eup %9833  ;;  %v6217_v2 = vadd.f32 1.0, %v9832_v54 }
 0xd5c   :  { %v6223_v0 = vadd.f32 1.0, %v9834_v21  ;;  %v9836_v49 = vpop.eup %9835 }
 0xd5d   :  { %9839 = vrcp.f32 %v6217_v2  ;;  %v9838_v62 = vpop.eup %9837  ;;  %v6230_v14 = vadd.f32 1.0, %v9836_v49 }
 0xd5e   :  { %9841 = vrcp.f32 %v6223_v0 }
 0xd5f   :  { %9843 = vrcp.f32 %v6230_v14 }
 0xd67   :  { %v9840_v27 = vpop.eup %9839 }
 0xd68   :  { %v9842_v42 = vpop.eup %9841  ;;  %v6234_v20 = vmul.f32 %v9840_v27, %v9838_v62 }
 0xd69   :  { %v6233_v1 = vmul.f32 %v9842_v42, %v11901_v16  ;;  %v9844_v60 = vpop.eup %9843 }
 0xd6b   :  { %v11943_v57 = vadd.f32 %v6234_v20, %v6233_v1 }
 0xd6d   :  { %9845 = vtanh.f32 %v11943_v57 }
 0xd77   :  { %v9846_v41 = vpop.eup %9845 }
 0xd78   :  { %v6237_v25 = vmul.f32 %v9846_v41, %v9844_v60 }
 0xd7a   :  { %6307 = vmatmul.mubr.f32.vlgmr.msra.gmra.mrb[40].mxu0 %v6237_v25  ;;  %6378 = vmatmul.mubr.f32.vlgmr.msra.gmra.mrb[40].mxu1 %v6237_v25 }
 0xd7b   :  { %9073 = vmatpush1.bf16.msra.mxu0 %v11624_v31  ;;  %9105 = vmatpush1.bf16.msra.mxu1 %v11627_v15 }
 0xd7c   :  { %9075 = vmatprep.subr.bf16.mxu0 %v11630_v17  ;;  %9107 = vmatprep.subr.bf16.mxu1 %v11633_v50 }
 0xd7d   :  { %6480 = vmatprep.mubr.f32.mxu0 %v12233_v19  ;;  %6551 = vmatprep.mubr.f32.mxu1 %v12233_v19 }
 0xd7f   :  { %9077 = vmatpush1.bf16.msra.mxu0 %v11637_v53  ;;  %9109 = vmatpush1.bf16.msra.mxu1 %v11641_v26 }
 0xd80   :  { %9079 = vmatprep.subr.bf16.mxu0 %v11645_v47  ;;  %9111 = vmatprep.subr.bf16.mxu1 %v11649_v7 }
 0xd83   :  { %9081 = vmatpush1.bf16.msra.mxu0 %v11653_v29  ;;  %9113 = vmatpush1.bf16.msra.mxu1 %v11657_v4 }
 0xd84   :  { %9083 = vmatprep.subr.bf16.mxu0 %v11661_v58  ;;  %9115 = vmatprep.subr.bf16.mxu1 %v11665_v11 }
 0xd87   :  { %9085 = vmatpush1.bf16.msra.mxu0 %v11669_v18  ;;  %9117 = vmatpush1.bf16.msra.mxu1 %v11673_v63 }
 0xd88   :  { %9087 = vmatprep.subr.bf16.mxu0 %v11677_v55  ;;  %9119 = vmatprep.subr.bf16.mxu1 %v11681_v30 }
 0xd8b   :  { %9089 = vmatpush1.bf16.msra.mxu0 %v11685_v6  ;;  %9121 = vmatpush1.bf16.msra.mxu1 %v11689_v10 }
 0xd8c   :  { %9091 = vmatprep.subr.bf16.mxu0 %v11693_v44  ;;  %9123 = vmatprep.subr.bf16.mxu1 %v11697_v51 }
 0xd8f   :  { %9093 = vmatpush1.bf16.msra.mxu0 %v11701_v56  ;;  %9125 = vmatpush1.bf16.msra.mxu1 %v11705_v22 }
 0xd90   :  { %9095 = vmatprep.subr.bf16.mxu0 %v11709_v43  ;;  %9127 = vmatprep.subr.bf16.mxu1 %v11713_v8 }
 0xd93   :  { %9097 = vmatpush1.bf16.msra.mxu0 %v11717_v34  ;;  %9129 = vmatpush1.bf16.msra.mxu1 %v11721_v37 }
 0xd94   :  { %9099 = vmatprep.subr.bf16.mxu0 %v11725_v46  ;;  %9131 = vmatprep.subr.bf16.mxu1 %v11729_v23 }
 0xd97   :  { %9101 = vmatpush1.bf16.msra.mxu0 %v11733_v40  ;;  %9133 = vmatpush1.bf16.msra.mxu1 %v11737_v32 }
 0xd98   :  { %9135 = vmatprep.subr.bf16.mxu0 %v11620_v59  ;;  %9167 = vmatprep.subr.bf16.mxu1 %v11622_v48 }
 0xe4d   :  { %v6308_v16 = vpop.f32.mrb[40].mxu0  ;;  %v6379_v5 = vpop.f32.mrb[40].mxu1 }
 0xe4e   :  { %v9382_v24 = vadd.f32 %v6308_v16, %v11797_v39  ;;  %v6310_v9 = vpop.f32.mrb[41].mxu0  ;;  %v6381_v12 = vpop.f32.mrb[41].mxu1  ;;  %v9398_v13 = vadd.f32 %v6379_v5, %v11812_v3 }
 0xe4f   :  { %v9383_v61 = vadd.f32 %v6310_v9, %v11801_v35  ;;  %v9399_v52 = vadd.f32 %v6381_v12, %v11807_v45 }
 0xe50   :  { %v7220_v38 = vmul.f32 -1.442695, %v9382_v24 }
 0xe51   :  { %v7221_v28 = vmul.f32 -1.442695, %v9383_v61  ;;  %v7222_v33 = vmul.f32 -1.442695, %v9399_v52 }
 0xe52   :  { %9847 = vpow2.f32 %v7220_v38 }
 0xe53   :  { %9849 = vpow2.f32 %v7221_v28 }
 0xe54   :  { %9851 = vpow2.f32 %v7222_v33 }
 0xe55   :  { %9853 = vtanh.f32 %v9398_v13 }
 0xe5c   :  { %v9848_v54 = vpop.eup %9847 }
 0xe5d   :  { %v9850_v21 = vpop.eup %9849  ;;  %v6391_v2 = vadd.f32 1.0, %v9848_v54 }
 0xe5e   :  { %v6397_v0 = vadd.f32 1.0, %v9850_v21  ;;  %v9852_v49 = vpop.eup %9851 }
 0xe5f   :  { %9855 = vrcp.f32 %v6391_v2  ;;  %v9854_v62 = vpop.eup %9853  ;;  %v6404_v14 = vadd.f32 1.0, %v9852_v49 }
 0xe60   :  { %9857 = vrcp.f32 %v6397_v0 }
 0xe61   :  { %9859 = vrcp.f32 %v6404_v14 }
 0xe69   :  { %v9856_v27 = vpop.eup %9855 }
 0xe6a   :  { %v9858_v42 = vpop.eup %9857  ;;  %v6408_v20 = vmul.f32 %v9856_v27, %v9854_v62 }
 0xe6b   :  { %v6407_v1 = vmul.f32 %v9858_v42, %v11943_v57  ;;  %v9860_v41 = vpop.eup %9859 }
 0xe6d   :  { %v11985_v60 = vadd.f32 %v6408_v20, %v6407_v1 }
 0xe6f   :  { %9861 = vtanh.f32 %v11985_v60 }
 0xe79   :  { %v9862_v25 = vpop.eup %9861 }
 0xe7a   :  { %v6411_v16 = vmul.f32 %v9862_v25, %v9860_v41 }
 0xe7c   :  { %6481 = vmatmul.mubr.f32.vlgmr.msra.gmra.mrb[42].mxu0 %v6411_v16  ;;  %6552 = vmatmul.mubr.f32.vlgmr.msra.gmra.mrb[42].mxu1 %v6411_v16  ;;  %v6972_v16 = vld [vmem:[#allocation6 + $0x98] sm:$0xff] }
 0xe7d   :  { %9137 = vmatpush1.bf16.msra.mxu0 %v11624_v31  ;;  %9169 = vmatpush1.bf16.msra.mxu1 %v11627_v15 }
 0xe7e   :  { %9139 = vmatprep.subr.bf16.mxu0 %v11630_v17  ;;  %9171 = vmatprep.subr.bf16.mxu1 %v11633_v50 }
 0xe7f   :  { %6654 = vmatprep.mubr.f32.mxu0 %v12233_v19  ;;  %6725 = vmatprep.mubr.f32.mxu1 %v12233_v19 }
 0xe81   :  { %9141 = vmatpush1.bf16.msra.mxu0 %v11637_v53  ;;  %9173 = vmatpush1.bf16.msra.mxu1 %v11641_v26 }
 0xe82   :  { %9143 = vmatprep.subr.bf16.mxu0 %v11645_v47  ;;  %9175 = vmatprep.subr.bf16.mxu1 %v11649_v7 }
 0xe85   :  { %9145 = vmatpush1.bf16.msra.mxu0 %v11653_v29  ;;  %9177 = vmatpush1.bf16.msra.mxu1 %v11657_v4 }
 0xe86   :  { %9147 = vmatprep.subr.bf16.mxu0 %v11661_v58  ;;  %9179 = vmatprep.subr.bf16.mxu1 %v11665_v11 }
 0xe89   :  { %9149 = vmatpush1.bf16.msra.mxu0 %v11669_v18  ;;  %9181 = vmatpush1.bf16.msra.mxu1 %v11673_v63 }
 0xe8a   :  { %9151 = vmatprep.subr.bf16.mxu0 %v11677_v55  ;;  %9183 = vmatprep.subr.bf16.mxu1 %v11681_v30 }
 0xe8d   :  { %9153 = vmatpush1.bf16.msra.mxu0 %v11685_v6  ;;  %9185 = vmatpush1.bf16.msra.mxu1 %v11689_v10 }
 0xe8e   :  { %9155 = vmatprep.subr.bf16.mxu0 %v11693_v44  ;;  %9187 = vmatprep.subr.bf16.mxu1 %v11697_v51 }
 0xe91   :  { %9157 = vmatpush1.bf16.msra.mxu0 %v11701_v56  ;;  %9189 = vmatpush1.bf16.msra.mxu1 %v11705_v22 }
 0xe92   :  { %9159 = vmatprep.subr.bf16.mxu0 %v11709_v43  ;;  %9191 = vmatprep.subr.bf16.mxu1 %v11713_v8 }
 0xe95   :  { %9161 = vmatpush1.bf16.msra.mxu0 %v11717_v34  ;;  %9193 = vmatpush1.bf16.msra.mxu1 %v11721_v37 }
 0xe96   :  { %9163 = vmatprep.subr.bf16.mxu0 %v11725_v46  ;;  %9195 = vmatprep.subr.bf16.mxu1 %v11729_v23 }
 0xe99   :  { %9165 = vmatpush1.bf16.msra.mxu0 %v11733_v40  ;;  %9197 = vmatpush1.bf16.msra.mxu1 %v11737_v32 }
 0xe9a   :  { %9199 = vmatprep.subr.bf16.mxu0 %v11620_v59  ;;  %9231 = vmatprep.subr.bf16.mxu1 %v11622_v48 }
 0xf4f   :  { %v6482_v57 = vpop.f32.mrb[42].mxu0  ;;  %v6553_v5 = vpop.f32.mrb[42].mxu1 }
 0xf50   :  { %v9384_v24 = vadd.f32 %v6482_v57, %v11797_v39  ;;  %v6484_v9 = vpop.f32.mrb[43].mxu0  ;;  %v6555_v12 = vpop.f32.mrb[43].mxu1  ;;  %v9400_v13 = vadd.f32 %v6553_v5, %v11812_v3  ;;  %v6973_v5 = vld [vmem:[#allocation6 + $0xa0] sm:$0xff] }
 0xf51   :  { %v9385_v61 = vadd.f32 %v6484_v9, %v11801_v35  ;;  %v9401_v52 = vadd.f32 %v6555_v12, %v11807_v45  ;;  %v6975_v12 = vld [vmem:[#allocation6 + $0xb0] sm:$0xff] }
 0xf52   :  { %v7223_v38 = vmul.f32 -1.442695, %v9384_v24  ;;  %v6974_v24 = vld [vmem:[#allocation6 + $0xa8] sm:$0xff] }
 0xf53   :  { %v7224_v28 = vmul.f32 -1.442695, %v9385_v61  ;;  %v7225_v33 = vmul.f32 -1.442695, %v9401_v52  ;;  %v9269_v9 = vpack.c.bf16 %v6974_v24, %v6973_v5  ;;  %v6976_v61 = vld [vmem:[#allocation6 + $0xb8] sm:$0xff]  ;;  %v6978_v52 = vld [vmem:[#allocation6 + $0xc8] sm:$0xff] }
 0xf54   :  { %9863 = vpow2.f32 %v7223_v38  ;;  %v9272_v38 = vpack.c.bf16 %v6976_v61, %v6975_v12 }
 0xf55   :  { %9865 = vpow2.f32 %v7224_v28  ;;  %v6977_v28 = vld [vmem:[#allocation6 + $0xc0] sm:$0xff] }
 0xf56   :  { %9867 = vpow2.f32 %v7225_v33  ;;  %v9275_v33 = vpack.c.bf16 %v6978_v52, %v6977_v28 }
 0xf57   :  { %9869 = vtanh.f32 %v9400_v13  ;;  %v6979_v13 = vld [vmem:[#allocation6 + $0xd0] sm:$0xff] }
 0xf5e   :  { %v9864_v59 = vpop.eup %9863 }
 0xf5f   :  { %v9866_v54 = vpop.eup %9865  ;;  %v6565_v48 = vadd.f32 1.0, %v9864_v59  ;;  %v6980_v59 = vld [vmem:[#allocation6 + $0xd8] sm:$0xff] }
 0xf60   :  { %v6571_v21 = vadd.f32 1.0, %v9866_v54  ;;  %v9868_v2 = vpop.eup %9867  ;;  %v6981_v54 = vld [vmem:[#allocation6 + $0xe0] sm:$0xff] }
 0xf61   :  { %9871 = vrcp.f32 %v6565_v48  ;;  %v9870_v0 = vpop.eup %9869  ;;  %v6578_v42 = vadd.f32 1.0, %v9868_v2  ;;  %v6982_v48 = vld [vmem:[#allocation6 + $0xe8] sm:$0xff]  ;;  %v6983_v2 = vld [vmem:[#allocation6 + $0xf0] sm:$0xff] }
 0xf62   :  { %9873 = vrcp.f32 %v6571_v21  ;;  %v9281_v21 = vpack.c.bf16 %v6982_v48, %v6981_v54 }
 0xf63   :  { %9875 = vrcp.f32 %v6578_v42 }
 0xf6b   :  { %v9872_v49 = vpop.eup %9871 }
 0xf6c   :  { %v9874_v62 = vpop.eup %9873  ;;  %v6582_v27 = vmul.f32 %v9872_v49, %v9870_v0  ;;  %v6984_v0 = vld [vmem:[#allocation6 + $0xf8] sm:$0xff] }
 0xf6d   :  { %v6581_v20 = vmul.f32 %v9874_v62, %v11985_v60  ;;  %v9876_v1 = vpop.eup %9875  ;;  %v6971_v60 = vld [vmem:[#allocation6 + $0x90] sm:$0xff]  ;;  %v9284_v49 = vpack.c.bf16 %v6984_v0, %v6983_v2  ;;  %v6953_v62 = vld [vmem:[#allocation6] sm:$0xff] }
 0xf6e   :  { %v9266_v57 = vpack.c.bf16 %v6972_v16, %v6971_v60 }
 0xf6f   :  { %v12027_v14 = vadd.f32 %v6582_v27, %v6581_v20  ;;  %v6954_v27 = vld [vmem:[#allocation6 + $0x8] sm:$0xff]  ;;  %v6955_v20 = vld [vmem:[#allocation6 + $0x10] sm:$0xff] }
 0xf70   :  { %v9287_v42 = vpack.c.bf16 %v6954_v27, %v6953_v62 }
 0xf71   :  { %9877 = vtanh.f32 %v12027_v14 }
 0xf7b   :  { %v9878_v41 = vpop.eup %9877 }
 0xf7c   :  { %v6585_v25 = vmul.f32 %v9878_v41, %v9876_v1  ;;  %v6957_v41 = vld [vmem:[#allocation6 + $0x20] sm:$0xff] }
 0xf7e   :  { %6655 = vmatmul.mubr.f32.vlgmr.msra.gmra.mrb[44].mxu0 %v6585_v25  ;;  %6726 = vmatmul.mubr.f32.vlgmr.msra.gmra.mrb[44].mxu1 %v6585_v25  ;;  %v6958_v25 = vld [vmem:[#allocation6 + $0x28] sm:$0xff] }
 0xf7f   :  { %9201 = vmatpush1.bf16.msra.mxu0 %v11624_v31  ;;  %9233 = vmatpush1.bf16.msra.mxu1 %v11627_v15  ;;  %v10064_v31 = vmov 0.0|0.0  }
 0xf80   :  { %9203 = vmatprep.subr.bf16.mxu0 %v11630_v17  ;;  %9235 = vmatprep.subr.bf16.mxu1 %v11633_v50 }
 0xf81   :  { %6828 = vmatprep.mubr.f32.mxu0 %v12233_v19  ;;  %6899 = vmatprep.mubr.f32.mxu1 %v12233_v19 }
 0xf83   :  { %9205 = vmatpush1.bf16.msra.mxu0 %v11637_v53  ;;  %9237 = vmatpush1.bf16.msra.mxu1 %v11641_v26 }
 0xf84   :  { %9207 = vmatprep.subr.bf16.mxu0 %v11645_v47  ;;  %9239 = vmatprep.subr.bf16.mxu1 %v11649_v7 }
 0xf87   :  { %9209 = vmatpush1.bf16.msra.mxu0 %v11653_v29  ;;  %9241 = vmatpush1.bf16.msra.mxu1 %v11657_v4 }
 0xf88   :  { %9211 = vmatprep.subr.bf16.mxu0 %v11661_v58  ;;  %9243 = vmatprep.subr.bf16.mxu1 %v11665_v11 }
 0xf8b   :  { %9213 = vmatpush1.bf16.msra.mxu0 %v11669_v18  ;;  %9245 = vmatpush1.bf16.msra.mxu1 %v11673_v63 }
 0xf8c   :  { %9215 = vmatprep.subr.bf16.mxu0 %v11677_v55  ;;  %9247 = vmatprep.subr.bf16.mxu1 %v11681_v30 }
 0xf8f   :  { %9217 = vmatpush1.bf16.msra.mxu0 %v11685_v6  ;;  %9249 = vmatpush1.bf16.msra.mxu1 %v11689_v10 }
 0xf90   :  { %9219 = vmatprep.subr.bf16.mxu0 %v11693_v44  ;;  %9251 = vmatprep.subr.bf16.mxu1 %v11697_v51 }
 0xf93   :  { %9221 = vmatpush1.bf16.msra.mxu0 %v11701_v56  ;;  %9253 = vmatpush1.bf16.msra.mxu1 %v11705_v22 }
 0xf94   :  { %9223 = vmatprep.subr.bf16.mxu0 %v11709_v43  ;;  %9255 = vmatprep.subr.bf16.mxu1 %v11713_v8 }
 0xf97   :  { %9225 = vmatpush1.bf16.msra.mxu0 %v11717_v34  ;;  %9257 = vmatpush1.bf16.msra.mxu1 %v11721_v37  ;;  %v6969_v34 = vld [vmem:[#allocation6 + $0x80] sm:$0xff]  ;;  %v6970_v37 = vld [vmem:[#allocation6 + $0x88] sm:$0xff] }
 0xf98   :  { %9227 = vmatprep.subr.bf16.mxu0 %v11725_v46  ;;  %9259 = vmatprep.subr.bf16.mxu1 %v11729_v23 }
 0xf9b   :  { %9229 = vmatpush1.bf16.msra.mxu0 %v11733_v40  ;;  %9261 = vmatpush1.bf16.msra.mxu1 %v11737_v32  ;;  %v9263_v40 = vpack.c.bf16 %v6970_v37, %v6969_v34 }
 0xf9c   :  { %9262 = vmatprep.subr.bf16.mxu0 %v10064_v31  ;;  %9286 = vmatprep.subr.bf16.mxu1 %v10064_v31 }
0x1051   :  { %v6656_v15 = vpop.f32.mrb[44].mxu0  ;;  %v6727_v17 = vpop.f32.mrb[44].mxu1 }
0x1052   :  { %v9386_v50 = vadd.f32 %v6656_v15, %v11797_v39  ;;  %v6658_v53 = vpop.f32.mrb[45].mxu0  ;;  %v6729_v26 = vpop.f32.mrb[45].mxu1  ;;  %v9402_v11 = vadd.f32 %v6727_v17, %v11812_v3  ;;  %v9293_v15 = vpack.c.bf16 %v6958_v25, %v6957_v41  ;;  %v6959_v17 = vld [vmem:[#allocation6 + $0x30] sm:$0xff] }
0x1053   :  { %v9387_v47 = vadd.f32 %v6658_v53, %v11801_v35  ;;  %v9403_v4 = vadd.f32 %v6729_v26, %v11807_v45  ;;  %v6961_v53 = vld [vmem:[#allocation6 + $0x40] sm:$0xff]  ;;  %v6962_v26 = vld [vmem:[#allocation6 + $0x48] sm:$0xff] }
0x1054   :  { %v7226_v7 = vmul.f32 -1.442695, %v9386_v50 }
0x1055   :  { %v7227_v29 = vmul.f32 -1.442695, %v9387_v47  ;;  %v7228_v58 = vmul.f32 -1.442695, %v9403_v4  ;;  %v9299_v47 = vpack.c.bf16 %v6962_v26, %v6961_v53  ;;  %v6965_v4 = vld [vmem:[#allocation6 + $0x60] sm:$0xff] }
0x1056   :  { %9879 = vpow2.f32 %v7226_v7  ;;  %v6963_v7 = vld [vmem:[#allocation6 + $0x50] sm:$0xff] }
0x1057   :  { %9881 = vpow2.f32 %v7227_v29  ;;  %v6964_v29 = vld [vmem:[#allocation6 + $0x58] sm:$0xff] }
0x1058   :  { %9883 = vpow2.f32 %v7228_v58  ;;  %v9302_v58 = vpack.c.bf16 %v6964_v29, %v6963_v7 }
0x1059   :  { %9885 = vtanh.f32 %v9402_v11  ;;  %v6966_v11 = vld [vmem:[#allocation6 + $0x68] sm:$0xff] }
0x1060   :  { %v9880_v18 = vpop.eup %9879 }
0x1061   :  { %v9882_v63 = vpop.eup %9881  ;;  %v6739_v55 = vadd.f32 1.0, %v9880_v18  ;;  %v9305_v18 = vpack.c.bf16 %v6966_v11, %v6965_v4 }
0x1062   :  { %v6745_v30 = vadd.f32 1.0, %v9882_v63  ;;  %v9884_v6 = vpop.eup %9883  ;;  %v6967_v63 = vld [vmem:[#allocation6 + $0x70] sm:$0xff] }
0x1063   :  { %9887 = vrcp.f32 %v6739_v55  ;;  %v9886_v10 = vpop.eup %9885  ;;  %v6752_v22 = vadd.f32 1.0, %v9884_v6  ;;  %v6968_v55 = vld [vmem:[#allocation6 + $0x78] sm:$0xff] }
0x1064   :  { %9889 = vrcp.f32 %v6745_v30  ;;  %v9308_v30 = vpack.c.bf16 %v6968_v55, %v6967_v63 }
0x1065   :  { %9891 = vrcp.f32 %v6752_v22 }
0x106d   :  { %v9888_v44 = vpop.eup %9887 }
0x106e   :  { %v9890_v51 = vpop.eup %9889  ;;  %v6756_v56 = vmul.f32 %v9888_v44, %v9886_v10 }
0x106f   :  { %v6755_v43 = vmul.f32 %v9890_v51, %v12027_v14  ;;  %v9892_v46 = vpop.eup %9891  ;;  %v6956_v14 = vld [vmem:[#allocation6 + $0x18] sm:$0xff] }
0x1070   :  { %v9290_v1 = vpack.c.bf16 %v6956_v14, %v6955_v20 }
0x1071   :  { %v12069_v8 = vadd.f32 %v6756_v56, %v6755_v43 }
0x1073   :  { %9893 = vtanh.f32 %v12069_v8 }
0x107d   :  { %v9894_v23 = vpop.eup %9893 }
0x107e   :  { %v6759_v32 = vmul.f32 %v9894_v23, %v9892_v46 }
0x1080   :  { %6829 = vmatmul.mubr.f32.vlgmr.msra.gmra.mrb[46].mxu0 %v6759_v32  ;;  %6900 = vmatmul.mubr.f32.vlgmr.msra.gmra.mrb[46].mxu1 %v6759_v32 }
0x1081   :  { %9264 = vmatpush3.bf16.msra.mxu0 %v9263_v40  ;;  %7304 = vmatprep.mubr.msk.f32.mxu0 %vm10065_vm0, %v12233_v19 }
0x1082   :  { %9265 = vmatprep.subr.bf16.mxu0 %v10064_v31  ;;  %7339 = vmatprep.mubr.msk.f32.mxu1 %vm10065_vm0, %v12233_v19  ;;  %v9278_v19 = vpack.c.bf16 %v6980_v59, %v6979_v13 }
0x1083   :  { %9288 = vmatpush3.bf16.msra.mxu1 %v9287_v42 }
0x1084   :  { %9289 = vmatprep.subr.bf16.mxu1 %v10064_v31 }
0x1085   :  { %9267 = vmatpush3.bf16.msra.mxu0 %v9266_v57 }
0x1086   :  { %9268 = vmatprep.subr.bf16.mxu0 %v10064_v31 }
0x1087   :  { %9291 = vmatpush3.bf16.msra.mxu1 %v9290_v1 }
0x1088   :  { %9292 = vmatprep.subr.bf16.mxu1 %v10064_v31 }
0x1089   :  { %9270 = vmatpush3.bf16.msra.mxu0 %v9269_v9 }
0x108a   :  { %9271 = vmatprep.subr.bf16.mxu0 %v10064_v31 }
0x108b   :  { %9294 = vmatpush3.bf16.msra.mxu1 %v9293_v15 }
0x108c   :  { %9295 = vmatprep.subr.bf16.mxu1 %v10064_v31 }
0x108d   :  { %9273 = vmatpush3.bf16.msra.mxu0 %v9272_v38 }
0x108e   :  { %9274 = vmatprep.subr.bf16.mxu0 %v10064_v31 }
0x1091   :  { %9276 = vmatpush3.bf16.msra.mxu0 %v9275_v33  ;;  %v7234_v33 = vld [vmem:[%s12106_s6] ss:$0 sm:$0xff] }
0x1092   :  { %9277 = vmatprep.subr.bf16.mxu0 %v10064_v31 }
0x1095   :  { %9279 = vmatpush3.bf16.msra.mxu0 %v9278_v19 }
0x1096   :  { %9280 = vmatprep.subr.bf16.mxu0 %v10064_v31 }
0x1099   :  { %9282 = vmatpush3.bf16.msra.mxu0 %v9281_v21 }
0x109a   :  { %9283 = vmatprep.subr.bf16.mxu0 %v10064_v31 }
0x109d   :  { %9285 = vmatpush3.bf16.msra.mxu0 %v9284_v49 }
0x10a0   :  { %7305 = vmatmul.mubr.f32.vlgmr.msra.gmra.mrb[64].mxu0 %v11818_v36  ;;  %v6960_v36 = vld [vmem:[#allocation6 + $0x38] sm:$0xff] }
0x10a1   :  { %v9296_v50 = vpack.c.bf16 %v6960_v36, %v6959_v17 }
0x10a3   :  { %9297 = vmatpush3.bf16.msra.mxu1 %v9296_v50 }
0x10a4   :  { %9298 = vmatprep.subr.bf16.mxu1 %v10064_v31 }
0x10a7   :  { %9300 = vmatpush3.bf16.msra.mxu1 %v9299_v47 }
0x10a8   :  { %9301 = vmatprep.subr.bf16.mxu1 %v10064_v31 }
0x10ab   :  { %9303 = vmatpush3.bf16.msra.mxu1 %v9302_v58 }
0x10ac   :  { %9304 = vmatprep.subr.bf16.mxu1 %v10064_v31 }
0x10af   :  { %9306 = vmatpush3.bf16.msra.mxu1 %v9305_v18 }
0x10b0   :  { %9307 = vmatprep.subr.bf16.mxu1 %v10064_v31 }
0x10b3   :  { %9309 = vmatpush3.bf16.msra.mxu1 %v9308_v30 }
0x1153   :  { %v6830_v6 = vpop.f32.mrb[46].mxu0  ;;  %v6901_v10 = vpop.f32.mrb[46].mxu1 }
0x1154   :  { %v9388_v44 = vadd.f32 %v6830_v6, %v11797_v39  ;;  %v6832_v51 = vpop.f32.mrb[47].mxu0  ;;  %v6903_v56 = vpop.f32.mrb[47].mxu1  ;;  %v9404_v23 = vadd.f32 %v6901_v10, %v11812_v3 }
0x1155   :  { %v9389_v22 = vadd.f32 %v6832_v51, %v11801_v35  ;;  %v9405_v37 = vadd.f32 %v6903_v56, %v11807_v45 }
0x1156   :  { %v7229_v43 = vmul.f32 -1.442695, %v9388_v44 }
0x1157   :  { %v7230_v34 = vmul.f32 -1.442695, %v9389_v22  ;;  %v7231_v46 = vmul.f32 -1.442695, %v9405_v37 }
0x1158   :  { %9895 = vpow2.f32 %v7229_v43 }
0x1159   :  { %9897 = vpow2.f32 %v7230_v34 }
0x115a   :  { %9899 = vpow2.f32 %v7231_v46 }
0x115b   :  { %9901 = vtanh.f32 %v9404_v23 }
0x1162   :  { %v9896_v40 = vpop.eup %9895 }
0x1163   :  { %v9898_v31 = vpop.eup %9897  ;;  %v6913_v32 = vadd.f32 1.0, %v9896_v40 }
0x1164   :  { %v6919_v60 = vadd.f32 1.0, %v9898_v31  ;;  %v9900_v39 = vpop.eup %9899 }
0x1165   :  { %9903 = vrcp.f32 %v6913_v32  ;;  %v9902_v16 = vpop.eup %9901  ;;  %v6926_v24 = vadd.f32 1.0, %v9900_v39 }
0x1166   :  { %9905 = vrcp.f32 %v6919_v60 }
0x1167   :  { %9907 = vrcp.f32 %v6926_v24 }
0x116f   :  { %v9904_v35 = vpop.eup %9903 }
0x1170   :  { %v9906_v57 = vpop.eup %9905  ;;  %v6930_v5 = vmul.f32 %v9904_v35, %v9902_v16 }
0x1171   :  { %v6929_v9 = vmul.f32 %v9906_v57, %v12069_v8  ;;  %v9908_v61 = vpop.eup %9907 }
0x1173   :  { %v6931_v45 = vadd.f32 %v6930_v5, %v6929_v9  ;;  %v7051_v12 = vpop.f32.mrb[64].mxu0 }
0x1174   :  { %v7306_v3 = vpop.f32.mrb[65].mxu0 }
0x1175   :  { %9909 = vtanh.f32 %v6931_v45 }
0x117f   :  { %v9910_v38 = vpop.eup %9909 }
0x1180   :  { %v6933_v28 = vmul.f32 %v9910_v38, %v9908_v61 }
0x1182   :  { %7340 = vmatmul.mubr.f32.vlgmr.msra.gmra.mrb[64].mxu1 %v6933_v28 }
0x1255   :  { %v7121_v52 = vpop.f32.mrb[64].mxu1 }
0x1256   :  { %v7122_v13 = vadd.f32 %v7121_v52, %v7051_v12  ;;  %v7341_v59 = vpop.f32.mrb[65].mxu1 }
0x1258   :  { %v7132_v19 = vadd.f32 %v7234_v33, %v7122_v13 }
0x125a   :  { %7133 = vst [vmem:[%s12110_s10] sm:$0xff] %v7132_v19 }
0x125b   :  { %7138 = vsyncpa [#allocation9], 1 }
0x125c   :  { %7139 = vsyncpa [#allocation11], 1 }
0x125d   :  { %7140 = vsyncmov [#allocation7] }
0x1260   :  { %s7141_s17 = vpop.sfrf %7140 }
0x1261   :  { %p7235_p6 = scmp.ne.s32.totalorder %s7141_s17, 0 }
0x1263   :  { %7145 = shalt.err (%p7235_p6)  }
0x1264   :  { %7147 = vsyncmov [#allocation7 + $0x1] }
0x1267   :  { %s7148_s3 = vpop.sfrf %7147 }
0x1268   :  { %p7236_p7 = scmp.ne.s32.totalorder %s7148_s3, 0 }
0x126a   :  { %7152 = shalt.err (%p7236_p7)  }
0x126b   :  { %7154 = vsyncmov [#allocation7 + $0x2] }
0x126e   :  { %s7155_s14 = vpop.sfrf %7154 }
0x126f   :  { %p7237_p8 = scmp.ne.s32.totalorder %s7155_s14, 0 }
0x1271   :  { %7159 = shalt.err (%p7237_p8)  }

</bundles_post_ra>
